<compile_context>
chip_gen: v7x
topology: tpu7x:2x2x1
jax: 0.10.0
libtpu: 0.0.40
codegen_flags: <defaults>
</compile_context>

<pallas_src>
import jax
import jax.numpy as jnp
from jax.experimental import pallas as pl
from jax.experimental.pallas import tpu as pltpu

# ----------------------------- model dimensions -----------------------------
EMB_DIM = 8
NUM_HEADS = 8
NUM_LAYERS = 6
NUM_NUM = 5                                    # numerical features
CAT_DIMS = [2, 4, 3, 4, 2, 3]                  # categorical cardinalities
RAW_DIM = NUM_NUM + len(CAT_DIMS) * EMB_DIM    # 53
D = (RAW_DIM + NUM_HEADS - 1) // NUM_HEADS * NUM_HEADS   # 56 (total_input_dim)
HEAD_DIM = D // NUM_HEADS                      # 7
FF_DIM = 4 * D                                 # 224
HALF_D = D // 2                                # 28
LN_EPS = 1e-5


# ------------------------------ in-kernel math ------------------------------
def _erf(x):
    # Abramowitz & Stegun 7.1.26 (|err| < 1.5e-7) -- exact-GELU to f32 noise.
    # The divide below is an exact VALU divide; cost is negligible at [8,224]x6.
    a1, a2, a3, a4, a5 = 0.254829592, -0.284496736, 1.421413741, -1.453152027, 1.061405429
    p = 0.3275911
    s = jnp.where(x >= 0.0, 1.0, -1.0)
    ax = jnp.abs(x)
    t = 1.0 / (1.0 + p * ax)
    poly = ((((a5 * t + a4) * t + a3) * t + a2) * t + a1) * t
    return s * (1.0 - poly * jnp.exp(-ax * ax))


def _gelu(x):
    # nn.GELU() default = exact (erf) GELU
    return 0.5 * x * (1.0 + _erf(x * 0.7071067811865476))


def _layernorm(x, g, b):
    mu = jnp.mean(x, axis=-1, keepdims=True)
    var = jnp.mean((x - mu) ** 2, axis=-1, keepdims=True)
    return (x - mu) * jax.lax.rsqrt(var + LN_EPS) * g + b


def _dot(x, w_bf16):
    # bf16 operands into the MXU, f32 accumulation; elementwise stays f32.
    return jnp.dot(x.astype(jnp.bfloat16), w_bf16, preferred_element_type=jnp.float32)


def _dot_rhs_t(x, w_t_bf16):
    # x [B, K] @ w_t.T where w_t is [out, K]  ->  [B, out], bf16 in / f32 acc.
    return jax.lax.dot_general(x.astype(jnp.bfloat16), w_t_bf16,
                               (((1,), (1,)), ((), ())),
                               preferred_element_type=jnp.float32)


# --------------------------------- the kernel --------------------------------
def transformer_classifier_kernel(
    x_ref,            # [B, D]      f32  (raw features zero-padded to D lanes)
    w_pre_ref,        # [2, D, D]   bf16 (initial_projection padded | input_projection)
    b_pre_ref,        # [2, D]      f32
    w_qkv_ref,        # [L, 3D, D]  bf16 (rows = out features, Q rows pre-scaled)
    b_qkv_ref,        # [L, 3D]     f32  (Q part pre-scaled)
    w_ao_ref,         # [L, D, D]   bf16 (attention out-projection, x@W layout)
    w_ff1_ref,        # [L, D, FF]  bf16
    b_ff1_ref,        # [L, FF]     f32
    w_ff2_ref,        # [L, FF, D]  bf16
    vecs_d_ref,       # [L, 6, D]   f32: ln1_g, ln1_b, ln2_g, ln2_b, attn_out_b, ff_b2
    cls_w1_ref,       # [D, D]      bf16
    cls_w2_ref,       # [D, HALF_D] bf16
    cls_w3_ref,       # [HALF_D, 1] bf16
    cls_vecs_ref,     # [7, D]      f32: c1_b, c1_g, c1_beta, c2_b, c2_g, c2_beta, c3_b
    out_ref,          # [B, 1]      f32
):
    f32 = jnp.float32
    bf16 = jnp.bfloat16
    B = x_ref.shape[0]

    # initial_projection then input_projection (the unsqueeze(1) is implicit).
    x = x_ref[...]                                                   # [B, D]
    x = _dot(x, w_pre_ref[0]) + b_pre_ref[0:1, :]
    x = _dot(x, w_pre_ref[1]) + b_pre_ref[1:2, :]

    # Block-diagonal head mask: row h has ones in lanes [h*HEAD_DIM, (h+1)*HEAD_DIM).
    lane = jax.lax.broadcasted_iota(jnp.int32, (NUM_HEADS, D), 1)
    head = jax.lax.broadcasted_iota(jnp.int32, (NUM_HEADS, D), 0)
    head_mask = jnp.where((lane >= head * HEAD_DIM) &
                          (lane < (head + 1) * HEAD_DIM), 1.0, 0.0).astype(f32)

    # Layer loop is statically unrolled: live values are tiny ([B,FF] max),
    # so spill pressure is not a concern and LLO keeps full visibility.
    for l in range(NUM_LAYERS):
        vd = vecs_d_ref[l]                                           # [6, D]
        ln1_g, ln1_b = vd[0:1, :], vd[1:2, :]
        ln2_g, ln2_b = vd[2:3, :], vd[3:4, :]
        attn_out_b, ff_b2 = vd[4:5, :], vd[5:6, :]

        # ---- pre-norm self-attention block ------------------------------
        residual = x
        h = _layernorm(x, ln1_g, ln1_b)

        # ONE fused QKV projection per layer (1/sqrt(head_dim) folded into Q).
        qkv = _dot_rhs_t(h, w_qkv_ref[l]) + b_qkv_ref[l:l + 1, :]    # [B, 3D] f32
        q_all = qkv[:, 0:D]
        k_all = qkv[:, D:2 * D]
        v_all = qkv[:, 2 * D:3 * D].astype(bf16)

        # Per-head score tiles, sublane-stacked for a single batched softmax.
        score_tiles = []
        for hh in range(NUM_HEADS):
            lo = hh * HEAD_DIM
            qh = q_all[:, lo:lo + HEAD_DIM].astype(bf16)             # [B, hd]
            kh = k_all[:, lo:lo + HEAD_DIM].astype(bf16)             # [B, hd]
            score_tiles.append(
                jax.lax.dot_general(qh, kh, (((1,), (1,)), ((), ())),
                                    preferred_element_type=f32))     # [B, B]
        scores = jnp.concatenate(score_tiles, axis=0)                # [H*B, B]

        scores = scores - jnp.max(scores, axis=-1, keepdims=True)
        p = jnp.exp(scores)
        p = p * pl.reciprocal(jnp.sum(p, axis=-1, keepdims=True), approx=True)

        # ONE PV matmul for all heads; each head's lane block is picked out
        # with the block-diagonal mask (the off-block lanes of r are discarded).
        r = jnp.dot(p.astype(bf16), v_all, preferred_element_type=f32)   # [H*B, D]
        head_concat = r[0:B, :] * head_mask[0:1, :]
        for hh in range(1, NUM_HEADS):
            head_concat = head_concat + r[hh * B:(hh + 1) * B, :] * head_mask[hh:hh + 1, :]

        # ONE output-projection matmul per layer.
        attn = _dot(head_concat, w_ao_ref[l]) + attn_out_b
        x = residual + attn                                # dropout = identity (eval)

        # ---- pre-norm feed-forward block --------------------------------
        residual = x
        h = _layernorm(x, ln2_g, ln2_b)
        h = _dot(h, w_ff1_ref[l]) + b_ff1_ref[l:l + 1, :]            # [B, FF]
        h = _gelu(h)
        h = _dot(h, w_ff2_ref[l]) + ff_b2                            # [B, D]
        x = residual + h

    # final_features = x.mean(dim=1) over a size-1 axis -> identity on [B, D]
    cv = cls_vecs_ref[...]                                           # [7, D]
    h = _dot(x, cls_w1_ref[...]) + cv[0:1, :]
    h = _layernorm(h, cv[1:2, :], cv[2:3, :])
    h = jnp.maximum(h, 0.0)
    h = _dot(h, cls_w2_ref[...]) + cv[3:4, 0:HALF_D]
    h = _layernorm(h, cv[4:5, 0:HALF_D], cv[5:6, 0:HALF_D])
    h = jnp.maximum(h, 0.0)
    h = _dot(h, cls_w3_ref[...]) + cv[6:7, 0:1]                      # [B, 1]
    out_ref[...] = jax.nn.sigmoid(h)


# ------------------------------ params / packing ------------------------------
def init_params(key):
    """PyTorch-equivalent parameter shapes (x @ W layout for linears)."""
    keys = iter(jax.random.split(key, 64))

    def w(shape, scale=0.1):
        return (scale * jax.random.normal(next(keys), shape)).astype(jnp.float32)

    params = {}
    params["emb"] = [w((dim, EMB_DIM)) for dim in CAT_DIMS]
    params["w_init"] = w((RAW_DIM, D)); params["b_init"] = w((1, D))
    params["w_inp"] = w((D, D));        params["b_inp"] = w((1, D))
    params["ln1_g"] = jnp.ones((NUM_LAYERS, D), jnp.float32)
    params["ln1_b"] = jnp.zeros((NUM_LAYERS, D), jnp.float32)
    params["attn_in_w"] = w((NUM_LAYERS, D, 3 * D))   # columns: Q | K | V
    params["attn_in_b"] = w((NUM_LAYERS, 3 * D))
    params["attn_out_w"] = w((NUM_LAYERS, D, D))
    params["attn_out_b"] = w((NUM_LAYERS, D))
    params["ln2_g"] = jnp.ones((NUM_LAYERS, D), jnp.float32)
    params["ln2_b"] = jnp.zeros((NUM_LAYERS, D), jnp.float32)
    params["ff_w1"] = w((NUM_LAYERS, D, FF_DIM)); params["ff_b1"] = w((NUM_LAYERS, FF_DIM))
    params["ff_w2"] = w((NUM_LAYERS, FF_DIM, D)); params["ff_b2"] = w((NUM_LAYERS, D))
    params["c1_w"] = w((D, D));       params["c1_b"] = w((1, D))
    params["c1_g"] = jnp.ones((1, D), jnp.float32); params["c1_beta"] = jnp.zeros((1, D), jnp.float32)
    params["c2_w"] = w((D, HALF_D));  params["c2_b"] = w((1, HALF_D))
    params["c2_g"] = jnp.ones((1, HALF_D), jnp.float32); params["c2_beta"] = jnp.zeros((1, HALF_D), jnp.float32)
    params["c3_w"] = w((HALF_D, 1));  params["c3_b"] = w((1, 1))
    return params


def pack_params(params):
    """One-time host-side re-layout:
       * fused per-layer QKV slab [L, 3D, D] with 1/sqrt(head_dim) folded into Q,
       * bf16 weight slabs for the MXU,
       * tiny per-layer / classifier vectors merged into lane-dense f32 slabs,
       * initial_projection zero-padded to [D, D] and stacked with input_projection."""
    f32, bf16 = jnp.float32, jnp.bfloat16
    scale = 1.0 / (HEAD_DIM ** 0.5)

    packed = {"emb": params["emb"]}

    # pre-projection slab (input is zero-padded to D lanes in the wrapper).
    w_init_pad = jnp.zeros((D, D), f32).at[:RAW_DIM, :].set(params["w_init"])
    packed["w_pre"] = jnp.stack([w_init_pad, params["w_inp"]], axis=0).astype(bf16)   # [2, D, D]
    packed["b_pre"] = jnp.concatenate([params["b_init"], params["b_inp"]], axis=0)    # [2, D]

    # fused QKV projection: out-features along rows, Q rows pre-scaled.
    w_qkv = jnp.transpose(params["attn_in_w"], (0, 2, 1))                             # [L, 3D, D]
    qscale = jnp.concatenate([jnp.full((D,), scale, f32), jnp.ones((2 * D,), f32)])
    packed["w_qkv"] = (w_qkv * qscale[None, :, None]).astype(bf16)
    packed["b_qkv"] = params["attn_in_b"] * qscale[None, :]                           # [L, 3D] f32

    packed["w_attn_out"] = params["attn_out_w"].astype(bf16)                          # [L, D, D]
    packed["w_ff1"] = params["ff_w1"].astype(bf16)                                    # [L, D, FF]
    packed["b_ff1"] = params["ff_b1"]                                                 # [L, FF]  f32
    packed["w_ff2"] = params["ff_w2"].astype(bf16)                                    # [L, FF, D]

    # per-layer width-D vectors in one slab.
    packed["vecs_d"] = jnp.stack(
        [params["ln1_g"], params["ln1_b"], params["ln2_g"], params["ln2_b"],
         params["attn_out_b"], params["ff_b2"]], axis=1)                              # [L, 6, D]

    # classifier.
    packed["cls_w1"] = params["c1_w"].astype(bf16)                                    # [D, D]
    packed["cls_w2"] = params["c2_w"].astype(bf16)                                    # [D, HALF_D]
    packed["cls_w3"] = params["c3_w"].astype(bf16)                                    # [HALF_D, 1]

    def pad_row(v):                                                                   # [1, k] -> [1, D]
        return jnp.zeros((1, D), f32).at[:, :v.shape[1]].set(v)

    packed["cls_vecs"] = jnp.concatenate(
        [params["c1_b"], params["c1_g"], params["c1_beta"],
         pad_row(params["c2_b"]), pad_row(params["c2_g"]), pad_row(params["c2_beta"]),
         pad_row(params["c3_b"])], axis=0)                                            # [7, D]
    return packed


# --------------------------------- wrapper ------------------------------------
def transformer_classifier(num_x, cat_x, packed):
    """num_x: [B, 5] float32, cat_x: [B, 6] int32. Returns [B] probabilities."""
    B = num_x.shape[0]
    # TODO(synk): embedding gathers + feature concat stay in plain JAX outside the
    # kernel; the six tables are tiny and an in-kernel row-gather would add serial work.
    embedded = [packed["emb"][i][cat_x[:, i]] for i in range(len(CAT_DIMS))]
    feats = jnp.concatenate([num_x.astype(jnp.float32)] + embedded, axis=1)           # [B, 53]
    x = jnp.zeros((B, D), jnp.float32).at[:, :RAW_DIM].set(feats)                     # pad to D lanes

    args = (
        x,
        packed["w_pre"], packed["b_pre"],
        packed["w_qkv"], packed["b_qkv"],
        packed["w_attn_out"],
        packed["w_ff1"], packed["b_ff1"], packed["w_ff2"],
        packed["vecs_d"],
        packed["cls_w1"], packed["cls_w2"], packed["cls_w3"], packed["cls_vecs"],
    )

    out = pl.pallas_call(
        transformer_classifier_kernel,
        out_shape=jax.ShapeDtypeStruct((B, 1), jnp.float32),
        in_specs=[pl.BlockSpec(memory_space=pltpu.MemorySpace.VMEM)] * len(args),
        out_specs=pl.BlockSpec(memory_space=pltpu.MemorySpace.VMEM),
        compiler_params=pltpu.CompilerParams(vmem_limit_bytes=32 * 1024 * 1024),
    )(*args)
    return out[:, 0]          # matches torch `.squeeze()` -> [B]


# ----------------------------------- main ------------------------------------
if __name__ == "__main__":
    key = jax.random.PRNGKey(0)
    k_params, k_num, k_cat = jax.random.split(key, 3)

    params = init_params(k_params)
    packed = pack_params(params)        # one-time host-side re-layout

    B = 8
    num_x = jax.random.normal(k_num, (B, NUM_NUM), dtype=jnp.float32)
    cat_cols = []
    cat_keys = jax.random.split(k_cat, len(CAT_DIMS))
    for i, card in enumerate(CAT_DIMS):
        cat_cols.append(jax.random.randint(cat_keys[i], (B,), 0, card, dtype=jnp.int32))
    cat_x = jnp.stack(cat_cols, axis=1)                              # [B, 6]

    probs = transformer_classifier(num_x, cat_x, packed)
    jax.block_until_ready(probs)
    assert probs.shape == (B,)
    assert bool(jnp.all(jnp.isfinite(probs)))
    assert bool(jnp.all((probs >= 0.0) & (probs <= 1.0)))
    print("KERNEL_OK")
</pallas_src>

<mosaic_0001>
module attributes {stable_mosaic.version = 11 : i64} {
  func.func @transformer_classifier_kernel(%arg0: memref<8x56xf32, #tpu.memory_space<vmem>>, %arg1: memref<2x56x56xbf16, #tpu.memory_space<vmem>>, %arg2: memref<2x56xf32, #tpu.memory_space<vmem>>, %arg3: memref<6x168x56xbf16, #tpu.memory_space<vmem>>, %arg4: memref<6x168xf32, #tpu.memory_space<vmem>>, %arg5: memref<6x56x56xbf16, #tpu.memory_space<vmem>>, %arg6: memref<6x56x224xbf16, #tpu.memory_space<vmem>>, %arg7: memref<6x224xf32, #tpu.memory_space<vmem>>, %arg8: memref<6x224x56xbf16, #tpu.memory_space<vmem>>, %arg9: memref<6x6x56xf32, #tpu.memory_space<vmem>>, %arg10: memref<56x56xbf16, #tpu.memory_space<vmem>>, %arg11: memref<56x28xbf16, #tpu.memory_space<vmem>>, %arg12: memref<28x1xbf16, #tpu.memory_space<vmem>>, %arg13: memref<7x56xf32, #tpu.memory_space<vmem>>, %arg14: memref<8x1xf32, #tpu.memory_space<vmem>>) attributes {dimension_semantics = [], scalar_prefetch = 0 : i64, scratch_operands = 0 : i64, tpu.core_type = #tpu.core_type<tc>} {
    %c0 = arith.constant 0 : index
    %c0_0 = arith.constant 0 : index
    %0 = vector.load %arg0[%c0, %c0_0] : memref<8x56xf32, #tpu.memory_space<vmem>>, vector<8x56xf32>
    %c0_1 = arith.constant 0 : index
    %c0_2 = arith.constant 0 : index
    %c0_3 = arith.constant 0 : index
    %1 = vector.load %arg1[%c0_1, %c0_2, %c0_3] : memref<2x56x56xbf16, #tpu.memory_space<vmem>>, vector<1x56x56xbf16>
    %2 = vector.shape_cast %1 : vector<1x56x56xbf16> to vector<56x56xbf16>
    %3 = arith.truncf %0 : vector<8x56xf32> to vector<8x56xbf16>
    %cst = arith.constant dense<0.000000e+00> : vector<8x56xf32>
    %4 = tpu.matmul %3, %2, %cst {dimension_numbers = #tpu.dot_dimension_numbers<[1], [0], [0], [1], [0, 0, 1, 1], [], []>} : vector<8x56xbf16>, vector<56x56xbf16>, vector<8x56xf32> -> vector<8x56xf32>
    %c0_4 = arith.constant 0 : index
    %c0_5 = arith.constant 0 : index
    %5 = vector.load %arg2[%c0_4, %c0_5] : memref<2x56xf32, #tpu.memory_space<vmem>>, vector<1x56xf32>
    %6 = vector.broadcast %5 : vector<1x56xf32> to vector<8x56xf32>
    %7 = arith.addf %4, %6 : vector<8x56xf32>
    %c1 = arith.constant 1 : index
    %c0_6 = arith.constant 0 : index
    %c0_7 = arith.constant 0 : index
    %8 = vector.load %arg1[%c1, %c0_6, %c0_7] : memref<2x56x56xbf16, #tpu.memory_space<vmem>>, vector<1x56x56xbf16>
    %9 = vector.shape_cast %8 : vector<1x56x56xbf16> to vector<56x56xbf16>
    %10 = arith.truncf %7 : vector<8x56xf32> to vector<8x56xbf16>
    %cst_8 = arith.constant dense<0.000000e+00> : vector<8x56xf32>
    %11 = tpu.matmul %10, %9, %cst_8 {dimension_numbers = #tpu.dot_dimension_numbers<[1], [0], [0], [1], [0, 0, 1, 1], [], []>} : vector<8x56xbf16>, vector<56x56xbf16>, vector<8x56xf32> -> vector<8x56xf32>
    %c1_9 = arith.constant 1 : index
    %c0_10 = arith.constant 0 : index
    %12 = vector.load %arg2[%c1_9, %c0_10] : memref<2x56xf32, #tpu.memory_space<vmem>>, vector<1x56xf32>
    %13 = vector.broadcast %12 : vector<1x56xf32> to vector<8x56xf32>
    %14 = arith.addf %11, %13 : vector<8x56xf32>
    %15 = tpu.iota {dimensions = array<i32: 1>} : vector<8x56xi32>
    %16 = tpu.iota {dimensions = array<i32: 0>} : vector<8x56xi32>
    %c7_i32 = arith.constant 7 : i32
    %17 = vector.broadcast %c7_i32 : i32 to vector<8x56xi32>
    %18 = arith.muli %16, %17 : vector<8x56xi32>
    %19 = arith.cmpi sge, %15, %18 : vector<8x56xi32>
    %c1_i32 = arith.constant 1 : i32
    %20 = vector.broadcast %c1_i32 : i32 to vector<8x56xi32>
    %21 = arith.addi %16, %20 : vector<8x56xi32>
    %c7_i32_11 = arith.constant 7 : i32
    %22 = vector.broadcast %c7_i32_11 : i32 to vector<8x56xi32>
    %23 = arith.muli %21, %22 : vector<8x56xi32>
    %24 = arith.cmpi slt, %15, %23 : vector<8x56xi32>
    %25 = arith.andi %19, %24 : vector<8x56xi1>
    %cst_12 = arith.constant 1.000000e+00 : f32
    %cst_13 = arith.constant 0.000000e+00 : f32
    %26 = vector.broadcast %cst_12 : f32 to vector<8x56xf32>
    %27 = vector.broadcast %cst_13 : f32 to vector<8x56xf32>
    %28 = arith.select %25, %26, %27 : vector<8x56xi1>, vector<8x56xf32>
    %c0_14 = arith.constant 0 : index
    %c0_15 = arith.constant 0 : index
    %c0_16 = arith.constant 0 : index
    %29 = vector.load %arg9[%c0_14, %c0_15, %c0_16] : memref<6x6x56xf32, #tpu.memory_space<vmem>>, vector<1x6x56xf32>
    %30 = vector.shape_cast %29 : vector<1x6x56xf32> to vector<6x56xf32>
    %31 = vector.extract_strided_slice %30 {offsets = [0, 0], sizes = [1, 56], strides = [1, 1]} : vector<6x56xf32> to vector<1x56xf32>
    %32 = vector.extract_strided_slice %30 {offsets = [1, 0], sizes = [1, 56], strides = [1, 1]} : vector<6x56xf32> to vector<1x56xf32>
    %33 = vector.extract_strided_slice %30 {offsets = [2, 0], sizes = [1, 56], strides = [1, 1]} : vector<6x56xf32> to vector<1x56xf32>
    %34 = vector.extract_strided_slice %30 {offsets = [3, 0], sizes = [1, 56], strides = [1, 1]} : vector<6x56xf32> to vector<1x56xf32>
    %35 = vector.extract_strided_slice %30 {offsets = [4, 0], sizes = [1, 56], strides = [1, 1]} : vector<6x56xf32> to vector<1x56xf32>
    %36 = vector.extract_strided_slice %30 {offsets = [5, 0], sizes = [1, 56], strides = [1, 1]} : vector<6x56xf32> to vector<1x56xf32>
    %cst_17 = arith.constant dense<0.000000e+00> : vector<8xf32>
    %37 = vector.multi_reduction <add>, %14, %cst_17 [1] : vector<8x56xf32> to vector<8xf32>
    %38 = vector.shape_cast %37 : vector<8xf32> to vector<8x1xf32>
    %cst_18 = arith.constant 5.600000e+01 : f32
    %39 = vector.broadcast %cst_18 : f32 to vector<8x1xf32>
    %40 = arith.divf %38, %39 : vector<8x1xf32>
    %41 = vector.broadcast %40 : vector<8x1xf32> to vector<8x56xf32>
    %42 = arith.subf %14, %41 : vector<8x56xf32>
    %43 = arith.mulf %42, %42 : vector<8x56xf32>
    %cst_19 = arith.constant dense<0.000000e+00> : vector<8xf32>
    %44 = vector.multi_reduction <add>, %43, %cst_19 [1] : vector<8x56xf32> to vector<8xf32>
    %45 = vector.shape_cast %44 : vector<8xf32> to vector<8x1xf32>
    %cst_20 = arith.constant 5.600000e+01 : f32
    %46 = vector.broadcast %cst_20 : f32 to vector<8x1xf32>
    %47 = arith.divf %45, %46 : vector<8x1xf32>
    %48 = vector.broadcast %40 : vector<8x1xf32> to vector<8x56xf32>
    %49 = arith.subf %14, %48 : vector<8x56xf32>
    %cst_21 = arith.constant 9.99999974E-6 : f32
    %50 = vector.broadcast %cst_21 : f32 to vector<8x1xf32>
    %51 = arith.addf %47, %50 : vector<8x1xf32>
    %52 = math.rsqrt %51 : vector<8x1xf32>
    %53 = vector.broadcast %52 : vector<8x1xf32> to vector<8x56xf32>
    %54 = arith.mulf %49, %53 : vector<8x56xf32>
    %55 = vector.broadcast %31 : vector<1x56xf32> to vector<8x56xf32>
    %56 = arith.mulf %54, %55 : vector<8x56xf32>
    %57 = vector.broadcast %32 : vector<1x56xf32> to vector<8x56xf32>
    %58 = arith.addf %56, %57 : vector<8x56xf32>
    %c0_22 = arith.constant 0 : index
    %c0_23 = arith.constant 0 : index
    %c0_24 = arith.constant 0 : index
    %59 = vector.load %arg3[%c0_22, %c0_23, %c0_24] : memref<6x168x56xbf16, #tpu.memory_space<vmem>>, vector<1x168x56xbf16>
    %60 = vector.shape_cast %59 : vector<1x168x56xbf16> to vector<168x56xbf16>
    %61 = arith.truncf %58 : vector<8x56xf32> to vector<8x56xbf16>
    %cst_25 = arith.constant dense<0.000000e+00> : vector<8x168xf32>
    %62 = tpu.matmul %61, %60, %cst_25 {dimension_numbers = #tpu.dot_dimension_numbers<[1], [1], [0], [0], [0, 0, 1, 0], [], []>} : vector<8x56xbf16>, vector<168x56xbf16>, vector<8x168xf32> -> vector<8x168xf32>
    %c0_26 = arith.constant 0 : index
    %c0_27 = arith.constant 0 : index
    %63 = vector.load %arg4[%c0_26, %c0_27] : memref<6x168xf32, #tpu.memory_space<vmem>>, vector<1x168xf32>
    %64 = vector.broadcast %63 : vector<1x168xf32> to vector<8x168xf32>
    %65 = arith.addf %62, %64 : vector<8x168xf32>
    %66 = vector.extract_strided_slice %65 {offsets = [0, 0], sizes = [8, 56], strides = [1, 1]} : vector<8x168xf32> to vector<8x56xf32>
    %67 = vector.extract_strided_slice %65 {offsets = [0, 56], sizes = [8, 56], strides = [1, 1]} : vector<8x168xf32> to vector<8x56xf32>
    %68 = vector.extract_strided_slice %65 {offsets = [0, 112], sizes = [8, 56], strides = [1, 1]} : vector<8x168xf32> to vector<8x56xf32>
    %69 = arith.truncf %68 : vector<8x56xf32> to vector<8x56xbf16>
    %70 = vector.extract_strided_slice %66 {offsets = [0, 0], sizes = [8, 7], strides = [1, 1]} : vector<8x56xf32> to vector<8x7xf32>
    %71 = arith.truncf %70 : vector<8x7xf32> to vector<8x7xbf16>
    %72 = vector.extract_strided_slice %67 {offsets = [0, 0], sizes = [8, 7], strides = [1, 1]} : vector<8x56xf32> to vector<8x7xf32>
    %73 = arith.truncf %72 : vector<8x7xf32> to vector<8x7xbf16>
    %cst_28 = arith.constant dense<0.000000e+00> : vector<8x8xf32>
    %74 = tpu.matmul %71, %73, %cst_28 {dimension_numbers = #tpu.dot_dimension_numbers<[1], [1], [0], [0], [0, 0, 1, 0], [], []>} : vector<8x7xbf16>, vector<8x7xbf16>, vector<8x8xf32> -> vector<8x8xf32>
    %75 = vector.extract_strided_slice %66 {offsets = [0, 7], sizes = [8, 7], strides = [1, 1]} : vector<8x56xf32> to vector<8x7xf32>
    %76 = arith.truncf %75 : vector<8x7xf32> to vector<8x7xbf16>
    %77 = vector.extract_strided_slice %67 {offsets = [0, 7], sizes = [8, 7], strides = [1, 1]} : vector<8x56xf32> to vector<8x7xf32>
    %78 = arith.truncf %77 : vector<8x7xf32> to vector<8x7xbf16>
    %cst_29 = arith.constant dense<0.000000e+00> : vector<8x8xf32>
    %79 = tpu.matmul %76, %78, %cst_29 {dimension_numbers = #tpu.dot_dimension_numbers<[1], [1], [0], [0], [0, 0, 1, 0], [], []>} : vector<8x7xbf16>, vector<8x7xbf16>, vector<8x8xf32> -> vector<8x8xf32>
    %80 = vector.extract_strided_slice %66 {offsets = [0, 14], sizes = [8, 7], strides = [1, 1]} : vector<8x56xf32> to vector<8x7xf32>
    %81 = arith.truncf %80 : vector<8x7xf32> to vector<8x7xbf16>
    %82 = vector.extract_strided_slice %67 {offsets = [0, 14], sizes = [8, 7], strides = [1, 1]} : vector<8x56xf32> to vector<8x7xf32>
    %83 = arith.truncf %82 : vector<8x7xf32> to vector<8x7xbf16>
    %cst_30 = arith.constant dense<0.000000e+00> : vector<8x8xf32>
    %84 = tpu.matmul %81, %83, %cst_30 {dimension_numbers = #tpu.dot_dimension_numbers<[1], [1], [0], [0], [0, 0, 1, 0], [], []>} : vector<8x7xbf16>, vector<8x7xbf16>, vector<8x8xf32> -> vector<8x8xf32>
    %85 = vector.extract_strided_slice %66 {offsets = [0, 21], sizes = [8, 7], strides = [1, 1]} : vector<8x56xf32> to vector<8x7xf32>
    %86 = arith.truncf %85 : vector<8x7xf32> to vector<8x7xbf16>
    %87 = vector.extract_strided_slice %67 {offsets = [0, 21], sizes = [8, 7], strides = [1, 1]} : vector<8x56xf32> to vector<8x7xf32>
    %88 = arith.truncf %87 : vector<8x7xf32> to vector<8x7xbf16>
    %cst_31 = arith.constant dense<0.000000e+00> : vector<8x8xf32>
    %89 = tpu.matmul %86, %88, %cst_31 {dimension_numbers = #tpu.dot_dimension_numbers<[1], [1], [0], [0], [0, 0, 1, 0], [], []>} : vector<8x7xbf16>, vector<8x7xbf16>, vector<8x8xf32> -> vector<8x8xf32>
    %90 = vector.extract_strided_slice %66 {offsets = [0, 28], sizes = [8, 7], strides = [1, 1]} : vector<8x56xf32> to vector<8x7xf32>
    %91 = arith.truncf %90 : vector<8x7xf32> to vector<8x7xbf16>
    %92 = vector.extract_strided_slice %67 {offsets = [0, 28], sizes = [8, 7], strides = [1, 1]} : vector<8x56xf32> to vector<8x7xf32>
    %93 = arith.truncf %92 : vector<8x7xf32> to vector<8x7xbf16>
    %cst_32 = arith.constant dense<0.000000e+00> : vector<8x8xf32>
    %94 = tpu.matmul %91, %93, %cst_32 {dimension_numbers = #tpu.dot_dimension_numbers<[1], [1], [0], [0], [0, 0, 1, 0], [], []>} : vector<8x7xbf16>, vector<8x7xbf16>, vector<8x8xf32> -> vector<8x8xf32>
    %95 = vector.extract_strided_slice %66 {offsets = [0, 35], sizes = [8, 7], strides = [1, 1]} : vector<8x56xf32> to vector<8x7xf32>
    %96 = arith.truncf %95 : vector<8x7xf32> to vector<8x7xbf16>
    %97 = vector.extract_strided_slice %67 {offsets = [0, 35], sizes = [8, 7], strides = [1, 1]} : vector<8x56xf32> to vector<8x7xf32>
    %98 = arith.truncf %97 : vector<8x7xf32> to vector<8x7xbf16>
    %cst_33 = arith.constant dense<0.000000e+00> : vector<8x8xf32>
    %99 = tpu.matmul %96, %98, %cst_33 {dimension_numbers = #tpu.dot_dimension_numbers<[1], [1], [0], [0], [0, 0, 1, 0], [], []>} : vector<8x7xbf16>, vector<8x7xbf16>, vector<8x8xf32> -> vector<8x8xf32>
    %100 = vector.extract_strided_slice %66 {offsets = [0, 42], sizes = [8, 7], strides = [1, 1]} : vector<8x56xf32> to vector<8x7xf32>
    %101 = arith.truncf %100 : vector<8x7xf32> to vector<8x7xbf16>
    %102 = vector.extract_strided_slice %67 {offsets = [0, 42], sizes = [8, 7], strides = [1, 1]} : vector<8x56xf32> to vector<8x7xf32>
    %103 = arith.truncf %102 : vector<8x7xf32> to vector<8x7xbf16>
    %cst_34 = arith.constant dense<0.000000e+00> : vector<8x8xf32>
    %104 = tpu.matmul %101, %103, %cst_34 {dimension_numbers = #tpu.dot_dimension_numbers<[1], [1], [0], [0], [0, 0, 1, 0], [], []>} : vector<8x7xbf16>, vector<8x7xbf16>, vector<8x8xf32> -> vector<8x8xf32>
    %105 = vector.extract_strided_slice %66 {offsets = [0, 49], sizes = [8, 7], strides = [1, 1]} : vector<8x56xf32> to vector<8x7xf32>
    %106 = arith.truncf %105 : vector<8x7xf32> to vector<8x7xbf16>
    %107 = vector.extract_strided_slice %67 {offsets = [0, 49], sizes = [8, 7], strides = [1, 1]} : vector<8x56xf32> to vector<8x7xf32>
    %108 = arith.truncf %107 : vector<8x7xf32> to vector<8x7xbf16>
    %cst_35 = arith.constant dense<0.000000e+00> : vector<8x8xf32>
    %109 = tpu.matmul %106, %108, %cst_35 {dimension_numbers = #tpu.dot_dimension_numbers<[1], [1], [0], [0], [0, 0, 1, 0], [], []>} : vector<8x7xbf16>, vector<8x7xbf16>, vector<8x8xf32> -> vector<8x8xf32>
    %110 = tpu.concatenate %74, %79, %84, %89, %94, %99, %104, %109 in 0 : vector<8x8xf32>, vector<8x8xf32>, vector<8x8xf32>, vector<8x8xf32>, vector<8x8xf32>, vector<8x8xf32>, vector<8x8xf32>, vector<8x8xf32> -> vector<64x8xf32>
    %cst_36 = arith.constant dense<0xFF800000> : vector<64xf32>
    %111 = vector.multi_reduction <maximumf>, %110, %cst_36 [1] : vector<64x8xf32> to vector<64xf32>
    %112 = vector.shape_cast %111 : vector<64xf32> to vector<64x1xf32>
    %113 = vector.broadcast %112 : vector<64x1xf32> to vector<64x8xf32>
    %114 = arith.subf %110, %113 : vector<64x8xf32>
    %115 = math.exp %114 : vector<64x8xf32>
    %cst_37 = arith.constant dense<0.000000e+00> : vector<64xf32>
    %116 = vector.multi_reduction <add>, %115, %cst_37 [1] : vector<64x8xf32> to vector<64xf32>
    %117 = vector.shape_cast %116 : vector<64xf32> to vector<64x1xf32>
    %118 = tpu.reciprocal %117 {approx = true} : vector<64x1xf32> -> vector<64x1xf32>
    %119 = vector.broadcast %118 : vector<64x1xf32> to vector<64x8xf32>
    %120 = arith.mulf %115, %119 : vector<64x8xf32>
    %121 = arith.truncf %120 : vector<64x8xf32> to vector<64x8xbf16>
    %cst_38 = arith.constant dense<0.000000e+00> : vector<64x56xf32>
    %122 = tpu.matmul %121, %69, %cst_38 {dimension_numbers = #tpu.dot_dimension_numbers<[1], [0], [0], [1], [0, 0, 1, 1], [], []>} : vector<64x8xbf16>, vector<8x56xbf16>, vector<64x56xf32> -> vector<64x56xf32>
    %123 = vector.extract_strided_slice %122 {offsets = [0, 0], sizes = [8, 56], strides = [1, 1]} : vector<64x56xf32> to vector<8x56xf32>
    %124 = vector.extract_strided_slice %28 {offsets = [0, 0], sizes = [1, 56], strides = [1, 1]} : vector<8x56xf32> to vector<1x56xf32>
    %125 = vector.broadcast %124 : vector<1x56xf32> to vector<8x56xf32>
    %126 = arith.mulf %123, %125 : vector<8x56xf32>
    %127 = vector.extract_strided_slice %122 {offsets = [8, 0], sizes = [8, 56], strides = [1, 1]} : vector<64x56xf32> to vector<8x56xf32>
    %128 = vector.extract_strided_slice %28 {offsets = [1, 0], sizes = [1, 56], strides = [1, 1]} : vector<8x56xf32> to vector<1x56xf32>
    %129 = vector.broadcast %128 : vector<1x56xf32> to vector<8x56xf32>
    %130 = arith.mulf %127, %129 : vector<8x56xf32>
    %131 = arith.addf %126, %130 : vector<8x56xf32>
    %132 = vector.extract_strided_slice %122 {offsets = [16, 0], sizes = [8, 56], strides = [1, 1]} : vector<64x56xf32> to vector<8x56xf32>
    %133 = vector.extract_strided_slice %28 {offsets = [2, 0], sizes = [1, 56], strides = [1, 1]} : vector<8x56xf32> to vector<1x56xf32>
    %134 = vector.broadcast %133 : vector<1x56xf32> to vector<8x56xf32>
    %135 = arith.mulf %132, %134 : vector<8x56xf32>
    %136 = arith.addf %131, %135 : vector<8x56xf32>
    %137 = vector.extract_strided_slice %122 {offsets = [24, 0], sizes = [8, 56], strides = [1, 1]} : vector<64x56xf32> to vector<8x56xf32>
    %138 = vector.extract_strided_slice %28 {offsets = [3, 0], sizes = [1, 56], strides = [1, 1]} : vector<8x56xf32> to vector<1x56xf32>
    %139 = vector.broadcast %138 : vector<1x56xf32> to vector<8x56xf32>
    %140 = arith.mulf %137, %139 : vector<8x56xf32>
    %141 = arith.addf %136, %140 : vector<8x56xf32>
    %142 = vector.extract_strided_slice %122 {offsets = [32, 0], sizes = [8, 56], strides = [1, 1]} : vector<64x56xf32> to vector<8x56xf32>
    %143 = vector.extract_strided_slice %28 {offsets = [4, 0], sizes = [1, 56], strides = [1, 1]} : vector<8x56xf32> to vector<1x56xf32>
    %144 = vector.broadcast %143 : vector<1x56xf32> to vector<8x56xf32>
    %145 = arith.mulf %142, %144 : vector<8x56xf32>
    %146 = arith.addf %141, %145 : vector<8x56xf32>
    %147 = vector.extract_strided_slice %122 {offsets = [40, 0], sizes = [8, 56], strides = [1, 1]} : vector<64x56xf32> to vector<8x56xf32>
    %148 = vector.extract_strided_slice %28 {offsets = [5, 0], sizes = [1, 56], strides = [1, 1]} : vector<8x56xf32> to vector<1x56xf32>
    %149 = vector.broadcast %148 : vector<1x56xf32> to vector<8x56xf32>
    %150 = arith.mulf %147, %149 : vector<8x56xf32>
    %151 = arith.addf %146, %150 : vector<8x56xf32>
    %152 = vector.extract_strided_slice %122 {offsets = [48, 0], sizes = [8, 56], strides = [1, 1]} : vector<64x56xf32> to vector<8x56xf32>
    %153 = vector.extract_strided_slice %28 {offsets = [6, 0], sizes = [1, 56], strides = [1, 1]} : vector<8x56xf32> to vector<1x56xf32>
    %154 = vector.broadcast %153 : vector<1x56xf32> to vector<8x56xf32>
    %155 = arith.mulf %152, %154 : vector<8x56xf32>
    %156 = arith.addf %151, %155 : vector<8x56xf32>
    %157 = vector.extract_strided_slice %122 {offsets = [56, 0], sizes = [8, 56], strides = [1, 1]} : vector<64x56xf32> to vector<8x56xf32>
    %158 = vector.extract_strided_slice %28 {offsets = [7, 0], sizes = [1, 56], strides = [1, 1]} : vector<8x56xf32> to vector<1x56xf32>
    %159 = vector.broadcast %158 : vector<1x56xf32> to vector<8x56xf32>
    %160 = arith.mulf %157, %159 : vector<8x56xf32>
    %161 = arith.addf %156, %160 : vector<8x56xf32>
    %c0_39 = arith.constant 0 : index
    %c0_40 = arith.constant 0 : index
    %c0_41 = arith.constant 0 : index
    %162 = vector.load %arg5[%c0_39, %c0_40, %c0_41] : memref<6x56x56xbf16, #tpu.memory_space<vmem>>, vector<1x56x56xbf16>
    %163 = vector.shape_cast %162 : vector<1x56x56xbf16> to vector<56x56xbf16>
    %164 = arith.truncf %161 : vector<8x56xf32> to vector<8x56xbf16>
    %cst_42 = arith.constant dense<0.000000e+00> : vector<8x56xf32>
    %165 = tpu.matmul %164, %163, %cst_42 {dimension_numbers = #tpu.dot_dimension_numbers<[1], [0], [0], [1], [0, 0, 1, 1], [], []>} : vector<8x56xbf16>, vector<56x56xbf16>, vector<8x56xf32> -> vector<8x56xf32>
    %166 = vector.broadcast %35 : vector<1x56xf32> to vector<8x56xf32>
    %167 = arith.addf %165, %166 : vector<8x56xf32>
    %168 = arith.addf %14, %167 : vector<8x56xf32>
    %cst_43 = arith.constant dense<0.000000e+00> : vector<8xf32>
    %169 = vector.multi_reduction <add>, %168, %cst_43 [1] : vector<8x56xf32> to vector<8xf32>
    %170 = vector.shape_cast %169 : vector<8xf32> to vector<8x1xf32>
    %cst_44 = arith.constant 5.600000e+01 : f32
    %171 = vector.broadcast %cst_44 : f32 to vector<8x1xf32>
    %172 = arith.divf %170, %171 : vector<8x1xf32>
    %173 = vector.broadcast %172 : vector<8x1xf32> to vector<8x56xf32>
    %174 = arith.subf %168, %173 : vector<8x56xf32>
    %175 = arith.mulf %174, %174 : vector<8x56xf32>
    %cst_45 = arith.constant dense<0.000000e+00> : vector<8xf32>
    %176 = vector.multi_reduction <add>, %175, %cst_45 [1] : vector<8x56xf32> to vector<8xf32>
    %177 = vector.shape_cast %176 : vector<8xf32> to vector<8x1xf32>
    %cst_46 = arith.constant 5.600000e+01 : f32
    %178 = vector.broadcast %cst_46 : f32 to vector<8x1xf32>
    %179 = arith.divf %177, %178 : vector<8x1xf32>
    %180 = vector.broadcast %172 : vector<8x1xf32> to vector<8x56xf32>
    %181 = arith.subf %168, %180 : vector<8x56xf32>
    %cst_47 = arith.constant 9.99999974E-6 : f32
    %182 = vector.broadcast %cst_47 : f32 to vector<8x1xf32>
    %183 = arith.addf %179, %182 : vector<8x1xf32>
    %184 = math.rsqrt %183 : vector<8x1xf32>
    %185 = vector.broadcast %184 : vector<8x1xf32> to vector<8x56xf32>
    %186 = arith.mulf %181, %185 : vector<8x56xf32>
    %187 = vector.broadcast %33 : vector<1x56xf32> to vector<8x56xf32>
    %188 = arith.mulf %186, %187 : vector<8x56xf32>
    %189 = vector.broadcast %34 : vector<1x56xf32> to vector<8x56xf32>
    %190 = arith.addf %188, %189 : vector<8x56xf32>
    %c0_48 = arith.constant 0 : index
    %c0_49 = arith.constant 0 : index
    %c0_50 = arith.constant 0 : index
    %191 = vector.load %arg6[%c0_48, %c0_49, %c0_50] : memref<6x56x224xbf16, #tpu.memory_space<vmem>>, vector<1x56x224xbf16>
    %192 = vector.shape_cast %191 : vector<1x56x224xbf16> to vector<56x224xbf16>
    %193 = arith.truncf %190 : vector<8x56xf32> to vector<8x56xbf16>
    %cst_51 = arith.constant dense<0.000000e+00> : vector<8x224xf32>
    %194 = tpu.matmul %193, %192, %cst_51 {dimension_numbers = #tpu.dot_dimension_numbers<[1], [0], [0], [1], [0, 0, 1, 1], [], []>} : vector<8x56xbf16>, vector<56x224xbf16>, vector<8x224xf32> -> vector<8x224xf32>
    %c0_52 = arith.constant 0 : index
    %c0_53 = arith.constant 0 : index
    %195 = vector.load %arg7[%c0_52, %c0_53] : memref<6x224xf32, #tpu.memory_space<vmem>>, vector<1x224xf32>
    %196 = vector.broadcast %195 : vector<1x224xf32> to vector<8x224xf32>
    %197 = arith.addf %194, %196 : vector<8x224xf32>
    %cst_54 = arith.constant 5.000000e-01 : f32
    %198 = vector.broadcast %cst_54 : f32 to vector<8x224xf32>
    %199 = arith.mulf %198, %197 : vector<8x224xf32>
    %cst_55 = arith.constant 0.707106769 : f32
    %200 = vector.broadcast %cst_55 : f32 to vector<8x224xf32>
    %201 = arith.mulf %197, %200 : vector<8x224xf32>
    %cst_56 = arith.constant 0.000000e+00 : f32
    %202 = vector.broadcast %cst_56 : f32 to vector<8x224xf32>
    %203 = arith.cmpf oge, %201, %202 : vector<8x224xf32>
    %cst_57 = arith.constant 1.000000e+00 : f32
    %cst_58 = arith.constant -1.000000e+00 : f32
    %204 = vector.broadcast %cst_57 : f32 to vector<8x224xf32>
    %205 = vector.broadcast %cst_58 : f32 to vector<8x224xf32>
    %206 = arith.select %203, %204, %205 : vector<8x224xi1>, vector<8x224xf32>
    %207 = math.absf %201 : vector<8x224xf32>
    %cst_59 = arith.constant 0.327591091 : f32
    %208 = vector.broadcast %cst_59 : f32 to vector<8x224xf32>
    %209 = arith.mulf %208, %207 : vector<8x224xf32>
    %cst_60 = arith.constant 1.000000e+00 : f32
    %210 = vector.broadcast %cst_60 : f32 to vector<8x224xf32>
    %211 = arith.addf %210, %209 : vector<8x224xf32>
    %cst_61 = arith.constant 1.000000e+00 : f32
    %212 = vector.broadcast %cst_61 : f32 to vector<8x224xf32>
    %213 = arith.divf %212, %211 : vector<8x224xf32>
    %cst_62 = arith.constant 1.06140542 : f32
    %214 = vector.broadcast %cst_62 : f32 to vector<8x224xf32>
    %215 = arith.mulf %214, %213 : vector<8x224xf32>
    %cst_63 = arith.constant -1.45315206 : f32
    %216 = vector.broadcast %cst_63 : f32 to vector<8x224xf32>
    %217 = arith.addf %215, %216 : vector<8x224xf32>
    %218 = arith.mulf %217, %213 : vector<8x224xf32>
    %cst_64 = arith.constant 1.42141378 : f32
    %219 = vector.broadcast %cst_64 : f32 to vector<8x224xf32>
    %220 = arith.addf %218, %219 : vector<8x224xf32>
    %221 = arith.mulf %220, %213 : vector<8x224xf32>
    %cst_65 = arith.constant -0.284496725 : f32
    %222 = vector.broadcast %cst_65 : f32 to vector<8x224xf32>
    %223 = arith.addf %221, %222 : vector<8x224xf32>
    %224 = arith.mulf %223, %213 : vector<8x224xf32>
    %cst_66 = arith.constant 0.254829586 : f32
    %225 = vector.broadcast %cst_66 : f32 to vector<8x224xf32>
    %226 = arith.addf %224, %225 : vector<8x224xf32>
    %227 = arith.mulf %226, %213 : vector<8x224xf32>
    %cst_67 = arith.constant 0.000000e+00 : f32
    %228 = vector.broadcast %cst_67 : f32 to vector<8x224xf32>
    %229 = arith.subf %228, %207 : vector<8x224xf32>
    %230 = arith.mulf %229, %207 : vector<8x224xf32>
    %231 = math.exp %230 : vector<8x224xf32>
    %232 = arith.mulf %227, %231 : vector<8x224xf32>
    %cst_68 = arith.constant 1.000000e+00 : f32
    %233 = vector.broadcast %cst_68 : f32 to vector<8x224xf32>
    %234 = arith.subf %233, %232 : vector<8x224xf32>
    %235 = arith.mulf %206, %234 : vector<8x224xf32>
    %cst_69 = arith.constant 1.000000e+00 : f32
    %236 = vector.broadcast %cst_69 : f32 to vector<8x224xf32>
    %237 = arith.addf %236, %235 : vector<8x224xf32>
    %238 = arith.mulf %199, %237 : vector<8x224xf32>
    %c0_70 = arith.constant 0 : index
    %c0_71 = arith.constant 0 : index
    %c0_72 = arith.constant 0 : index
    %239 = vector.load %arg8[%c0_70, %c0_71, %c0_72] : memref<6x224x56xbf16, #tpu.memory_space<vmem>>, vector<1x224x56xbf16>
    %240 = vector.shape_cast %239 : vector<1x224x56xbf16> to vector<224x56xbf16>
    %241 = arith.truncf %238 : vector<8x224xf32> to vector<8x224xbf16>
    %cst_73 = arith.constant dense<0.000000e+00> : vector<8x56xf32>
    %242 = tpu.matmul %241, %240, %cst_73 {dimension_numbers = #tpu.dot_dimension_numbers<[1], [0], [0], [1], [0, 0, 1, 1], [], []>} : vector<8x224xbf16>, vector<224x56xbf16>, vector<8x56xf32> -> vector<8x56xf32>
    %243 = vector.broadcast %36 : vector<1x56xf32> to vector<8x56xf32>
    %244 = arith.addf %242, %243 : vector<8x56xf32>
    %245 = arith.addf %168, %244 : vector<8x56xf32>
    %c1_74 = arith.constant 1 : index
    %c0_75 = arith.constant 0 : index
    %c0_76 = arith.constant 0 : index
    %246 = vector.load %arg9[%c1_74, %c0_75, %c0_76] : memref<6x6x56xf32, #tpu.memory_space<vmem>>, vector<1x6x56xf32>
    %247 = vector.shape_cast %246 : vector<1x6x56xf32> to vector<6x56xf32>
    %248 = vector.extract_strided_slice %247 {offsets = [0, 0], sizes = [1, 56], strides = [1, 1]} : vector<6x56xf32> to vector<1x56xf32>
    %249 = vector.extract_strided_slice %247 {offsets = [1, 0], sizes = [1, 56], strides = [1, 1]} : vector<6x56xf32> to vector<1x56xf32>
    %250 = vector.extract_strided_slice %247 {offsets = [2, 0], sizes = [1, 56], strides = [1, 1]} : vector<6x56xf32> to vector<1x56xf32>
    %251 = vector.extract_strided_slice %247 {offsets = [3, 0], sizes = [1, 56], strides = [1, 1]} : vector<6x56xf32> to vector<1x56xf32>
    %252 = vector.extract_strided_slice %247 {offsets = [4, 0], sizes = [1, 56], strides = [1, 1]} : vector<6x56xf32> to vector<1x56xf32>
    %253 = vector.extract_strided_slice %247 {offsets = [5, 0], sizes = [1, 56], strides = [1, 1]} : vector<6x56xf32> to vector<1x56xf32>
    %cst_77 = arith.constant dense<0.000000e+00> : vector<8xf32>
    %254 = vector.multi_reduction <add>, %245, %cst_77 [1] : vector<8x56xf32> to vector<8xf32>
    %255 = vector.shape_cast %254 : vector<8xf32> to vector<8x1xf32>
    %cst_78 = arith.constant 5.600000e+01 : f32
    %256 = vector.broadcast %cst_78 : f32 to vector<8x1xf32>
    %257 = arith.divf %255, %256 : vector<8x1xf32>
    %258 = vector.broadcast %257 : vector<8x1xf32> to vector<8x56xf32>
    %259 = arith.subf %245, %258 : vector<8x56xf32>
    %260 = arith.mulf %259, %259 : vector<8x56xf32>
    %cst_79 = arith.constant dense<0.000000e+00> : vector<8xf32>
    %261 = vector.multi_reduction <add>, %260, %cst_79 [1] : vector<8x56xf32> to vector<8xf32>
    %262 = vector.shape_cast %261 : vector<8xf32> to vector<8x1xf32>
    %cst_80 = arith.constant 5.600000e+01 : f32
    %263 = vector.broadcast %cst_80 : f32 to vector<8x1xf32>
    %264 = arith.divf %262, %263 : vector<8x1xf32>
    %265 = vector.broadcast %257 : vector<8x1xf32> to vector<8x56xf32>
    %266 = arith.subf %245, %265 : vector<8x56xf32>
    %cst_81 = arith.constant 9.99999974E-6 : f32
    %267 = vector.broadcast %cst_81 : f32 to vector<8x1xf32>
    %268 = arith.addf %264, %267 : vector<8x1xf32>
    %269 = math.rsqrt %268 : vector<8x1xf32>
    %270 = vector.broadcast %269 : vector<8x1xf32> to vector<8x56xf32>
    %271 = arith.mulf %266, %270 : vector<8x56xf32>
    %272 = vector.broadcast %248 : vector<1x56xf32> to vector<8x56xf32>
    %273 = arith.mulf %271, %272 : vector<8x56xf32>
    %274 = vector.broadcast %249 : vector<1x56xf32> to vector<8x56xf32>
    %275 = arith.addf %273, %274 : vector<8x56xf32>
    %c1_82 = arith.constant 1 : index
    %c0_83 = arith.constant 0 : index
    %c0_84 = arith.constant 0 : index
    %276 = vector.load %arg3[%c1_82, %c0_83, %c0_84] : memref<6x168x56xbf16, #tpu.memory_space<vmem>>, vector<1x168x56xbf16>
    %277 = vector.shape_cast %276 : vector<1x168x56xbf16> to vector<168x56xbf16>
    %278 = arith.truncf %275 : vector<8x56xf32> to vector<8x56xbf16>
    %cst_85 = arith.constant dense<0.000000e+00> : vector<8x168xf32>
    %279 = tpu.matmul %278, %277, %cst_85 {dimension_numbers = #tpu.dot_dimension_numbers<[1], [1], [0], [0], [0, 0, 1, 0], [], []>} : vector<8x56xbf16>, vector<168x56xbf16>, vector<8x168xf32> -> vector<8x168xf32>
    %c1_86 = arith.constant 1 : index
    %c0_87 = arith.constant 0 : index
    %280 = vector.load %arg4[%c1_86, %c0_87] : memref<6x168xf32, #tpu.memory_space<vmem>>, vector<1x168xf32>
    %281 = vector.broadcast %280 : vector<1x168xf32> to vector<8x168xf32>
    %282 = arith.addf %279, %281 : vector<8x168xf32>
    %283 = vector.extract_strided_slice %282 {offsets = [0, 0], sizes = [8, 56], strides = [1, 1]} : vector<8x168xf32> to vector<8x56xf32>
    %284 = vector.extract_strided_slice %282 {offsets = [0, 56], sizes = [8, 56], strides = [1, 1]} : vector<8x168xf32> to vector<8x56xf32>
    %285 = vector.extract_strided_slice %282 {offsets = [0, 112], sizes = [8, 56], strides = [1, 1]} : vector<8x168xf32> to vector<8x56xf32>
    %286 = arith.truncf %285 : vector<8x56xf32> to vector<8x56xbf16>
    %287 = vector.extract_strided_slice %283 {offsets = [0, 0], sizes = [8, 7], strides = [1, 1]} : vector<8x56xf32> to vector<8x7xf32>
    %288 = arith.truncf %287 : vector<8x7xf32> to vector<8x7xbf16>
    %289 = vector.extract_strided_slice %284 {offsets = [0, 0], sizes = [8, 7], strides = [1, 1]} : vector<8x56xf32> to vector<8x7xf32>
    %290 = arith.truncf %289 : vector<8x7xf32> to vector<8x7xbf16>
    %cst_88 = arith.constant dense<0.000000e+00> : vector<8x8xf32>
    %291 = tpu.matmul %288, %290, %cst_88 {dimension_numbers = #tpu.dot_dimension_numbers<[1], [1], [0], [0], [0, 0, 1, 0], [], []>} : vector<8x7xbf16>, vector<8x7xbf16>, vector<8x8xf32> -> vector<8x8xf32>
    %292 = vector.extract_strided_slice %283 {offsets = [0, 7], sizes = [8, 7], strides = [1, 1]} : vector<8x56xf32> to vector<8x7xf32>
    %293 = arith.truncf %292 : vector<8x7xf32> to vector<8x7xbf16>
    %294 = vector.extract_strided_slice %284 {offsets = [0, 7], sizes = [8, 7], strides = [1, 1]} : vector<8x56xf32> to vector<8x7xf32>
    %295 = arith.truncf %294 : vector<8x7xf32> to vector<8x7xbf16>
    %cst_89 = arith.constant dense<0.000000e+00> : vector<8x8xf32>
    %296 = tpu.matmul %293, %295, %cst_89 {dimension_numbers = #tpu.dot_dimension_numbers<[1], [1], [0], [0], [0, 0, 1, 0], [], []>} : vector<8x7xbf16>, vector<8x7xbf16>, vector<8x8xf32> -> vector<8x8xf32>
    %297 = vector.extract_strided_slice %283 {offsets = [0, 14], sizes = [8, 7], strides = [1, 1]} : vector<8x56xf32> to vector<8x7xf32>
    %298 = arith.truncf %297 : vector<8x7xf32> to vector<8x7xbf16>
    %299 = vector.extract_strided_slice %284 {offsets = [0, 14], sizes = [8, 7], strides = [1, 1]} : vector<8x56xf32> to vector<8x7xf32>
    %300 = arith.truncf %299 : vector<8x7xf32> to vector<8x7xbf16>
    %cst_90 = arith.constant dense<0.000000e+00> : vector<8x8xf32>
    %301 = tpu.matmul %298, %300, %cst_90 {dimension_numbers = #tpu.dot_dimension_numbers<[1], [1], [0], [0], [0, 0, 1, 0], [], []>} : vector<8x7xbf16>, vector<8x7xbf16>, vector<8x8xf32> -> vector<8x8xf32>
    %302 = vector.extract_strided_slice %283 {offsets = [0, 21], sizes = [8, 7], strides = [1, 1]} : vector<8x56xf32> to vector<8x7xf32>
    %303 = arith.truncf %302 : vector<8x7xf32> to vector<8x7xbf16>
    %304 = vector.extract_strided_slice %284 {offsets = [0, 21], sizes = [8, 7], strides = [1, 1]} : vector<8x56xf32> to vector<8x7xf32>
    %305 = arith.truncf %304 : vector<8x7xf32> to vector<8x7xbf16>
    %cst_91 = arith.constant dense<0.000000e+00> : vector<8x8xf32>
    %306 = tpu.matmul %303, %305, %cst_91 {dimension_numbers = #tpu.dot_dimension_numbers<[1], [1], [0], [0], [0, 0, 1, 0], [], []>} : vector<8x7xbf16>, vector<8x7xbf16>, vector<8x8xf32> -> vector<8x8xf32>
    %307 = vector.extract_strided_slice %283 {offsets = [0, 28], sizes = [8, 7], strides = [1, 1]} : vector<8x56xf32> to vector<8x7xf32>
    %308 = arith.truncf %307 : vector<8x7xf32> to vector<8x7xbf16>
    %309 = vector.extract_strided_slice %284 {offsets = [0, 28], sizes = [8, 7], strides = [1, 1]} : vector<8x56xf32> to vector<8x7xf32>
    %310 = arith.truncf %309 : vector<8x7xf32> to vector<8x7xbf16>
    %cst_92 = arith.constant dense<0.000000e+00> : vector<8x8xf32>
    %311 = tpu.matmul %308, %310, %cst_92 {dimension_numbers = #tpu.dot_dimension_numbers<[1], [1], [0], [0], [0, 0, 1, 0], [], []>} : vector<8x7xbf16>, vector<8x7xbf16>, vector<8x8xf32> -> vector<8x8xf32>
    %312 = vector.extract_strided_slice %283 {offsets = [0, 35], sizes = [8, 7], strides = [1, 1]} : vector<8x56xf32> to vector<8x7xf32>
    %313 = arith.truncf %312 : vector<8x7xf32> to vector<8x7xbf16>
    %314 = vector.extract_strided_slice %284 {offsets = [0, 35], sizes = [8, 7], strides = [1, 1]} : vector<8x56xf32> to vector<8x7xf32>
    %315 = arith.truncf %314 : vector<8x7xf32> to vector<8x7xbf16>
    %cst_93 = arith.constant dense<0.000000e+00> : vector<8x8xf32>
    %316 = tpu.matmul %313, %315, %cst_93 {dimension_numbers = #tpu.dot_dimension_numbers<[1], [1], [0], [0], [0, 0, 1, 0], [], []>} : vector<8x7xbf16>, vector<8x7xbf16>, vector<8x8xf32> -> vector<8x8xf32>
    %317 = vector.extract_strided_slice %283 {offsets = [0, 42], sizes = [8, 7], strides = [1, 1]} : vector<8x56xf32> to vector<8x7xf32>
    %318 = arith.truncf %317 : vector<8x7xf32> to vector<8x7xbf16>
    %319 = vector.extract_strided_slice %284 {offsets = [0, 42], sizes = [8, 7], strides = [1, 1]} : vector<8x56xf32> to vector<8x7xf32>
    %320 = arith.truncf %319 : vector<8x7xf32> to vector<8x7xbf16>
    %cst_94 = arith.constant dense<0.000000e+00> : vector<8x8xf32>
    %321 = tpu.matmul %318, %320, %cst_94 {dimension_numbers = #tpu.dot_dimension_numbers<[1], [1], [0], [0], [0, 0, 1, 0], [], []>} : vector<8x7xbf16>, vector<8x7xbf16>, vector<8x8xf32> -> vector<8x8xf32>
    %322 = vector.extract_strided_slice %283 {offsets = [0, 49], sizes = [8, 7], strides = [1, 1]} : vector<8x56xf32> to vector<8x7xf32>
    %323 = arith.truncf %322 : vector<8x7xf32> to vector<8x7xbf16>
    %324 = vector.extract_strided_slice %284 {offsets = [0, 49], sizes = [8, 7], strides = [1, 1]} : vector<8x56xf32> to vector<8x7xf32>
    %325 = arith.truncf %324 : vector<8x7xf32> to vector<8x7xbf16>
    %cst_95 = arith.constant dense<0.000000e+00> : vector<8x8xf32>
    %326 = tpu.matmul %323, %325, %cst_95 {dimension_numbers = #tpu.dot_dimension_numbers<[1], [1], [0], [0], [0, 0, 1, 0], [], []>} : vector<8x7xbf16>, vector<8x7xbf16>, vector<8x8xf32> -> vector<8x8xf32>
    %327 = tpu.concatenate %291, %296, %301, %306, %311, %316, %321, %326 in 0 : vector<8x8xf32>, vector<8x8xf32>, vector<8x8xf32>, vector<8x8xf32>, vector<8x8xf32>, vector<8x8xf32>, vector<8x8xf32>, vector<8x8xf32> -> vector<64x8xf32>
    %cst_96 = arith.constant dense<0xFF800000> : vector<64xf32>
    %328 = vector.multi_reduction <maximumf>, %327, %cst_96 [1] : vector<64x8xf32> to vector<64xf32>
    %329 = vector.shape_cast %328 : vector<64xf32> to vector<64x1xf32>
    %330 = vector.broadcast %329 : vector<64x1xf32> to vector<64x8xf32>
    %331 = arith.subf %327, %330 : vector<64x8xf32>
    %332 = math.exp %331 : vector<64x8xf32>
    %cst_97 = arith.constant dense<0.000000e+00> : vector<64xf32>
    %333 = vector.multi_reduction <add>, %332, %cst_97 [1] : vector<64x8xf32> to vector<64xf32>
    %334 = vector.shape_cast %333 : vector<64xf32> to vector<64x1xf32>
    %335 = tpu.reciprocal %334 {approx = true} : vector<64x1xf32> -> vector<64x1xf32>
    %336 = vector.broadcast %335 : vector<64x1xf32> to vector<64x8xf32>
    %337 = arith.mulf %332, %336 : vector<64x8xf32>
    %338 = arith.truncf %337 : vector<64x8xf32> to vector<64x8xbf16>
    %cst_98 = arith.constant dense<0.000000e+00> : vector<64x56xf32>
    %339 = tpu.matmul %338, %286, %cst_98 {dimension_numbers = #tpu.dot_dimension_numbers<[1], [0], [0], [1], [0, 0, 1, 1], [], []>} : vector<64x8xbf16>, vector<8x56xbf16>, vector<64x56xf32> -> vector<64x56xf32>
    %340 = vector.extract_strided_slice %339 {offsets = [0, 0], sizes = [8, 56], strides = [1, 1]} : vector<64x56xf32> to vector<8x56xf32>
    %341 = vector.extract_strided_slice %28 {offsets = [0, 0], sizes = [1, 56], strides = [1, 1]} : vector<8x56xf32> to vector<1x56xf32>
    %342 = vector.broadcast %341 : vector<1x56xf32> to vector<8x56xf32>
    %343 = arith.mulf %340, %342 : vector<8x56xf32>
    %344 = vector.extract_strided_slice %339 {offsets = [8, 0], sizes = [8, 56], strides = [1, 1]} : vector<64x56xf32> to vector<8x56xf32>
    %345 = vector.extract_strided_slice %28 {offsets = [1, 0], sizes = [1, 56], strides = [1, 1]} : vector<8x56xf32> to vector<1x56xf32>
    %346 = vector.broadcast %345 : vector<1x56xf32> to vector<8x56xf32>
    %347 = arith.mulf %344, %346 : vector<8x56xf32>
    %348 = arith.addf %343, %347 : vector<8x56xf32>
    %349 = vector.extract_strided_slice %339 {offsets = [16, 0], sizes = [8, 56], strides = [1, 1]} : vector<64x56xf32> to vector<8x56xf32>
    %350 = vector.extract_strided_slice %28 {offsets = [2, 0], sizes = [1, 56], strides = [1, 1]} : vector<8x56xf32> to vector<1x56xf32>
    %351 = vector.broadcast %350 : vector<1x56xf32> to vector<8x56xf32>
    %352 = arith.mulf %349, %351 : vector<8x56xf32>
    %353 = arith.addf %348, %352 : vector<8x56xf32>
    %354 = vector.extract_strided_slice %339 {offsets = [24, 0], sizes = [8, 56], strides = [1, 1]} : vector<64x56xf32> to vector<8x56xf32>
    %355 = vector.extract_strided_slice %28 {offsets = [3, 0], sizes = [1, 56], strides = [1, 1]} : vector<8x56xf32> to vector<1x56xf32>
    %356 = vector.broadcast %355 : vector<1x56xf32> to vector<8x56xf32>
    %357 = arith.mulf %354, %356 : vector<8x56xf32>
    %358 = arith.addf %353, %357 : vector<8x56xf32>
    %359 = vector.extract_strided_slice %339 {offsets = [32, 0], sizes = [8, 56], strides = [1, 1]} : vector<64x56xf32> to vector<8x56xf32>
    %360 = vector.extract_strided_slice %28 {offsets = [4, 0], sizes = [1, 56], strides = [1, 1]} : vector<8x56xf32> to vector<1x56xf32>
    %361 = vector.broadcast %360 : vector<1x56xf32> to vector<8x56xf32>
    %362 = arith.mulf %359, %361 : vector<8x56xf32>
    %363 = arith.addf %358, %362 : vector<8x56xf32>
    %364 = vector.extract_strided_slice %339 {offsets = [40, 0], sizes = [8, 56], strides = [1, 1]} : vector<64x56xf32> to vector<8x56xf32>
    %365 = vector.extract_strided_slice %28 {offsets = [5, 0], sizes = [1, 56], strides = [1, 1]} : vector<8x56xf32> to vector<1x56xf32>
    %366 = vector.broadcast %365 : vector<1x56xf32> to vector<8x56xf32>
    %367 = arith.mulf %364, %366 : vector<8x56xf32>
    %368 = arith.addf %363, %367 : vector<8x56xf32>
    %369 = vector.extract_strided_slice %339 {offsets = [48, 0], sizes = [8, 56], strides = [1, 1]} : vector<64x56xf32> to vector<8x56xf32>
    %370 = vector.extract_strided_slice %28 {offsets = [6, 0], sizes = [1, 56], strides = [1, 1]} : vector<8x56xf32> to vector<1x56xf32>
    %371 = vector.broadcast %370 : vector<1x56xf32> to vector<8x56xf32>
    %372 = arith.mulf %369, %371 : vector<8x56xf32>
    %373 = arith.addf %368, %372 : vector<8x56xf32>
    %374 = vector.extract_strided_slice %339 {offsets = [56, 0], sizes = [8, 56], strides = [1, 1]} : vector<64x56xf32> to vector<8x56xf32>
    %375 = vector.extract_strided_slice %28 {offsets = [7, 0], sizes = [1, 56], strides = [1, 1]} : vector<8x56xf32> to vector<1x56xf32>
    %376 = vector.broadcast %375 : vector<1x56xf32> to vector<8x56xf32>
    %377 = arith.mulf %374, %376 : vector<8x56xf32>
    %378 = arith.addf %373, %377 : vector<8x56xf32>
    %c1_99 = arith.constant 1 : index
    %c0_100 = arith.constant 0 : index
    %c0_101 = arith.constant 0 : index
    %379 = vector.load %arg5[%c1_99, %c0_100, %c0_101] : memref<6x56x56xbf16, #tpu.memory_space<vmem>>, vector<1x56x56xbf16>
    %380 = vector.shape_cast %379 : vector<1x56x56xbf16> to vector<56x56xbf16>
    %381 = arith.truncf %378 : vector<8x56xf32> to vector<8x56xbf16>
    %cst_102 = arith.constant dense<0.000000e+00> : vector<8x56xf32>
    %382 = tpu.matmul %381, %380, %cst_102 {dimension_numbers = #tpu.dot_dimension_numbers<[1], [0], [0], [1], [0, 0, 1, 1], [], []>} : vector<8x56xbf16>, vector<56x56xbf16>, vector<8x56xf32> -> vector<8x56xf32>
    %383 = vector.broadcast %252 : vector<1x56xf32> to vector<8x56xf32>
    %384 = arith.addf %382, %383 : vector<8x56xf32>
    %385 = arith.addf %245, %384 : vector<8x56xf32>
    %cst_103 = arith.constant dense<0.000000e+00> : vector<8xf32>
    %386 = vector.multi_reduction <add>, %385, %cst_103 [1] : vector<8x56xf32> to vector<8xf32>
    %387 = vector.shape_cast %386 : vector<8xf32> to vector<8x1xf32>
    %cst_104 = arith.constant 5.600000e+01 : f32
    %388 = vector.broadcast %cst_104 : f32 to vector<8x1xf32>
    %389 = arith.divf %387, %388 : vector<8x1xf32>
    %390 = vector.broadcast %389 : vector<8x1xf32> to vector<8x56xf32>
    %391 = arith.subf %385, %390 : vector<8x56xf32>
    %392 = arith.mulf %391, %391 : vector<8x56xf32>
    %cst_105 = arith.constant dense<0.000000e+00> : vector<8xf32>
    %393 = vector.multi_reduction <add>, %392, %cst_105 [1] : vector<8x56xf32> to vector<8xf32>
    %394 = vector.shape_cast %393 : vector<8xf32> to vector<8x1xf32>
    %cst_106 = arith.constant 5.600000e+01 : f32
    %395 = vector.broadcast %cst_106 : f32 to vector<8x1xf32>
    %396 = arith.divf %394, %395 : vector<8x1xf32>
    %397 = vector.broadcast %389 : vector<8x1xf32> to vector<8x56xf32>
    %398 = arith.subf %385, %397 : vector<8x56xf32>
    %cst_107 = arith.constant 9.99999974E-6 : f32
    %399 = vector.broadcast %cst_107 : f32 to vector<8x1xf32>
    %400 = arith.addf %396, %399 : vector<8x1xf32>
    %401 = math.rsqrt %400 : vector<8x1xf32>
    %402 = vector.broadcast %401 : vector<8x1xf32> to vector<8x56xf32>
    %403 = arith.mulf %398, %402 : vector<8x56xf32>
    %404 = vector.broadcast %250 : vector<1x56xf32> to vector<8x56xf32>
    %405 = arith.mulf %403, %404 : vector<8x56xf32>
    %406 = vector.broadcast %251 : vector<1x56xf32> to vector<8x56xf32>
    %407 = arith.addf %405, %406 : vector<8x56xf32>
    %c1_108 = arith.constant 1 : index
    %c0_109 = arith.constant 0 : index
    %c0_110 = arith.constant 0 : index
    %408 = vector.load %arg6[%c1_108, %c0_109, %c0_110] : memref<6x56x224xbf16, #tpu.memory_space<vmem>>, vector<1x56x224xbf16>
    %409 = vector.shape_cast %408 : vector<1x56x224xbf16> to vector<56x224xbf16>
    %410 = arith.truncf %407 : vector<8x56xf32> to vector<8x56xbf16>
    %cst_111 = arith.constant dense<0.000000e+00> : vector<8x224xf32>
    %411 = tpu.matmul %410, %409, %cst_111 {dimension_numbers = #tpu.dot_dimension_numbers<[1], [0], [0], [1], [0, 0, 1, 1], [], []>} : vector<8x56xbf16>, vector<56x224xbf16>, vector<8x224xf32> -> vector<8x224xf32>
    %c1_112 = arith.constant 1 : index
    %c0_113 = arith.constant 0 : index
    %412 = vector.load %arg7[%c1_112, %c0_113] : memref<6x224xf32, #tpu.memory_space<vmem>>, vector<1x224xf32>
    %413 = vector.broadcast %412 : vector<1x224xf32> to vector<8x224xf32>
    %414 = arith.addf %411, %413 : vector<8x224xf32>
    %cst_114 = arith.constant 5.000000e-01 : f32
    %415 = vector.broadcast %cst_114 : f32 to vector<8x224xf32>
    %416 = arith.mulf %415, %414 : vector<8x224xf32>
    %cst_115 = arith.constant 0.707106769 : f32
    %417 = vector.broadcast %cst_115 : f32 to vector<8x224xf32>
    %418 = arith.mulf %414, %417 : vector<8x224xf32>
    %cst_116 = arith.constant 0.000000e+00 : f32
    %419 = vector.broadcast %cst_116 : f32 to vector<8x224xf32>
    %420 = arith.cmpf oge, %418, %419 : vector<8x224xf32>
    %cst_117 = arith.constant 1.000000e+00 : f32
    %cst_118 = arith.constant -1.000000e+00 : f32
    %421 = vector.broadcast %cst_117 : f32 to vector<8x224xf32>
    %422 = vector.broadcast %cst_118 : f32 to vector<8x224xf32>
    %423 = arith.select %420, %421, %422 : vector<8x224xi1>, vector<8x224xf32>
    %424 = math.absf %418 : vector<8x224xf32>
    %cst_119 = arith.constant 0.327591091 : f32
    %425 = vector.broadcast %cst_119 : f32 to vector<8x224xf32>
    %426 = arith.mulf %425, %424 : vector<8x224xf32>
    %cst_120 = arith.constant 1.000000e+00 : f32
    %427 = vector.broadcast %cst_120 : f32 to vector<8x224xf32>
    %428 = arith.addf %427, %426 : vector<8x224xf32>
    %cst_121 = arith.constant 1.000000e+00 : f32
    %429 = vector.broadcast %cst_121 : f32 to vector<8x224xf32>
    %430 = arith.divf %429, %428 : vector<8x224xf32>
    %cst_122 = arith.constant 1.06140542 : f32
    %431 = vector.broadcast %cst_122 : f32 to vector<8x224xf32>
    %432 = arith.mulf %431, %430 : vector<8x224xf32>
    %cst_123 = arith.constant -1.45315206 : f32
    %433 = vector.broadcast %cst_123 : f32 to vector<8x224xf32>
    %434 = arith.addf %432, %433 : vector<8x224xf32>
    %435 = arith.mulf %434, %430 : vector<8x224xf32>
    %cst_124 = arith.constant 1.42141378 : f32
    %436 = vector.broadcast %cst_124 : f32 to vector<8x224xf32>
    %437 = arith.addf %435, %436 : vector<8x224xf32>
    %438 = arith.mulf %437, %430 : vector<8x224xf32>
    %cst_125 = arith.constant -0.284496725 : f32
    %439 = vector.broadcast %cst_125 : f32 to vector<8x224xf32>
    %440 = arith.addf %438, %439 : vector<8x224xf32>
    %441 = arith.mulf %440, %430 : vector<8x224xf32>
    %cst_126 = arith.constant 0.254829586 : f32
    %442 = vector.broadcast %cst_126 : f32 to vector<8x224xf32>
    %443 = arith.addf %441, %442 : vector<8x224xf32>
    %444 = arith.mulf %443, %430 : vector<8x224xf32>
    %cst_127 = arith.constant 0.000000e+00 : f32
    %445 = vector.broadcast %cst_127 : f32 to vector<8x224xf32>
    %446 = arith.subf %445, %424 : vector<8x224xf32>
    %447 = arith.mulf %446, %424 : vector<8x224xf32>
    %448 = math.exp %447 : vector<8x224xf32>
    %449 = arith.mulf %444, %448 : vector<8x224xf32>
    %cst_128 = arith.constant 1.000000e+00 : f32
    %450 = vector.broadcast %cst_128 : f32 to vector<8x224xf32>
    %451 = arith.subf %450, %449 : vector<8x224xf32>
    %452 = arith.mulf %423, %451 : vector<8x224xf32>
    %cst_129 = arith.constant 1.000000e+00 : f32
    %453 = vector.broadcast %cst_129 : f32 to vector<8x224xf32>
    %454 = arith.addf %453, %452 : vector<8x224xf32>
    %455 = arith.mulf %416, %454 : vector<8x224xf32>
    %c1_130 = arith.constant 1 : index
    %c0_131 = arith.constant 0 : index
    %c0_132 = arith.constant 0 : index
    %456 = vector.load %arg8[%c1_130, %c0_131, %c0_132] : memref<6x224x56xbf16, #tpu.memory_space<vmem>>, vector<1x224x56xbf16>
    %457 = vector.shape_cast %456 : vector<1x224x56xbf16> to vector<224x56xbf16>
    %458 = arith.truncf %455 : vector<8x224xf32> to vector<8x224xbf16>
    %cst_133 = arith.constant dense<0.000000e+00> : vector<8x56xf32>
    %459 = tpu.matmul %458, %457, %cst_133 {dimension_numbers = #tpu.dot_dimension_numbers<[1], [0], [0], [1], [0, 0, 1, 1], [], []>} : vector<8x224xbf16>, vector<224x56xbf16>, vector<8x56xf32> -> vector<8x56xf32>
    %460 = vector.broadcast %253 : vector<1x56xf32> to vector<8x56xf32>
    %461 = arith.addf %459, %460 : vector<8x56xf32>
    %462 = arith.addf %385, %461 : vector<8x56xf32>
    %c2 = arith.constant 2 : index
    %c0_134 = arith.constant 0 : index
    %c0_135 = arith.constant 0 : index
    %463 = vector.load %arg9[%c2, %c0_134, %c0_135] : memref<6x6x56xf32, #tpu.memory_space<vmem>>, vector<1x6x56xf32>
    %464 = vector.shape_cast %463 : vector<1x6x56xf32> to vector<6x56xf32>
    %465 = vector.extract_strided_slice %464 {offsets = [0, 0], sizes = [1, 56], strides = [1, 1]} : vector<6x56xf32> to vector<1x56xf32>
    %466 = vector.extract_strided_slice %464 {offsets = [1, 0], sizes = [1, 56], strides = [1, 1]} : vector<6x56xf32> to vector<1x56xf32>
    %467 = vector.extract_strided_slice %464 {offsets = [2, 0], sizes = [1, 56], strides = [1, 1]} : vector<6x56xf32> to vector<1x56xf32>
    %468 = vector.extract_strided_slice %464 {offsets = [3, 0], sizes = [1, 56], strides = [1, 1]} : vector<6x56xf32> to vector<1x56xf32>
    %469 = vector.extract_strided_slice %464 {offsets = [4, 0], sizes = [1, 56], strides = [1, 1]} : vector<6x56xf32> to vector<1x56xf32>
    %470 = vector.extract_strided_slice %464 {offsets = [5, 0], sizes = [1, 56], strides = [1, 1]} : vector<6x56xf32> to vector<1x56xf32>
    %cst_136 = arith.constant dense<0.000000e+00> : vector<8xf32>
    %471 = vector.multi_reduction <add>, %462, %cst_136 [1] : vector<8x56xf32> to vector<8xf32>
    %472 = vector.shape_cast %471 : vector<8xf32> to vector<8x1xf32>
    %cst_137 = arith.constant 5.600000e+01 : f32
    %473 = vector.broadcast %cst_137 : f32 to vector<8x1xf32>
    %474 = arith.divf %472, %473 : vector<8x1xf32>
    %475 = vector.broadcast %474 : vector<8x1xf32> to vector<8x56xf32>
    %476 = arith.subf %462, %475 : vector<8x56xf32>
    %477 = arith.mulf %476, %476 : vector<8x56xf32>
    %cst_138 = arith.constant dense<0.000000e+00> : vector<8xf32>
    %478 = vector.multi_reduction <add>, %477, %cst_138 [1] : vector<8x56xf32> to vector<8xf32>
    %479 = vector.shape_cast %478 : vector<8xf32> to vector<8x1xf32>
    %cst_139 = arith.constant 5.600000e+01 : f32
    %480 = vector.broadcast %cst_139 : f32 to vector<8x1xf32>
    %481 = arith.divf %479, %480 : vector<8x1xf32>
    %482 = vector.broadcast %474 : vector<8x1xf32> to vector<8x56xf32>
    %483 = arith.subf %462, %482 : vector<8x56xf32>
    %cst_140 = arith.constant 9.99999974E-6 : f32
    %484 = vector.broadcast %cst_140 : f32 to vector<8x1xf32>
    %485 = arith.addf %481, %484 : vector<8x1xf32>
    %486 = math.rsqrt %485 : vector<8x1xf32>
    %487 = vector.broadcast %486 : vector<8x1xf32> to vector<8x56xf32>
    %488 = arith.mulf %483, %487 : vector<8x56xf32>
    %489 = vector.broadcast %465 : vector<1x56xf32> to vector<8x56xf32>
    %490 = arith.mulf %488, %489 : vector<8x56xf32>
    %491 = vector.broadcast %466 : vector<1x56xf32> to vector<8x56xf32>
    %492 = arith.addf %490, %491 : vector<8x56xf32>
    %c2_141 = arith.constant 2 : index
    %c0_142 = arith.constant 0 : index
    %c0_143 = arith.constant 0 : index
    %493 = vector.load %arg3[%c2_141, %c0_142, %c0_143] : memref<6x168x56xbf16, #tpu.memory_space<vmem>>, vector<1x168x56xbf16>
    %494 = vector.shape_cast %493 : vector<1x168x56xbf16> to vector<168x56xbf16>
    %495 = arith.truncf %492 : vector<8x56xf32> to vector<8x56xbf16>
    %cst_144 = arith.constant dense<0.000000e+00> : vector<8x168xf32>
    %496 = tpu.matmul %495, %494, %cst_144 {dimension_numbers = #tpu.dot_dimension_numbers<[1], [1], [0], [0], [0, 0, 1, 0], [], []>} : vector<8x56xbf16>, vector<168x56xbf16>, vector<8x168xf32> -> vector<8x168xf32>
    %c2_145 = arith.constant 2 : index
    %c0_146 = arith.constant 0 : index
    %497 = vector.load %arg4[%c2_145, %c0_146] : memref<6x168xf32, #tpu.memory_space<vmem>>, vector<1x168xf32>
    %498 = vector.broadcast %497 : vector<1x168xf32> to vector<8x168xf32>
    %499 = arith.addf %496, %498 : vector<8x168xf32>
    %500 = vector.extract_strided_slice %499 {offsets = [0, 0], sizes = [8, 56], strides = [1, 1]} : vector<8x168xf32> to vector<8x56xf32>
    %501 = vector.extract_strided_slice %499 {offsets = [0, 56], sizes = [8, 56], strides = [1, 1]} : vector<8x168xf32> to vector<8x56xf32>
    %502 = vector.extract_strided_slice %499 {offsets = [0, 112], sizes = [8, 56], strides = [1, 1]} : vector<8x168xf32> to vector<8x56xf32>
    %503 = arith.truncf %502 : vector<8x56xf32> to vector<8x56xbf16>
    %504 = vector.extract_strided_slice %500 {offsets = [0, 0], sizes = [8, 7], strides = [1, 1]} : vector<8x56xf32> to vector<8x7xf32>
    %505 = arith.truncf %504 : vector<8x7xf32> to vector<8x7xbf16>
    %506 = vector.extract_strided_slice %501 {offsets = [0, 0], sizes = [8, 7], strides = [1, 1]} : vector<8x56xf32> to vector<8x7xf32>
    %507 = arith.truncf %506 : vector<8x7xf32> to vector<8x7xbf16>
    %cst_147 = arith.constant dense<0.000000e+00> : vector<8x8xf32>
    %508 = tpu.matmul %505, %507, %cst_147 {dimension_numbers = #tpu.dot_dimension_numbers<[1], [1], [0], [0], [0, 0, 1, 0], [], []>} : vector<8x7xbf16>, vector<8x7xbf16>, vector<8x8xf32> -> vector<8x8xf32>
    %509 = vector.extract_strided_slice %500 {offsets = [0, 7], sizes = [8, 7], strides = [1, 1]} : vector<8x56xf32> to vector<8x7xf32>
    %510 = arith.truncf %509 : vector<8x7xf32> to vector<8x7xbf16>
    %511 = vector.extract_strided_slice %501 {offsets = [0, 7], sizes = [8, 7], strides = [1, 1]} : vector<8x56xf32> to vector<8x7xf32>
    %512 = arith.truncf %511 : vector<8x7xf32> to vector<8x7xbf16>
    %cst_148 = arith.constant dense<0.000000e+00> : vector<8x8xf32>
    %513 = tpu.matmul %510, %512, %cst_148 {dimension_numbers = #tpu.dot_dimension_numbers<[1], [1], [0], [0], [0, 0, 1, 0], [], []>} : vector<8x7xbf16>, vector<8x7xbf16>, vector<8x8xf32> -> vector<8x8xf32>
    %514 = vector.extract_strided_slice %500 {offsets = [0, 14], sizes = [8, 7], strides = [1, 1]} : vector<8x56xf32> to vector<8x7xf32>
    %515 = arith.truncf %514 : vector<8x7xf32> to vector<8x7xbf16>
    %516 = vector.extract_strided_slice %501 {offsets = [0, 14], sizes = [8, 7], strides = [1, 1]} : vector<8x56xf32> to vector<8x7xf32>
    %517 = arith.truncf %516 : vector<8x7xf32> to vector<8x7xbf16>
    %cst_149 = arith.constant dense<0.000000e+00> : vector<8x8xf32>
    %518 = tpu.matmul %515, %517, %cst_149 {dimension_numbers = #tpu.dot_dimension_numbers<[1], [1], [0], [0], [0, 0, 1, 0], [], []>} : vector<8x7xbf16>, vector<8x7xbf16>, vector<8x8xf32> -> vector<8x8xf32>
    %519 = vector.extract_strided_slice %500 {offsets = [0, 21], sizes = [8, 7], strides = [1, 1]} : vector<8x56xf32> to vector<8x7xf32>
    %520 = arith.truncf %519 : vector<8x7xf32> to vector<8x7xbf16>
    %521 = vector.extract_strided_slice %501 {offsets = [0, 21], sizes = [8, 7], strides = [1, 1]} : vector<8x56xf32> to vector<8x7xf32>
    %522 = arith.truncf %521 : vector<8x7xf32> to vector<8x7xbf16>
    %cst_150 = arith.constant dense<0.000000e+00> : vector<8x8xf32>
    %523 = tpu.matmul %520, %522, %cst_150 {dimension_numbers = #tpu.dot_dimension_numbers<[1], [1], [0], [0], [0, 0, 1, 0], [], []>} : vector<8x7xbf16>, vector<8x7xbf16>, vector<8x8xf32> -> vector<8x8xf32>
    %524 = vector.extract_strided_slice %500 {offsets = [0, 28], sizes = [8, 7], strides = [1, 1]} : vector<8x56xf32> to vector<8x7xf32>
    %525 = arith.truncf %524 : vector<8x7xf32> to vector<8x7xbf16>
    %526 = vector.extract_strided_slice %501 {offsets = [0, 28], sizes = [8, 7], strides = [1, 1]} : vector<8x56xf32> to vector<8x7xf32>
    %527 = arith.truncf %526 : vector<8x7xf32> to vector<8x7xbf16>
    %cst_151 = arith.constant dense<0.000000e+00> : vector<8x8xf32>
    %528 = tpu.matmul %525, %527, %cst_151 {dimension_numbers = #tpu.dot_dimension_numbers<[1], [1], [0], [0], [0, 0, 1, 0], [], []>} : vector<8x7xbf16>, vector<8x7xbf16>, vector<8x8xf32> -> vector<8x8xf32>
    %529 = vector.extract_strided_slice %500 {offsets = [0, 35], sizes = [8, 7], strides = [1, 1]} : vector<8x56xf32> to vector<8x7xf32>
    %530 = arith.truncf %529 : vector<8x7xf32> to vector<8x7xbf16>
    %531 = vector.extract_strided_slice %501 {offsets = [0, 35], sizes = [8, 7], strides = [1, 1]} : vector<8x56xf32> to vector<8x7xf32>
    %532 = arith.truncf %531 : vector<8x7xf32> to vector<8x7xbf16>
    %cst_152 = arith.constant dense<0.000000e+00> : vector<8x8xf32>
    %533 = tpu.matmul %530, %532, %cst_152 {dimension_numbers = #tpu.dot_dimension_numbers<[1], [1], [0], [0], [0, 0, 1, 0], [], []>} : vector<8x7xbf16>, vector<8x7xbf16>, vector<8x8xf32> -> vector<8x8xf32>
    %534 = vector.extract_strided_slice %500 {offsets = [0, 42], sizes = [8, 7], strides = [1, 1]} : vector<8x56xf32> to vector<8x7xf32>
    %535 = arith.truncf %534 : vector<8x7xf32> to vector<8x7xbf16>
    %536 = vector.extract_strided_slice %501 {offsets = [0, 42], sizes = [8, 7], strides = [1, 1]} : vector<8x56xf32> to vector<8x7xf32>
    %537 = arith.truncf %536 : vector<8x7xf32> to vector<8x7xbf16>
    %cst_153 = arith.constant dense<0.000000e+00> : vector<8x8xf32>
    %538 = tpu.matmul %535, %537, %cst_153 {dimension_numbers = #tpu.dot_dimension_numbers<[1], [1], [0], [0], [0, 0, 1, 0], [], []>} : vector<8x7xbf16>, vector<8x7xbf16>, vector<8x8xf32> -> vector<8x8xf32>
    %539 = vector.extract_strided_slice %500 {offsets = [0, 49], sizes = [8, 7], strides = [1, 1]} : vector<8x56xf32> to vector<8x7xf32>
    %540 = arith.truncf %539 : vector<8x7xf32> to vector<8x7xbf16>
    %541 = vector.extract_strided_slice %501 {offsets = [0, 49], sizes = [8, 7], strides = [1, 1]} : vector<8x56xf32> to vector<8x7xf32>
    %542 = arith.truncf %541 : vector<8x7xf32> to vector<8x7xbf16>
    %cst_154 = arith.constant dense<0.000000e+00> : vector<8x8xf32>
    %543 = tpu.matmul %540, %542, %cst_154 {dimension_numbers = #tpu.dot_dimension_numbers<[1], [1], [0], [0], [0, 0, 1, 0], [], []>} : vector<8x7xbf16>, vector<8x7xbf16>, vector<8x8xf32> -> vector<8x8xf32>
    %544 = tpu.concatenate %508, %513, %518, %523, %528, %533, %538, %543 in 0 : vector<8x8xf32>, vector<8x8xf32>, vector<8x8xf32>, vector<8x8xf32>, vector<8x8xf32>, vector<8x8xf32>, vector<8x8xf32>, vector<8x8xf32> -> vector<64x8xf32>
    %cst_155 = arith.constant dense<0xFF800000> : vector<64xf32>
    %545 = vector.multi_reduction <maximumf>, %544, %cst_155 [1] : vector<64x8xf32> to vector<64xf32>
    %546 = vector.shape_cast %545 : vector<64xf32> to vector<64x1xf32>
    %547 = vector.broadcast %546 : vector<64x1xf32> to vector<64x8xf32>
    %548 = arith.subf %544, %547 : vector<64x8xf32>
    %549 = math.exp %548 : vector<64x8xf32>
    %cst_156 = arith.constant dense<0.000000e+00> : vector<64xf32>
    %550 = vector.multi_reduction <add>, %549, %cst_156 [1] : vector<64x8xf32> to vector<64xf32>
    %551 = vector.shape_cast %550 : vector<64xf32> to vector<64x1xf32>
    %552 = tpu.reciprocal %551 {approx = true} : vector<64x1xf32> -> vector<64x1xf32>
    %553 = vector.broadcast %552 : vector<64x1xf32> to vector<64x8xf32>
    %554 = arith.mulf %549, %553 : vector<64x8xf32>
    %555 = arith.truncf %554 : vector<64x8xf32> to vector<64x8xbf16>
    %cst_157 = arith.constant dense<0.000000e+00> : vector<64x56xf32>
    %556 = tpu.matmul %555, %503, %cst_157 {dimension_numbers = #tpu.dot_dimension_numbers<[1], [0], [0], [1], [0, 0, 1, 1], [], []>} : vector<64x8xbf16>, vector<8x56xbf16>, vector<64x56xf32> -> vector<64x56xf32>
    %557 = vector.extract_strided_slice %556 {offsets = [0, 0], sizes = [8, 56], strides = [1, 1]} : vector<64x56xf32> to vector<8x56xf32>
    %558 = vector.extract_strided_slice %28 {offsets = [0, 0], sizes = [1, 56], strides = [1, 1]} : vector<8x56xf32> to vector<1x56xf32>
    %559 = vector.broadcast %558 : vector<1x56xf32> to vector<8x56xf32>
    %560 = arith.mulf %557, %559 : vector<8x56xf32>
    %561 = vector.extract_strided_slice %556 {offsets = [8, 0], sizes = [8, 56], strides = [1, 1]} : vector<64x56xf32> to vector<8x56xf32>
    %562 = vector.extract_strided_slice %28 {offsets = [1, 0], sizes = [1, 56], strides = [1, 1]} : vector<8x56xf32> to vector<1x56xf32>
    %563 = vector.broadcast %562 : vector<1x56xf32> to vector<8x56xf32>
    %564 = arith.mulf %561, %563 : vector<8x56xf32>
    %565 = arith.addf %560, %564 : vector<8x56xf32>
    %566 = vector.extract_strided_slice %556 {offsets = [16, 0], sizes = [8, 56], strides = [1, 1]} : vector<64x56xf32> to vector<8x56xf32>
    %567 = vector.extract_strided_slice %28 {offsets = [2, 0], sizes = [1, 56], strides = [1, 1]} : vector<8x56xf32> to vector<1x56xf32>
    %568 = vector.broadcast %567 : vector<1x56xf32> to vector<8x56xf32>
    %569 = arith.mulf %566, %568 : vector<8x56xf32>
    %570 = arith.addf %565, %569 : vector<8x56xf32>
    %571 = vector.extract_strided_slice %556 {offsets = [24, 0], sizes = [8, 56], strides = [1, 1]} : vector<64x56xf32> to vector<8x56xf32>
    %572 = vector.extract_strided_slice %28 {offsets = [3, 0], sizes = [1, 56], strides = [1, 1]} : vector<8x56xf32> to vector<1x56xf32>
    %573 = vector.broadcast %572 : vector<1x56xf32> to vector<8x56xf32>
    %574 = arith.mulf %571, %573 : vector<8x56xf32>
    %575 = arith.addf %570, %574 : vector<8x56xf32>
    %576 = vector.extract_strided_slice %556 {offsets = [32, 0], sizes = [8, 56], strides = [1, 1]} : vector<64x56xf32> to vector<8x56xf32>
    %577 = vector.extract_strided_slice %28 {offsets = [4, 0], sizes = [1, 56], strides = [1, 1]} : vector<8x56xf32> to vector<1x56xf32>
    %578 = vector.broadcast %577 : vector<1x56xf32> to vector<8x56xf32>
    %579 = arith.mulf %576, %578 : vector<8x56xf32>
    %580 = arith.addf %575, %579 : vector<8x56xf32>
    %581 = vector.extract_strided_slice %556 {offsets = [40, 0], sizes = [8, 56], strides = [1, 1]} : vector<64x56xf32> to vector<8x56xf32>
    %582 = vector.extract_strided_slice %28 {offsets = [5, 0], sizes = [1, 56], strides = [1, 1]} : vector<8x56xf32> to vector<1x56xf32>
    %583 = vector.broadcast %582 : vector<1x56xf32> to vector<8x56xf32>
    %584 = arith.mulf %581, %583 : vector<8x56xf32>
    %585 = arith.addf %580, %584 : vector<8x56xf32>
    %586 = vector.extract_strided_slice %556 {offsets = [48, 0], sizes = [8, 56], strides = [1, 1]} : vector<64x56xf32> to vector<8x56xf32>
    %587 = vector.extract_strided_slice %28 {offsets = [6, 0], sizes = [1, 56], strides = [1, 1]} : vector<8x56xf32> to vector<1x56xf32>
    %588 = vector.broadcast %587 : vector<1x56xf32> to vector<8x56xf32>
    %589 = arith.mulf %586, %588 : vector<8x56xf32>
    %590 = arith.addf %585, %589 : vector<8x56xf32>
    %591 = vector.extract_strided_slice %556 {offsets = [56, 0], sizes = [8, 56], strides = [1, 1]} : vector<64x56xf32> to vector<8x56xf32>
    %592 = vector.extract_strided_slice %28 {offsets = [7, 0], sizes = [1, 56], strides = [1, 1]} : vector<8x56xf32> to vector<1x56xf32>
    %593 = vector.broadcast %592 : vector<1x56xf32> to vector<8x56xf32>
    %594 = arith.mulf %591, %593 : vector<8x56xf32>
    %595 = arith.addf %590, %594 : vector<8x56xf32>
    %c2_158 = arith.constant 2 : index
    %c0_159 = arith.constant 0 : index
    %c0_160 = arith.constant 0 : index
    %596 = vector.load %arg5[%c2_158, %c0_159, %c0_160] : memref<6x56x56xbf16, #tpu.memory_space<vmem>>, vector<1x56x56xbf16>
    %597 = vector.shape_cast %596 : vector<1x56x56xbf16> to vector<56x56xbf16>
    %598 = arith.truncf %595 : vector<8x56xf32> to vector<8x56xbf16>
    %cst_161 = arith.constant dense<0.000000e+00> : vector<8x56xf32>
    %599 = tpu.matmul %598, %597, %cst_161 {dimension_numbers = #tpu.dot_dimension_numbers<[1], [0], [0], [1], [0, 0, 1, 1], [], []>} : vector<8x56xbf16>, vector<56x56xbf16>, vector<8x56xf32> -> vector<8x56xf32>
    %600 = vector.broadcast %469 : vector<1x56xf32> to vector<8x56xf32>
    %601 = arith.addf %599, %600 : vector<8x56xf32>
    %602 = arith.addf %462, %601 : vector<8x56xf32>
    %cst_162 = arith.constant dense<0.000000e+00> : vector<8xf32>
    %603 = vector.multi_reduction <add>, %602, %cst_162 [1] : vector<8x56xf32> to vector<8xf32>
    %604 = vector.shape_cast %603 : vector<8xf32> to vector<8x1xf32>
    %cst_163 = arith.constant 5.600000e+01 : f32
    %605 = vector.broadcast %cst_163 : f32 to vector<8x1xf32>
    %606 = arith.divf %604, %605 : vector<8x1xf32>
    %607 = vector.broadcast %606 : vector<8x1xf32> to vector<8x56xf32>
    %608 = arith.subf %602, %607 : vector<8x56xf32>
    %609 = arith.mulf %608, %608 : vector<8x56xf32>
    %cst_164 = arith.constant dense<0.000000e+00> : vector<8xf32>
    %610 = vector.multi_reduction <add>, %609, %cst_164 [1] : vector<8x56xf32> to vector<8xf32>
    %611 = vector.shape_cast %610 : vector<8xf32> to vector<8x1xf32>
    %cst_165 = arith.constant 5.600000e+01 : f32
    %612 = vector.broadcast %cst_165 : f32 to vector<8x1xf32>
    %613 = arith.divf %611, %612 : vector<8x1xf32>
    %614 = vector.broadcast %606 : vector<8x1xf32> to vector<8x56xf32>
    %615 = arith.subf %602, %614 : vector<8x56xf32>
    %cst_166 = arith.constant 9.99999974E-6 : f32
    %616 = vector.broadcast %cst_166 : f32 to vector<8x1xf32>
    %617 = arith.addf %613, %616 : vector<8x1xf32>
    %618 = math.rsqrt %617 : vector<8x1xf32>
    %619 = vector.broadcast %618 : vector<8x1xf32> to vector<8x56xf32>
    %620 = arith.mulf %615, %619 : vector<8x56xf32>
    %621 = vector.broadcast %467 : vector<1x56xf32> to vector<8x56xf32>
    %622 = arith.mulf %620, %621 : vector<8x56xf32>
    %623 = vector.broadcast %468 : vector<1x56xf32> to vector<8x56xf32>
    %624 = arith.addf %622, %623 : vector<8x56xf32>
    %c2_167 = arith.constant 2 : index
    %c0_168 = arith.constant 0 : index
    %c0_169 = arith.constant 0 : index
    %625 = vector.load %arg6[%c2_167, %c0_168, %c0_169] : memref<6x56x224xbf16, #tpu.memory_space<vmem>>, vector<1x56x224xbf16>
    %626 = vector.shape_cast %625 : vector<1x56x224xbf16> to vector<56x224xbf16>
    %627 = arith.truncf %624 : vector<8x56xf32> to vector<8x56xbf16>
    %cst_170 = arith.constant dense<0.000000e+00> : vector<8x224xf32>
    %628 = tpu.matmul %627, %626, %cst_170 {dimension_numbers = #tpu.dot_dimension_numbers<[1], [0], [0], [1], [0, 0, 1, 1], [], []>} : vector<8x56xbf16>, vector<56x224xbf16>, vector<8x224xf32> -> vector<8x224xf32>
    %c2_171 = arith.constant 2 : index
    %c0_172 = arith.constant 0 : index
    %629 = vector.load %arg7[%c2_171, %c0_172] : memref<6x224xf32, #tpu.memory_space<vmem>>, vector<1x224xf32>
    %630 = vector.broadcast %629 : vector<1x224xf32> to vector<8x224xf32>
    %631 = arith.addf %628, %630 : vector<8x224xf32>
    %cst_173 = arith.constant 5.000000e-01 : f32
    %632 = vector.broadcast %cst_173 : f32 to vector<8x224xf32>
    %633 = arith.mulf %632, %631 : vector<8x224xf32>
    %cst_174 = arith.constant 0.707106769 : f32
    %634 = vector.broadcast %cst_174 : f32 to vector<8x224xf32>
    %635 = arith.mulf %631, %634 : vector<8x224xf32>
    %cst_175 = arith.constant 0.000000e+00 : f32
    %636 = vector.broadcast %cst_175 : f32 to vector<8x224xf32>
    %637 = arith.cmpf oge, %635, %636 : vector<8x224xf32>
    %cst_176 = arith.constant 1.000000e+00 : f32
    %cst_177 = arith.constant -1.000000e+00 : f32
    %638 = vector.broadcast %cst_176 : f32 to vector<8x224xf32>
    %639 = vector.broadcast %cst_177 : f32 to vector<8x224xf32>
    %640 = arith.select %637, %638, %639 : vector<8x224xi1>, vector<8x224xf32>
    %641 = math.absf %635 : vector<8x224xf32>
    %cst_178 = arith.constant 0.327591091 : f32
    %642 = vector.broadcast %cst_178 : f32 to vector<8x224xf32>
    %643 = arith.mulf %642, %641 : vector<8x224xf32>
    %cst_179 = arith.constant 1.000000e+00 : f32
    %644 = vector.broadcast %cst_179 : f32 to vector<8x224xf32>
    %645 = arith.addf %644, %643 : vector<8x224xf32>
    %cst_180 = arith.constant 1.000000e+00 : f32
    %646 = vector.broadcast %cst_180 : f32 to vector<8x224xf32>
    %647 = arith.divf %646, %645 : vector<8x224xf32>
    %cst_181 = arith.constant 1.06140542 : f32
    %648 = vector.broadcast %cst_181 : f32 to vector<8x224xf32>
    %649 = arith.mulf %648, %647 : vector<8x224xf32>
    %cst_182 = arith.constant -1.45315206 : f32
    %650 = vector.broadcast %cst_182 : f32 to vector<8x224xf32>
    %651 = arith.addf %649, %650 : vector<8x224xf32>
    %652 = arith.mulf %651, %647 : vector<8x224xf32>
    %cst_183 = arith.constant 1.42141378 : f32
    %653 = vector.broadcast %cst_183 : f32 to vector<8x224xf32>
    %654 = arith.addf %652, %653 : vector<8x224xf32>
    %655 = arith.mulf %654, %647 : vector<8x224xf32>
    %cst_184 = arith.constant -0.284496725 : f32
    %656 = vector.broadcast %cst_184 : f32 to vector<8x224xf32>
    %657 = arith.addf %655, %656 : vector<8x224xf32>
    %658 = arith.mulf %657, %647 : vector<8x224xf32>
    %cst_185 = arith.constant 0.254829586 : f32
    %659 = vector.broadcast %cst_185 : f32 to vector<8x224xf32>
    %660 = arith.addf %658, %659 : vector<8x224xf32>
    %661 = arith.mulf %660, %647 : vector<8x224xf32>
    %cst_186 = arith.constant 0.000000e+00 : f32
    %662 = vector.broadcast %cst_186 : f32 to vector<8x224xf32>
    %663 = arith.subf %662, %641 : vector<8x224xf32>
    %664 = arith.mulf %663, %641 : vector<8x224xf32>
    %665 = math.exp %664 : vector<8x224xf32>
    %666 = arith.mulf %661, %665 : vector<8x224xf32>
    %cst_187 = arith.constant 1.000000e+00 : f32
    %667 = vector.broadcast %cst_187 : f32 to vector<8x224xf32>
    %668 = arith.subf %667, %666 : vector<8x224xf32>
    %669 = arith.mulf %640, %668 : vector<8x224xf32>
    %cst_188 = arith.constant 1.000000e+00 : f32
    %670 = vector.broadcast %cst_188 : f32 to vector<8x224xf32>
    %671 = arith.addf %670, %669 : vector<8x224xf32>
    %672 = arith.mulf %633, %671 : vector<8x224xf32>
    %c2_189 = arith.constant 2 : index
    %c0_190 = arith.constant 0 : index
    %c0_191 = arith.constant 0 : index
    %673 = vector.load %arg8[%c2_189, %c0_190, %c0_191] : memref<6x224x56xbf16, #tpu.memory_space<vmem>>, vector<1x224x56xbf16>
    %674 = vector.shape_cast %673 : vector<1x224x56xbf16> to vector<224x56xbf16>
    %675 = arith.truncf %672 : vector<8x224xf32> to vector<8x224xbf16>
    %cst_192 = arith.constant dense<0.000000e+00> : vector<8x56xf32>
    %676 = tpu.matmul %675, %674, %cst_192 {dimension_numbers = #tpu.dot_dimension_numbers<[1], [0], [0], [1], [0, 0, 1, 1], [], []>} : vector<8x224xbf16>, vector<224x56xbf16>, vector<8x56xf32> -> vector<8x56xf32>
    %677 = vector.broadcast %470 : vector<1x56xf32> to vector<8x56xf32>
    %678 = arith.addf %676, %677 : vector<8x56xf32>
    %679 = arith.addf %602, %678 : vector<8x56xf32>
    %c3 = arith.constant 3 : index
    %c0_193 = arith.constant 0 : index
    %c0_194 = arith.constant 0 : index
    %680 = vector.load %arg9[%c3, %c0_193, %c0_194] : memref<6x6x56xf32, #tpu.memory_space<vmem>>, vector<1x6x56xf32>
    %681 = vector.shape_cast %680 : vector<1x6x56xf32> to vector<6x56xf32>
    %682 = vector.extract_strided_slice %681 {offsets = [0, 0], sizes = [1, 56], strides = [1, 1]} : vector<6x56xf32> to vector<1x56xf32>
    %683 = vector.extract_strided_slice %681 {offsets = [1, 0], sizes = [1, 56], strides = [1, 1]} : vector<6x56xf32> to vector<1x56xf32>
    %684 = vector.extract_strided_slice %681 {offsets = [2, 0], sizes = [1, 56], strides = [1, 1]} : vector<6x56xf32> to vector<1x56xf32>
    %685 = vector.extract_strided_slice %681 {offsets = [3, 0], sizes = [1, 56], strides = [1, 1]} : vector<6x56xf32> to vector<1x56xf32>
    %686 = vector.extract_strided_slice %681 {offsets = [4, 0], sizes = [1, 56], strides = [1, 1]} : vector<6x56xf32> to vector<1x56xf32>
    %687 = vector.extract_strided_slice %681 {offsets = [5, 0], sizes = [1, 56], strides = [1, 1]} : vector<6x56xf32> to vector<1x56xf32>
    %cst_195 = arith.constant dense<0.000000e+00> : vector<8xf32>
    %688 = vector.multi_reduction <add>, %679, %cst_195 [1] : vector<8x56xf32> to vector<8xf32>
    %689 = vector.shape_cast %688 : vector<8xf32> to vector<8x1xf32>
    %cst_196 = arith.constant 5.600000e+01 : f32
    %690 = vector.broadcast %cst_196 : f32 to vector<8x1xf32>
    %691 = arith.divf %689, %690 : vector<8x1xf32>
    %692 = vector.broadcast %691 : vector<8x1xf32> to vector<8x56xf32>
    %693 = arith.subf %679, %692 : vector<8x56xf32>
    %694 = arith.mulf %693, %693 : vector<8x56xf32>
    %cst_197 = arith.constant dense<0.000000e+00> : vector<8xf32>
    %695 = vector.multi_reduction <add>, %694, %cst_197 [1] : vector<8x56xf32> to vector<8xf32>
    %696 = vector.shape_cast %695 : vector<8xf32> to vector<8x1xf32>
    %cst_198 = arith.constant 5.600000e+01 : f32
    %697 = vector.broadcast %cst_198 : f32 to vector<8x1xf32>
    %698 = arith.divf %696, %697 : vector<8x1xf32>
    %699 = vector.broadcast %691 : vector<8x1xf32> to vector<8x56xf32>
    %700 = arith.subf %679, %699 : vector<8x56xf32>
    %cst_199 = arith.constant 9.99999974E-6 : f32
    %701 = vector.broadcast %cst_199 : f32 to vector<8x1xf32>
    %702 = arith.addf %698, %701 : vector<8x1xf32>
    %703 = math.rsqrt %702 : vector<8x1xf32>
    %704 = vector.broadcast %703 : vector<8x1xf32> to vector<8x56xf32>
    %705 = arith.mulf %700, %704 : vector<8x56xf32>
    %706 = vector.broadcast %682 : vector<1x56xf32> to vector<8x56xf32>
    %707 = arith.mulf %705, %706 : vector<8x56xf32>
    %708 = vector.broadcast %683 : vector<1x56xf32> to vector<8x56xf32>
    %709 = arith.addf %707, %708 : vector<8x56xf32>
    %c3_200 = arith.constant 3 : index
    %c0_201 = arith.constant 0 : index
    %c0_202 = arith.constant 0 : index
    %710 = vector.load %arg3[%c3_200, %c0_201, %c0_202] : memref<6x168x56xbf16, #tpu.memory_space<vmem>>, vector<1x168x56xbf16>
    %711 = vector.shape_cast %710 : vector<1x168x56xbf16> to vector<168x56xbf16>
    %712 = arith.truncf %709 : vector<8x56xf32> to vector<8x56xbf16>
    %cst_203 = arith.constant dense<0.000000e+00> : vector<8x168xf32>
    %713 = tpu.matmul %712, %711, %cst_203 {dimension_numbers = #tpu.dot_dimension_numbers<[1], [1], [0], [0], [0, 0, 1, 0], [], []>} : vector<8x56xbf16>, vector<168x56xbf16>, vector<8x168xf32> -> vector<8x168xf32>
    %c3_204 = arith.constant 3 : index
    %c0_205 = arith.constant 0 : index
    %714 = vector.load %arg4[%c3_204, %c0_205] : memref<6x168xf32, #tpu.memory_space<vmem>>, vector<1x168xf32>
    %715 = vector.broadcast %714 : vector<1x168xf32> to vector<8x168xf32>
    %716 = arith.addf %713, %715 : vector<8x168xf32>
    %717 = vector.extract_strided_slice %716 {offsets = [0, 0], sizes = [8, 56], strides = [1, 1]} : vector<8x168xf32> to vector<8x56xf32>
    %718 = vector.extract_strided_slice %716 {offsets = [0, 56], sizes = [8, 56], strides = [1, 1]} : vector<8x168xf32> to vector<8x56xf32>
    %719 = vector.extract_strided_slice %716 {offsets = [0, 112], sizes = [8, 56], strides = [1, 1]} : vector<8x168xf32> to vector<8x56xf32>
    %720 = arith.truncf %719 : vector<8x56xf32> to vector<8x56xbf16>
    %721 = vector.extract_strided_slice %717 {offsets = [0, 0], sizes = [8, 7], strides = [1, 1]} : vector<8x56xf32> to vector<8x7xf32>
    %722 = arith.truncf %721 : vector<8x7xf32> to vector<8x7xbf16>
    %723 = vector.extract_strided_slice %718 {offsets = [0, 0], sizes = [8, 7], strides = [1, 1]} : vector<8x56xf32> to vector<8x7xf32>
    %724 = arith.truncf %723 : vector<8x7xf32> to vector<8x7xbf16>
    %cst_206 = arith.constant dense<0.000000e+00> : vector<8x8xf32>
    %725 = tpu.matmul %722, %724, %cst_206 {dimension_numbers = #tpu.dot_dimension_numbers<[1], [1], [0], [0], [0, 0, 1, 0], [], []>} : vector<8x7xbf16>, vector<8x7xbf16>, vector<8x8xf32> -> vector<8x8xf32>
    %726 = vector.extract_strided_slice %717 {offsets = [0, 7], sizes = [8, 7], strides = [1, 1]} : vector<8x56xf32> to vector<8x7xf32>
    %727 = arith.truncf %726 : vector<8x7xf32> to vector<8x7xbf16>
    %728 = vector.extract_strided_slice %718 {offsets = [0, 7], sizes = [8, 7], strides = [1, 1]} : vector<8x56xf32> to vector<8x7xf32>
    %729 = arith.truncf %728 : vector<8x7xf32> to vector<8x7xbf16>
    %cst_207 = arith.constant dense<0.000000e+00> : vector<8x8xf32>
    %730 = tpu.matmul %727, %729, %cst_207 {dimension_numbers = #tpu.dot_dimension_numbers<[1], [1], [0], [0], [0, 0, 1, 0], [], []>} : vector<8x7xbf16>, vector<8x7xbf16>, vector<8x8xf32> -> vector<8x8xf32>
    %731 = vector.extract_strided_slice %717 {offsets = [0, 14], sizes = [8, 7], strides = [1, 1]} : vector<8x56xf32> to vector<8x7xf32>
    %732 = arith.truncf %731 : vector<8x7xf32> to vector<8x7xbf16>
    %733 = vector.extract_strided_slice %718 {offsets = [0, 14], sizes = [8, 7], strides = [1, 1]} : vector<8x56xf32> to vector<8x7xf32>
    %734 = arith.truncf %733 : vector<8x7xf32> to vector<8x7xbf16>
    %cst_208 = arith.constant dense<0.000000e+00> : vector<8x8xf32>
    %735 = tpu.matmul %732, %734, %cst_208 {dimension_numbers = #tpu.dot_dimension_numbers<[1], [1], [0], [0], [0, 0, 1, 0], [], []>} : vector<8x7xbf16>, vector<8x7xbf16>, vector<8x8xf32> -> vector<8x8xf32>
    %736 = vector.extract_strided_slice %717 {offsets = [0, 21], sizes = [8, 7], strides = [1, 1]} : vector<8x56xf32> to vector<8x7xf32>
    %737 = arith.truncf %736 : vector<8x7xf32> to vector<8x7xbf16>
    %738 = vector.extract_strided_slice %718 {offsets = [0, 21], sizes = [8, 7], strides = [1, 1]} : vector<8x56xf32> to vector<8x7xf32>
    %739 = arith.truncf %738 : vector<8x7xf32> to vector<8x7xbf16>
    %cst_209 = arith.constant dense<0.000000e+00> : vector<8x8xf32>
    %740 = tpu.matmul %737, %739, %cst_209 {dimension_numbers = #tpu.dot_dimension_numbers<[1], [1], [0], [0], [0, 0, 1, 0], [], []>} : vector<8x7xbf16>, vector<8x7xbf16>, vector<8x8xf32> -> vector<8x8xf32>
    %741 = vector.extract_strided_slice %717 {offsets = [0, 28], sizes = [8, 7], strides = [1, 1]} : vector<8x56xf32> to vector<8x7xf32>
    %742 = arith.truncf %741 : vector<8x7xf32> to vector<8x7xbf16>
    %743 = vector.extract_strided_slice %718 {offsets = [0, 28], sizes = [8, 7], strides = [1, 1]} : vector<8x56xf32> to vector<8x7xf32>
    %744 = arith.truncf %743 : vector<8x7xf32> to vector<8x7xbf16>
    %cst_210 = arith.constant dense<0.000000e+00> : vector<8x8xf32>
    %745 = tpu.matmul %742, %744, %cst_210 {dimension_numbers = #tpu.dot_dimension_numbers<[1], [1], [0], [0], [0, 0, 1, 0], [], []>} : vector<8x7xbf16>, vector<8x7xbf16>, vector<8x8xf32> -> vector<8x8xf32>
    %746 = vector.extract_strided_slice %717 {offsets = [0, 35], sizes = [8, 7], strides = [1, 1]} : vector<8x56xf32> to vector<8x7xf32>
    %747 = arith.truncf %746 : vector<8x7xf32> to vector<8x7xbf16>
    %748 = vector.extract_strided_slice %718 {offsets = [0, 35], sizes = [8, 7], strides = [1, 1]} : vector<8x56xf32> to vector<8x7xf32>
    %749 = arith.truncf %748 : vector<8x7xf32> to vector<8x7xbf16>
    %cst_211 = arith.constant dense<0.000000e+00> : vector<8x8xf32>
    %750 = tpu.matmul %747, %749, %cst_211 {dimension_numbers = #tpu.dot_dimension_numbers<[1], [1], [0], [0], [0, 0, 1, 0], [], []>} : vector<8x7xbf16>, vector<8x7xbf16>, vector<8x8xf32> -> vector<8x8xf32>
    %751 = vector.extract_strided_slice %717 {offsets = [0, 42], sizes = [8, 7], strides = [1, 1]} : vector<8x56xf32> to vector<8x7xf32>
    %752 = arith.truncf %751 : vector<8x7xf32> to vector<8x7xbf16>
    %753 = vector.extract_strided_slice %718 {offsets = [0, 42], sizes = [8, 7], strides = [1, 1]} : vector<8x56xf32> to vector<8x7xf32>
    %754 = arith.truncf %753 : vector<8x7xf32> to vector<8x7xbf16>
    %cst_212 = arith.constant dense<0.000000e+00> : vector<8x8xf32>
    %755 = tpu.matmul %752, %754, %cst_212 {dimension_numbers = #tpu.dot_dimension_numbers<[1], [1], [0], [0], [0, 0, 1, 0], [], []>} : vector<8x7xbf16>, vector<8x7xbf16>, vector<8x8xf32> -> vector<8x8xf32>
    %756 = vector.extract_strided_slice %717 {offsets = [0, 49], sizes = [8, 7], strides = [1, 1]} : vector<8x56xf32> to vector<8x7xf32>
    %757 = arith.truncf %756 : vector<8x7xf32> to vector<8x7xbf16>
    %758 = vector.extract_strided_slice %718 {offsets = [0, 49], sizes = [8, 7], strides = [1, 1]} : vector<8x56xf32> to vector<8x7xf32>
    %759 = arith.truncf %758 : vector<8x7xf32> to vector<8x7xbf16>
    %cst_213 = arith.constant dense<0.000000e+00> : vector<8x8xf32>
    %760 = tpu.matmul %757, %759, %cst_213 {dimension_numbers = #tpu.dot_dimension_numbers<[1], [1], [0], [0], [0, 0, 1, 0], [], []>} : vector<8x7xbf16>, vector<8x7xbf16>, vector<8x8xf32> -> vector<8x8xf32>
    %761 = tpu.concatenate %725, %730, %735, %740, %745, %750, %755, %760 in 0 : vector<8x8xf32>, vector<8x8xf32>, vector<8x8xf32>, vector<8x8xf32>, vector<8x8xf32>, vector<8x8xf32>, vector<8x8xf32>, vector<8x8xf32> -> vector<64x8xf32>
    %cst_214 = arith.constant dense<0xFF800000> : vector<64xf32>
    %762 = vector.multi_reduction <maximumf>, %761, %cst_214 [1] : vector<64x8xf32> to vector<64xf32>
    %763 = vector.shape_cast %762 : vector<64xf32> to vector<64x1xf32>
    %764 = vector.broadcast %763 : vector<64x1xf32> to vector<64x8xf32>
    %765 = arith.subf %761, %764 : vector<64x8xf32>
    %766 = math.exp %765 : vector<64x8xf32>
    %cst_215 = arith.constant dense<0.000000e+00> : vector<64xf32>
    %767 = vector.multi_reduction <add>, %766, %cst_215 [1] : vector<64x8xf32> to vector<64xf32>
    %768 = vector.shape_cast %767 : vector<64xf32> to vector<64x1xf32>
    %769 = tpu.reciprocal %768 {approx = true} : vector<64x1xf32> -> vector<64x1xf32>
    %770 = vector.broadcast %769 : vector<64x1xf32> to vector<64x8xf32>
    %771 = arith.mulf %766, %770 : vector<64x8xf32>
    %772 = arith.truncf %771 : vector<64x8xf32> to vector<64x8xbf16>
    %cst_216 = arith.constant dense<0.000000e+00> : vector<64x56xf32>
    %773 = tpu.matmul %772, %720, %cst_216 {dimension_numbers = #tpu.dot_dimension_numbers<[1], [0], [0], [1], [0, 0, 1, 1], [], []>} : vector<64x8xbf16>, vector<8x56xbf16>, vector<64x56xf32> -> vector<64x56xf32>
    %774 = vector.extract_strided_slice %773 {offsets = [0, 0], sizes = [8, 56], strides = [1, 1]} : vector<64x56xf32> to vector<8x56xf32>
    %775 = vector.extract_strided_slice %28 {offsets = [0, 0], sizes = [1, 56], strides = [1, 1]} : vector<8x56xf32> to vector<1x56xf32>
    %776 = vector.broadcast %775 : vector<1x56xf32> to vector<8x56xf32>
    %777 = arith.mulf %774, %776 : vector<8x56xf32>
    %778 = vector.extract_strided_slice %773 {offsets = [8, 0], sizes = [8, 56], strides = [1, 1]} : vector<64x56xf32> to vector<8x56xf32>
    %779 = vector.extract_strided_slice %28 {offsets = [1, 0], sizes = [1, 56], strides = [1, 1]} : vector<8x56xf32> to vector<1x56xf32>
    %780 = vector.broadcast %779 : vector<1x56xf32> to vector<8x56xf32>
    %781 = arith.mulf %778, %780 : vector<8x56xf32>
    %782 = arith.addf %777, %781 : vector<8x56xf32>
    %783 = vector.extract_strided_slice %773 {offsets = [16, 0], sizes = [8, 56], strides = [1, 1]} : vector<64x56xf32> to vector<8x56xf32>
    %784 = vector.extract_strided_slice %28 {offsets = [2, 0], sizes = [1, 56], strides = [1, 1]} : vector<8x56xf32> to vector<1x56xf32>
    %785 = vector.broadcast %784 : vector<1x56xf32> to vector<8x56xf32>
    %786 = arith.mulf %783, %785 : vector<8x56xf32>
    %787 = arith.addf %782, %786 : vector<8x56xf32>
    %788 = vector.extract_strided_slice %773 {offsets = [24, 0], sizes = [8, 56], strides = [1, 1]} : vector<64x56xf32> to vector<8x56xf32>
    %789 = vector.extract_strided_slice %28 {offsets = [3, 0], sizes = [1, 56], strides = [1, 1]} : vector<8x56xf32> to vector<1x56xf32>
    %790 = vector.broadcast %789 : vector<1x56xf32> to vector<8x56xf32>
    %791 = arith.mulf %788, %790 : vector<8x56xf32>
    %792 = arith.addf %787, %791 : vector<8x56xf32>
    %793 = vector.extract_strided_slice %773 {offsets = [32, 0], sizes = [8, 56], strides = [1, 1]} : vector<64x56xf32> to vector<8x56xf32>
    %794 = vector.extract_strided_slice %28 {offsets = [4, 0], sizes = [1, 56], strides = [1, 1]} : vector<8x56xf32> to vector<1x56xf32>
    %795 = vector.broadcast %794 : vector<1x56xf32> to vector<8x56xf32>
    %796 = arith.mulf %793, %795 : vector<8x56xf32>
    %797 = arith.addf %792, %796 : vector<8x56xf32>
    %798 = vector.extract_strided_slice %773 {offsets = [40, 0], sizes = [8, 56], strides = [1, 1]} : vector<64x56xf32> to vector<8x56xf32>
    %799 = vector.extract_strided_slice %28 {offsets = [5, 0], sizes = [1, 56], strides = [1, 1]} : vector<8x56xf32> to vector<1x56xf32>
    %800 = vector.broadcast %799 : vector<1x56xf32> to vector<8x56xf32>
    %801 = arith.mulf %798, %800 : vector<8x56xf32>
    %802 = arith.addf %797, %801 : vector<8x56xf32>
    %803 = vector.extract_strided_slice %773 {offsets = [48, 0], sizes = [8, 56], strides = [1, 1]} : vector<64x56xf32> to vector<8x56xf32>
    %804 = vector.extract_strided_slice %28 {offsets = [6, 0], sizes = [1, 56], strides = [1, 1]} : vector<8x56xf32> to vector<1x56xf32>
    %805 = vector.broadcast %804 : vector<1x56xf32> to vector<8x56xf32>
    %806 = arith.mulf %803, %805 : vector<8x56xf32>
    %807 = arith.addf %802, %806 : vector<8x56xf32>
    %808 = vector.extract_strided_slice %773 {offsets = [56, 0], sizes = [8, 56], strides = [1, 1]} : vector<64x56xf32> to vector<8x56xf32>
    %809 = vector.extract_strided_slice %28 {offsets = [7, 0], sizes = [1, 56], strides = [1, 1]} : vector<8x56xf32> to vector<1x56xf32>
    %810 = vector.broadcast %809 : vector<1x56xf32> to vector<8x56xf32>
    %811 = arith.mulf %808, %810 : vector<8x56xf32>
    %812 = arith.addf %807, %811 : vector<8x56xf32>
    %c3_217 = arith.constant 3 : index
    %c0_218 = arith.constant 0 : index
    %c0_219 = arith.constant 0 : index
    %813 = vector.load %arg5[%c3_217, %c0_218, %c0_219] : memref<6x56x56xbf16, #tpu.memory_space<vmem>>, vector<1x56x56xbf16>
    %814 = vector.shape_cast %813 : vector<1x56x56xbf16> to vector<56x56xbf16>
    %815 = arith.truncf %812 : vector<8x56xf32> to vector<8x56xbf16>
    %cst_220 = arith.constant dense<0.000000e+00> : vector<8x56xf32>
    %816 = tpu.matmul %815, %814, %cst_220 {dimension_numbers = #tpu.dot_dimension_numbers<[1], [0], [0], [1], [0, 0, 1, 1], [], []>} : vector<8x56xbf16>, vector<56x56xbf16>, vector<8x56xf32> -> vector<8x56xf32>
    %817 = vector.broadcast %686 : vector<1x56xf32> to vector<8x56xf32>
    %818 = arith.addf %816, %817 : vector<8x56xf32>
    %819 = arith.addf %679, %818 : vector<8x56xf32>
    %cst_221 = arith.constant dense<0.000000e+00> : vector<8xf32>
    %820 = vector.multi_reduction <add>, %819, %cst_221 [1] : vector<8x56xf32> to vector<8xf32>
    %821 = vector.shape_cast %820 : vector<8xf32> to vector<8x1xf32>
    %cst_222 = arith.constant 5.600000e+01 : f32
    %822 = vector.broadcast %cst_222 : f32 to vector<8x1xf32>
    %823 = arith.divf %821, %822 : vector<8x1xf32>
    %824 = vector.broadcast %823 : vector<8x1xf32> to vector<8x56xf32>
    %825 = arith.subf %819, %824 : vector<8x56xf32>
    %826 = arith.mulf %825, %825 : vector<8x56xf32>
    %cst_223 = arith.constant dense<0.000000e+00> : vector<8xf32>
    %827 = vector.multi_reduction <add>, %826, %cst_223 [1] : vector<8x56xf32> to vector<8xf32>
    %828 = vector.shape_cast %827 : vector<8xf32> to vector<8x1xf32>
    %cst_224 = arith.constant 5.600000e+01 : f32
    %829 = vector.broadcast %cst_224 : f32 to vector<8x1xf32>
    %830 = arith.divf %828, %829 : vector<8x1xf32>
    %831 = vector.broadcast %823 : vector<8x1xf32> to vector<8x56xf32>
    %832 = arith.subf %819, %831 : vector<8x56xf32>
    %cst_225 = arith.constant 9.99999974E-6 : f32
    %833 = vector.broadcast %cst_225 : f32 to vector<8x1xf32>
    %834 = arith.addf %830, %833 : vector<8x1xf32>
    %835 = math.rsqrt %834 : vector<8x1xf32>
    %836 = vector.broadcast %835 : vector<8x1xf32> to vector<8x56xf32>
    %837 = arith.mulf %832, %836 : vector<8x56xf32>
    %838 = vector.broadcast %684 : vector<1x56xf32> to vector<8x56xf32>
    %839 = arith.mulf %837, %838 : vector<8x56xf32>
    %840 = vector.broadcast %685 : vector<1x56xf32> to vector<8x56xf32>
    %841 = arith.addf %839, %840 : vector<8x56xf32>
    %c3_226 = arith.constant 3 : index
    %c0_227 = arith.constant 0 : index
    %c0_228 = arith.constant 0 : index
    %842 = vector.load %arg6[%c3_226, %c0_227, %c0_228] : memref<6x56x224xbf16, #tpu.memory_space<vmem>>, vector<1x56x224xbf16>
    %843 = vector.shape_cast %842 : vector<1x56x224xbf16> to vector<56x224xbf16>
    %844 = arith.truncf %841 : vector<8x56xf32> to vector<8x56xbf16>
    %cst_229 = arith.constant dense<0.000000e+00> : vector<8x224xf32>
    %845 = tpu.matmul %844, %843, %cst_229 {dimension_numbers = #tpu.dot_dimension_numbers<[1], [0], [0], [1], [0, 0, 1, 1], [], []>} : vector<8x56xbf16>, vector<56x224xbf16>, vector<8x224xf32> -> vector<8x224xf32>
    %c3_230 = arith.constant 3 : index
    %c0_231 = arith.constant 0 : index
    %846 = vector.load %arg7[%c3_230, %c0_231] : memref<6x224xf32, #tpu.memory_space<vmem>>, vector<1x224xf32>
    %847 = vector.broadcast %846 : vector<1x224xf32> to vector<8x224xf32>
    %848 = arith.addf %845, %847 : vector<8x224xf32>
    %cst_232 = arith.constant 5.000000e-01 : f32
    %849 = vector.broadcast %cst_232 : f32 to vector<8x224xf32>
    %850 = arith.mulf %849, %848 : vector<8x224xf32>
    %cst_233 = arith.constant 0.707106769 : f32
    %851 = vector.broadcast %cst_233 : f32 to vector<8x224xf32>
    %852 = arith.mulf %848, %851 : vector<8x224xf32>
    %cst_234 = arith.constant 0.000000e+00 : f32
    %853 = vector.broadcast %cst_234 : f32 to vector<8x224xf32>
    %854 = arith.cmpf oge, %852, %853 : vector<8x224xf32>
    %cst_235 = arith.constant 1.000000e+00 : f32
    %cst_236 = arith.constant -1.000000e+00 : f32
    %855 = vector.broadcast %cst_235 : f32 to vector<8x224xf32>
    %856 = vector.broadcast %cst_236 : f32 to vector<8x224xf32>
    %857 = arith.select %854, %855, %856 : vector<8x224xi1>, vector<8x224xf32>
    %858 = math.absf %852 : vector<8x224xf32>
    %cst_237 = arith.constant 0.327591091 : f32
    %859 = vector.broadcast %cst_237 : f32 to vector<8x224xf32>
    %860 = arith.mulf %859, %858 : vector<8x224xf32>
    %cst_238 = arith.constant 1.000000e+00 : f32
    %861 = vector.broadcast %cst_238 : f32 to vector<8x224xf32>
    %862 = arith.addf %861, %860 : vector<8x224xf32>
    %cst_239 = arith.constant 1.000000e+00 : f32
    %863 = vector.broadcast %cst_239 : f32 to vector<8x224xf32>
    %864 = arith.divf %863, %862 : vector<8x224xf32>
    %cst_240 = arith.constant 1.06140542 : f32
    %865 = vector.broadcast %cst_240 : f32 to vector<8x224xf32>
    %866 = arith.mulf %865, %864 : vector<8x224xf32>
    %cst_241 = arith.constant -1.45315206 : f32
    %867 = vector.broadcast %cst_241 : f32 to vector<8x224xf32>
    %868 = arith.addf %866, %867 : vector<8x224xf32>
    %869 = arith.mulf %868, %864 : vector<8x224xf32>
    %cst_242 = arith.constant 1.42141378 : f32
    %870 = vector.broadcast %cst_242 : f32 to vector<8x224xf32>
    %871 = arith.addf %869, %870 : vector<8x224xf32>
    %872 = arith.mulf %871, %864 : vector<8x224xf32>
    %cst_243 = arith.constant -0.284496725 : f32
    %873 = vector.broadcast %cst_243 : f32 to vector<8x224xf32>
    %874 = arith.addf %872, %873 : vector<8x224xf32>
    %875 = arith.mulf %874, %864 : vector<8x224xf32>
    %cst_244 = arith.constant 0.254829586 : f32
    %876 = vector.broadcast %cst_244 : f32 to vector<8x224xf32>
    %877 = arith.addf %875, %876 : vector<8x224xf32>
    %878 = arith.mulf %877, %864 : vector<8x224xf32>
    %cst_245 = arith.constant 0.000000e+00 : f32
    %879 = vector.broadcast %cst_245 : f32 to vector<8x224xf32>
    %880 = arith.subf %879, %858 : vector<8x224xf32>
    %881 = arith.mulf %880, %858 : vector<8x224xf32>
    %882 = math.exp %881 : vector<8x224xf32>
    %883 = arith.mulf %878, %882 : vector<8x224xf32>
    %cst_246 = arith.constant 1.000000e+00 : f32
    %884 = vector.broadcast %cst_246 : f32 to vector<8x224xf32>
    %885 = arith.subf %884, %883 : vector<8x224xf32>
    %886 = arith.mulf %857, %885 : vector<8x224xf32>
    %cst_247 = arith.constant 1.000000e+00 : f32
    %887 = vector.broadcast %cst_247 : f32 to vector<8x224xf32>
    %888 = arith.addf %887, %886 : vector<8x224xf32>
    %889 = arith.mulf %850, %888 : vector<8x224xf32>
    %c3_248 = arith.constant 3 : index
    %c0_249 = arith.constant 0 : index
    %c0_250 = arith.constant 0 : index
    %890 = vector.load %arg8[%c3_248, %c0_249, %c0_250] : memref<6x224x56xbf16, #tpu.memory_space<vmem>>, vector<1x224x56xbf16>
    %891 = vector.shape_cast %890 : vector<1x224x56xbf16> to vector<224x56xbf16>
    %892 = arith.truncf %889 : vector<8x224xf32> to vector<8x224xbf16>
    %cst_251 = arith.constant dense<0.000000e+00> : vector<8x56xf32>
    %893 = tpu.matmul %892, %891, %cst_251 {dimension_numbers = #tpu.dot_dimension_numbers<[1], [0], [0], [1], [0, 0, 1, 1], [], []>} : vector<8x224xbf16>, vector<224x56xbf16>, vector<8x56xf32> -> vector<8x56xf32>
    %894 = vector.broadcast %687 : vector<1x56xf32> to vector<8x56xf32>
    %895 = arith.addf %893, %894 : vector<8x56xf32>
    %896 = arith.addf %819, %895 : vector<8x56xf32>
    %c4 = arith.constant 4 : index
    %c0_252 = arith.constant 0 : index
    %c0_253 = arith.constant 0 : index
    %897 = vector.load %arg9[%c4, %c0_252, %c0_253] : memref<6x6x56xf32, #tpu.memory_space<vmem>>, vector<1x6x56xf32>
    %898 = vector.shape_cast %897 : vector<1x6x56xf32> to vector<6x56xf32>
    %899 = vector.extract_strided_slice %898 {offsets = [0, 0], sizes = [1, 56], strides = [1, 1]} : vector<6x56xf32> to vector<1x56xf32>
    %900 = vector.extract_strided_slice %898 {offsets = [1, 0], sizes = [1, 56], strides = [1, 1]} : vector<6x56xf32> to vector<1x56xf32>
    %901 = vector.extract_strided_slice %898 {offsets = [2, 0], sizes = [1, 56], strides = [1, 1]} : vector<6x56xf32> to vector<1x56xf32>
    %902 = vector.extract_strided_slice %898 {offsets = [3, 0], sizes = [1, 56], strides = [1, 1]} : vector<6x56xf32> to vector<1x56xf32>
    %903 = vector.extract_strided_slice %898 {offsets = [4, 0], sizes = [1, 56], strides = [1, 1]} : vector<6x56xf32> to vector<1x56xf32>
    %904 = vector.extract_strided_slice %898 {offsets = [5, 0], sizes = [1, 56], strides = [1, 1]} : vector<6x56xf32> to vector<1x56xf32>
    %cst_254 = arith.constant dense<0.000000e+00> : vector<8xf32>
    %905 = vector.multi_reduction <add>, %896, %cst_254 [1] : vector<8x56xf32> to vector<8xf32>
    %906 = vector.shape_cast %905 : vector<8xf32> to vector<8x1xf32>
    %cst_255 = arith.constant 5.600000e+01 : f32
    %907 = vector.broadcast %cst_255 : f32 to vector<8x1xf32>
    %908 = arith.divf %906, %907 : vector<8x1xf32>
    %909 = vector.broadcast %908 : vector<8x1xf32> to vector<8x56xf32>
    %910 = arith.subf %896, %909 : vector<8x56xf32>
    %911 = arith.mulf %910, %910 : vector<8x56xf32>
    %cst_256 = arith.constant dense<0.000000e+00> : vector<8xf32>
    %912 = vector.multi_reduction <add>, %911, %cst_256 [1] : vector<8x56xf32> to vector<8xf32>
    %913 = vector.shape_cast %912 : vector<8xf32> to vector<8x1xf32>
    %cst_257 = arith.constant 5.600000e+01 : f32
    %914 = vector.broadcast %cst_257 : f32 to vector<8x1xf32>
    %915 = arith.divf %913, %914 : vector<8x1xf32>
    %916 = vector.broadcast %908 : vector<8x1xf32> to vector<8x56xf32>
    %917 = arith.subf %896, %916 : vector<8x56xf32>
    %cst_258 = arith.constant 9.99999974E-6 : f32
    %918 = vector.broadcast %cst_258 : f32 to vector<8x1xf32>
    %919 = arith.addf %915, %918 : vector<8x1xf32>
    %920 = math.rsqrt %919 : vector<8x1xf32>
    %921 = vector.broadcast %920 : vector<8x1xf32> to vector<8x56xf32>
    %922 = arith.mulf %917, %921 : vector<8x56xf32>
    %923 = vector.broadcast %899 : vector<1x56xf32> to vector<8x56xf32>
    %924 = arith.mulf %922, %923 : vector<8x56xf32>
    %925 = vector.broadcast %900 : vector<1x56xf32> to vector<8x56xf32>
    %926 = arith.addf %924, %925 : vector<8x56xf32>
    %c4_259 = arith.constant 4 : index
    %c0_260 = arith.constant 0 : index
    %c0_261 = arith.constant 0 : index
    %927 = vector.load %arg3[%c4_259, %c0_260, %c0_261] : memref<6x168x56xbf16, #tpu.memory_space<vmem>>, vector<1x168x56xbf16>
    %928 = vector.shape_cast %927 : vector<1x168x56xbf16> to vector<168x56xbf16>
    %929 = arith.truncf %926 : vector<8x56xf32> to vector<8x56xbf16>
    %cst_262 = arith.constant dense<0.000000e+00> : vector<8x168xf32>
    %930 = tpu.matmul %929, %928, %cst_262 {dimension_numbers = #tpu.dot_dimension_numbers<[1], [1], [0], [0], [0, 0, 1, 0], [], []>} : vector<8x56xbf16>, vector<168x56xbf16>, vector<8x168xf32> -> vector<8x168xf32>
    %c4_263 = arith.constant 4 : index
    %c0_264 = arith.constant 0 : index
    %931 = vector.load %arg4[%c4_263, %c0_264] : memref<6x168xf32, #tpu.memory_space<vmem>>, vector<1x168xf32>
    %932 = vector.broadcast %931 : vector<1x168xf32> to vector<8x168xf32>
    %933 = arith.addf %930, %932 : vector<8x168xf32>
    %934 = vector.extract_strided_slice %933 {offsets = [0, 0], sizes = [8, 56], strides = [1, 1]} : vector<8x168xf32> to vector<8x56xf32>
    %935 = vector.extract_strided_slice %933 {offsets = [0, 56], sizes = [8, 56], strides = [1, 1]} : vector<8x168xf32> to vector<8x56xf32>
    %936 = vector.extract_strided_slice %933 {offsets = [0, 112], sizes = [8, 56], strides = [1, 1]} : vector<8x168xf32> to vector<8x56xf32>
    %937 = arith.truncf %936 : vector<8x56xf32> to vector<8x56xbf16>
    %938 = vector.extract_strided_slice %934 {offsets = [0, 0], sizes = [8, 7], strides = [1, 1]} : vector<8x56xf32> to vector<8x7xf32>
    %939 = arith.truncf %938 : vector<8x7xf32> to vector<8x7xbf16>
    %940 = vector.extract_strided_slice %935 {offsets = [0, 0], sizes = [8, 7], strides = [1, 1]} : vector<8x56xf32> to vector<8x7xf32>
    %941 = arith.truncf %940 : vector<8x7xf32> to vector<8x7xbf16>
    %cst_265 = arith.constant dense<0.000000e+00> : vector<8x8xf32>
    %942 = tpu.matmul %939, %941, %cst_265 {dimension_numbers = #tpu.dot_dimension_numbers<[1], [1], [0], [0], [0, 0, 1, 0], [], []>} : vector<8x7xbf16>, vector<8x7xbf16>, vector<8x8xf32> -> vector<8x8xf32>
    %943 = vector.extract_strided_slice %934 {offsets = [0, 7], sizes = [8, 7], strides = [1, 1]} : vector<8x56xf32> to vector<8x7xf32>
    %944 = arith.truncf %943 : vector<8x7xf32> to vector<8x7xbf16>
    %945 = vector.extract_strided_slice %935 {offsets = [0, 7], sizes = [8, 7], strides = [1, 1]} : vector<8x56xf32> to vector<8x7xf32>
    %946 = arith.truncf %945 : vector<8x7xf32> to vector<8x7xbf16>
    %cst_266 = arith.constant dense<0.000000e+00> : vector<8x8xf32>
    %947 = tpu.matmul %944, %946, %cst_266 {dimension_numbers = #tpu.dot_dimension_numbers<[1], [1], [0], [0], [0, 0, 1, 0], [], []>} : vector<8x7xbf16>, vector<8x7xbf16>, vector<8x8xf32> -> vector<8x8xf32>
    %948 = vector.extract_strided_slice %934 {offsets = [0, 14], sizes = [8, 7], strides = [1, 1]} : vector<8x56xf32> to vector<8x7xf32>
    %949 = arith.truncf %948 : vector<8x7xf32> to vector<8x7xbf16>
    %950 = vector.extract_strided_slice %935 {offsets = [0, 14], sizes = [8, 7], strides = [1, 1]} : vector<8x56xf32> to vector<8x7xf32>
    %951 = arith.truncf %950 : vector<8x7xf32> to vector<8x7xbf16>
    %cst_267 = arith.constant dense<0.000000e+00> : vector<8x8xf32>
    %952 = tpu.matmul %949, %951, %cst_267 {dimension_numbers = #tpu.dot_dimension_numbers<[1], [1], [0], [0], [0, 0, 1, 0], [], []>} : vector<8x7xbf16>, vector<8x7xbf16>, vector<8x8xf32> -> vector<8x8xf32>
    %953 = vector.extract_strided_slice %934 {offsets = [0, 21], sizes = [8, 7], strides = [1, 1]} : vector<8x56xf32> to vector<8x7xf32>
    %954 = arith.truncf %953 : vector<8x7xf32> to vector<8x7xbf16>
    %955 = vector.extract_strided_slice %935 {offsets = [0, 21], sizes = [8, 7], strides = [1, 1]} : vector<8x56xf32> to vector<8x7xf32>
    %956 = arith.truncf %955 : vector<8x7xf32> to vector<8x7xbf16>
    %cst_268 = arith.constant dense<0.000000e+00> : vector<8x8xf32>
    %957 = tpu.matmul %954, %956, %cst_268 {dimension_numbers = #tpu.dot_dimension_numbers<[1], [1], [0], [0], [0, 0, 1, 0], [], []>} : vector<8x7xbf16>, vector<8x7xbf16>, vector<8x8xf32> -> vector<8x8xf32>
    %958 = vector.extract_strided_slice %934 {offsets = [0, 28], sizes = [8, 7], strides = [1, 1]} : vector<8x56xf32> to vector<8x7xf32>
    %959 = arith.truncf %958 : vector<8x7xf32> to vector<8x7xbf16>
    %960 = vector.extract_strided_slice %935 {offsets = [0, 28], sizes = [8, 7], strides = [1, 1]} : vector<8x56xf32> to vector<8x7xf32>
    %961 = arith.truncf %960 : vector<8x7xf32> to vector<8x7xbf16>
    %cst_269 = arith.constant dense<0.000000e+00> : vector<8x8xf32>
    %962 = tpu.matmul %959, %961, %cst_269 {dimension_numbers = #tpu.dot_dimension_numbers<[1], [1], [0], [0], [0, 0, 1, 0], [], []>} : vector<8x7xbf16>, vector<8x7xbf16>, vector<8x8xf32> -> vector<8x8xf32>
    %963 = vector.extract_strided_slice %934 {offsets = [0, 35], sizes = [8, 7], strides = [1, 1]} : vector<8x56xf32> to vector<8x7xf32>
    %964 = arith.truncf %963 : vector<8x7xf32> to vector<8x7xbf16>
    %965 = vector.extract_strided_slice %935 {offsets = [0, 35], sizes = [8, 7], strides = [1, 1]} : vector<8x56xf32> to vector<8x7xf32>
    %966 = arith.truncf %965 : vector<8x7xf32> to vector<8x7xbf16>
    %cst_270 = arith.constant dense<0.000000e+00> : vector<8x8xf32>
    %967 = tpu.matmul %964, %966, %cst_270 {dimension_numbers = #tpu.dot_dimension_numbers<[1], [1], [0], [0], [0, 0, 1, 0], [], []>} : vector<8x7xbf16>, vector<8x7xbf16>, vector<8x8xf32> -> vector<8x8xf32>
    %968 = vector.extract_strided_slice %934 {offsets = [0, 42], sizes = [8, 7], strides = [1, 1]} : vector<8x56xf32> to vector<8x7xf32>
    %969 = arith.truncf %968 : vector<8x7xf32> to vector<8x7xbf16>
    %970 = vector.extract_strided_slice %935 {offsets = [0, 42], sizes = [8, 7], strides = [1, 1]} : vector<8x56xf32> to vector<8x7xf32>
    %971 = arith.truncf %970 : vector<8x7xf32> to vector<8x7xbf16>
    %cst_271 = arith.constant dense<0.000000e+00> : vector<8x8xf32>
    %972 = tpu.matmul %969, %971, %cst_271 {dimension_numbers = #tpu.dot_dimension_numbers<[1], [1], [0], [0], [0, 0, 1, 0], [], []>} : vector<8x7xbf16>, vector<8x7xbf16>, vector<8x8xf32> -> vector<8x8xf32>
    %973 = vector.extract_strided_slice %934 {offsets = [0, 49], sizes = [8, 7], strides = [1, 1]} : vector<8x56xf32> to vector<8x7xf32>
    %974 = arith.truncf %973 : vector<8x7xf32> to vector<8x7xbf16>
    %975 = vector.extract_strided_slice %935 {offsets = [0, 49], sizes = [8, 7], strides = [1, 1]} : vector<8x56xf32> to vector<8x7xf32>
    %976 = arith.truncf %975 : vector<8x7xf32> to vector<8x7xbf16>
    %cst_272 = arith.constant dense<0.000000e+00> : vector<8x8xf32>
    %977 = tpu.matmul %974, %976, %cst_272 {dimension_numbers = #tpu.dot_dimension_numbers<[1], [1], [0], [0], [0, 0, 1, 0], [], []>} : vector<8x7xbf16>, vector<8x7xbf16>, vector<8x8xf32> -> vector<8x8xf32>
    %978 = tpu.concatenate %942, %947, %952, %957, %962, %967, %972, %977 in 0 : vector<8x8xf32>, vector<8x8xf32>, vector<8x8xf32>, vector<8x8xf32>, vector<8x8xf32>, vector<8x8xf32>, vector<8x8xf32>, vector<8x8xf32> -> vector<64x8xf32>
    %cst_273 = arith.constant dense<0xFF800000> : vector<64xf32>
    %979 = vector.multi_reduction <maximumf>, %978, %cst_273 [1] : vector<64x8xf32> to vector<64xf32>
    %980 = vector.shape_cast %979 : vector<64xf32> to vector<64x1xf32>
    %981 = vector.broadcast %980 : vector<64x1xf32> to vector<64x8xf32>
    %982 = arith.subf %978, %981 : vector<64x8xf32>
    %983 = math.exp %982 : vector<64x8xf32>
    %cst_274 = arith.constant dense<0.000000e+00> : vector<64xf32>
    %984 = vector.multi_reduction <add>, %983, %cst_274 [1] : vector<64x8xf32> to vector<64xf32>
    %985 = vector.shape_cast %984 : vector<64xf32> to vector<64x1xf32>
    %986 = tpu.reciprocal %985 {approx = true} : vector<64x1xf32> -> vector<64x1xf32>
    %987 = vector.broadcast %986 : vector<64x1xf32> to vector<64x8xf32>
    %988 = arith.mulf %983, %987 : vector<64x8xf32>
    %989 = arith.truncf %988 : vector<64x8xf32> to vector<64x8xbf16>
    %cst_275 = arith.constant dense<0.000000e+00> : vector<64x56xf32>
    %990 = tpu.matmul %989, %937, %cst_275 {dimension_numbers = #tpu.dot_dimension_numbers<[1], [0], [0], [1], [0, 0, 1, 1], [], []>} : vector<64x8xbf16>, vector<8x56xbf16>, vector<64x56xf32> -> vector<64x56xf32>
    %991 = vector.extract_strided_slice %990 {offsets = [0, 0], sizes = [8, 56], strides = [1, 1]} : vector<64x56xf32> to vector<8x56xf32>
    %992 = vector.extract_strided_slice %28 {offsets = [0, 0], sizes = [1, 56], strides = [1, 1]} : vector<8x56xf32> to vector<1x56xf32>
    %993 = vector.broadcast %992 : vector<1x56xf32> to vector<8x56xf32>
    %994 = arith.mulf %991, %993 : vector<8x56xf32>
    %995 = vector.extract_strided_slice %990 {offsets = [8, 0], sizes = [8, 56], strides = [1, 1]} : vector<64x56xf32> to vector<8x56xf32>
    %996 = vector.extract_strided_slice %28 {offsets = [1, 0], sizes = [1, 56], strides = [1, 1]} : vector<8x56xf32> to vector<1x56xf32>
    %997 = vector.broadcast %996 : vector<1x56xf32> to vector<8x56xf32>
    %998 = arith.mulf %995, %997 : vector<8x56xf32>
    %999 = arith.addf %994, %998 : vector<8x56xf32>
    %1000 = vector.extract_strided_slice %990 {offsets = [16, 0], sizes = [8, 56], strides = [1, 1]} : vector<64x56xf32> to vector<8x56xf32>
    %1001 = vector.extract_strided_slice %28 {offsets = [2, 0], sizes = [1, 56], strides = [1, 1]} : vector<8x56xf32> to vector<1x56xf32>
    %1002 = vector.broadcast %1001 : vector<1x56xf32> to vector<8x56xf32>
    %1003 = arith.mulf %1000, %1002 : vector<8x56xf32>
    %1004 = arith.addf %999, %1003 : vector<8x56xf32>
    %1005 = vector.extract_strided_slice %990 {offsets = [24, 0], sizes = [8, 56], strides = [1, 1]} : vector<64x56xf32> to vector<8x56xf32>
    %1006 = vector.extract_strided_slice %28 {offsets = [3, 0], sizes = [1, 56], strides = [1, 1]} : vector<8x56xf32> to vector<1x56xf32>
    %1007 = vector.broadcast %1006 : vector<1x56xf32> to vector<8x56xf32>
    %1008 = arith.mulf %1005, %1007 : vector<8x56xf32>
    %1009 = arith.addf %1004, %1008 : vector<8x56xf32>
    %1010 = vector.extract_strided_slice %990 {offsets = [32, 0], sizes = [8, 56], strides = [1, 1]} : vector<64x56xf32> to vector<8x56xf32>
    %1011 = vector.extract_strided_slice %28 {offsets = [4, 0], sizes = [1, 56], strides = [1, 1]} : vector<8x56xf32> to vector<1x56xf32>
    %1012 = vector.broadcast %1011 : vector<1x56xf32> to vector<8x56xf32>
    %1013 = arith.mulf %1010, %1012 : vector<8x56xf32>
    %1014 = arith.addf %1009, %1013 : vector<8x56xf32>
    %1015 = vector.extract_strided_slice %990 {offsets = [40, 0], sizes = [8, 56], strides = [1, 1]} : vector<64x56xf32> to vector<8x56xf32>
    %1016 = vector.extract_strided_slice %28 {offsets = [5, 0], sizes = [1, 56], strides = [1, 1]} : vector<8x56xf32> to vector<1x56xf32>
    %1017 = vector.broadcast %1016 : vector<1x56xf32> to vector<8x56xf32>
    %1018 = arith.mulf %1015, %1017 : vector<8x56xf32>
    %1019 = arith.addf %1014, %1018 : vector<8x56xf32>
    %1020 = vector.extract_strided_slice %990 {offsets = [48, 0], sizes = [8, 56], strides = [1, 1]} : vector<64x56xf32> to vector<8x56xf32>
    %1021 = vector.extract_strided_slice %28 {offsets = [6, 0], sizes = [1, 56], strides = [1, 1]} : vector<8x56xf32> to vector<1x56xf32>
    %1022 = vector.broadcast %1021 : vector<1x56xf32> to vector<8x56xf32>
    %1023 = arith.mulf %1020, %1022 : vector<8x56xf32>
    %1024 = arith.addf %1019, %1023 : vector<8x56xf32>
    %1025 = vector.extract_strided_slice %990 {offsets = [56, 0], sizes = [8, 56], strides = [1, 1]} : vector<64x56xf32> to vector<8x56xf32>
    %1026 = vector.extract_strided_slice %28 {offsets = [7, 0], sizes = [1, 56], strides = [1, 1]} : vector<8x56xf32> to vector<1x56xf32>
    %1027 = vector.broadcast %1026 : vector<1x56xf32> to vector<8x56xf32>
    %1028 = arith.mulf %1025, %1027 : vector<8x56xf32>
    %1029 = arith.addf %1024, %1028 : vector<8x56xf32>
    %c4_276 = arith.constant 4 : index
    %c0_277 = arith.constant 0 : index
    %c0_278 = arith.constant 0 : index
    %1030 = vector.load %arg5[%c4_276, %c0_277, %c0_278] : memref<6x56x56xbf16, #tpu.memory_space<vmem>>, vector<1x56x56xbf16>
    %1031 = vector.shape_cast %1030 : vector<1x56x56xbf16> to vector<56x56xbf16>
    %1032 = arith.truncf %1029 : vector<8x56xf32> to vector<8x56xbf16>
    %cst_279 = arith.constant dense<0.000000e+00> : vector<8x56xf32>
    %1033 = tpu.matmul %1032, %1031, %cst_279 {dimension_numbers = #tpu.dot_dimension_numbers<[1], [0], [0], [1], [0, 0, 1, 1], [], []>} : vector<8x56xbf16>, vector<56x56xbf16>, vector<8x56xf32> -> vector<8x56xf32>
    %1034 = vector.broadcast %903 : vector<1x56xf32> to vector<8x56xf32>
    %1035 = arith.addf %1033, %1034 : vector<8x56xf32>
    %1036 = arith.addf %896, %1035 : vector<8x56xf32>
    %cst_280 = arith.constant dense<0.000000e+00> : vector<8xf32>
    %1037 = vector.multi_reduction <add>, %1036, %cst_280 [1] : vector<8x56xf32> to vector<8xf32>
    %1038 = vector.shape_cast %1037 : vector<8xf32> to vector<8x1xf32>
    %cst_281 = arith.constant 5.600000e+01 : f32
    %1039 = vector.broadcast %cst_281 : f32 to vector<8x1xf32>
    %1040 = arith.divf %1038, %1039 : vector<8x1xf32>
    %1041 = vector.broadcast %1040 : vector<8x1xf32> to vector<8x56xf32>
    %1042 = arith.subf %1036, %1041 : vector<8x56xf32>
    %1043 = arith.mulf %1042, %1042 : vector<8x56xf32>
    %cst_282 = arith.constant dense<0.000000e+00> : vector<8xf32>
    %1044 = vector.multi_reduction <add>, %1043, %cst_282 [1] : vector<8x56xf32> to vector<8xf32>
    %1045 = vector.shape_cast %1044 : vector<8xf32> to vector<8x1xf32>
    %cst_283 = arith.constant 5.600000e+01 : f32
    %1046 = vector.broadcast %cst_283 : f32 to vector<8x1xf32>
    %1047 = arith.divf %1045, %1046 : vector<8x1xf32>
    %1048 = vector.broadcast %1040 : vector<8x1xf32> to vector<8x56xf32>
    %1049 = arith.subf %1036, %1048 : vector<8x56xf32>
    %cst_284 = arith.constant 9.99999974E-6 : f32
    %1050 = vector.broadcast %cst_284 : f32 to vector<8x1xf32>
    %1051 = arith.addf %1047, %1050 : vector<8x1xf32>
    %1052 = math.rsqrt %1051 : vector<8x1xf32>
    %1053 = vector.broadcast %1052 : vector<8x1xf32> to vector<8x56xf32>
    %1054 = arith.mulf %1049, %1053 : vector<8x56xf32>
    %1055 = vector.broadcast %901 : vector<1x56xf32> to vector<8x56xf32>
    %1056 = arith.mulf %1054, %1055 : vector<8x56xf32>
    %1057 = vector.broadcast %902 : vector<1x56xf32> to vector<8x56xf32>
    %1058 = arith.addf %1056, %1057 : vector<8x56xf32>
    %c4_285 = arith.constant 4 : index
    %c0_286 = arith.constant 0 : index
    %c0_287 = arith.constant 0 : index
    %1059 = vector.load %arg6[%c4_285, %c0_286, %c0_287] : memref<6x56x224xbf16, #tpu.memory_space<vmem>>, vector<1x56x224xbf16>
    %1060 = vector.shape_cast %1059 : vector<1x56x224xbf16> to vector<56x224xbf16>
    %1061 = arith.truncf %1058 : vector<8x56xf32> to vector<8x56xbf16>
    %cst_288 = arith.constant dense<0.000000e+00> : vector<8x224xf32>
    %1062 = tpu.matmul %1061, %1060, %cst_288 {dimension_numbers = #tpu.dot_dimension_numbers<[1], [0], [0], [1], [0, 0, 1, 1], [], []>} : vector<8x56xbf16>, vector<56x224xbf16>, vector<8x224xf32> -> vector<8x224xf32>
    %c4_289 = arith.constant 4 : index
    %c0_290 = arith.constant 0 : index
    %1063 = vector.load %arg7[%c4_289, %c0_290] : memref<6x224xf32, #tpu.memory_space<vmem>>, vector<1x224xf32>
    %1064 = vector.broadcast %1063 : vector<1x224xf32> to vector<8x224xf32>
    %1065 = arith.addf %1062, %1064 : vector<8x224xf32>
    %cst_291 = arith.constant 5.000000e-01 : f32
    %1066 = vector.broadcast %cst_291 : f32 to vector<8x224xf32>
    %1067 = arith.mulf %1066, %1065 : vector<8x224xf32>
    %cst_292 = arith.constant 0.707106769 : f32
    %1068 = vector.broadcast %cst_292 : f32 to vector<8x224xf32>
    %1069 = arith.mulf %1065, %1068 : vector<8x224xf32>
    %cst_293 = arith.constant 0.000000e+00 : f32
    %1070 = vector.broadcast %cst_293 : f32 to vector<8x224xf32>
    %1071 = arith.cmpf oge, %1069, %1070 : vector<8x224xf32>
    %cst_294 = arith.constant 1.000000e+00 : f32
    %cst_295 = arith.constant -1.000000e+00 : f32
    %1072 = vector.broadcast %cst_294 : f32 to vector<8x224xf32>
    %1073 = vector.broadcast %cst_295 : f32 to vector<8x224xf32>
    %1074 = arith.select %1071, %1072, %1073 : vector<8x224xi1>, vector<8x224xf32>
    %1075 = math.absf %1069 : vector<8x224xf32>
    %cst_296 = arith.constant 0.327591091 : f32
    %1076 = vector.broadcast %cst_296 : f32 to vector<8x224xf32>
    %1077 = arith.mulf %1076, %1075 : vector<8x224xf32>
    %cst_297 = arith.constant 1.000000e+00 : f32
    %1078 = vector.broadcast %cst_297 : f32 to vector<8x224xf32>
    %1079 = arith.addf %1078, %1077 : vector<8x224xf32>
    %cst_298 = arith.constant 1.000000e+00 : f32
    %1080 = vector.broadcast %cst_298 : f32 to vector<8x224xf32>
    %1081 = arith.divf %1080, %1079 : vector<8x224xf32>
    %cst_299 = arith.constant 1.06140542 : f32
    %1082 = vector.broadcast %cst_299 : f32 to vector<8x224xf32>
    %1083 = arith.mulf %1082, %1081 : vector<8x224xf32>
    %cst_300 = arith.constant -1.45315206 : f32
    %1084 = vector.broadcast %cst_300 : f32 to vector<8x224xf32>
    %1085 = arith.addf %1083, %1084 : vector<8x224xf32>
    %1086 = arith.mulf %1085, %1081 : vector<8x224xf32>
    %cst_301 = arith.constant 1.42141378 : f32
    %1087 = vector.broadcast %cst_301 : f32 to vector<8x224xf32>
    %1088 = arith.addf %1086, %1087 : vector<8x224xf32>
    %1089 = arith.mulf %1088, %1081 : vector<8x224xf32>
    %cst_302 = arith.constant -0.284496725 : f32
    %1090 = vector.broadcast %cst_302 : f32 to vector<8x224xf32>
    %1091 = arith.addf %1089, %1090 : vector<8x224xf32>
    %1092 = arith.mulf %1091, %1081 : vector<8x224xf32>
    %cst_303 = arith.constant 0.254829586 : f32
    %1093 = vector.broadcast %cst_303 : f32 to vector<8x224xf32>
    %1094 = arith.addf %1092, %1093 : vector<8x224xf32>
    %1095 = arith.mulf %1094, %1081 : vector<8x224xf32>
    %cst_304 = arith.constant 0.000000e+00 : f32
    %1096 = vector.broadcast %cst_304 : f32 to vector<8x224xf32>
    %1097 = arith.subf %1096, %1075 : vector<8x224xf32>
    %1098 = arith.mulf %1097, %1075 : vector<8x224xf32>
    %1099 = math.exp %1098 : vector<8x224xf32>
    %1100 = arith.mulf %1095, %1099 : vector<8x224xf32>
    %cst_305 = arith.constant 1.000000e+00 : f32
    %1101 = vector.broadcast %cst_305 : f32 to vector<8x224xf32>
    %1102 = arith.subf %1101, %1100 : vector<8x224xf32>
    %1103 = arith.mulf %1074, %1102 : vector<8x224xf32>
    %cst_306 = arith.constant 1.000000e+00 : f32
    %1104 = vector.broadcast %cst_306 : f32 to vector<8x224xf32>
    %1105 = arith.addf %1104, %1103 : vector<8x224xf32>
    %1106 = arith.mulf %1067, %1105 : vector<8x224xf32>
    %c4_307 = arith.constant 4 : index
    %c0_308 = arith.constant 0 : index
    %c0_309 = arith.constant 0 : index
    %1107 = vector.load %arg8[%c4_307, %c0_308, %c0_309] : memref<6x224x56xbf16, #tpu.memory_space<vmem>>, vector<1x224x56xbf16>
    %1108 = vector.shape_cast %1107 : vector<1x224x56xbf16> to vector<224x56xbf16>
    %1109 = arith.truncf %1106 : vector<8x224xf32> to vector<8x224xbf16>
    %cst_310 = arith.constant dense<0.000000e+00> : vector<8x56xf32>
    %1110 = tpu.matmul %1109, %1108, %cst_310 {dimension_numbers = #tpu.dot_dimension_numbers<[1], [0], [0], [1], [0, 0, 1, 1], [], []>} : vector<8x224xbf16>, vector<224x56xbf16>, vector<8x56xf32> -> vector<8x56xf32>
    %1111 = vector.broadcast %904 : vector<1x56xf32> to vector<8x56xf32>
    %1112 = arith.addf %1110, %1111 : vector<8x56xf32>
    %1113 = arith.addf %1036, %1112 : vector<8x56xf32>
    %c5 = arith.constant 5 : index
    %c0_311 = arith.constant 0 : index
    %c0_312 = arith.constant 0 : index
    %1114 = vector.load %arg9[%c5, %c0_311, %c0_312] : memref<6x6x56xf32, #tpu.memory_space<vmem>>, vector<1x6x56xf32>
    %1115 = vector.shape_cast %1114 : vector<1x6x56xf32> to vector<6x56xf32>
    %1116 = vector.extract_strided_slice %1115 {offsets = [0, 0], sizes = [1, 56], strides = [1, 1]} : vector<6x56xf32> to vector<1x56xf32>
    %1117 = vector.extract_strided_slice %1115 {offsets = [1, 0], sizes = [1, 56], strides = [1, 1]} : vector<6x56xf32> to vector<1x56xf32>
    %1118 = vector.extract_strided_slice %1115 {offsets = [2, 0], sizes = [1, 56], strides = [1, 1]} : vector<6x56xf32> to vector<1x56xf32>
    %1119 = vector.extract_strided_slice %1115 {offsets = [3, 0], sizes = [1, 56], strides = [1, 1]} : vector<6x56xf32> to vector<1x56xf32>
    %1120 = vector.extract_strided_slice %1115 {offsets = [4, 0], sizes = [1, 56], strides = [1, 1]} : vector<6x56xf32> to vector<1x56xf32>
    %1121 = vector.extract_strided_slice %1115 {offsets = [5, 0], sizes = [1, 56], strides = [1, 1]} : vector<6x56xf32> to vector<1x56xf32>
    %cst_313 = arith.constant dense<0.000000e+00> : vector<8xf32>
    %1122 = vector.multi_reduction <add>, %1113, %cst_313 [1] : vector<8x56xf32> to vector<8xf32>
    %1123 = vector.shape_cast %1122 : vector<8xf32> to vector<8x1xf32>
    %cst_314 = arith.constant 5.600000e+01 : f32
    %1124 = vector.broadcast %cst_314 : f32 to vector<8x1xf32>
    %1125 = arith.divf %1123, %1124 : vector<8x1xf32>
    %1126 = vector.broadcast %1125 : vector<8x1xf32> to vector<8x56xf32>
    %1127 = arith.subf %1113, %1126 : vector<8x56xf32>
    %1128 = arith.mulf %1127, %1127 : vector<8x56xf32>
    %cst_315 = arith.constant dense<0.000000e+00> : vector<8xf32>
    %1129 = vector.multi_reduction <add>, %1128, %cst_315 [1] : vector<8x56xf32> to vector<8xf32>
    %1130 = vector.shape_cast %1129 : vector<8xf32> to vector<8x1xf32>
    %cst_316 = arith.constant 5.600000e+01 : f32
    %1131 = vector.broadcast %cst_316 : f32 to vector<8x1xf32>
    %1132 = arith.divf %1130, %1131 : vector<8x1xf32>
    %1133 = vector.broadcast %1125 : vector<8x1xf32> to vector<8x56xf32>
    %1134 = arith.subf %1113, %1133 : vector<8x56xf32>
    %cst_317 = arith.constant 9.99999974E-6 : f32
    %1135 = vector.broadcast %cst_317 : f32 to vector<8x1xf32>
    %1136 = arith.addf %1132, %1135 : vector<8x1xf32>
    %1137 = math.rsqrt %1136 : vector<8x1xf32>
    %1138 = vector.broadcast %1137 : vector<8x1xf32> to vector<8x56xf32>
    %1139 = arith.mulf %1134, %1138 : vector<8x56xf32>
    %1140 = vector.broadcast %1116 : vector<1x56xf32> to vector<8x56xf32>
    %1141 = arith.mulf %1139, %1140 : vector<8x56xf32>
    %1142 = vector.broadcast %1117 : vector<1x56xf32> to vector<8x56xf32>
    %1143 = arith.addf %1141, %1142 : vector<8x56xf32>
    %c5_318 = arith.constant 5 : index
    %c0_319 = arith.constant 0 : index
    %c0_320 = arith.constant 0 : index
    %1144 = vector.load %arg3[%c5_318, %c0_319, %c0_320] : memref<6x168x56xbf16, #tpu.memory_space<vmem>>, vector<1x168x56xbf16>
    %1145 = vector.shape_cast %1144 : vector<1x168x56xbf16> to vector<168x56xbf16>
    %1146 = arith.truncf %1143 : vector<8x56xf32> to vector<8x56xbf16>
    %cst_321 = arith.constant dense<0.000000e+00> : vector<8x168xf32>
    %1147 = tpu.matmul %1146, %1145, %cst_321 {dimension_numbers = #tpu.dot_dimension_numbers<[1], [1], [0], [0], [0, 0, 1, 0], [], []>} : vector<8x56xbf16>, vector<168x56xbf16>, vector<8x168xf32> -> vector<8x168xf32>
    %c5_322 = arith.constant 5 : index
    %c0_323 = arith.constant 0 : index
    %1148 = vector.load %arg4[%c5_322, %c0_323] : memref<6x168xf32, #tpu.memory_space<vmem>>, vector<1x168xf32>
    %1149 = vector.broadcast %1148 : vector<1x168xf32> to vector<8x168xf32>
    %1150 = arith.addf %1147, %1149 : vector<8x168xf32>
    %1151 = vector.extract_strided_slice %1150 {offsets = [0, 0], sizes = [8, 56], strides = [1, 1]} : vector<8x168xf32> to vector<8x56xf32>
    %1152 = vector.extract_strided_slice %1150 {offsets = [0, 56], sizes = [8, 56], strides = [1, 1]} : vector<8x168xf32> to vector<8x56xf32>
    %1153 = vector.extract_strided_slice %1150 {offsets = [0, 112], sizes = [8, 56], strides = [1, 1]} : vector<8x168xf32> to vector<8x56xf32>
    %1154 = arith.truncf %1153 : vector<8x56xf32> to vector<8x56xbf16>
    %1155 = vector.extract_strided_slice %1151 {offsets = [0, 0], sizes = [8, 7], strides = [1, 1]} : vector<8x56xf32> to vector<8x7xf32>
    %1156 = arith.truncf %1155 : vector<8x7xf32> to vector<8x7xbf16>
    %1157 = vector.extract_strided_slice %1152 {offsets = [0, 0], sizes = [8, 7], strides = [1, 1]} : vector<8x56xf32> to vector<8x7xf32>
    %1158 = arith.truncf %1157 : vector<8x7xf32> to vector<8x7xbf16>
    %cst_324 = arith.constant dense<0.000000e+00> : vector<8x8xf32>
    %1159 = tpu.matmul %1156, %1158, %cst_324 {dimension_numbers = #tpu.dot_dimension_numbers<[1], [1], [0], [0], [0, 0, 1, 0], [], []>} : vector<8x7xbf16>, vector<8x7xbf16>, vector<8x8xf32> -> vector<8x8xf32>
    %1160 = vector.extract_strided_slice %1151 {offsets = [0, 7], sizes = [8, 7], strides = [1, 1]} : vector<8x56xf32> to vector<8x7xf32>
    %1161 = arith.truncf %1160 : vector<8x7xf32> to vector<8x7xbf16>
    %1162 = vector.extract_strided_slice %1152 {offsets = [0, 7], sizes = [8, 7], strides = [1, 1]} : vector<8x56xf32> to vector<8x7xf32>
    %1163 = arith.truncf %1162 : vector<8x7xf32> to vector<8x7xbf16>
    %cst_325 = arith.constant dense<0.000000e+00> : vector<8x8xf32>
    %1164 = tpu.matmul %1161, %1163, %cst_325 {dimension_numbers = #tpu.dot_dimension_numbers<[1], [1], [0], [0], [0, 0, 1, 0], [], []>} : vector<8x7xbf16>, vector<8x7xbf16>, vector<8x8xf32> -> vector<8x8xf32>
    %1165 = vector.extract_strided_slice %1151 {offsets = [0, 14], sizes = [8, 7], strides = [1, 1]} : vector<8x56xf32> to vector<8x7xf32>
    %1166 = arith.truncf %1165 : vector<8x7xf32> to vector<8x7xbf16>
    %1167 = vector.extract_strided_slice %1152 {offsets = [0, 14], sizes = [8, 7], strides = [1, 1]} : vector<8x56xf32> to vector<8x7xf32>
    %1168 = arith.truncf %1167 : vector<8x7xf32> to vector<8x7xbf16>
    %cst_326 = arith.constant dense<0.000000e+00> : vector<8x8xf32>
    %1169 = tpu.matmul %1166, %1168, %cst_326 {dimension_numbers = #tpu.dot_dimension_numbers<[1], [1], [0], [0], [0, 0, 1, 0], [], []>} : vector<8x7xbf16>, vector<8x7xbf16>, vector<8x8xf32> -> vector<8x8xf32>
    %1170 = vector.extract_strided_slice %1151 {offsets = [0, 21], sizes = [8, 7], strides = [1, 1]} : vector<8x56xf32> to vector<8x7xf32>
    %1171 = arith.truncf %1170 : vector<8x7xf32> to vector<8x7xbf16>
    %1172 = vector.extract_strided_slice %1152 {offsets = [0, 21], sizes = [8, 7], strides = [1, 1]} : vector<8x56xf32> to vector<8x7xf32>
    %1173 = arith.truncf %1172 : vector<8x7xf32> to vector<8x7xbf16>
    %cst_327 = arith.constant dense<0.000000e+00> : vector<8x8xf32>
    %1174 = tpu.matmul %1171, %1173, %cst_327 {dimension_numbers = #tpu.dot_dimension_numbers<[1], [1], [0], [0], [0, 0, 1, 0], [], []>} : vector<8x7xbf16>, vector<8x7xbf16>, vector<8x8xf32> -> vector<8x8xf32>
    %1175 = vector.extract_strided_slice %1151 {offsets = [0, 28], sizes = [8, 7], strides = [1, 1]} : vector<8x56xf32> to vector<8x7xf32>
    %1176 = arith.truncf %1175 : vector<8x7xf32> to vector<8x7xbf16>
    %1177 = vector.extract_strided_slice %1152 {offsets = [0, 28], sizes = [8, 7], strides = [1, 1]} : vector<8x56xf32> to vector<8x7xf32>
    %1178 = arith.truncf %1177 : vector<8x7xf32> to vector<8x7xbf16>
    %cst_328 = arith.constant dense<0.000000e+00> : vector<8x8xf32>
    %1179 = tpu.matmul %1176, %1178, %cst_328 {dimension_numbers = #tpu.dot_dimension_numbers<[1], [1], [0], [0], [0, 0, 1, 0], [], []>} : vector<8x7xbf16>, vector<8x7xbf16>, vector<8x8xf32> -> vector<8x8xf32>
    %1180 = vector.extract_strided_slice %1151 {offsets = [0, 35], sizes = [8, 7], strides = [1, 1]} : vector<8x56xf32> to vector<8x7xf32>
    %1181 = arith.truncf %1180 : vector<8x7xf32> to vector<8x7xbf16>
    %1182 = vector.extract_strided_slice %1152 {offsets = [0, 35], sizes = [8, 7], strides = [1, 1]} : vector<8x56xf32> to vector<8x7xf32>
    %1183 = arith.truncf %1182 : vector<8x7xf32> to vector<8x7xbf16>
    %cst_329 = arith.constant dense<0.000000e+00> : vector<8x8xf32>
    %1184 = tpu.matmul %1181, %1183, %cst_329 {dimension_numbers = #tpu.dot_dimension_numbers<[1], [1], [0], [0], [0, 0, 1, 0], [], []>} : vector<8x7xbf16>, vector<8x7xbf16>, vector<8x8xf32> -> vector<8x8xf32>
    %1185 = vector.extract_strided_slice %1151 {offsets = [0, 42], sizes = [8, 7], strides = [1, 1]} : vector<8x56xf32> to vector<8x7xf32>
    %1186 = arith.truncf %1185 : vector<8x7xf32> to vector<8x7xbf16>
    %1187 = vector.extract_strided_slice %1152 {offsets = [0, 42], sizes = [8, 7], strides = [1, 1]} : vector<8x56xf32> to vector<8x7xf32>
    %1188 = arith.truncf %1187 : vector<8x7xf32> to vector<8x7xbf16>
    %cst_330 = arith.constant dense<0.000000e+00> : vector<8x8xf32>
    %1189 = tpu.matmul %1186, %1188, %cst_330 {dimension_numbers = #tpu.dot_dimension_numbers<[1], [1], [0], [0], [0, 0, 1, 0], [], []>} : vector<8x7xbf16>, vector<8x7xbf16>, vector<8x8xf32> -> vector<8x8xf32>
    %1190 = vector.extract_strided_slice %1151 {offsets = [0, 49], sizes = [8, 7], strides = [1, 1]} : vector<8x56xf32> to vector<8x7xf32>
    %1191 = arith.truncf %1190 : vector<8x7xf32> to vector<8x7xbf16>
    %1192 = vector.extract_strided_slice %1152 {offsets = [0, 49], sizes = [8, 7], strides = [1, 1]} : vector<8x56xf32> to vector<8x7xf32>
    %1193 = arith.truncf %1192 : vector<8x7xf32> to vector<8x7xbf16>
    %cst_331 = arith.constant dense<0.000000e+00> : vector<8x8xf32>
    %1194 = tpu.matmul %1191, %1193, %cst_331 {dimension_numbers = #tpu.dot_dimension_numbers<[1], [1], [0], [0], [0, 0, 1, 0], [], []>} : vector<8x7xbf16>, vector<8x7xbf16>, vector<8x8xf32> -> vector<8x8xf32>
    %1195 = tpu.concatenate %1159, %1164, %1169, %1174, %1179, %1184, %1189, %1194 in 0 : vector<8x8xf32>, vector<8x8xf32>, vector<8x8xf32>, vector<8x8xf32>, vector<8x8xf32>, vector<8x8xf32>, vector<8x8xf32>, vector<8x8xf32> -> vector<64x8xf32>
    %cst_332 = arith.constant dense<0xFF800000> : vector<64xf32>
    %1196 = vector.multi_reduction <maximumf>, %1195, %cst_332 [1] : vector<64x8xf32> to vector<64xf32>
    %1197 = vector.shape_cast %1196 : vector<64xf32> to vector<64x1xf32>
    %1198 = vector.broadcast %1197 : vector<64x1xf32> to vector<64x8xf32>
    %1199 = arith.subf %1195, %1198 : vector<64x8xf32>
    %1200 = math.exp %1199 : vector<64x8xf32>
    %cst_333 = arith.constant dense<0.000000e+00> : vector<64xf32>
    %1201 = vector.multi_reduction <add>, %1200, %cst_333 [1] : vector<64x8xf32> to vector<64xf32>
    %1202 = vector.shape_cast %1201 : vector<64xf32> to vector<64x1xf32>
    %1203 = tpu.reciprocal %1202 {approx = true} : vector<64x1xf32> -> vector<64x1xf32>
    %1204 = vector.broadcast %1203 : vector<64x1xf32> to vector<64x8xf32>
    %1205 = arith.mulf %1200, %1204 : vector<64x8xf32>
    %1206 = arith.truncf %1205 : vector<64x8xf32> to vector<64x8xbf16>
    %cst_334 = arith.constant dense<0.000000e+00> : vector<64x56xf32>
    %1207 = tpu.matmul %1206, %1154, %cst_334 {dimension_numbers = #tpu.dot_dimension_numbers<[1], [0], [0], [1], [0, 0, 1, 1], [], []>} : vector<64x8xbf16>, vector<8x56xbf16>, vector<64x56xf32> -> vector<64x56xf32>
    %1208 = vector.extract_strided_slice %1207 {offsets = [0, 0], sizes = [8, 56], strides = [1, 1]} : vector<64x56xf32> to vector<8x56xf32>
    %1209 = vector.extract_strided_slice %28 {offsets = [0, 0], sizes = [1, 56], strides = [1, 1]} : vector<8x56xf32> to vector<1x56xf32>
    %1210 = vector.broadcast %1209 : vector<1x56xf32> to vector<8x56xf32>
    %1211 = arith.mulf %1208, %1210 : vector<8x56xf32>
    %1212 = vector.extract_strided_slice %1207 {offsets = [8, 0], sizes = [8, 56], strides = [1, 1]} : vector<64x56xf32> to vector<8x56xf32>
    %1213 = vector.extract_strided_slice %28 {offsets = [1, 0], sizes = [1, 56], strides = [1, 1]} : vector<8x56xf32> to vector<1x56xf32>
    %1214 = vector.broadcast %1213 : vector<1x56xf32> to vector<8x56xf32>
    %1215 = arith.mulf %1212, %1214 : vector<8x56xf32>
    %1216 = arith.addf %1211, %1215 : vector<8x56xf32>
    %1217 = vector.extract_strided_slice %1207 {offsets = [16, 0], sizes = [8, 56], strides = [1, 1]} : vector<64x56xf32> to vector<8x56xf32>
    %1218 = vector.extract_strided_slice %28 {offsets = [2, 0], sizes = [1, 56], strides = [1, 1]} : vector<8x56xf32> to vector<1x56xf32>
    %1219 = vector.broadcast %1218 : vector<1x56xf32> to vector<8x56xf32>
    %1220 = arith.mulf %1217, %1219 : vector<8x56xf32>
    %1221 = arith.addf %1216, %1220 : vector<8x56xf32>
    %1222 = vector.extract_strided_slice %1207 {offsets = [24, 0], sizes = [8, 56], strides = [1, 1]} : vector<64x56xf32> to vector<8x56xf32>
    %1223 = vector.extract_strided_slice %28 {offsets = [3, 0], sizes = [1, 56], strides = [1, 1]} : vector<8x56xf32> to vector<1x56xf32>
    %1224 = vector.broadcast %1223 : vector<1x56xf32> to vector<8x56xf32>
    %1225 = arith.mulf %1222, %1224 : vector<8x56xf32>
    %1226 = arith.addf %1221, %1225 : vector<8x56xf32>
    %1227 = vector.extract_strided_slice %1207 {offsets = [32, 0], sizes = [8, 56], strides = [1, 1]} : vector<64x56xf32> to vector<8x56xf32>
    %1228 = vector.extract_strided_slice %28 {offsets = [4, 0], sizes = [1, 56], strides = [1, 1]} : vector<8x56xf32> to vector<1x56xf32>
    %1229 = vector.broadcast %1228 : vector<1x56xf32> to vector<8x56xf32>
    %1230 = arith.mulf %1227, %1229 : vector<8x56xf32>
    %1231 = arith.addf %1226, %1230 : vector<8x56xf32>
    %1232 = vector.extract_strided_slice %1207 {offsets = [40, 0], sizes = [8, 56], strides = [1, 1]} : vector<64x56xf32> to vector<8x56xf32>
    %1233 = vector.extract_strided_slice %28 {offsets = [5, 0], sizes = [1, 56], strides = [1, 1]} : vector<8x56xf32> to vector<1x56xf32>
    %1234 = vector.broadcast %1233 : vector<1x56xf32> to vector<8x56xf32>
    %1235 = arith.mulf %1232, %1234 : vector<8x56xf32>
    %1236 = arith.addf %1231, %1235 : vector<8x56xf32>
    %1237 = vector.extract_strided_slice %1207 {offsets = [48, 0], sizes = [8, 56], strides = [1, 1]} : vector<64x56xf32> to vector<8x56xf32>
    %1238 = vector.extract_strided_slice %28 {offsets = [6, 0], sizes = [1, 56], strides = [1, 1]} : vector<8x56xf32> to vector<1x56xf32>
    %1239 = vector.broadcast %1238 : vector<1x56xf32> to vector<8x56xf32>
    %1240 = arith.mulf %1237, %1239 : vector<8x56xf32>
    %1241 = arith.addf %1236, %1240 : vector<8x56xf32>
    %1242 = vector.extract_strided_slice %1207 {offsets = [56, 0], sizes = [8, 56], strides = [1, 1]} : vector<64x56xf32> to vector<8x56xf32>
    %1243 = vector.extract_strided_slice %28 {offsets = [7, 0], sizes = [1, 56], strides = [1, 1]} : vector<8x56xf32> to vector<1x56xf32>
    %1244 = vector.broadcast %1243 : vector<1x56xf32> to vector<8x56xf32>
    %1245 = arith.mulf %1242, %1244 : vector<8x56xf32>
    %1246 = arith.addf %1241, %1245 : vector<8x56xf32>
    %c5_335 = arith.constant 5 : index
    %c0_336 = arith.constant 0 : index
    %c0_337 = arith.constant 0 : index
    %1247 = vector.load %arg5[%c5_335, %c0_336, %c0_337] : memref<6x56x56xbf16, #tpu.memory_space<vmem>>, vector<1x56x56xbf16>
    %1248 = vector.shape_cast %1247 : vector<1x56x56xbf16> to vector<56x56xbf16>
    %1249 = arith.truncf %1246 : vector<8x56xf32> to vector<8x56xbf16>
    %cst_338 = arith.constant dense<0.000000e+00> : vector<8x56xf32>
    %1250 = tpu.matmul %1249, %1248, %cst_338 {dimension_numbers = #tpu.dot_dimension_numbers<[1], [0], [0], [1], [0, 0, 1, 1], [], []>} : vector<8x56xbf16>, vector<56x56xbf16>, vector<8x56xf32> -> vector<8x56xf32>
    %1251 = vector.broadcast %1120 : vector<1x56xf32> to vector<8x56xf32>
    %1252 = arith.addf %1250, %1251 : vector<8x56xf32>
    %1253 = arith.addf %1113, %1252 : vector<8x56xf32>
    %cst_339 = arith.constant dense<0.000000e+00> : vector<8xf32>
    %1254 = vector.multi_reduction <add>, %1253, %cst_339 [1] : vector<8x56xf32> to vector<8xf32>
    %1255 = vector.shape_cast %1254 : vector<8xf32> to vector<8x1xf32>
    %cst_340 = arith.constant 5.600000e+01 : f32
    %1256 = vector.broadcast %cst_340 : f32 to vector<8x1xf32>
    %1257 = arith.divf %1255, %1256 : vector<8x1xf32>
    %1258 = vector.broadcast %1257 : vector<8x1xf32> to vector<8x56xf32>
    %1259 = arith.subf %1253, %1258 : vector<8x56xf32>
    %1260 = arith.mulf %1259, %1259 : vector<8x56xf32>
    %cst_341 = arith.constant dense<0.000000e+00> : vector<8xf32>
    %1261 = vector.multi_reduction <add>, %1260, %cst_341 [1] : vector<8x56xf32> to vector<8xf32>
    %1262 = vector.shape_cast %1261 : vector<8xf32> to vector<8x1xf32>
    %cst_342 = arith.constant 5.600000e+01 : f32
    %1263 = vector.broadcast %cst_342 : f32 to vector<8x1xf32>
    %1264 = arith.divf %1262, %1263 : vector<8x1xf32>
    %1265 = vector.broadcast %1257 : vector<8x1xf32> to vector<8x56xf32>
    %1266 = arith.subf %1253, %1265 : vector<8x56xf32>
    %cst_343 = arith.constant 9.99999974E-6 : f32
    %1267 = vector.broadcast %cst_343 : f32 to vector<8x1xf32>
    %1268 = arith.addf %1264, %1267 : vector<8x1xf32>
    %1269 = math.rsqrt %1268 : vector<8x1xf32>
    %1270 = vector.broadcast %1269 : vector<8x1xf32> to vector<8x56xf32>
    %1271 = arith.mulf %1266, %1270 : vector<8x56xf32>
    %1272 = vector.broadcast %1118 : vector<1x56xf32> to vector<8x56xf32>
    %1273 = arith.mulf %1271, %1272 : vector<8x56xf32>
    %1274 = vector.broadcast %1119 : vector<1x56xf32> to vector<8x56xf32>
    %1275 = arith.addf %1273, %1274 : vector<8x56xf32>
    %c5_344 = arith.constant 5 : index
    %c0_345 = arith.constant 0 : index
    %c0_346 = arith.constant 0 : index
    %1276 = vector.load %arg6[%c5_344, %c0_345, %c0_346] : memref<6x56x224xbf16, #tpu.memory_space<vmem>>, vector<1x56x224xbf16>
    %1277 = vector.shape_cast %1276 : vector<1x56x224xbf16> to vector<56x224xbf16>
    %1278 = arith.truncf %1275 : vector<8x56xf32> to vector<8x56xbf16>
    %cst_347 = arith.constant dense<0.000000e+00> : vector<8x224xf32>
    %1279 = tpu.matmul %1278, %1277, %cst_347 {dimension_numbers = #tpu.dot_dimension_numbers<[1], [0], [0], [1], [0, 0, 1, 1], [], []>} : vector<8x56xbf16>, vector<56x224xbf16>, vector<8x224xf32> -> vector<8x224xf32>
    %c5_348 = arith.constant 5 : index
    %c0_349 = arith.constant 0 : index
    %1280 = vector.load %arg7[%c5_348, %c0_349] : memref<6x224xf32, #tpu.memory_space<vmem>>, vector<1x224xf32>
    %1281 = vector.broadcast %1280 : vector<1x224xf32> to vector<8x224xf32>
    %1282 = arith.addf %1279, %1281 : vector<8x224xf32>
    %cst_350 = arith.constant 5.000000e-01 : f32
    %1283 = vector.broadcast %cst_350 : f32 to vector<8x224xf32>
    %1284 = arith.mulf %1283, %1282 : vector<8x224xf32>
    %cst_351 = arith.constant 0.707106769 : f32
    %1285 = vector.broadcast %cst_351 : f32 to vector<8x224xf32>
    %1286 = arith.mulf %1282, %1285 : vector<8x224xf32>
    %cst_352 = arith.constant 0.000000e+00 : f32
    %1287 = vector.broadcast %cst_352 : f32 to vector<8x224xf32>
    %1288 = arith.cmpf oge, %1286, %1287 : vector<8x224xf32>
    %cst_353 = arith.constant 1.000000e+00 : f32
    %cst_354 = arith.constant -1.000000e+00 : f32
    %1289 = vector.broadcast %cst_353 : f32 to vector<8x224xf32>
    %1290 = vector.broadcast %cst_354 : f32 to vector<8x224xf32>
    %1291 = arith.select %1288, %1289, %1290 : vector<8x224xi1>, vector<8x224xf32>
    %1292 = math.absf %1286 : vector<8x224xf32>
    %cst_355 = arith.constant 0.327591091 : f32
    %1293 = vector.broadcast %cst_355 : f32 to vector<8x224xf32>
    %1294 = arith.mulf %1293, %1292 : vector<8x224xf32>
    %cst_356 = arith.constant 1.000000e+00 : f32
    %1295 = vector.broadcast %cst_356 : f32 to vector<8x224xf32>
    %1296 = arith.addf %1295, %1294 : vector<8x224xf32>
    %cst_357 = arith.constant 1.000000e+00 : f32
    %1297 = vector.broadcast %cst_357 : f32 to vector<8x224xf32>
    %1298 = arith.divf %1297, %1296 : vector<8x224xf32>
    %cst_358 = arith.constant 1.06140542 : f32
    %1299 = vector.broadcast %cst_358 : f32 to vector<8x224xf32>
    %1300 = arith.mulf %1299, %1298 : vector<8x224xf32>
    %cst_359 = arith.constant -1.45315206 : f32
    %1301 = vector.broadcast %cst_359 : f32 to vector<8x224xf32>
    %1302 = arith.addf %1300, %1301 : vector<8x224xf32>
    %1303 = arith.mulf %1302, %1298 : vector<8x224xf32>
    %cst_360 = arith.constant 1.42141378 : f32
    %1304 = vector.broadcast %cst_360 : f32 to vector<8x224xf32>
    %1305 = arith.addf %1303, %1304 : vector<8x224xf32>
    %1306 = arith.mulf %1305, %1298 : vector<8x224xf32>
    %cst_361 = arith.constant -0.284496725 : f32
    %1307 = vector.broadcast %cst_361 : f32 to vector<8x224xf32>
    %1308 = arith.addf %1306, %1307 : vector<8x224xf32>
    %1309 = arith.mulf %1308, %1298 : vector<8x224xf32>
    %cst_362 = arith.constant 0.254829586 : f32
    %1310 = vector.broadcast %cst_362 : f32 to vector<8x224xf32>
    %1311 = arith.addf %1309, %1310 : vector<8x224xf32>
    %1312 = arith.mulf %1311, %1298 : vector<8x224xf32>
    %cst_363 = arith.constant 0.000000e+00 : f32
    %1313 = vector.broadcast %cst_363 : f32 to vector<8x224xf32>
    %1314 = arith.subf %1313, %1292 : vector<8x224xf32>
    %1315 = arith.mulf %1314, %1292 : vector<8x224xf32>
    %1316 = math.exp %1315 : vector<8x224xf32>
    %1317 = arith.mulf %1312, %1316 : vector<8x224xf32>
    %cst_364 = arith.constant 1.000000e+00 : f32
    %1318 = vector.broadcast %cst_364 : f32 to vector<8x224xf32>
    %1319 = arith.subf %1318, %1317 : vector<8x224xf32>
    %1320 = arith.mulf %1291, %1319 : vector<8x224xf32>
    %cst_365 = arith.constant 1.000000e+00 : f32
    %1321 = vector.broadcast %cst_365 : f32 to vector<8x224xf32>
    %1322 = arith.addf %1321, %1320 : vector<8x224xf32>
    %1323 = arith.mulf %1284, %1322 : vector<8x224xf32>
    %c5_366 = arith.constant 5 : index
    %c0_367 = arith.constant 0 : index
    %c0_368 = arith.constant 0 : index
    %1324 = vector.load %arg8[%c5_366, %c0_367, %c0_368] : memref<6x224x56xbf16, #tpu.memory_space<vmem>>, vector<1x224x56xbf16>
    %1325 = vector.shape_cast %1324 : vector<1x224x56xbf16> to vector<224x56xbf16>
    %1326 = arith.truncf %1323 : vector<8x224xf32> to vector<8x224xbf16>
    %cst_369 = arith.constant dense<0.000000e+00> : vector<8x56xf32>
    %1327 = tpu.matmul %1326, %1325, %cst_369 {dimension_numbers = #tpu.dot_dimension_numbers<[1], [0], [0], [1], [0, 0, 1, 1], [], []>} : vector<8x224xbf16>, vector<224x56xbf16>, vector<8x56xf32> -> vector<8x56xf32>
    %1328 = vector.broadcast %1121 : vector<1x56xf32> to vector<8x56xf32>
    %1329 = arith.addf %1327, %1328 : vector<8x56xf32>
    %1330 = arith.addf %1253, %1329 : vector<8x56xf32>
    %c0_370 = arith.constant 0 : index
    %c0_371 = arith.constant 0 : index
    %1331 = vector.load %arg13[%c0_370, %c0_371] : memref<7x56xf32, #tpu.memory_space<vmem>>, vector<7x56xf32>
    %c0_372 = arith.constant 0 : index
    %c0_373 = arith.constant 0 : index
    %1332 = vector.load %arg10[%c0_372, %c0_373] : memref<56x56xbf16, #tpu.memory_space<vmem>>, vector<56x56xbf16>
    %1333 = arith.truncf %1330 : vector<8x56xf32> to vector<8x56xbf16>
    %cst_374 = arith.constant dense<0.000000e+00> : vector<8x56xf32>
    %1334 = tpu.matmul %1333, %1332, %cst_374 {dimension_numbers = #tpu.dot_dimension_numbers<[1], [0], [0], [1], [0, 0, 1, 1], [], []>} : vector<8x56xbf16>, vector<56x56xbf16>, vector<8x56xf32> -> vector<8x56xf32>
    %1335 = vector.extract_strided_slice %1331 {offsets = [0, 0], sizes = [1, 56], strides = [1, 1]} : vector<7x56xf32> to vector<1x56xf32>
    %1336 = vector.broadcast %1335 : vector<1x56xf32> to vector<8x56xf32>
    %1337 = arith.addf %1334, %1336 : vector<8x56xf32>
    %1338 = vector.extract_strided_slice %1331 {offsets = [1, 0], sizes = [1, 56], strides = [1, 1]} : vector<7x56xf32> to vector<1x56xf32>
    %1339 = vector.extract_strided_slice %1331 {offsets = [2, 0], sizes = [1, 56], strides = [1, 1]} : vector<7x56xf32> to vector<1x56xf32>
    %cst_375 = arith.constant dense<0.000000e+00> : vector<8xf32>
    %1340 = vector.multi_reduction <add>, %1337, %cst_375 [1] : vector<8x56xf32> to vector<8xf32>
    %1341 = vector.shape_cast %1340 : vector<8xf32> to vector<8x1xf32>
    %cst_376 = arith.constant 5.600000e+01 : f32
    %1342 = vector.broadcast %cst_376 : f32 to vector<8x1xf32>
    %1343 = arith.divf %1341, %1342 : vector<8x1xf32>
    %1344 = vector.broadcast %1343 : vector<8x1xf32> to vector<8x56xf32>
    %1345 = arith.subf %1337, %1344 : vector<8x56xf32>
    %1346 = arith.mulf %1345, %1345 : vector<8x56xf32>
    %cst_377 = arith.constant dense<0.000000e+00> : vector<8xf32>
    %1347 = vector.multi_reduction <add>, %1346, %cst_377 [1] : vector<8x56xf32> to vector<8xf32>
    %1348 = vector.shape_cast %1347 : vector<8xf32> to vector<8x1xf32>
    %cst_378 = arith.constant 5.600000e+01 : f32
    %1349 = vector.broadcast %cst_378 : f32 to vector<8x1xf32>
    %1350 = arith.divf %1348, %1349 : vector<8x1xf32>
    %1351 = vector.broadcast %1343 : vector<8x1xf32> to vector<8x56xf32>
    %1352 = arith.subf %1337, %1351 : vector<8x56xf32>
    %cst_379 = arith.constant 9.99999974E-6 : f32
    %1353 = vector.broadcast %cst_379 : f32 to vector<8x1xf32>
    %1354 = arith.addf %1350, %1353 : vector<8x1xf32>
    %1355 = math.rsqrt %1354 : vector<8x1xf32>
    %1356 = vector.broadcast %1355 : vector<8x1xf32> to vector<8x56xf32>
    %1357 = arith.mulf %1352, %1356 : vector<8x56xf32>
    %1358 = vector.broadcast %1338 : vector<1x56xf32> to vector<8x56xf32>
    %1359 = arith.mulf %1357, %1358 : vector<8x56xf32>
    %1360 = vector.broadcast %1339 : vector<1x56xf32> to vector<8x56xf32>
    %1361 = arith.addf %1359, %1360 : vector<8x56xf32>
    %cst_380 = arith.constant 0.000000e+00 : f32
    %1362 = vector.broadcast %cst_380 : f32 to vector<8x56xf32>
    %1363 = arith.maximumf %1361, %1362 : vector<8x56xf32>
    %c0_381 = arith.constant 0 : index
    %c0_382 = arith.constant 0 : index
    %1364 = vector.load %arg11[%c0_381, %c0_382] : memref<56x28xbf16, #tpu.memory_space<vmem>>, vector<56x28xbf16>
    %1365 = arith.truncf %1363 : vector<8x56xf32> to vector<8x56xbf16>
    %cst_383 = arith.constant dense<0.000000e+00> : vector<8x28xf32>
    %1366 = tpu.matmul %1365, %1364, %cst_383 {dimension_numbers = #tpu.dot_dimension_numbers<[1], [0], [0], [1], [0, 0, 1, 1], [], []>} : vector<8x56xbf16>, vector<56x28xbf16>, vector<8x28xf32> -> vector<8x28xf32>
    %1367 = vector.extract_strided_slice %1331 {offsets = [3, 0], sizes = [1, 28], strides = [1, 1]} : vector<7x56xf32> to vector<1x28xf32>
    %1368 = vector.broadcast %1367 : vector<1x28xf32> to vector<8x28xf32>
    %1369 = arith.addf %1366, %1368 : vector<8x28xf32>
    %1370 = vector.extract_strided_slice %1331 {offsets = [4, 0], sizes = [1, 28], strides = [1, 1]} : vector<7x56xf32> to vector<1x28xf32>
    %1371 = vector.extract_strided_slice %1331 {offsets = [5, 0], sizes = [1, 28], strides = [1, 1]} : vector<7x56xf32> to vector<1x28xf32>
    %cst_384 = arith.constant dense<0.000000e+00> : vector<8xf32>
    %1372 = vector.multi_reduction <add>, %1369, %cst_384 [1] : vector<8x28xf32> to vector<8xf32>
    %1373 = vector.shape_cast %1372 : vector<8xf32> to vector<8x1xf32>
    %cst_385 = arith.constant 2.800000e+01 : f32
    %1374 = vector.broadcast %cst_385 : f32 to vector<8x1xf32>
    %1375 = arith.divf %1373, %1374 : vector<8x1xf32>
    %1376 = vector.broadcast %1375 : vector<8x1xf32> to vector<8x28xf32>
    %1377 = arith.subf %1369, %1376 : vector<8x28xf32>
    %1378 = arith.mulf %1377, %1377 : vector<8x28xf32>
    %cst_386 = arith.constant dense<0.000000e+00> : vector<8xf32>
    %1379 = vector.multi_reduction <add>, %1378, %cst_386 [1] : vector<8x28xf32> to vector<8xf32>
    %1380 = vector.shape_cast %1379 : vector<8xf32> to vector<8x1xf32>
    %cst_387 = arith.constant 2.800000e+01 : f32
    %1381 = vector.broadcast %cst_387 : f32 to vector<8x1xf32>
    %1382 = arith.divf %1380, %1381 : vector<8x1xf32>
    %1383 = vector.broadcast %1375 : vector<8x1xf32> to vector<8x28xf32>
    %1384 = arith.subf %1369, %1383 : vector<8x28xf32>
    %cst_388 = arith.constant 9.99999974E-6 : f32
    %1385 = vector.broadcast %cst_388 : f32 to vector<8x1xf32>
    %1386 = arith.addf %1382, %1385 : vector<8x1xf32>
    %1387 = math.rsqrt %1386 : vector<8x1xf32>
    %1388 = vector.broadcast %1387 : vector<8x1xf32> to vector<8x28xf32>
    %1389 = arith.mulf %1384, %1388 : vector<8x28xf32>
    %1390 = vector.broadcast %1370 : vector<1x28xf32> to vector<8x28xf32>
    %1391 = arith.mulf %1389, %1390 : vector<8x28xf32>
    %1392 = vector.broadcast %1371 : vector<1x28xf32> to vector<8x28xf32>
    %1393 = arith.addf %1391, %1392 : vector<8x28xf32>
    %cst_389 = arith.constant 0.000000e+00 : f32
    %1394 = vector.broadcast %cst_389 : f32 to vector<8x28xf32>
    %1395 = arith.maximumf %1393, %1394 : vector<8x28xf32>
    %c0_390 = arith.constant 0 : index
    %c0_391 = arith.constant 0 : index
    %1396 = vector.load %arg12[%c0_390, %c0_391] : memref<28x1xbf16, #tpu.memory_space<vmem>>, vector<28x1xbf16>
    %1397 = arith.truncf %1395 : vector<8x28xf32> to vector<8x28xbf16>
    %cst_392 = arith.constant dense<0.000000e+00> : vector<8x1xf32>
    %1398 = tpu.matmul %1397, %1396, %cst_392 {dimension_numbers = #tpu.dot_dimension_numbers<[1], [0], [0], [1], [0, 0, 1, 1], [], []>} : vector<8x28xbf16>, vector<28x1xbf16>, vector<8x1xf32> -> vector<8x1xf32>
    %1399 = vector.extract_strided_slice %1331 {offsets = [6, 0], sizes = [1, 1], strides = [1, 1]} : vector<7x56xf32> to vector<1x1xf32>
    %1400 = vector.broadcast %1399 : vector<1x1xf32> to vector<8x1xf32>
    %1401 = arith.addf %1398, %1400 : vector<8x1xf32>
    %1402 = arith.negf %1401 : vector<8x1xf32>
    %1403 = math.exp %1402 : vector<8x1xf32>
    %cst_393 = arith.constant 1.000000e+00 : f32
    %1404 = vector.broadcast %cst_393 : f32 to vector<8x1xf32>
    %1405 = arith.addf %1404, %1403 : vector<8x1xf32>
    %1406 = arith.divf %1404, %1405 : vector<8x1xf32>
    %c0_394 = arith.constant 0 : index
    %c0_395 = arith.constant 0 : index
    %1407 = vector.load %arg14[%c0_394, %c0_395] : memref<8x1xf32, #tpu.memory_space<vmem>>, vector<8x1xf32>
    tpu.vector_store %arg14[%c0_394, %c0_395], %1406 {strides = array<i32>} : memref<8x1xf32, #tpu.memory_space<vmem>>, vector<8x1xf32>,
    return
  }
}

</mosaic_0001>

<bundles_post_ra>
// kernel: tpu_custom_call.1
= control target key start
LH: loop header
LB: loop body
LE: loop exit
PB: predicated region body
PF: predicated region fallthrough
CT: control target
= control target key end

     0   :  { %v9718_v0 = vmov 0.0   ;;  %vm9719_vm0 = vmmov 0   ;;  %vm87_vm1 = vcmask 1043456   ;;  %vm83_vm2 = vcmask 457728   ;;  %s11977_s23 = smov 121   ;;  %s11979_s24 = smov 72   ;;  %s11936_s1 = inlined_call_operand.vmem [shape: bf16[2,56,56], index: 1, kind: input, shape index: {}]   ;;  %s11937_s0 = inlined_call_operand.vmem [shape: f32[8,56], index: 0, kind: input, shape index: {}]   ;;  %s11938_s2 = inlined_call_operand.vmem [shape: f32[2,56], index: 2, kind: input, shape index: {}]   ;;  %s11939_s3 = inlined_call_operand.vmem [shape: bf16[6,168,56], index: 3, kind: input, shape index: {}]   ;;  %s11940_s9 = inlined_call_operand.vmem [shape: f32[6,6,56], index: 9, kind: input, shape index: {}]   ;;  %s11941_s4 = inlined_call_operand.vmem [shape: f32[6,168], index: 4, kind: input, shape index: {}]   ;;  %s11942_s5 = inlined_call_operand.vmem [shape: bf16[6,56,56], index: 5, kind: input, shape index: {}]   ;;  %s11943_s6 = inlined_call_operand.vmem [shape: bf16[6,56,224], index: 6, kind: input, shape index: {}]   ;;  %s11944_s8 = inlined_call_operand.vmem [shape: bf16[6,224,56], index: 8, kind: input, shape index: {}]   ;;  %s11945_s7 = inlined_call_operand.vmem [shape: f32[6,224], index: 7, kind: input, shape index: {}]   ;;  %s11946_s10 = inlined_call_operand.vmem [shape: bf16[56,56], index: 10, kind: input, shape index: {}]   ;;  %s11947_s13 = inlined_call_operand.vmem [shape: f32[7,56], index: 13, kind: input, shape index: {}]   ;;  %s11948_s11 = inlined_call_operand.vmem [shape: bf16[56,28], index: 11, kind: input, shape index: {}]   ;;  %s11949_s12 = inlined_call_operand.vmem [shape: bf16[28,1], index: 12, kind: input, shape index: {}]   ;;  %s11950_s14 = inlined_call_operand.vmem [shape: f32[8,1], index: 14, kind: output, shape index: {}]  }
   0x1   :  { %11991 = sst [smem:[#allocation2_spill]] %s11942_s5  ;;  %8685 = vmatprep.subr.bf16.mxu0 %v9718_v0  ;;  %v9187_v1 = vld [vmem:[%s11936_s1] sm:$0xff]   ;;  %8693 = vmatprep.mubr.msk.bf16.mxu0 %vm9719_vm0, %v9718_v0  ;;  %v9188_v2 = vld [vmem:[%s11936_s1 + $0x8] sm:$0xff]   ;;  %v9189_v4 = vld [vmem:[%s11936_s1 + $0x10] sm:$0xff]   ;;  %v9720_v27 = vmov 0   ;;  %v212_v57 = vlaneseq  ;;  %s11959_s25 = smov 37  }
   0x2   :  { %11992 = sst [smem:[#allocation3_spill]] %s11946_s10  ;;  %8697 = vmatprep.subr.bf16.mxu1 %v9718_v0  ;;  %8705 = vmatprep.mubr.msk.bf16.mxu1 %vm9719_vm0, %v9718_v0  ;;  %v9191_v3 = vld [vmem:[%s11936_s1 + $0x1c] sm:$0xff]   ;;  %v9192_v5 = vld [vmem:[%s11936_s1 + $0x24] sm:$0xff]   ;;  %v9190_v6 = vld [vmem:[%s11936_s1 + $0x18] ss:$0 sps:$4 sm:$0xff]   ;;  %s11981_s26 = smov 65  }
   0x3   :  { %11993 = sst [smem:[#allocation4_spill]] %s11947_s13  ;;  %8686 = vmatpush3.bf16.msra.mxu0 %v9187_v1  ;;  %8698 = vmatpush3.bf16.msra.mxu1 %v9191_v3  ;;  %v48_v7 = vld [vmem:[%s11937_s0] sm:$0xff]  ;;  %v9193_v8 = vld [vmem:[%s11936_s1 + $0x2c] sm:$0xff]   ;;  %v89_v9 = vsel %vm87_vm1, %v9190_v6, 0  ;;  %v9194_v11 = vld [vmem:[%s11936_s1 + $0x34] ss:$0 sps:$4 sm:$0xff]  }
   0x4   :  { %11994 = sst [smem:[#allocation5_spill]] %s11948_s11  ;;  %8687 = vmatprep.subr.bf16.mxu0 %v9718_v0  ;;  %8699 = vmatprep.subr.bf16.mxu1 %v9718_v0  ;;  %v56_v10 = vpack.c.bf16 %v48_v7, %v48_v7  ;;  %v170_v12 = vsel %vm87_vm1, %v9194_v11, 0  ;;  %v7819_v13 = vld [vmem:[%s11938_s2] ss:$0 sm:$0xff]  ;;  %v7832_v20 = vld [vmem:[%s11938_s2 + $0x1] ss:$0 sm:$0xff] }
   0x5   :  { %11995 = sst [smem:[#allocation6_spill]] %s11949_s12  ;;  %v9195_v28 = vld [vmem:[%s11939_s3] sm:$0xff]   ;;  %v9196_v29 = vld [vmem:[%s11939_s3 + $0x8] sm:$0xff]   ;;  %v9197_v31 = vld [vmem:[%s11939_s3 + $0x10] sm:$0xff]   ;;  %v9928_v59 = vshrl.u32 %v212_v57, 7  ;;  %s11955_s27 = smov 30  }
   0x6   :  { %11996 = sst [smem:[#allocation7_spill]] %s11950_s14  ;;  %v339_v30 = vsel %vm83_vm2, %v9195_v28, 0  ;;  %v9198_v32 = vld [vmem:[%s11939_s3 + $0x18] sm:$0xff]   ;;  %v9199_v33 = vld [vmem:[%s11939_s3 + $0x20] sm:$0xff]   ;;  %v9200_v34 = vld [vmem:[%s11939_s3 + $0x28] sm:$0xff]   ;;  %v342_v35 = vsel %vm83_vm2, %v9196_v29, 0 }
   0x7   :  { %8688 = vmatpush3.bf16.msra.mxu0 %v9188_v2  ;;  %8700 = vmatpush3.bf16.msra.mxu1 %v9192_v5  ;;  %v345_v36 = vsel %vm83_vm2, %v9197_v31, 0  ;;  %v348_v37 = vsel %vm83_vm2, %v9198_v32, 0  ;;  %v351_v38 = vsel %vm83_vm2, %v9199_v33, 0  ;;  %v354_v39 = vsel %vm83_vm2, %v9200_v34, 0  ;;  %v9201_v40 = vld [vmem:[%s11939_s3 + $0x30] sm:$0xff]   ;;  %v9202_v42 = vld [vmem:[%s11939_s3 + $0x38] sm:$0xff]  }
   0x8   :  { %8689 = vmatprep.subr.bf16.mxu0 %v9718_v0  ;;  %8701 = vmatprep.subr.bf16.mxu1 %v9718_v0  ;;  %v357_v41 = vsel %vm83_vm2, %v9201_v40, 0  ;;  %v360_v43 = vsel %vm83_vm2, %v9202_v42, 0  ;;  %v9203_v49 = vld [vmem:[%s11939_s3 + $0x40] sm:$0xff]   ;;  %v9204_v51 = vld [vmem:[%s11939_s3 + $0x48] sm:$0xff]   ;;  %v9205_v53 = vld [vmem:[%s11939_s3 + $0x50] ss:$0 sps:$4 sm:$0xff]  }
   0x9   :  { %v363_v50 = vsel %vm83_vm2, %v9203_v49, 0  ;;  %v366_v52 = vsel %vm83_vm2, %v9204_v51, 0  ;;  %v369_v54 = vsel %vm83_vm2, %v9205_v53, 0  ;;  %v9931_v60 = vsub.s32 0, %v9928_v59  ;;  %v9936_v61 = vld [vmem:[%s11940_s9] sm:$0x3f] }
   0xa   :  { %v9939_v62 = vsub.s32 1, %v9928_v59  ;;  %v9950_v7 = vld [vmem:[%s11941_s4] ss:$8 sm:$0x3]  ;;  %s11975_s28 = smov 58   ;;  %s11961_s0 = smov 23  }
   0xb   :  { %8690 = vmatpush3.bf16.msra.mxu0 %v9189_v4  ;;  %8702 = vmatpush3.bf16.msra.mxu1 %v9193_v8  ;;  %v241_v63 = vrot.slane %v9936_v61, %v9931_v60  ;;  %v275_v8 = vrot.slane %v9950_v7, %v9931_v60  ;;  %s11973_s29 = smov 114   ;;  %s11971_s30 = smov 51   ;;  %vm417_vm3 = vcmask 56320   ;;  %vm814_vm4 = vcmask 64512  }
   0xc   :  { %8691 = vmatprep.subr.bf16.mxu0 %v9718_v0  ;;  %8703 = vmatprep.subr.bf16.mxu1 %v9718_v0  ;;  %v246_v3 = vrot.slane %v9936_v61, %v9939_v62  ;;  %s11969_s15 = smov 107   ;;  %s11963_s1 = smov 44   ;;  %vm912_vm5 = vcmask 130048   ;;  %vm1421_vm11 = vcmask 785408  }
   0xd   :  { %s11967_s16 = smov 100   ;;  %s11965_s17 = smov 93  }
   0xe   :  { %s11953_s18 = smov 86   ;;  %s11957_s2 = smov 79  }
   0xf   :  { %8692 = vmatpush3.bf16.msra.mxu0 %v89_v9  ;;  %8704 = vmatpush3.bf16.msra.mxu1 %v170_v12  ;;  %s11951_s19 = smov 16   ;;  %s12002_s21 = smov 86  }
  0x10   :  { %8709 = vmatprep.subr.bf16.mxu1 %v9718_v0  ;;  %371 = vmatprep.subr.bf16.mxu0 %v9720_v27  ;;  %s12003_s22 = smov 16   ;;  %s12011_s12 = smov 65  }
  0x11   :  { %s12012_s14 = smov 72   ;;  %s12014_s11 = sld [smem:[#allocation2_spill]] }
  0x12   :  { %8694 = vmatmul.mubr.msk.bf16.vlgmr.msra.gmra.mrb[0].mxu0 %vm83_vm2, %v56_v10 }
  0x13   :  { %403 = vmatprep.mubr.bf16.mxu0 %v9720_v27 }
  0x18   :  { %372 = vmatpush1.bf16.xpose.msra.mxu0 %v339_v30 }
  0x19   :  { %373 = vmatprep.subr.bf16.mxu0 %v9720_v27 }
  0x20   :  { %374 = vmatpush1.bf16.xpose.msra.mxu0 %v342_v35 }
  0x21   :  { %375 = vmatprep.subr.bf16.mxu0 %v9720_v27 }
  0x28   :  { %376 = vmatpush1.bf16.xpose.msra.mxu0 %v345_v36 }
  0x29   :  { %377 = vmatprep.subr.bf16.mxu0 %v9720_v27 }
  0x30   :  { %378 = vmatpush1.bf16.xpose.msra.mxu0 %v348_v37 }
  0x31   :  { %379 = vmatprep.subr.bf16.mxu0 %v9720_v27 }
  0x38   :  { %380 = vmatpush1.bf16.xpose.msra.mxu0 %v351_v38 }
  0x39   :  { %381 = vmatprep.subr.bf16.mxu0 %v9720_v27 }
  0x40   :  { %382 = vmatpush1.bf16.xpose.msra.mxu0 %v354_v39 }
  0x41   :  { %383 = vmatprep.subr.bf16.mxu0 %v9720_v27 }
  0x48   :  { %384 = vmatpush1.bf16.xpose.msra.mxu0 %v357_v41 }
  0x49   :  { %385 = vmatprep.subr.bf16.mxu0 %v9720_v27 }
  0x50   :  { %386 = vmatpush1.bf16.xpose.msra.mxu0 %v360_v43 }
  0x51   :  { %387 = vmatprep.subr.bf16.mxu0 %v9720_v27 }
  0x58   :  { %388 = vmatpush1.bf16.xpose.msra.mxu0 %v363_v50 }
  0x59   :  { %389 = vmatprep.subr.bf16.mxu0 %v9720_v27 }
  0x60   :  { %390 = vmatpush1.bf16.xpose.msra.mxu0 %v366_v52 }
  0x61   :  { %391 = vmatprep.subr.bf16.mxu0 %v9720_v27 }
  0x68   :  { %392 = vmatpush1.bf16.xpose.msra.mxu0 %v369_v54 }
  0xe5   :  { %v125_v14 = vpop.f32.mrb[0].mxu0 }
  0xe6   :  { %v126_v15 = vadd.f32 %v7819_v13, %v125_v14  ;;  %v8695_v16 = vpop.f32.mrb[1].mxu0 }
  0xe7   :  { %v128_v17 = vpop.f32.mrb[2].mxu0 }
  0xe8   :  { %v139_v18 = vpack.c.bf16 %v126_v15, %v126_v15  ;;  %v8696_v19 = vpop.f32.mrb[3].mxu0 }
  0xea   :  { %8706 = vmatmul.mubr.msk.bf16.vlgmr.msra.gmra.mrb[0].mxu1 %vm83_vm2, %v139_v18 }
  0xeb   :  { %8711 = vmatprep.mubr.msk.bf16.mxu1 %vm9719_vm0, %v9718_v0 }
 0x1bd   :  { %v206_v21 = vpop.f32.mrb[0].mxu1 }
 0x1be   :  { %v9865_v22 = vadd.f32 %v7832_v20, %v206_v21  ;;  %v8707_v23 = vpop.f32.mrb[1].mxu1 }
 0x1bf   :  { %v209_v24 = vpop.f32.mrb[2].mxu1 }
 0x1c0   :  { %v8708_v25 = vpop.f32.mrb[3].mxu1  ;;  %v224_v26 = vsel %vm83_vm2, %v9865_v22, 0.0 }
 0x1c1   :  { %225 = vadd.xlane.f32.xlu0 %v224_v26 }
 0x24e   :  { %v226_v44 = vpop.xlane.xlu0 %225 }
 0x24f   :  { %v228_v45 = vmul.f32 0.017857144, %v226_v44 }
 0x251   :  { %v229_v46 = vsub.f32 %v9865_v22, %v228_v45 }
 0x253   :  { %v230_v47 = vmul.f32 %v229_v46, %v229_v46 }
 0x255   :  { %v231_v48 = vsel %vm83_vm2, %v230_v47, 0.0 }
 0x256   :  { %232 = vadd.xlane.f32.xlu0 %v231_v48 }
 0x2e3   :  { %v233_v55 = vpop.xlane.xlu0 %232 }
 0x2e4   :  { %v234_v56 = vmul.f32 0.017857144, %v233_v55 }
 0x2e6   :  { %v235_v58 = vadd.f32 1e-05, %v234_v56 }
 0x2e8   :  { %9445 = vrsqrt.f32 %v235_v58 }
 0x2f2   :  { %v9446_v1 = vpop.eup %9445 }
 0x2f3   :  { %v237_v2 = vmul.f32 %v9446_v1, %v229_v46 }
 0x2f5   :  { %v242_v4 = vmul.f32 %v241_v63, %v237_v2 }
 0x2f7   :  { %v247_v5 = vadd.f32 %v246_v3, %v242_v4 }
 0x2f9   :  { %v269_v6 = vpack.c.bf16 %v247_v5, %v247_v5 }
 0x2fb   :  { %7849 = vmatmul.mubr.msk.bf16.vlgmr.msra.gmra.mrb[4].mxu0 %vm83_vm2, %v269_v6 }
 0x2fc   :  { %1240 = vmatprep.mubr.bf16.mxu0 %v9720_v27 }
 0x3ce   :  { %v405_v9 = vpop.f32.mrb[4].mxu0 }
 0x3cf   :  { %v406_v10 = vadd.f32 %v405_v9, %v275_v8  ;;  %v9954_v11 = vpop.f32.mrb[5].mxu0 }
 0x3d0   :  { %v409_v12 = vpop.f32.mrb[6].mxu0 }
 0x3d1   :  { %v9956_v13 = vpack.c.bf16 %v406_v10, %v406_v10  ;;  %v410_v14 = vpop.f32.mrb[7].mxu0 }
 0x3d3   :  { %464 = vrot.lane.b32.xlu0 %v9956_v13, %s11977_s23  ;;  %415 = vrot.lane.b32.xlu1 %v9956_v13, %s11979_s24 }
 0x3d7   :  { %666 = vrot.lane.b32.xlu0 %v9956_v13, %s11959_s25  ;;  %466 = vrot.lane.b32.xlu1 %v9956_v13, %s11981_s26  ;;  %s11999_s25 = smov 37  }
 0x3db   :  { %716 = vrot.lane.b32.xlu0 %v9956_v13, %s11955_s27  ;;  %516 = vrot.lane.b32.xlu1 %v9956_v13, %s11975_s28  ;;  %s12020_s27 = sld [smem:[#allocation6_spill]] }
 0x3df   :  { %766 = vrot.lane.b32.xlu0 %v9956_v13, %s11961_s0  ;;  %514 = vrot.lane.b32.xlu1 %v9956_v13, %s11973_s29  ;;  %s12000_s0 = smov 79  }
 0x3e3   :  { %566 = vrot.lane.b32.xlu1 %v9956_v13, %s11971_s30 }
 0x3e7   :  { %564 = vrot.lane.b32.xlu1 %v9956_v13, %s11969_s15 }
 0x3eb   :  { %616 = vrot.lane.b32.xlu1 %v9956_v13, %s11963_s1  ;;  %s12001_s1 = smov 30  }
 0x3ef   :  { %614 = vrot.lane.b32.xlu1 %v9956_v13, %s11967_s16 }
 0x3f3   :  { %664 = vrot.lane.b32.xlu1 %v9956_v13, %s11965_s17 }
 0x3f7   :  { %714 = vrot.lane.b32.xlu1 %v9956_v13, %s11953_s18  ;;  %s12017_s18 = sld [smem:[#allocation3_spill]] }
 0x3fb   :  { %764 = vrot.lane.b32.xlu1 %v9956_v13, %s11957_s2  ;;  %s11997_s2 = smov 44  }
 0x445   :  { %v416_v15 = vpop.permute.xlu1 %415  ;;  %v465_v21 = vpop.permute.xlu0 %464 }
 0x446   :  { %v422_v16 = vsel %vm417_vm3, %v416_v15, 0 }
 0x447   :  { %8710 = vmatpush3.bf16.xpose.msra.mxu1 %v422_v16 }
 0x448   :  { %8715 = vmatprep.subr.bf16.mxu1 %v9718_v0 }
 0x449   :  { %v467_v17 = vpop.permute.xlu1 %466  ;;  %v667_v30 = vpop.permute.xlu0 %666 }
 0x44a   :  { %v472_v19 = vsel %vm417_vm3, %v467_v17, 0  ;;  %v672_v32 = vsel %vm417_vm3, %v667_v30, 0 }
 0x44d   :  { %v517_v18 = vpop.permute.xlu1 %516  ;;  %v717_v33 = vpop.permute.xlu0 %716 }
 0x44e   :  { %8712 = vmatmul.mubr.msk.bf16.vlgmr.msra.gmra.mrb[4].mxu1 %vm417_vm3, %v9956_v13  ;;  %v522_v23 = vsel %vm417_vm3, %v517_v18, 0  ;;  %v722_v35 = vsel %vm417_vm3, %v717_v33, 0 }
 0x44f   :  { %8716 = vmatpush3.bf16.xpose.msra.mxu1 %v472_v19  ;;  %8717 = vmatprep.mubr.msk.bf16.mxu1 %vm9719_vm0, %v9718_v0 }
 0x450   :  { %8721 = vmatprep.subr.bf16.mxu1 %v9718_v0 }
 0x451   :  { %v515_v20 = vpop.permute.xlu1 %514  ;;  %v767_v36 = vpop.permute.xlu0 %766 }
 0x452   :  { %v772_v38 = vsel %vm417_vm3, %v767_v36, 0 }
 0x455   :  { %v567_v24 = vpop.permute.xlu1 %566 }
 0x456   :  { %8718 = vmatmul.mubr.msk.bf16.vlgmr.msra.gmra.mrb[8].mxu1 %vm417_vm3, %v465_v21  ;;  %v572_v26 = vsel %vm417_vm3, %v567_v24, 0 }
 0x457   :  { %8722 = vmatpush3.bf16.xpose.msra.mxu1 %v522_v23  ;;  %8723 = vmatprep.mubr.msk.bf16.mxu1 %vm9719_vm0, %v9718_v0 }
 0x458   :  { %8727 = vmatprep.subr.bf16.mxu1 %v9718_v0 }
 0x459   :  { %v565_v25 = vpop.permute.xlu1 %564 }
 0x45d   :  { %v617_v28 = vpop.permute.xlu1 %616 }
 0x45e   :  { %8724 = vmatmul.mubr.msk.bf16.vlgmr.msra.gmra.mrb[12].mxu1 %vm417_vm3, %v515_v20  ;;  %v622_v29 = vsel %vm417_vm3, %v617_v28, 0 }
 0x45f   :  { %8728 = vmatpush3.bf16.xpose.msra.mxu1 %v572_v26  ;;  %8729 = vmatprep.mubr.msk.bf16.mxu1 %vm9719_vm0, %v9718_v0 }
 0x460   :  { %8733 = vmatprep.subr.bf16.mxu1 %v9718_v0 }
 0x461   :  { %v615_v31 = vpop.permute.xlu1 %614 }
 0x465   :  { %v665_v34 = vpop.permute.xlu1 %664 }
 0x466   :  { %8730 = vmatmul.mubr.msk.bf16.vlgmr.msra.gmra.mrb[16].mxu1 %vm417_vm3, %v565_v25 }
 0x467   :  { %8734 = vmatpush3.bf16.xpose.msra.mxu1 %v622_v29  ;;  %8735 = vmatprep.mubr.msk.bf16.mxu1 %vm9719_vm0, %v9718_v0 }
 0x468   :  { %8739 = vmatprep.subr.bf16.mxu1 %v9718_v0 }
 0x469   :  { %v715_v37 = vpop.permute.xlu1 %714 }
 0x46d   :  { %v765_v39 = vpop.permute.xlu1 %764 }
 0x46e   :  { %8736 = vmatmul.mubr.msk.bf16.vlgmr.msra.gmra.mrb[20].mxu1 %vm417_vm3, %v615_v31 }
 0x46f   :  { %8740 = vmatpush3.bf16.xpose.msra.mxu1 %v672_v32  ;;  %8741 = vmatprep.mubr.msk.bf16.mxu1 %vm9719_vm0, %v9718_v0 }
 0x470   :  { %8745 = vmatprep.subr.bf16.mxu1 %v9718_v0 }
 0x476   :  { %8742 = vmatmul.mubr.msk.bf16.vlgmr.msra.gmra.mrb[24].mxu1 %vm417_vm3, %v665_v34 }
 0x477   :  { %8746 = vmatpush3.bf16.xpose.msra.mxu1 %v722_v35  ;;  %8747 = vmatprep.mubr.msk.bf16.mxu1 %vm9719_vm0, %v9718_v0 }
 0x478   :  { %8751 = vmatprep.subr.bf16.mxu1 %v9718_v0 }
 0x47e   :  { %8748 = vmatmul.mubr.msk.bf16.vlgmr.msra.gmra.mrb[28].mxu1 %vm417_vm3, %v715_v37 }
 0x47f   :  { %8752 = vmatpush3.bf16.xpose.msra.mxu1 %v772_v38  ;;  %8753 = vmatprep.mubr.msk.bf16.mxu1 %vm9719_vm0, %v9718_v0 }
 0x486   :  { %8754 = vmatmul.mubr.msk.bf16.vlgmr.msra.gmra.mrb[32].mxu1 %vm417_vm3, %v765_v39 }
 0x521   :  { %v458_v40 = vpop.f32.mrb[4].mxu1 }
 0x522   :  { %v8713_v41 = vpop.f32.mrb[5].mxu1  ;;  %v815_v42 = vsel %vm814_vm4, %v458_v40, -inf }
 0x523   :  { %816 = vmax.xlane.f32.xlu0 %v815_v42  ;;  %v461_v43 = vpop.f32.mrb[6].mxu1 }
 0x524   :  { %v8714_v44 = vpop.f32.mrb[7].mxu1 }
 0x529   :  { %v508_v45 = vpop.f32.mrb[8].mxu1 }
 0x52a   :  { %v8719_v46 = vpop.f32.mrb[9].mxu1  ;;  %v818_v47 = vsel %vm814_vm4, %v508_v45, -inf }
 0x52b   :  { %819 = vmax.xlane.f32.xlu1 %v818_v47  ;;  %v511_v48 = vpop.f32.mrb[10].mxu1 }
 0x52c   :  { %v8720_v49 = vpop.f32.mrb[11].mxu1 }
 0x531   :  { %v558_v50 = vpop.f32.mrb[12].mxu1 }
 0x532   :  { %v8725_v51 = vpop.f32.mrb[13].mxu1  ;;  %v821_v52 = vsel %vm814_vm4, %v558_v50, -inf }
 0x533   :  { %822 = vmax.xlane.f32.xlu0 %v821_v52  ;;  %v561_v53 = vpop.f32.mrb[14].mxu1 }
 0x534   :  { %v8726_v54 = vpop.f32.mrb[15].mxu1 }
 0x539   :  { %v608_v55 = vpop.f32.mrb[16].mxu1 }
 0x53a   :  { %v8731_v56 = vpop.f32.mrb[17].mxu1  ;;  %v824_v58 = vsel %vm814_vm4, %v608_v55, -inf }
 0x53b   :  { %825 = vmax.xlane.f32.xlu0 %v824_v58  ;;  %v611_v63 = vpop.f32.mrb[18].mxu1 }
 0x53c   :  { %v8732_v1 = vpop.f32.mrb[19].mxu1 }
 0x541   :  { %v658_v2 = vpop.f32.mrb[20].mxu1 }
 0x542   :  { %v8737_v3 = vpop.f32.mrb[21].mxu1  ;;  %v827_v4 = vsel %vm814_vm4, %v658_v2, -inf }
 0x543   :  { %828 = vmax.xlane.f32.xlu1 %v827_v4  ;;  %v661_v5 = vpop.f32.mrb[22].mxu1 }
 0x544   :  { %v8738_v6 = vpop.f32.mrb[23].mxu1 }
 0x549   :  { %v708_v8 = vpop.f32.mrb[24].mxu1 }
 0x54a   :  { %v8743_v9 = vpop.f32.mrb[25].mxu1  ;;  %v830_v10 = vsel %vm814_vm4, %v708_v8, -inf }
 0x54b   :  { %831 = vmax.xlane.f32.xlu0 %v830_v10  ;;  %v711_v12 = vpop.f32.mrb[26].mxu1  ;;  %v279_v10 = vrot.slane %v9950_v7, %v9939_v62 }
 0x54c   :  { %v8744_v14 = vpop.f32.mrb[27].mxu1 }
 0x54d   :  { %v408_v12 = vadd.f32 %v9954_v11, %v279_v10 }
 0x54f   :  { %v413_v14 = vpack.c.bf16 %v408_v12, %v408_v12  ;;  %v10107_v12 = vsub.s32 5, %v9928_v59 }
 0x551   :  { %v758_v15 = vpop.f32.mrb[28].mxu1 }
 0x552   :  { %v8749_v16 = vpop.f32.mrb[29].mxu1  ;;  %v833_v17 = vsel %vm814_vm4, %v758_v15, -inf }
 0x553   :  { %834 = vmax.xlane.f32.xlu1 %v833_v17  ;;  %v761_v18 = vpop.f32.mrb[30].mxu1 }
 0x554   :  { %v8750_v19 = vpop.f32.mrb[31].mxu1 }
 0x559   :  { %v808_v20 = vpop.f32.mrb[32].mxu1 }
 0x55a   :  { %v8755_v21 = vpop.f32.mrb[33].mxu1  ;;  %v836_v23 = vsel %vm814_vm4, %v808_v20, -inf }
 0x55b   :  { %837 = vmax.xlane.f32.xlu0 %v836_v23  ;;  %v811_v24 = vpop.f32.mrb[34].mxu1 }
 0x55c   :  { %v8756_v25 = vpop.f32.mrb[35].mxu1 }
 0x5b0   :  { %v817_v26 = vpop.xlane.xlu0 %816 }
 0x5b1   :  { %v839_v28 = vsub.f32 %v458_v40, %v817_v26 }
 0x5b3   :  { %v847_v29 = vmul.f32 1.442695, %v839_v28 }
 0x5b5   :  { %9447 = vpow2.f32 %v847_v29 }
 0x5b8   :  { %v820_v30 = vpop.xlane.xlu1 %819 }
 0x5b9   :  { %v840_v31 = vsub.f32 %v508_v45, %v820_v30 }
 0x5bb   :  { %v849_v32 = vmul.f32 1.442695, %v840_v31 }
 0x5bd   :  { %9449 = vpow2.f32 %v849_v32 }
 0x5bf   :  { %v9448_v33 = vpop.eup %9447 }
 0x5c0   :  { %v823_v34 = vpop.xlane.xlu0 %822  ;;  %v863_v35 = vsel %vm814_vm4, %v9448_v33, 0.0 }
 0x5c1   :  { %v841_v36 = vsub.f32 %v558_v50, %v823_v34  ;;  %864 = vadd.xlane.f32.xlu1 %v863_v35 }
 0x5c3   :  { %v851_v37 = vmul.f32 1.442695, %v841_v36 }
 0x5c5   :  { %9451 = vpow2.f32 %v851_v37 }
 0x5c7   :  { %v9450_v38 = vpop.eup %9449 }
 0x5c8   :  { %v826_v39 = vpop.xlane.xlu0 %825  ;;  %v866_v41 = vsel %vm814_vm4, %v9450_v38, 0.0 }
 0x5c9   :  { %v842_v42 = vsub.f32 %v608_v55, %v826_v39  ;;  %867 = vadd.xlane.f32.xlu0 %v866_v41 }
 0x5cb   :  { %v853_v40 = vmul.f32 1.442695, %v842_v42 }
 0x5cd   :  { %9453 = vpow2.f32 %v853_v40 }
 0x5cf   :  { %v10036_v43 = vpop.eup %9451 }
 0x5d0   :  { %v829_v44 = vpop.xlane.xlu1 %828  ;;  %v869_v45 = vsel %vm814_vm4, %v10036_v43, 0.0 }
 0x5d1   :  { %v843_v46 = vsub.f32 %v658_v2, %v829_v44  ;;  %870 = vadd.xlane.f32.xlu1 %v869_v45 }
 0x5d3   :  { %v855_v47 = vmul.f32 1.442695, %v843_v46 }
 0x5d5   :  { %9455 = vpow2.f32 %v855_v47  ;;  %v9207_v47 = vld [vmem:[%s11942_s5 + $0x8] sm:$0xff]  }
 0x5d7   :  { %v9454_v48 = vpop.eup %9453 }
 0x5d8   :  { %v832_v49 = vpop.xlane.xlu0 %831  ;;  %v872_v50 = vsel %vm814_vm4, %v9454_v48, 0.0 }
 0x5d9   :  { %v844_v51 = vsub.f32 %v708_v8, %v832_v49  ;;  %873 = vadd.xlane.f32.xlu0 %v872_v50  ;;  %v9209_v49 = vld [vmem:[%s11942_s5 + $0x18] ss:$0 sps:$4 sm:$0xff]  }
 0x5da   :  { %v1078_v50 = vsel %vm87_vm1, %v9209_v49, 0 }
 0x5db   :  { %v857_v52 = vmul.f32 1.442695, %v844_v51  ;;  %v218_v51 = vadd.s32 1, %v9928_v59 }
 0x5dd   :  { %9457 = vpow2.f32 %v857_v52  ;;  %v213_v52 = vand.u32 127, %v212_v57 }
 0x5df   :  { %v9456_v53 = vpop.eup %9455 }
 0x5e0   :  { %v835_v54 = vpop.xlane.xlu1 %834  ;;  %v875_v55 = vsel %vm814_vm4, %v9456_v53, 0.0 }
 0x5e1   :  { %v845_v56 = vsub.f32 %v758_v15, %v835_v54  ;;  %876 = vadd.xlane.f32.xlu1 %v875_v55  ;;  %v219_v54 = vmul.u32 7, %v218_v51  ;;  %v9213_v51 = vld [vmem:[%s11943_s6 + $0x10] ss:$8 sps:$4 sm:$0xff]  }
 0x5e3   :  { %v859_v58 = vmul.f32 1.442695, %v845_v56  ;;  %vm220_vm7 = vcmp.lt.s32.totalorder %v213_v52, %v219_v54  ;;  %v10084_v56 = vsub.s32 2, %v9928_v59  ;;  %v1150_v54 = vld [vmem:[%s11943_s6 + $0x30] sm:$0xff] }
 0x5e5   :  { %9459 = vpow2.f32 %v859_v58 }
 0x5e7   :  { %v9458_v63 = vpop.eup %9457 }
 0x5e8   :  { %v838_v1 = vpop.xlane.xlu0 %837  ;;  %v878_v2 = vsel %vm814_vm4, %v9458_v63, 0.0 }
 0x5e9   :  { %v846_v3 = vsub.f32 %v808_v20, %v838_v1  ;;  %879 = vadd.xlane.f32.xlu0 %v878_v2  ;;  %v10090_v1 = vsub.s32 3, %v9928_v59 }
 0x5eb   :  { %v861_v4 = vmul.f32 1.442695, %v846_v3 }
 0x5ed   :  { %9461 = vpow2.f32 %v861_v4 }
 0x5ef   :  { %v9460_v5 = vpop.eup %9459 }
 0x5f0   :  { %v881_v6 = vsel %vm814_vm4, %v9460_v5, 0.0 }
 0x5f1   :  { %882 = vadd.xlane.f32.xlu1 %v881_v6 }
 0x5f7   :  { %v9462_v8 = vpop.eup %9461 }
 0x5f8   :  { %v884_v9 = vsel %vm814_vm4, %v9462_v8, 0.0 }
 0x5f9   :  { %885 = vadd.xlane.f32.xlu0 %v884_v9 }
 0x602   :  { %908 = vrot.lane.b32.xlu1 %v9956_v13, %s11951_s19 }
 0x60f   :  { %910 = vrot.lane.b32.xlu0 %v413_v14, %s11951_s19  ;;  %s11998_s19 = smov 23  }
 0x64e   :  { %v865_v15 = vpop.xlane.xlu1 %864 }
 0x64f   :  { %9463 = vrcp.f32 %v865_v15 }
 0x656   :  { %v868_v16 = vpop.xlane.xlu0 %867 }
 0x657   :  { %9465 = vrcp.f32 %v868_v16  ;;  %v1031_v16 = vsub.s32 6, %v9928_v59 }
 0x659   :  { %v9464_v17 = vpop.eup %9463 }
 0x65a   :  { %v895_v19 = vmul.f32 %v9464_v17, %v9448_v33 }
 0x65e   :  { %v871_v23 = vpop.xlane.xlu1 %870 }
 0x661   :  { %v9466_v18 = vpop.eup %9465 }
 0x662   :  { %v896_v20 = vmul.f32 %v9466_v18, %v9450_v38 }
 0x664   :  { %v903_v21 = vpack.c.bf16 %v896_v20, %v895_v19 }
 0x666   :  { %8759 = vmatprep.mubr.msk.bf16.mxu1 %vm814_vm4, %v903_v21  ;;  %v874_v13 = vpop.xlane.xlu0 %873  ;;  %v1037_v21 = vsub.s32 7, %v9928_v59 }
 0x667   :  { %9467 = vrcp.f32 %v874_v13 }
 0x66e   :  { %v877_v7 = vpop.xlane.xlu1 %876 }
 0x671   :  { %v9468_v26 = vpop.eup %9467 }
 0x672   :  { %v898_v31 = vmul.f32 %v9468_v26, %v9454_v48  ;;  %v9208_v48 = vld [vmem:[%s11942_s5 + $0x10] sm:$0xff]  }
 0x676   :  { %v880_v24 = vpop.xlane.xlu0 %879 }
 0x677   :  { %9469 = vrcp.f32 %v880_v24 }
 0x678   :  { %9471 = vrcp.f32 %v871_v23 }
 0x679   :  { %9473 = vrcp.f32 %v877_v7 }
 0x67e   :  { %v883_v11 = vpop.xlane.xlu1 %882 }
 0x67f   :  { %9475 = vrcp.f32 %v883_v11 }
 0x681   :  { %v9470_v28 = vpop.eup %9469 }
 0x682   :  { %v9472_v29 = vpop.eup %9471  ;;  %v909_v32 = vpop.permute.xlu1 %908  ;;  %v900_v35 = vmul.f32 %v9470_v28, %v9458_v63 }
 0x683   :  { %v9474_v30 = vpop.eup %9473  ;;  %v897_v36 = vmul.f32 %v9472_v29, %v10036_v43  ;;  %v9206_v43 = vld [vmem:[%s11942_s5] sm:$0xff]  }
 0x684   :  { %v899_v38 = vmul.f32 %v9474_v30, %v9456_v53  ;;  %v216_v53 = vmul.u32 7, %v9928_v59 }
 0x685   :  { %v904_v39 = vpack.c.bf16 %v898_v31, %v897_v36 }
 0x686   :  { %v886_v25 = vpop.xlane.xlu0 %885  ;;  %v905_v41 = vpack.c.bf16 %v900_v35, %v899_v38  ;;  %vm217_vm6 = vcmp.ge.s32.totalorder %v213_v52, %v216_v53  ;;  %v9218_v52 = vld [vmem:[%s11943_s6 + $0x24] ss:$8 sps:$4 sm:$0xff]   ;;  %v9216_v53 = vld [vmem:[%s11943_s6 + $0x20] ss:$8 sps:$4 sm:$0xff]  }
 0x687   :  { %9477 = vrcp.f32 %v886_v25  ;;  %vm221_vm8 = vmand %vm217_vm6, %vm220_vm7 }
 0x688   :  { %v222_v55 = vsel %vm221_vm8, 1.0, %v9718_v0 }
 0x689   :  { %v9476_v42 = vpop.eup %9475  ;;  %v10087_v63 = vrot.slane %v222_v55, %v9931_v60  ;;  %v10093_v57 = vrot.slane %v222_v55, %v9939_v62  ;;  %v10096_v3 = vrot.slane %v222_v55, %v10084_v56  ;;  %v10103_v9 = vrot.slane %v222_v55, %v10090_v1 }
 0x68a   :  { %v911_v33 = vpop.permute.xlu0 %910  ;;  %v901_v45 = vmul.f32 %v9476_v42, %v9460_v5  ;;  %v10099_v5 = vsub.s32 4, %v9928_v59  ;;  %v10117_v13 = vrot.slane %v222_v55, %v10107_v12  ;;  %v10121_v24 = vrot.slane %v222_v55, %v1031_v16 }
 0x68b   :  { %v913_v34 = vsel %vm912_vm5, %v909_v32, %v911_v33  ;;  %v10124_v29 = vrot.slane %v222_v55, %v1037_v21 }
 0x68c   :  { %v927_v37 = vsel %vm87_vm1, %v913_v34, 0  ;;  %9161 = vmatprep.subr.msk.bf16.mxu1 %vm87_vm1, %v913_v34  ;;  %v10112_v17 = vrot.slane %v222_v55, %v10099_v5  ;;  %v7874_v55 = vcombine.high %v1150_v54, %v1150_v54 }
 0x68d   :  { %8758 = vmatpush3.bf16.msra.mxu1 %v927_v37  ;;  %v1052_v37 = vrot.slane %v9936_v61, %v10099_v5  ;;  %v9212_v61 = vld [vmem:[%s11943_s6 + $0x4] ss:$8 sps:$4 sm:$0xff]  }
 0x68e   :  { %8767 = vmatprep.subr.bf16.mxu1 %v9718_v0  ;;  %1208 = vmatprep.subr.bf16.mxu0 %v9212_v61 }
 0x690   :  { %8760 = vmatmul.mubr.msk.bf16.vlgmr.msra.gmra.mrb[36].mxu1 %vm814_vm4, %v904_v39 }
 0x691   :  { %v9478_v40 = vpop.eup %9477  ;;  %8763 = vmatprep.mubr.msk.bf16.mxu1 %vm814_vm4, %v905_v41  ;;  %8768 = vmatpush3.bf16.msra.mxu1 %v9206_v43 }
 0x692   :  { %v902_v44 = vmul.f32 %v9478_v40, %v9462_v8  ;;  %8769 = vmatprep.subr.bf16.mxu1 %v9718_v0 }
 0x694   :  { %v906_v46 = vpack.c.bf16 %v902_v44, %v901_v45 }
 0x695   :  { %8770 = vmatpush3.bf16.msra.mxu1 %v9207_v47 }
 0x696   :  { %8771 = vmatprep.subr.bf16.mxu1 %v9718_v0 }
 0x698   :  { %8764 = vmatmul.mubr.msk.bf16.gmra.mrb[40].mxu1 %vm814_vm4, %v906_v46 }
 0x699   :  { %8775 = vmatprep.mubr.msk.bf16.mxu1 %vm9719_vm0, %v9718_v0  ;;  %8772 = vmatpush3.bf16.msra.mxu1 %v9208_v48 }
 0x69a   :  { %8773 = vmatprep.subr.bf16.mxu1 %v9718_v0 }
 0x69d   :  { %8774 = vmatpush3.bf16.msra.mxu1 %v1078_v50  ;;  %v9215_v50 = vld [vmem:[%s11943_s6 + $0x14] ss:$8 sps:$4 sm:$0xff]  }
 0x69e   :  { %1425 = vmatprep.subr.bf16.mxu1 %v9720_v27 }
 0x763   :  { %v8761_v58 = vpop.f32.mrb[36].mxu1 }
 0x764   :  { %v963_v2 = vpop.f32.mrb[37].mxu1  ;;  %v1009_v14 = vmul.f32 %v8761_v58, %v10096_v3  ;;  %v7873_v58 = vcombine.low %v1150_v54, %v1150_v54 }
 0x765   :  { %v8762_v4 = vpop.f32.mrb[38].mxu1  ;;  %v998_v8 = vmul.f32 %v10087_v63, %v963_v2 }
 0x766   :  { %v966_v6 = vpop.f32.mrb[39].mxu1  ;;  %v1015_v18 = vmul.f32 %v8762_v4, %v10103_v9  ;;  %v1203_v2 = vsel %vm87_vm1, %v7873_v58, 0  ;;  %v9221_v4 = vld [vmem:[%s11944_s8] sm:$0xff]  }
 0x767   :  { %v1003_v10 = vmul.f32 %v10093_v57, %v966_v6 }
 0x769   :  { %v1004_v15 = vadd.f32 %v1003_v10, %v998_v8 }
 0x76b   :  { %v1010_v19 = vadd.f32 %v1009_v14, %v1004_v15  ;;  %v8765_v20 = vpop.f32.mrb[40].mxu1  ;;  %v10170_v14 = vld [vmem:[%s11940_s9] sm:$0x3f] }
 0x76c   :  { %v979_v23 = vpop.f32.mrb[41].mxu1  ;;  %v1033_v31 = vmul.f32 %v8765_v20, %v10121_v24  ;;  %v1137_v15 = vrot.slane %v10170_v14, %v10084_v56  ;;  %v1142_v20 = vrot.slane %v10170_v14, %v10090_v1 }
 0x76d   :  { %v1016_v7 = vadd.f32 %v1015_v18, %v1010_v19  ;;  %v1021_v11 = vmul.f32 %v10112_v17, %v979_v23  ;;  %v8766_v25 = vpop.f32.mrb[42].mxu1 }
 0x76e   :  { %v982_v26 = vpop.f32.mrb[43].mxu1  ;;  %v1039_v33 = vmul.f32 %v8766_v25, %v10124_v29  ;;  %v9223_v25 = vld [vmem:[%s11944_s8 + $0x10] sm:$0xff]  }
 0x76f   :  { %v1022_v28 = vadd.f32 %v1021_v11, %v1016_v7  ;;  %v1027_v30 = vmul.f32 %v10117_v13, %v982_v26  ;;  %v9222_v11 = vld [vmem:[%s11944_s8 + $0x8] sm:$0xff]   ;;  %v9224_v26 = vld [vmem:[%s11944_s8 + $0x18] sm:$0xff]  }
 0x771   :  { %v1028_v32 = vadd.f32 %v1027_v30, %v1022_v28  ;;  %v9225_v28 = vld [vmem:[%s11944_s8 + $0x20] sm:$0xff]   ;;  %v9226_v30 = vld [vmem:[%s11944_s8 + $0x28] sm:$0xff]  }
 0x773   :  { %v1034_v34 = vadd.f32 %v1033_v31, %v1028_v32  ;;  %v9227_v31 = vld [vmem:[%s11944_s8 + $0x30] sm:$0xff]   ;;  %v9228_v32 = vld [vmem:[%s11944_s8 + $0x38] sm:$0xff]  }
 0x775   :  { %v1040_v35 = vadd.f32 %v1039_v33, %v1034_v34  ;;  %v9229_v33 = vld [vmem:[%s11944_s8 + $0x40] sm:$0xff]   ;;  %v9230_v34 = vld [vmem:[%s11944_s8 + $0x48] sm:$0xff]  }
 0x777   :  { %v1048_v36 = vpack.c.bf16 %v1040_v35, %v1040_v35  ;;  %v9231_v35 = vld [vmem:[%s11944_s8 + $0x50] sm:$0xff]  }
 0x779   :  { %8776 = vmatmul.mubr.msk.bf16.vlgmr.msra.gmra.mrb[44].mxu1 %vm83_vm2, %v1048_v36  ;;  %v9232_v36 = vld [vmem:[%s11944_s8 + $0x58] sm:$0xff]  }
 0x77a   :  { %1426 = vmatpush1.bf16.msra.mxu1 %v9221_v4 }
 0x77b   :  { %1427 = vmatprep.subr.bf16.mxu1 %v9720_v27 }
 0x77e   :  { %1428 = vmatpush1.bf16.msra.mxu1 %v9222_v11 }
 0x77f   :  { %1429 = vmatprep.subr.bf16.mxu1 %v9720_v27 }
 0x782   :  { %1430 = vmatpush1.bf16.msra.mxu1 %v9223_v25 }
 0x783   :  { %1431 = vmatprep.subr.bf16.mxu1 %v9720_v27 }
 0x786   :  { %1432 = vmatpush1.bf16.msra.mxu1 %v9224_v26 }
 0x787   :  { %1433 = vmatprep.subr.bf16.mxu1 %v9720_v27 }
 0x78a   :  { %1434 = vmatpush1.bf16.msra.mxu1 %v9225_v28 }
 0x78b   :  { %1435 = vmatprep.subr.bf16.mxu1 %v9720_v27 }
 0x78e   :  { %1436 = vmatpush1.bf16.msra.mxu1 %v9226_v30 }
 0x78f   :  { %1437 = vmatprep.subr.bf16.mxu1 %v9720_v27 }
 0x792   :  { %1438 = vmatpush1.bf16.msra.mxu1 %v9227_v31 }
 0x793   :  { %1439 = vmatprep.subr.bf16.mxu1 %v9720_v27 }
 0x796   :  { %1440 = vmatpush1.bf16.msra.mxu1 %v9228_v32 }
 0x797   :  { %1441 = vmatprep.subr.bf16.mxu1 %v9720_v27 }
 0x79a   :  { %1442 = vmatpush1.bf16.msra.mxu1 %v9229_v33 }
 0x79b   :  { %1443 = vmatprep.subr.bf16.mxu1 %v9720_v27 }
 0x79e   :  { %1444 = vmatpush1.bf16.msra.mxu1 %v9230_v34 }
 0x79f   :  { %1445 = vmatprep.subr.bf16.mxu1 %v9720_v27 }
 0x7a2   :  { %1446 = vmatpush1.bf16.msra.mxu1 %v9231_v35 }
 0x7a3   :  { %1447 = vmatprep.subr.bf16.mxu1 %v9720_v27 }
 0x7a6   :  { %1448 = vmatpush1.bf16.msra.mxu1 %v9232_v36 }
 0x7a7   :  { %1449 = vmatprep.subr.bf16.mxu1 %v9720_v27 }
 0x84c   :  { %v1114_v38 = vpop.f32.mrb[44].mxu1 }
 0x84d   :  { %v1115_v39 = vadd.f32 %v1114_v38, %v1052_v37  ;;  %v8777_v41 = vpop.f32.mrb[45].mxu1  ;;  %v9233_v37 = vld [vmem:[%s11944_s8 + $0x60] sm:$0xff]   ;;  %v9234_v38 = vld [vmem:[%s11944_s8 + $0x68] sm:$0xff]  }
 0x84e   :  { %v1117_v42 = vpop.f32.mrb[46].mxu1  ;;  %1450 = vmatpush1.bf16.msra.mxu1 %v9233_v37 }
 0x84f   :  { %v10133_v40 = vadd.f32 %v1115_v39, %v9865_v22  ;;  %v8778_v44 = vpop.f32.mrb[47].mxu1  ;;  %v9210_v22 = vld [vmem:[%s11943_s6] ss:$8 sps:$4 sm:$0xff]   ;;  %1451 = vmatprep.subr.bf16.mxu1 %v9720_v27 }
 0x850   :  { %1209 = vmatpush1.bf16.msra.mxu0 %v9210_v22  ;;  %v1152_v39 = vld [vmem:[%s11945_s7] ss:$8 sm:$0x3] }
 0x851   :  { %v1121_v45 = vsel %vm83_vm2, %v10133_v40, 0.0  ;;  %1210 = vmatprep.subr.bf16.mxu0 %v9215_v50  ;;  %v1157_v41 = vrot.slane %v1152_v39, %v9931_v60  ;;  %v1161_v42 = vrot.slane %v1152_v39, %v9939_v62 }
 0x852   :  { %1122 = vadd.xlane.f32.xlu1 %v1121_v45  ;;  %1452 = vmatpush1.bf16.msra.mxu1 %v9234_v38 }
 0x853   :  { %8779 = vmatprep.subr.bf16.mxu1 %v9718_v0 }
 0x854   :  { %1211 = vmatpush1.bf16.msra.mxu0 %v9213_v51 }
 0x855   :  { %1212 = vmatprep.subr.bf16.mxu0 %v9218_v52 }
 0x858   :  { %1213 = vmatpush1.bf16.msra.mxu0 %v9216_v53 }
 0x859   :  { %7875 = vmatprep.subr.msk.bf16.mxu0 %vm87_vm1, %v7874_v55 }
 0x85c   :  { %1215 = vmatpush1.bf16.msra.mxu0 %v1203_v2 }
 0x85d   :  { %1616 = vmatprep.subr.bf16.mxu0 %v9720_v27 }
 0x8df   :  { %v1123_v46 = vpop.xlane.xlu1 %1122 }
 0x8e0   :  { %v1124_v43 = vmul.f32 0.017857144, %v1123_v46 }
 0x8e2   :  { %v1125_v47 = vsub.f32 %v10133_v40, %v1124_v43 }
 0x8e4   :  { %v1126_v48 = vmul.f32 %v1125_v47, %v1125_v47 }
 0x8e6   :  { %v1127_v49 = vsel %vm83_vm2, %v1126_v48, 0.0 }
 0x8e7   :  { %1128 = vadd.xlane.f32.xlu0 %v1127_v49 }
 0x974   :  { %v1129_v6 = vpop.xlane.xlu0 %1128 }
 0x975   :  { %v1130_v8 = vmul.f32 0.017857144, %v1129_v6 }
 0x977   :  { %v1131_v10 = vadd.f32 1e-05, %v1130_v8 }
 0x979   :  { %9479 = vrsqrt.f32 %v1131_v10 }
 0x983   :  { %v9480_v18 = vpop.eup %9479 }
 0x984   :  { %v1133_v19 = vmul.f32 %v9480_v18, %v1125_v47 }
 0x986   :  { %v1138_v21 = vmul.f32 %v1137_v15, %v1133_v19 }
 0x988   :  { %v1143_v23 = vadd.f32 %v1142_v20, %v1138_v21 }
 0x98a   :  { %v1151_v7 = vpack.c.bf16 %v1143_v23, %v1143_v23 }
 0x98c   :  { %7876 = vmatmul.mubr.msk.bf16.vlgmr.msra.gmra.mrb[8].mxu0 %vm83_vm2, %v1151_v7 }
 0x98d   :  { %1648 = vmatprep.mubr.bf16.mxu0 %v9720_v27 }
 0xa5f   :  { %v1242_v44 = vpop.f32.mrb[8].mxu0 }
 0xa60   :  { %v1243_v45 = vadd.f32 %v1242_v44, %v1157_v41  ;;  %v1244_v46 = vpop.f32.mrb[9].mxu0 }
 0xa61   :  { %v1245_v43 = vadd.f32 %v1244_v46, %v1161_v42  ;;  %v1246_v47 = vpop.f32.mrb[10].mxu0  ;;  %v9737_v46 = vmov -1.0  }
 0xa62   :  { %v1251_v48 = vmul.f32 0.70710677, %v1243_v45  ;;  %v1247_v49 = vpop.f32.mrb[11].mxu0 }
 0xa63   :  { %v1252_v61 = vmul.f32 0.70710677, %v1245_v43 }
 0xa64   :  { %v1257_v22 = vand.u32 2147483647, %v1251_v48  ;;  %vm1253_vm9 = vcmp.ge.f32.partialorder %v1251_v48, 0.0 }
 0xa65   :  { %v1258_v50 = vand.u32 2147483647, %v1252_v61  ;;  %vm1254_vm10 = vcmp.ge.f32.partialorder %v1252_v61, 0.0  ;;  %v1255_v47 = vsel %vm1253_vm9, 1.0, %v9737_v46  ;;  %v1336_v61 = vrot.slane %v10170_v14, %v10107_v12  ;;  %v9236_v14 = vld [vmem:[%s11939_s3 + $0x5c] sm:$0xff]  }
 0xa66   :  { %v1259_v51 = vmul.f32 0.3275911, %v1257_v22  ;;  %v1285_v55 = vsub.f32 0.0, %v1257_v22 }
 0xa67   :  { %v1260_v52 = vmul.f32 0.3275911, %v1258_v50  ;;  %v1286_v58 = vsub.f32 0.0, %v1258_v50 }
 0xa68   :  { %v1261_v53 = vadd.f32 1.0, %v1259_v51  ;;  %v1287_v4 = vmul.f32 %v1285_v55, %v1257_v22 }
 0xa69   :  { %v1262_v54 = vadd.f32 1.0, %v1260_v52  ;;  %v1288_v10 = vmul.f32 %v1286_v58, %v1258_v50  ;;  %v1256_v50 = vsel %vm1254_vm10, 1.0, %v9737_v46  ;;  %v1249_v52 = vmul.f32 0.5, %v1243_v45 }
 0xa6a   :  { %9481 = vrcp.f32 %v1261_v53  ;;  %v1289_v19 = vmul.f32 1.442695, %v1287_v4 }
 0xa6b   :  { %9483 = vrcp.f32 %v1262_v54  ;;  %v1291_v23 = vmul.f32 1.442695, %v1288_v10  ;;  %v1250_v54 = vmul.f32 0.5, %v1245_v43 }
 0xa6c   :  { %9485 = vpow2.f32 %v1289_v19  ;;  %v9235_v19 = vld [vmem:[%s11939_s3 + $0x54] sm:$0xff]  }
 0xa6d   :  { %9487 = vpow2.f32 %v1291_v23 }
 0xa74   :  { %v9482_v2 = vpop.eup %9481 }
 0xa75   :  { %v9484_v6 = vpop.eup %9483  ;;  %v1267_v8 = vmul.f32 1.0614054, %v9482_v2 }
 0xa76   :  { %v1268_v15 = vmul.f32 1.0614054, %v9484_v6  ;;  %v9486_v37 = vpop.eup %9485 }
 0xa77   :  { %v1269_v18 = vadd.f32 -1.4531521, %v1267_v8  ;;  %v9488_v39 = vpop.eup %9487 }
 0xa78   :  { %v1270_v20 = vadd.f32 -1.4531521, %v1268_v15 }
 0xa79   :  { %v1271_v21 = vmul.f32 %v9482_v2, %v1269_v18 }
 0xa7a   :  { %v1272_v7 = vmul.f32 %v9484_v6, %v1270_v20  ;;  %v1584_v20 = vsel %vm83_vm2, %v9235_v19, 0 }
 0xa7b   :  { %v1273_v11 = vadd.f32 1.4214138, %v1271_v21  ;;  %1617 = vmatpush1.bf16.xpose.msra.mxu0 %v1584_v20  ;;  %v9237_v21 = vld [vmem:[%s11939_s3 + $0x64] sm:$0xff]  }
 0xa7c   :  { %v1274_v25 = vadd.f32 1.4214138, %v1272_v7  ;;  %1618 = vmatprep.subr.bf16.mxu0 %v9720_v27  ;;  %v1590_v23 = vsel %vm83_vm2, %v9237_v21, 0  ;;  %v9238_v7 = vld [vmem:[%s11939_s3 + $0x6c] sm:$0xff]  }
 0xa7d   :  { %v1275_v26 = vmul.f32 %v9482_v2, %v1273_v11  ;;  %v1593_v11 = vsel %vm83_vm2, %v9238_v7, 0 }
 0xa7e   :  { %v1276_v28 = vmul.f32 %v9484_v6, %v1274_v25  ;;  %v9239_v25 = vld [vmem:[%s11939_s3 + $0x74] sm:$0xff]  }
 0xa7f   :  { %v1277_v30 = vadd.f32 -0.28449672, %v1275_v26  ;;  %v1596_v26 = vsel %vm83_vm2, %v9239_v25, 0 }
 0xa80   :  { %v1278_v31 = vadd.f32 -0.28449672, %v1276_v28  ;;  %v9240_v28 = vld [vmem:[%s11939_s3 + $0x7c] sm:$0xff]  }
 0xa81   :  { %v1279_v32 = vmul.f32 %v9482_v2, %v1277_v30  ;;  %v1599_v30 = vsel %vm83_vm2, %v9240_v28, 0 }
 0xa82   :  { %v1280_v33 = vmul.f32 %v9484_v6, %v1278_v31  ;;  %v9241_v31 = vld [vmem:[%s11939_s3 + $0x84] sm:$0xff]  }
 0xa83   :  { %v1281_v34 = vadd.f32 0.2548296, %v1279_v32  ;;  %v1602_v32 = vsel %vm83_vm2, %v9241_v31, 0 }
 0xa84   :  { %v1282_v35 = vadd.f32 0.2548296, %v1280_v33  ;;  %v9242_v33 = vld [vmem:[%s11939_s3 + $0x8c] sm:$0xff]  }
 0xa85   :  { %v1283_v36 = vmul.f32 %v9482_v2, %v1281_v34  ;;  %v1605_v34 = vsel %vm83_vm2, %v9242_v33, 0 }
 0xa86   :  { %v1284_v38 = vmul.f32 %v9484_v6, %v1282_v35 }
 0xa87   :  { %v1293_v41 = vmul.f32 %v9486_v37, %v1283_v36 }
 0xa88   :  { %v1294_v42 = vmul.f32 %v9488_v39, %v1284_v38 }
 0xa89   :  { %v1295_v44 = vsub.f32 1.0, %v1293_v41  ;;  %v9243_v41 = vld [vmem:[%s11939_s3 + $0x94] sm:$0xff]  }
 0xa8a   :  { %v1296_v49 = vsub.f32 1.0, %v1294_v42  ;;  %v1608_v42 = vsel %vm83_vm2, %v9243_v41, 0 }
 0xa8b   :  { %v1297_v22 = vmul.f32 %v1295_v44, %v1255_v47  ;;  %v9244_v44 = vld [vmem:[%s11939_s3 + $0x9c] sm:$0xff]  }
 0xa8c   :  { %v1298_v51 = vmul.f32 %v1296_v49, %v1256_v50  ;;  %v1611_v47 = vsel %vm83_vm2, %v9244_v44, 0  ;;  %v9245_v49 = vld [vmem:[%s11939_s3 + $0xa4] ss:$0 sps:$4 sm:$0xff]  }
 0xa8d   :  { %v1299_v53 = vadd.f32 1.0, %v1297_v22  ;;  %v1614_v22 = vsel %vm83_vm2, %v9245_v49, 0 }
 0xa8e   :  { %v1300_v55 = vadd.f32 1.0, %v1298_v51 }
 0xa8f   :  { %v1301_v58 = vmul.f32 %v1299_v53, %v1249_v52  ;;  %v10307_v53 = vld [vmem:[%s11940_s9 + $0x8] sm:$0x3f] }
 0xa90   :  { %v1302_v2 = vmul.f32 %v1300_v55, %v1250_v54  ;;  %v1484_v54 = vrot.slane %v10307_v53, %v9931_v60 }
 0xa91   :  { %v1331_v4 = vpack.c.bf16 %v1301_v58, %v1301_v58 }
 0xa92   :  { %v1332_v48 = vpack.c.bf16 %v1302_v2, %v1302_v2  ;;  %v1489_v2 = vrot.slane %v10307_v53, %v9939_v62 }
 0xa94   :  { %7891 = vmatprep.mubr.msk.bf16.mxu1 %vm1421_vm11, %v1332_v48 }
 0xa95   :  { %1458 = vmatmul.mubr.bf16.vlgmr.msra.gmra.mrb[48].mxu1 %v1331_v4 }
 0xa96   :  { %8781 = vmatprep.mubr.msk.bf16.mxu1 %vm9719_vm0, %v9718_v0 }
 0xb68   :  { %v1459_v6 = vpop.f32.mrb[48].mxu1 }
 0xb69   :  { %v1460_v8 = vadd.f32 %v1459_v6, %v1336_v61  ;;  %v1461_v45 = vpop.f32.mrb[49].mxu1  ;;  %v10319_v6 = vld [vmem:[%s11941_s4 + $0x1] ss:$8 sm:$0x3] }
 0xb6a   :  { %v1462_v10 = vpop.f32.mrb[50].mxu1 }
 0xb6b   :  { %v10243_v43 = vadd.f32 %v1460_v8, %v10133_v40  ;;  %v1463_v15 = vpop.f32.mrb[51].mxu1  ;;  %v1587_v40 = vsel %vm83_vm2, %v9236_v14, 0  ;;  %v1520_v8 = vrot.slane %v10319_v6, %v9931_v60 }
 0xb6c   :  { %1619 = vmatpush1.bf16.xpose.msra.mxu0 %v1587_v40 }
 0xb6d   :  { %v1468_v18 = vsel %vm83_vm2, %v10243_v43, 0.0  ;;  %1620 = vmatprep.subr.bf16.mxu0 %v9720_v27 }
 0xb6e   :  { %1469 = vadd.xlane.f32.xlu1 %v1468_v18 }
 0xb74   :  { %1621 = vmatpush1.bf16.xpose.msra.mxu0 %v1590_v23 }
 0xb75   :  { %1622 = vmatprep.subr.bf16.mxu0 %v9720_v27 }
 0xb7c   :  { %1623 = vmatpush1.bf16.xpose.msra.mxu0 %v1593_v11 }
 0xb7d   :  { %1624 = vmatprep.subr.bf16.mxu0 %v9720_v27 }
 0xb84   :  { %1625 = vmatpush1.bf16.xpose.msra.mxu0 %v1596_v26 }
 0xb85   :  { %1626 = vmatprep.subr.bf16.mxu0 %v9720_v27 }
 0xb8c   :  { %1627 = vmatpush1.bf16.xpose.msra.mxu0 %v1599_v30 }
 0xb8d   :  { %1628 = vmatprep.subr.bf16.mxu0 %v9720_v27 }
 0xb94   :  { %1629 = vmatpush1.bf16.xpose.msra.mxu0 %v1602_v32 }
 0xb95   :  { %1630 = vmatprep.subr.bf16.mxu0 %v9720_v27 }
 0xb9c   :  { %1631 = vmatpush1.bf16.xpose.msra.mxu0 %v1605_v34 }
 0xb9d   :  { %1632 = vmatprep.subr.bf16.mxu0 %v9720_v27 }
 0xba4   :  { %1633 = vmatpush1.bf16.xpose.msra.mxu0 %v1608_v42 }
 0xba5   :  { %1634 = vmatprep.subr.bf16.mxu0 %v9720_v27 }
 0xbac   :  { %1635 = vmatpush1.bf16.xpose.msra.mxu0 %v1611_v47 }
 0xbad   :  { %1636 = vmatprep.subr.bf16.mxu0 %v9720_v27 }
 0xbb4   :  { %1637 = vmatpush1.bf16.xpose.msra.mxu0 %v1614_v22 }
 0xbb5   :  { %8815 = vmatprep.subr.bf16.mxu0 %v9718_v0 }
 0xbfb   :  { %v1470_v35 = vpop.xlane.xlu1 %1469 }
 0xbfc   :  { %v1471_v36 = vmul.f32 0.017857144, %v1470_v35 }
 0xbfe   :  { %v1472_v37 = vsub.f32 %v10243_v43, %v1471_v36 }
 0xc00   :  { %v1473_v38 = vmul.f32 %v1472_v37, %v1472_v37 }
 0xc02   :  { %v1474_v39 = vsel %vm83_vm2, %v1473_v38, 0.0 }
 0xc03   :  { %1475 = vadd.xlane.f32.xlu0 %v1474_v39 }
 0xc90   :  { %v1476_v50 = vpop.xlane.xlu0 %1475 }
 0xc91   :  { %v1477_v51 = vmul.f32 0.017857144, %v1476_v50 }
 0xc93   :  { %v1478_v52 = vadd.f32 1e-05, %v1477_v51 }
 0xc95   :  { %9489 = vrsqrt.f32 %v1478_v52 }
 0xc9f   :  { %v9490_v55 = vpop.eup %9489 }
 0xca0   :  { %v1480_v58 = vmul.f32 %v9490_v55, %v1472_v37 }
 0xca2   :  { %v1485_v48 = vmul.f32 %v1484_v54, %v1480_v58 }
 0xca4   :  { %v1490_v4 = vadd.f32 %v1489_v2, %v1485_v48 }
 0xca6   :  { %v1513_v61 = vpack.c.bf16 %v1490_v4, %v1490_v4 }
 0xca8   :  { %7926 = vmatmul.mubr.msk.bf16.vlgmr.msra.gmra.mrb[12].mxu0 %vm83_vm2, %v1513_v61 }
 0xca9   :  { %8817 = vmatprep.mubr.msk.bf16.mxu0 %vm9719_vm0, %v9718_v0 }
 0xd7b   :  { %v1650_v45 = vpop.f32.mrb[12].mxu0 }
 0xd7c   :  { %v1651_v10 = vadd.f32 %v1650_v45, %v1520_v8  ;;  %v10323_v15 = vpop.f32.mrb[13].mxu0 }
 0xd7d   :  { %v1654_v18 = vpop.f32.mrb[14].mxu0 }
 0xd7e   :  { %v10325_v19 = vpack.c.bf16 %v1651_v10, %v1651_v10  ;;  %v1655_v20 = vpop.f32.mrb[15].mxu0 }
 0xd80   :  { %1710 = vrot.lane.b32.xlu0 %v10325_v19, %s11981_s26  ;;  %1660 = vrot.lane.b32.xlu1 %v10325_v19, %s11979_s24 }
 0xd84   :  { %1758 = vrot.lane.b32.xlu0 %v10325_v19, %s11973_s29  ;;  %1708 = vrot.lane.b32.xlu1 %v10325_v19, %s11977_s23  ;;  %s12008_s23 = smov 107   ;;  %s12010_s29 = smov 93  }
 0xd88   :  { %1808 = vrot.lane.b32.xlu0 %v10325_v19, %s11969_s15  ;;  %1760 = vrot.lane.b32.xlu1 %v10325_v19, %s11975_s28  ;;  %s12005_s15 = smov 58   ;;  %s12009_s28 = smov 100  }
 0xd8c   :  { %1858 = vrot.lane.b32.xlu0 %v10325_v19, %s11967_s16  ;;  %1810 = vrot.lane.b32.xlu1 %v10325_v19, %s11971_s30  ;;  %s12004_s30 = smov 121   ;;  %s12006_s16 = smov 114  }
 0xd90   :  { %1908 = vrot.lane.b32.xlu0 %v10325_v19, %s11965_s17  ;;  %1860 = vrot.lane.b32.xlu1 %v10325_v19, %s11997_s2  ;;  %s12007_s17 = smov 51  }
 0xd94   :  { %2010 = vrot.lane.b32.xlu0 %v10325_v19, %s11998_s19  ;;  %1910 = vrot.lane.b32.xlu1 %v10325_v19, %s11999_s25 }
 0xd98   :  { %2008 = vrot.lane.b32.xlu0 %v10325_v19, %s12000_s0  ;;  %1960 = vrot.lane.b32.xlu1 %v10325_v19, %s12001_s1 }
 0xd9c   :  { %1958 = vrot.lane.b32.xlu1 %v10325_v19, %s12002_s21 }
 0xdf2   :  { %v1661_v14 = vpop.permute.xlu1 %1660  ;;  %v1711_v23 = vpop.permute.xlu0 %1710 }
 0xdf3   :  { %v1666_v40 = vsel %vm417_vm3, %v1661_v14, 0  ;;  %v1716_v11 = vsel %vm417_vm3, %v1711_v23, 0 }
 0xdf4   :  { %8780 = vmatpush3.bf16.xpose.msra.mxu1 %v1666_v40 }
 0xdf5   :  { %8785 = vmatprep.subr.bf16.mxu1 %v9718_v0 }
 0xdf6   :  { %v1709_v21 = vpop.permute.xlu1 %1708  ;;  %v1759_v31 = vpop.permute.xlu0 %1758 }
 0xdfa   :  { %v1761_v7 = vpop.permute.xlu1 %1760  ;;  %v1809_v35 = vpop.permute.xlu0 %1808 }
 0xdfb   :  { %8782 = vmatmul.mubr.msk.bf16.vlgmr.msra.gmra.mrb[52].mxu1 %vm417_vm3, %v10325_v19  ;;  %v1766_v28 = vsel %vm417_vm3, %v1761_v7, 0 }
 0xdfc   :  { %8786 = vmatpush3.bf16.xpose.msra.mxu1 %v1716_v11  ;;  %8787 = vmatprep.mubr.msk.bf16.mxu1 %vm9719_vm0, %v9718_v0 }
 0xdfd   :  { %8791 = vmatprep.subr.bf16.mxu1 %v9718_v0 }
 0xdfe   :  { %v1811_v25 = vpop.permute.xlu1 %1810  ;;  %v1859_v38 = vpop.permute.xlu0 %1858 }
 0xdff   :  { %v1816_v33 = vsel %vm417_vm3, %v1811_v25, 0 }
 0xe02   :  { %v1861_v26 = vpop.permute.xlu1 %1860  ;;  %v1909_v39 = vpop.permute.xlu0 %1908 }
 0xe03   :  { %8788 = vmatmul.mubr.msk.bf16.vlgmr.msra.gmra.mrb[56].mxu1 %vm417_vm3, %v1709_v21  ;;  %v1866_v37 = vsel %vm417_vm3, %v1861_v26, 0 }
 0xe04   :  { %8792 = vmatpush3.bf16.xpose.msra.mxu1 %v1766_v28  ;;  %8793 = vmatprep.mubr.msk.bf16.mxu1 %vm9719_vm0, %v9718_v0 }
 0xe05   :  { %8797 = vmatprep.subr.bf16.mxu1 %v9718_v0 }
 0xe06   :  { %v1911_v30 = vpop.permute.xlu1 %1910  ;;  %v2011_v42 = vpop.permute.xlu0 %2010 }
 0xe07   :  { %v1916_v41 = vsel %vm417_vm3, %v1911_v30, 0  ;;  %v2016_v44 = vsel %vm417_vm3, %v2011_v42, 0 }
 0xe0a   :  { %v1961_v32 = vpop.permute.xlu1 %1960  ;;  %v2009_v47 = vpop.permute.xlu0 %2008 }
 0xe0b   :  { %v1966_v34 = vsel %vm417_vm3, %v1961_v32, 0  ;;  %8794 = vmatmul.mubr.msk.bf16.vlgmr.msra.gmra.mrb[60].mxu1 %vm417_vm3, %v1759_v31 }
 0xe0c   :  { %8798 = vmatpush3.bf16.xpose.msra.mxu1 %v1816_v33  ;;  %8816 = vmatpush3.bf16.xpose.msra.mxu0 %v1966_v34 }
 0xe0d   :  { %8799 = vmatprep.mubr.msk.bf16.mxu1 %vm9719_vm0, %v9718_v0  ;;  %8803 = vmatprep.subr.bf16.mxu1 %v9718_v0 }
 0xe0e   :  { %v1959_v36 = vpop.permute.xlu1 %1958 }
 0xe13   :  { %8800 = vmatmul.mubr.msk.bf16.vlgmr.msra.gmra.mrb[64].mxu1 %vm417_vm3, %v1809_v35  ;;  %8818 = vmatmul.mubr.msk.bf16.vlgmr.msra.gmra.mrb[16].mxu0 %vm417_vm3, %v1959_v36 }
 0xe14   :  { %8804 = vmatpush3.bf16.xpose.msra.mxu1 %v1866_v37  ;;  %8805 = vmatprep.mubr.msk.bf16.mxu1 %vm9719_vm0, %v9718_v0 }
 0xe15   :  { %8809 = vmatprep.subr.bf16.mxu1 %v9718_v0 }
 0xe1b   :  { %8806 = vmatmul.mubr.msk.bf16.vlgmr.msra.gmra.mrb[68].mxu1 %vm417_vm3, %v1859_v38 }
 0xe1c   :  { %8810 = vmatpush3.bf16.xpose.msra.mxu1 %v1916_v41  ;;  %8811 = vmatprep.mubr.msk.bf16.mxu1 %vm9719_vm0, %v9718_v0 }
 0xe1d   :  { %8821 = vmatprep.subr.bf16.mxu1 %v9718_v0 }
 0xe23   :  { %8812 = vmatmul.mubr.msk.bf16.vlgmr.msra.gmra.mrb[72].mxu1 %vm417_vm3, %v1909_v39 }
 0xe24   :  { %8822 = vmatpush3.bf16.xpose.msra.mxu1 %v2016_v44  ;;  %8823 = vmatprep.mubr.msk.bf16.mxu1 %vm9719_vm0, %v9718_v0 }
 0xe25   :  { %8837 = vmatprep.subr.bf16.mxu1 %v9718_v0 }
 0xe2b   :  { %8824 = vmatmul.mubr.msk.bf16.vlgmr.msra.gmra.mrb[76].mxu1 %vm417_vm3, %v2009_v47 }
 0xe2c   :  { %8845 = vmatprep.mubr.msk.bf16.mxu1 %vm9719_vm0, %v9718_v0 }
 0xece   :  { %v1702_v49 = vpop.f32.mrb[52].mxu1 }
 0xecf   :  { %v8783_v22 = vpop.f32.mrb[53].mxu1  ;;  %v2058_v50 = vsel %vm814_vm4, %v1702_v49, -inf }
 0xed0   :  { %2059 = vmax.xlane.f32.xlu1 %v2058_v50  ;;  %v1705_v51 = vpop.f32.mrb[54].mxu1 }
 0xed1   :  { %v8784_v52 = vpop.f32.mrb[55].mxu1 }
 0xed6   :  { %v1752_v54 = vpop.f32.mrb[56].mxu1 }
 0xed7   :  { %v8789_v55 = vpop.f32.mrb[57].mxu1  ;;  %v2061_v58 = vsel %vm814_vm4, %v1752_v54, -inf }
 0xed8   :  { %2062 = vmax.xlane.f32.xlu0 %v2061_v58  ;;  %v1755_v2 = vpop.f32.mrb[58].mxu1 }
 0xed9   :  { %v8790_v48 = vpop.f32.mrb[59].mxu1 }
 0xede   :  { %v1802_v4 = vpop.f32.mrb[60].mxu1 }
 0xedf   :  { %v8795_v61 = vpop.f32.mrb[61].mxu1  ;;  %v2064_v8 = vsel %vm814_vm4, %v1802_v4, -inf }
 0xee0   :  { %2065 = vmax.xlane.f32.xlu0 %v2064_v8  ;;  %v1805_v45 = vpop.f32.mrb[62].mxu1 }
 0xee1   :  { %v8796_v10 = vpop.f32.mrb[63].mxu1 }
 0xee6   :  { %v1852_v18 = vpop.f32.mrb[64].mxu1  ;;  %v2002_v20 = vpop.f32.mrb[16].mxu0 }
 0xee7   :  { %v8801_v14 = vpop.f32.mrb[65].mxu1  ;;  %v8819_v40 = vpop.f32.mrb[17].mxu0  ;;  %v2067_v21 = vsel %vm814_vm4, %v1852_v18, -inf  ;;  %v2076_v33 = vsel %vm814_vm4, %v2002_v20, -inf }
 0xee8   :  { %2068 = vmax.xlane.f32.xlu1 %v2067_v21  ;;  %v1855_v23 = vpop.f32.mrb[66].mxu1  ;;  %v2005_v7 = vpop.f32.mrb[18].mxu0 }
 0xee9   :  { %v8802_v11 = vpop.f32.mrb[67].mxu1  ;;  %v8820_v25 = vpop.f32.mrb[19].mxu0 }
 0xeee   :  { %v1902_v26 = vpop.f32.mrb[68].mxu1 }
 0xeef   :  { %v8807_v28 = vpop.f32.mrb[69].mxu1  ;;  %v2070_v30 = vsel %vm814_vm4, %v1902_v26, -inf }
 0xef0   :  { %2071 = vmax.xlane.f32.xlu0 %v2070_v30  ;;  %v1905_v31 = vpop.f32.mrb[70].mxu1 }
 0xef1   :  { %v8808_v32 = vpop.f32.mrb[71].mxu1 }
 0xef4   :  { %2077 = vmax.xlane.f32.xlu0 %v2076_v33 }
 0xef6   :  { %v1952_v34 = vpop.f32.mrb[72].mxu1 }
 0xef7   :  { %v8813_v35 = vpop.f32.mrb[73].mxu1  ;;  %v2073_v36 = vsel %vm814_vm4, %v1952_v34, -inf }
 0xef8   :  { %2074 = vmax.xlane.f32.xlu1 %v2073_v36  ;;  %v1955_v37 = vpop.f32.mrb[74].mxu1 }
 0xef9   :  { %v8814_v38 = vpop.f32.mrb[75].mxu1 }
 0xefe   :  { %v2052_v39 = vpop.f32.mrb[76].mxu1 }
 0xeff   :  { %v8825_v41 = vpop.f32.mrb[77].mxu1  ;;  %v2079_v42 = vsel %vm814_vm4, %v2052_v39, -inf }
 0xf00   :  { %2080 = vmax.xlane.f32.xlu1 %v2079_v42  ;;  %v2055_v44 = vpop.f32.mrb[78].mxu1 }
 0xf01   :  { %v8826_v47 = vpop.f32.mrb[79].mxu1 }
 0xf5d   :  { %v2060_v22 = vpop.xlane.xlu1 %2059 }
 0xf5e   :  { %v2082_v50 = vsub.f32 %v1702_v49, %v2060_v22  ;;  %v1524_v22 = vrot.slane %v10319_v6, %v9939_v62 }
 0xf60   :  { %v2090_v51 = vmul.f32 1.442695, %v2082_v50  ;;  %v1653_v50 = vadd.f32 %v10323_v15, %v1524_v22 }
 0xf62   :  { %9491 = vpow2.f32 %v2090_v51  ;;  %v1658_v51 = vpack.c.bf16 %v1653_v50, %v1653_v50 }
 0xf65   :  { %v2063_v52 = vpop.xlane.xlu0 %2062 }
 0xf66   :  { %v2083_v55 = vsub.f32 %v1752_v54, %v2063_v52 }
 0xf68   :  { %v2092_v58 = vmul.f32 1.442695, %v2083_v55 }
 0xf6a   :  { %9493 = vpow2.f32 %v2092_v58 }
 0xf6c   :  { %v9492_v2 = vpop.eup %9491 }
 0xf6d   :  { %v2106_v48 = vsel %vm814_vm4, %v9492_v2, 0.0  ;;  %v2066_v40 = vpop.xlane.xlu0 %2065 }
 0xf6e   :  { %2107 = vadd.xlane.f32.xlu0 %v2106_v48  ;;  %v2084_v21 = vsub.f32 %v1802_v4, %v2066_v40 }
 0xf70   :  { %v2094_v11 = vmul.f32 1.442695, %v2084_v21 }
 0xf74   :  { %v9494_v61 = vpop.eup %9493 }
 0xf75   :  { %v2069_v8 = vpop.xlane.xlu1 %2068  ;;  %v2109_v45 = vsel %vm814_vm4, %v9494_v61, 0.0 }
 0xf76   :  { %v2085_v10 = vsub.f32 %v1852_v18, %v2069_v8  ;;  %2110 = vadd.xlane.f32.xlu1 %v2109_v45 }
 0xf78   :  { %v2096_v14 = vmul.f32 1.442695, %v2085_v10 }
 0xf7a   :  { %9495 = vpow2.f32 %v2096_v14 }
 0xf7d   :  { %v2072_v49 = vpop.xlane.xlu0 %2071 }
 0xf7e   :  { %v2086_v25 = vsub.f32 %v1902_v26, %v2072_v49 }
 0xf80   :  { %v2098_v18 = vmul.f32 1.442695, %v2086_v25 }
 0xf81   :  { %v2078_v23 = vpop.xlane.xlu0 %2077 }
 0xf82   :  { %v2088_v7 = vsub.f32 %v2002_v20, %v2078_v23 }
 0xf84   :  { %v10405_v54 = vpop.eup %9495  ;;  %v2102_v28 = vmul.f32 1.442695, %v2088_v7 }
 0xf85   :  { %v2075_v30 = vpop.xlane.xlu1 %2074  ;;  %v2115_v31 = vsel %vm814_vm4, %v10405_v54, 0.0 }
 0xf86   :  { %9497 = vpow2.f32 %v2102_v28  ;;  %v2087_v32 = vsub.f32 %v1952_v34, %v2075_v30  ;;  %2116 = vadd.xlane.f32.xlu1 %v2115_v31 }
 0xf87   :  { %9499 = vpow2.f32 %v2094_v11 }
 0xf88   :  { %v2100_v33 = vmul.f32 1.442695, %v2087_v32 }
 0xf8a   :  { %9501 = vpow2.f32 %v2100_v33 }
 0xf8b   :  { %9503 = vpow2.f32 %v2098_v18 }
 0xf8d   :  { %v2081_v4 = vpop.xlane.xlu1 %2080 }
 0xf8e   :  { %v2089_v35 = vsub.f32 %v2052_v39, %v2081_v4 }
 0xf90   :  { %v10409_v20 = vpop.eup %9497  ;;  %v2104_v36 = vmul.f32 1.442695, %v2089_v35 }
 0xf91   :  { %v2124_v26 = vsel %vm814_vm4, %v10409_v20, 0.0  ;;  %v9500_v37 = vpop.eup %9499 }
 0xf92   :  { %9505 = vpow2.f32 %v2104_v36  ;;  %2125 = vadd.xlane.f32.xlu0 %v2124_v26  ;;  %v2112_v34 = vsel %vm814_vm4, %v9500_v37, 0.0 }
 0xf94   :  { %v9502_v38 = vpop.eup %9501 }
 0xf95   :  { %v2121_v41 = vsel %vm814_vm4, %v9502_v38, 0.0  ;;  %v9504_v42 = vpop.eup %9503 }
 0xf96   :  { %2113 = vadd.xlane.f32.xlu0 %v2112_v34  ;;  %2122 = vadd.xlane.f32.xlu1 %v2121_v41  ;;  %v2118_v44 = vsel %vm814_vm4, %v9504_v42, 0.0  ;;  %v9246_v34 = vld [vmem:[%s11942_s5 + $0x1c] sm:$0xff]   ;;  %v9249_v41 = vld [vmem:[%s11942_s5 + $0x34] ss:$0 sps:$4 sm:$0xff]  }
 0xf97   :  { %8838 = vmatpush3.bf16.msra.mxu1 %v9246_v34  ;;  %v9255_v34 = vld [vmem:[%s11943_s6 + $0x4c] ss:$8 sps:$4 sm:$0xff]  }
 0xf98   :  { %8839 = vmatprep.subr.bf16.mxu1 %v9718_v0 }
 0xf9a   :  { %2119 = vadd.xlane.f32.xlu0 %v2118_v44 }
 0xf9c   :  { %v9506_v39 = vpop.eup %9505 }
 0xf9d   :  { %v2127_v47 = vsel %vm814_vm4, %v9506_v39, 0.0 }
 0xf9e   :  { %2128 = vadd.xlane.f32.xlu1 %v2127_v47 }
 0xfaf   :  { %2153 = vrot.lane.b32.xlu1 %v1658_v51, %s12003_s22 }
 0xfb0   :  { %2151 = vrot.lane.b32.xlu0 %v10325_v19, %s12003_s22 }
 0xffb   :  { %v2108_v52 = vpop.xlane.xlu0 %2107 }
 0xffc   :  { %9507 = vrcp.f32 %v2108_v52 }
0x1003   :  { %v2111_v55 = vpop.xlane.xlu1 %2110 }
0x1004   :  { %9509 = vrcp.f32 %v2111_v55 }
0x1006   :  { %v9508_v58 = vpop.eup %9507 }
0x1007   :  { %v2138_v8 = vmul.f32 %v9508_v58, %v9492_v2 }
0x100e   :  { %v9510_v48 = vpop.eup %9509 }
0x100f   :  { %v2139_v45 = vmul.f32 %v9510_v48, %v9494_v61 }
0x1011   :  { %v2146_v10 = vpack.c.bf16 %v2139_v45, %v2138_v8 }
0x1013   :  { %8829 = vmatprep.mubr.msk.bf16.mxu0 %vm814_vm4, %v2146_v10  ;;  %v2117_v6 = vpop.xlane.xlu1 %2116 }
0x1014   :  { %9511 = vrcp.f32 %v2117_v6 }
0x101e   :  { %v9512_v21 = vpop.eup %9511 }
0x101f   :  { %v2126_v14 = vpop.xlane.xlu0 %2125  ;;  %v2141_v28 = vmul.f32 %v9512_v21, %v10405_v54 }
0x1023   :  { %v2114_v15 = vpop.xlane.xlu0 %2113  ;;  %v2123_v40 = vpop.xlane.xlu1 %2122 }
0x1024   :  { %9513 = vrcp.f32 %v2114_v15 }
0x1025   :  { %9515 = vrcp.f32 %v2123_v40 }
0x1027   :  { %v2120_v49 = vpop.xlane.xlu0 %2119 }
0x1028   :  { %9517 = vrcp.f32 %v2120_v49 }
0x1029   :  { %9519 = vrcp.f32 %v2126_v14 }
0x102b   :  { %v2129_v19 = vpop.xlane.xlu1 %2128  ;;  %v2152_v2 = vpop.permute.xlu0 %2151 }
0x102c   :  { %9521 = vrcp.f32 %v2129_v19 }
0x102e   :  { %v9514_v23 = vpop.eup %9513 }
0x102f   :  { %v2140_v7 = vmul.f32 %v9514_v23, %v9500_v37  ;;  %v2154_v61 = vpop.permute.xlu1 %2153  ;;  %v9516_v11 = vpop.eup %9515 }
0x1030   :  { %v2155_v25 = vsel %vm912_vm5, %v2152_v2, %v2154_v61  ;;  %v2143_v33 = vmul.f32 %v9516_v11, %v9502_v38  ;;  %v9247_v38 = vld [vmem:[%s11942_s5 + $0x24] sm:$0xff]   ;;  %v2263_v11 = vrot.slane %v10307_v53, %v10099_v5 }
0x1031   :  { %v2169_v30 = vsel %vm87_vm1, %v2155_v25, 0  ;;  %9162 = vmatprep.subr.msk.bf16.mxu0 %vm87_vm1, %v2155_v25  ;;  %v2147_v32 = vpack.c.bf16 %v2141_v28, %v2140_v7  ;;  %8840 = vmatpush3.bf16.msra.mxu1 %v9247_v38  ;;  %v9253_v38 = vld [vmem:[%s11943_s6 + $0x48] ss:$8 sps:$4 sm:$0xff]  }
0x1032   :  { %v9518_v31 = vpop.eup %9517  ;;  %8828 = vmatpush3.bf16.msra.mxu0 %v2169_v30  ;;  %8841 = vmatprep.subr.bf16.mxu1 %v9718_v0 }
0x1033   :  { %v2142_v18 = vmul.f32 %v9518_v31, %v9504_v42  ;;  %v9520_v4 = vpop.eup %9519  ;;  %v2289_v42 = vsel %vm87_vm1, %v9249_v41, 0  ;;  %v9256_v41 = vld [vmem:[%s11943_s6 + $0x58] ss:$8 sps:$4 sm:$0xff]  }
0x1034   :  { %v2144_v37 = vmul.f32 %v9520_v4, %v10409_v20  ;;  %v9248_v20 = vld [vmem:[%s11942_s5 + $0x2c] sm:$0xff]  }
0x1035   :  { %8830 = vmatmul.mubr.msk.bf16.vlgmr.msra.gmra.mrb[20].mxu0 %vm814_vm4, %v2147_v32  ;;  %v2148_v35 = vpack.c.bf16 %v2143_v33, %v2142_v18  ;;  %8842 = vmatpush3.bf16.msra.mxu1 %v9248_v20  ;;  %v9258_v20 = vld [vmem:[%s11943_s6 + $0x5c] ss:$8 sps:$4 sm:$0xff]  }
0x1036   :  { %v9522_v36 = vpop.eup %9521  ;;  %8843 = vmatprep.subr.bf16.mxu1 %v9718_v0 }
0x1037   :  { %8833 = vmatprep.mubr.msk.bf16.mxu0 %vm814_vm4, %v2148_v35  ;;  %v2145_v26 = vmul.f32 %v9522_v36, %v9506_v39 }
0x1039   :  { %v2149_v54 = vpack.c.bf16 %v2145_v26, %v2144_v37  ;;  %8844 = vmatpush3.bf16.msra.mxu1 %v2289_v42  ;;  %v7957_v42 = vld [vmem:[%s11943_s6 + $0x68] sm:$0xff] }
0x103a   :  { %2638 = vmatprep.subr.bf16.mxu1 %v9720_v27 }
0x103d   :  { %8834 = vmatmul.mubr.msk.bf16.gmra.mrb[24].mxu0 %vm814_vm4, %v2149_v54  ;;  %v9252_v54 = vld [vmem:[%s11943_s6 + $0x3c] ss:$8 sps:$4 sm:$0xff]  }
0x103e   :  { %2453 = vmatprep.mubr.bf16.mxu0 %v9720_v27  ;;  %2421 = vmatprep.subr.bf16.mxu0 %v9252_v54 }
0x1108   :  { %v8831_v44 = vpop.f32.mrb[20].mxu0 }
0x1109   :  { %v2205_v39 = vpop.f32.mrb[21].mxu0  ;;  %v2239_v52 = vmul.f32 %v8831_v44, %v10096_v3  ;;  %v7966_v44 = vcombine.high %v7957_v42, %v7957_v42 }
0x110a   :  { %v8832_v47 = vpop.f32.mrb[22].mxu0  ;;  %v2236_v50 = vmul.f32 %v2205_v39, %v10087_v63  ;;  %v7965_v39 = vcombine.low %v7957_v42, %v7957_v42 }
0x110b   :  { %v2208_v22 = vpop.f32.mrb[23].mxu0  ;;  %v2241_v58 = vmul.f32 %v8832_v47, %v10103_v9 }
0x110c   :  { %v2237_v51 = vmul.f32 %v2208_v22, %v10093_v57  ;;  %v2416_v47 = vsel %vm87_vm1, %v7965_v39, 0  ;;  %v9261_v22 = vld [vmem:[%s11944_s8 + $0x70] sm:$0xff]  }
0x110e   :  { %v2238_v55 = vadd.f32 %v2237_v51, %v2236_v50 }
0x1110   :  { %v2240_v48 = vadd.f32 %v2239_v52, %v2238_v55  ;;  %v8835_v8 = vpop.f32.mrb[24].mxu0  ;;  %v2348_v55 = vrot.slane %v10307_v53, %v10084_v56 }
0x1111   :  { %v2221_v45 = vpop.f32.mrb[25].mxu0  ;;  %v2247_v19 = vmul.f32 %v8835_v8, %v10121_v24 }
0x1112   :  { %v2242_v10 = vadd.f32 %v2241_v58, %v2240_v48  ;;  %v2243_v6 = vmul.f32 %v2221_v45, %v10112_v17  ;;  %v8836_v14 = vpop.f32.mrb[26].mxu0  ;;  %v2353_v48 = vrot.slane %v10307_v53, %v10090_v1 }
0x1113   :  { %v2224_v15 = vpop.f32.mrb[27].mxu0  ;;  %v2249_v23 = vmul.f32 %v8836_v14, %v10124_v29  ;;  %v9262_v14 = vld [vmem:[%s11944_s8 + $0x78] sm:$0xff]  }
0x1114   :  { %v2244_v40 = vadd.f32 %v2243_v6, %v2242_v10  ;;  %v2245_v49 = vmul.f32 %v2224_v15, %v10117_v13  ;;  %v9263_v15 = vld [vmem:[%s11944_s8 + $0x80] sm:$0xff]  }
0x1116   :  { %v2246_v21 = vadd.f32 %v2245_v49, %v2244_v40  ;;  %v9264_v40 = vld [vmem:[%s11944_s8 + $0x88] sm:$0xff]   ;;  %v9265_v49 = vld [vmem:[%s11944_s8 + $0x90] sm:$0xff]  }
0x1118   :  { %v2248_v7 = vadd.f32 %v2247_v19, %v2246_v21  ;;  %v9266_v19 = vld [vmem:[%s11944_s8 + $0x98] sm:$0xff]   ;;  %v9267_v21 = vld [vmem:[%s11944_s8 + $0xa0] sm:$0xff]  }
0x111a   :  { %v2250_v2 = vadd.f32 %v2249_v23, %v2248_v7  ;;  %v9268_v23 = vld [vmem:[%s11944_s8 + $0xa8] sm:$0xff]   ;;  %v9269_v7 = vld [vmem:[%s11944_s8 + $0xb0] sm:$0xff]  }
0x111c   :  { %v2259_v61 = vpack.c.bf16 %v2250_v2, %v2250_v2  ;;  %v9270_v2 = vld [vmem:[%s11944_s8 + $0xb8] sm:$0xff]  }
0x111e   :  { %8846 = vmatmul.mubr.msk.bf16.vlgmr.msra.gmra.mrb[80].mxu1 %vm83_vm2, %v2259_v61  ;;  %v9271_v61 = vld [vmem:[%s11944_s8 + $0xc0] sm:$0xff]  }
0x111f   :  { %2639 = vmatpush1.bf16.msra.mxu1 %v9261_v22 }
0x1120   :  { %2640 = vmatprep.subr.bf16.mxu1 %v9720_v27 }
0x1123   :  { %2641 = vmatpush1.bf16.msra.mxu1 %v9262_v14 }
0x1124   :  { %2642 = vmatprep.subr.bf16.mxu1 %v9720_v27 }
0x1127   :  { %2643 = vmatpush1.bf16.msra.mxu1 %v9263_v15 }
0x1128   :  { %2644 = vmatprep.subr.bf16.mxu1 %v9720_v27 }
0x112b   :  { %2645 = vmatpush1.bf16.msra.mxu1 %v9264_v40 }
0x112c   :  { %2646 = vmatprep.subr.bf16.mxu1 %v9720_v27 }
0x112f   :  { %2647 = vmatpush1.bf16.msra.mxu1 %v9265_v49 }
0x1130   :  { %2648 = vmatprep.subr.bf16.mxu1 %v9720_v27 }
0x1133   :  { %2649 = vmatpush1.bf16.msra.mxu1 %v9266_v19 }
0x1134   :  { %2650 = vmatprep.subr.bf16.mxu1 %v9720_v27 }
0x1137   :  { %2651 = vmatpush1.bf16.msra.mxu1 %v9267_v21 }
0x1138   :  { %2652 = vmatprep.subr.bf16.mxu1 %v9720_v27 }
0x113b   :  { %2653 = vmatpush1.bf16.msra.mxu1 %v9268_v23 }
0x113c   :  { %2654 = vmatprep.subr.bf16.mxu1 %v9720_v27 }
0x113f   :  { %2655 = vmatpush1.bf16.msra.mxu1 %v9269_v7 }
0x1140   :  { %2656 = vmatprep.subr.bf16.mxu1 %v9720_v27 }
0x1143   :  { %2657 = vmatpush1.bf16.msra.mxu1 %v9270_v2 }
0x1144   :  { %2658 = vmatprep.subr.bf16.mxu1 %v9720_v27 }
0x1147   :  { %2659 = vmatpush1.bf16.msra.mxu1 %v9271_v61 }
0x1148   :  { %2660 = vmatprep.subr.bf16.mxu1 %v9720_v27 }
0x11f1   :  { %v2325_v25 = vpop.f32.mrb[80].mxu1 }
0x11f2   :  { %v2326_v28 = vadd.f32 %v2325_v25, %v2263_v11  ;;  %v8847_v30 = vpop.f32.mrb[81].mxu1  ;;  %v9272_v11 = vld [vmem:[%s11944_s8 + $0xc8] sm:$0xff]   ;;  %v9273_v25 = vld [vmem:[%s11944_s8 + $0xd0] sm:$0xff]  }
0x11f3   :  { %v2328_v31 = vpop.f32.mrb[82].mxu1  ;;  %2661 = vmatpush1.bf16.msra.mxu1 %v9272_v11  ;;  %v7958_v30 = vld [vmem:[%s11945_s7 + $0x1] ss:$8 sm:$0x3] }
0x11f4   :  { %v10462_v32 = vadd.f32 %v2326_v28, %v10243_v43  ;;  %v8848_v18 = vpop.f32.mrb[83].mxu1  ;;  %v9250_v43 = vld [vmem:[%s11943_s6 + $0x38] ss:$8 sps:$4 sm:$0xff]   ;;  %2662 = vmatprep.subr.bf16.mxu1 %v9720_v27  ;;  %v2370_v31 = vrot.slane %v7958_v30, %v9931_v60 }
0x11f5   :  { %2422 = vmatpush1.bf16.msra.mxu0 %v9250_v43  ;;  %v9274_v28 = vld [vmem:[%s11944_s8 + $0xd8] sm:$0xff]   ;;  %v2374_v18 = vrot.slane %v7958_v30, %v9939_v62 }
0x11f6   :  { %v2332_v33 = vsel %vm83_vm2, %v10462_v32, 0.0  ;;  %2423 = vmatprep.subr.bf16.mxu0 %v9255_v34 }
0x11f7   :  { %2333 = vadd.xlane.f32.xlu1 %v2332_v33  ;;  %2663 = vmatpush1.bf16.msra.mxu1 %v9273_v25 }
0x11f8   :  { %2664 = vmatprep.subr.bf16.mxu1 %v9720_v27 }
0x11f9   :  { %2424 = vmatpush1.bf16.msra.mxu0 %v9253_v38 }
0x11fa   :  { %2425 = vmatprep.subr.bf16.mxu0 %v9258_v20 }
0x11fb   :  { %2665 = vmatpush1.bf16.msra.mxu1 %v9274_v28 }
0x11fc   :  { %8849 = vmatprep.subr.bf16.mxu1 %v9718_v0 }
0x11fd   :  { %2426 = vmatpush1.bf16.msra.mxu0 %v9256_v41 }
0x11fe   :  { %7967 = vmatprep.subr.msk.bf16.mxu0 %vm87_vm1, %v7966_v44 }
0x1201   :  { %2428 = vmatpush1.bf16.msra.mxu0 %v2416_v47 }
0x1202   :  { %2829 = vmatprep.subr.bf16.mxu0 %v9720_v27 }
0x1284   :  { %v2334_v4 = vpop.xlane.xlu1 %2333 }
0x1285   :  { %v2335_v35 = vmul.f32 0.017857144, %v2334_v4 }
0x1287   :  { %v2336_v36 = vsub.f32 %v10462_v32, %v2335_v35 }
0x1289   :  { %v2337_v26 = vmul.f32 %v2336_v36, %v2336_v36 }
0x128b   :  { %v2338_v37 = vsel %vm83_vm2, %v2337_v26, 0.0 }
0x128c   :  { %2339 = vadd.xlane.f32.xlu0 %v2338_v37 }
0x1319   :  { %v2340_v50 = vpop.xlane.xlu0 %2339 }
0x131a   :  { %v2341_v51 = vmul.f32 0.017857144, %v2340_v50 }
0x131c   :  { %v2342_v52 = vadd.f32 1e-05, %v2341_v51 }
0x131e   :  { %9523 = vrsqrt.f32 %v2342_v52 }
0x1328   :  { %v9524_v58 = vpop.eup %9523 }
0x1329   :  { %v2344_v8 = vmul.f32 %v9524_v58, %v2336_v36 }
0x132b   :  { %v2349_v45 = vmul.f32 %v2348_v55, %v2344_v8 }
0x132d   :  { %v2354_v10 = vadd.f32 %v2353_v48, %v2349_v45 }
0x132f   :  { %v2363_v6 = vpack.c.bf16 %v2354_v10, %v2354_v10 }
0x1331   :  { %7968 = vmatmul.mubr.msk.bf16.vlgmr.msra.gmra.mrb[28].mxu0 %vm83_vm2, %v2363_v6 }
0x1332   :  { %2861 = vmatprep.mubr.bf16.mxu0 %v9720_v27 }
0x1404   :  { %v2455_v33 = vpop.f32.mrb[28].mxu0 }
0x1405   :  { %v2456_v4 = vadd.f32 %v2455_v33, %v2370_v31  ;;  %v2457_v35 = vpop.f32.mrb[29].mxu0 }
0x1406   :  { %v2458_v36 = vadd.f32 %v2457_v35, %v2374_v18  ;;  %v2459_v26 = vpop.f32.mrb[30].mxu0 }
0x1407   :  { %v2464_v37 = vmul.f32 0.70710677, %v2456_v4  ;;  %v2460_v54 = vpop.f32.mrb[31].mxu0 }
0x1408   :  { %v2465_v43 = vmul.f32 0.70710677, %v2458_v36 }
0x1409   :  { %v2470_v34 = vand.u32 2147483647, %v2464_v37  ;;  %vm2466_vm12 = vcmp.ge.f32.partialorder %v2464_v37, 0.0  ;;  %v2550_v37 = vrot.slane %v10307_v53, %v10107_v12  ;;  %v9276_v53 = vld [vmem:[%s11939_s3 + $0xb0] sm:$0xff]  }
0x140a   :  { %v2471_v38 = vand.u32 2147483647, %v2465_v43  ;;  %vm2467_vm13 = vcmp.ge.f32.partialorder %v2465_v43, 0.0  ;;  %v2468_v26 = vsel %vm2466_vm12, 1.0, %v9737_v46 }
0x140b   :  { %v2472_v20 = vmul.f32 0.3275911, %v2470_v34  ;;  %v2498_v39 = vsub.f32 0.0, %v2470_v34 }
0x140c   :  { %v2473_v41 = vmul.f32 0.3275911, %v2471_v38  ;;  %v2499_v47 = vsub.f32 0.0, %v2471_v38 }
0x140d   :  { %v2474_v42 = vadd.f32 1.0, %v2472_v20  ;;  %v2500_v50 = vmul.f32 %v2498_v39, %v2470_v34 }
0x140e   :  { %v2475_v44 = vadd.f32 1.0, %v2473_v41  ;;  %v2501_v55 = vmul.f32 %v2499_v47, %v2471_v38  ;;  %v2469_v38 = vsel %vm2467_vm13, 1.0, %v9737_v46  ;;  %v2462_v41 = vmul.f32 0.5, %v2456_v4 }
0x140f   :  { %9525 = vrcp.f32 %v2474_v42  ;;  %v2502_v8 = vmul.f32 1.442695, %v2500_v50 }
0x1410   :  { %9527 = vrcp.f32 %v2475_v44  ;;  %v2504_v6 = vmul.f32 1.442695, %v2501_v55  ;;  %v2463_v44 = vmul.f32 0.5, %v2458_v36 }
0x1411   :  { %9529 = vpow2.f32 %v2502_v8  ;;  %v9275_v8 = vld [vmem:[%s11939_s3 + $0xa8] sm:$0xff]  }
0x1412   :  { %9531 = vpow2.f32 %v2504_v6 }
0x1419   :  { %v9526_v22 = vpop.eup %9525 }
0x141a   :  { %v9528_v51 = vpop.eup %9527  ;;  %v2480_v52 = vmul.f32 1.0614054, %v9526_v22 }
0x141b   :  { %v2481_v58 = vmul.f32 1.0614054, %v9528_v51  ;;  %v9530_v28 = vpop.eup %9529 }
0x141c   :  { %v2482_v48 = vadd.f32 -1.4531521, %v2480_v52  ;;  %v9532_v31 = vpop.eup %9531 }
0x141d   :  { %v2483_v45 = vadd.f32 -1.4531521, %v2481_v58 }
0x141e   :  { %v2484_v10 = vmul.f32 %v9526_v22, %v2482_v48 }
0x141f   :  { %v2485_v14 = vmul.f32 %v9528_v51, %v2483_v45  ;;  %v2797_v45 = vsel %vm83_vm2, %v9275_v8, 0 }
0x1420   :  { %v2486_v15 = vadd.f32 1.4214138, %v2484_v10  ;;  %2830 = vmatpush1.bf16.xpose.msra.mxu0 %v2797_v45  ;;  %v9277_v10 = vld [vmem:[%s11939_s3 + $0xb8] sm:$0xff]  }
0x1421   :  { %v2487_v40 = vadd.f32 1.4214138, %v2485_v14  ;;  %2831 = vmatprep.subr.bf16.mxu0 %v9720_v27  ;;  %v2803_v6 = vsel %vm83_vm2, %v9277_v10, 0  ;;  %v9278_v14 = vld [vmem:[%s11939_s3 + $0xc0] sm:$0xff]  }
0x1422   :  { %v2488_v49 = vmul.f32 %v9526_v22, %v2486_v15  ;;  %v2806_v15 = vsel %vm83_vm2, %v9278_v14, 0 }
0x1423   :  { %v2489_v19 = vmul.f32 %v9528_v51, %v2487_v40  ;;  %v9279_v40 = vld [vmem:[%s11939_s3 + $0xc8] sm:$0xff]  }
0x1424   :  { %v2490_v21 = vadd.f32 -0.28449672, %v2488_v49  ;;  %v2809_v49 = vsel %vm83_vm2, %v9279_v40, 0 }
0x1425   :  { %v2491_v23 = vadd.f32 -0.28449672, %v2489_v19  ;;  %v9280_v19 = vld [vmem:[%s11939_s3 + $0xd0] sm:$0xff]  }
0x1426   :  { %v2492_v7 = vmul.f32 %v9526_v22, %v2490_v21  ;;  %v2812_v21 = vsel %vm83_vm2, %v9280_v19, 0 }
0x1427   :  { %v2493_v2 = vmul.f32 %v9528_v51, %v2491_v23  ;;  %v9281_v23 = vld [vmem:[%s11939_s3 + $0xd8] sm:$0xff]  }
0x1428   :  { %v2494_v61 = vadd.f32 0.2548296, %v2492_v7  ;;  %v2815_v7 = vsel %vm83_vm2, %v9281_v23, 0 }
0x1429   :  { %v2495_v11 = vadd.f32 0.2548296, %v2493_v2  ;;  %v9282_v2 = vld [vmem:[%s11939_s3 + $0xe0] sm:$0xff]  }
0x142a   :  { %v2496_v25 = vmul.f32 %v9526_v22, %v2494_v61  ;;  %v2818_v61 = vsel %vm83_vm2, %v9282_v2, 0 }
0x142b   :  { %v2497_v30 = vmul.f32 %v9528_v51, %v2495_v11 }
0x142c   :  { %v2506_v18 = vmul.f32 %v9530_v28, %v2496_v25 }
0x142d   :  { %v2507_v33 = vmul.f32 %v9532_v31, %v2497_v30 }
0x142e   :  { %v2508_v35 = vsub.f32 1.0, %v2506_v18  ;;  %v9283_v18 = vld [vmem:[%s11939_s3 + $0xe8] sm:$0xff]  }
0x142f   :  { %v2509_v54 = vsub.f32 1.0, %v2507_v33  ;;  %v2821_v33 = vsel %vm83_vm2, %v9283_v18, 0 }
0x1430   :  { %v2510_v34 = vmul.f32 %v2508_v35, %v2468_v26  ;;  %v9284_v35 = vld [vmem:[%s11939_s3 + $0xf0] sm:$0xff]  }
0x1431   :  { %v2511_v20 = vmul.f32 %v2509_v54, %v2469_v38  ;;  %v2824_v26 = vsel %vm83_vm2, %v9284_v35, 0  ;;  %v9285_v54 = vld [vmem:[%s11939_s3 + $0xf8] ss:$0 sps:$4 sm:$0xff]  }
0x1432   :  { %v2512_v42 = vadd.f32 1.0, %v2510_v34  ;;  %v2827_v34 = vsel %vm83_vm2, %v9285_v54, 0 }
0x1433   :  { %v2513_v39 = vadd.f32 1.0, %v2511_v20 }
0x1434   :  { %v2514_v47 = vmul.f32 %v2512_v42, %v2462_v41  ;;  %v10631_v42 = vld [vmem:[%s11940_s9 + $0x10] sm:$0x3f] }
0x1435   :  { %v2515_v22 = vmul.f32 %v2513_v39, %v2463_v44  ;;  %v2697_v44 = vrot.slane %v10631_v42, %v9931_v60 }
0x1436   :  { %v2545_v51 = vpack.c.bf16 %v2514_v47, %v2514_v47 }
0x1437   :  { %v2546_v50 = vpack.c.bf16 %v2515_v22, %v2515_v22  ;;  %v2702_v22 = vrot.slane %v10631_v42, %v9939_v62 }
0x1439   :  { %8011 = vmatprep.mubr.msk.bf16.mxu1 %vm1421_vm11, %v2546_v50 }
0x143a   :  { %2671 = vmatmul.mubr.bf16.vlgmr.msra.gmra.mrb[84].mxu1 %v2545_v51 }
0x143b   :  { %8851 = vmatprep.mubr.msk.bf16.mxu1 %vm9719_vm0, %v9718_v0 }
0x150d   :  { %v2672_v43 = vpop.f32.mrb[84].mxu1 }
0x150e   :  { %v2673_v52 = vadd.f32 %v2672_v43, %v2550_v37  ;;  %v2674_v55 = vpop.f32.mrb[85].mxu1  ;;  %v10643_v43 = vld [vmem:[%s11941_s4 + $0x2] ss:$8 sm:$0x3] }
0x150f   :  { %v2675_v4 = vpop.f32.mrb[86].mxu1 }
0x1510   :  { %v10567_v36 = vadd.f32 %v2673_v52, %v10462_v32  ;;  %v2676_v58 = vpop.f32.mrb[87].mxu1  ;;  %v2800_v32 = vsel %vm83_vm2, %v9276_v53, 0  ;;  %v2733_v52 = vrot.slane %v10643_v43, %v9931_v60 }
0x1511   :  { %2832 = vmatpush1.bf16.xpose.msra.mxu0 %v2800_v32 }
0x1512   :  { %v2681_v48 = vsel %vm83_vm2, %v10567_v36, 0.0  ;;  %2833 = vmatprep.subr.bf16.mxu0 %v9720_v27 }
0x1513   :  { %2682 = vadd.xlane.f32.xlu0 %v2681_v48 }
0x1519   :  { %2834 = vmatpush1.bf16.xpose.msra.mxu0 %v2803_v6 }
0x151a   :  { %2835 = vmatprep.subr.bf16.mxu0 %v9720_v27 }
0x1521   :  { %2836 = vmatpush1.bf16.xpose.msra.mxu0 %v2806_v15 }
0x1522   :  { %2837 = vmatprep.subr.bf16.mxu0 %v9720_v27 }
0x1529   :  { %2838 = vmatpush1.bf16.xpose.msra.mxu0 %v2809_v49 }
0x152a   :  { %2839 = vmatprep.subr.bf16.mxu0 %v9720_v27 }
0x1531   :  { %2840 = vmatpush1.bf16.xpose.msra.mxu0 %v2812_v21 }
0x1532   :  { %2841 = vmatprep.subr.bf16.mxu0 %v9720_v27 }
0x1539   :  { %2842 = vmatpush1.bf16.xpose.msra.mxu0 %v2815_v7 }
0x153a   :  { %2843 = vmatprep.subr.bf16.mxu0 %v9720_v27 }
0x1541   :  { %2844 = vmatpush1.bf16.xpose.msra.mxu0 %v2818_v61 }
0x1542   :  { %2845 = vmatprep.subr.bf16.mxu0 %v9720_v27 }
0x1549   :  { %2846 = vmatpush1.bf16.xpose.msra.mxu0 %v2821_v33 }
0x154a   :  { %2847 = vmatprep.subr.bf16.mxu0 %v9720_v27 }
0x1551   :  { %2848 = vmatpush1.bf16.xpose.msra.mxu0 %v2824_v26 }
0x1552   :  { %2849 = vmatprep.subr.bf16.mxu0 %v9720_v27 }
0x1559   :  { %2850 = vmatpush1.bf16.xpose.msra.mxu0 %v2827_v34 }
0x155a   :  { %8879 = vmatprep.subr.bf16.mxu0 %v9718_v0 }
0x15a0   :  { %v2683_v11 = vpop.xlane.xlu0 %2682 }
0x15a1   :  { %v2684_v25 = vmul.f32 0.017857144, %v2683_v11 }
0x15a3   :  { %v2685_v28 = vsub.f32 %v10567_v36, %v2684_v25 }
0x15a5   :  { %v2686_v30 = vmul.f32 %v2685_v28, %v2685_v28 }
0x15a7   :  { %v2687_v31 = vsel %vm83_vm2, %v2686_v30, 0.0 }
0x15a8   :  { %2688 = vadd.xlane.f32.xlu1 %v2687_v31 }
0x1635   :  { %v2689_v38 = vpop.xlane.xlu1 %2688 }
0x1636   :  { %v2690_v20 = vmul.f32 0.017857144, %v2689_v38 }
0x1638   :  { %v2691_v41 = vadd.f32 1e-05, %v2690_v20 }
0x163a   :  { %9533 = vrsqrt.f32 %v2691_v41 }
0x1644   :  { %v9534_v39 = vpop.eup %9533 }
0x1645   :  { %v2693_v47 = vmul.f32 %v9534_v39, %v2685_v28 }
0x1647   :  { %v2698_v50 = vmul.f32 %v2697_v44, %v2693_v47 }
0x1649   :  { %v2703_v51 = vadd.f32 %v2702_v22, %v2698_v50 }
0x164b   :  { %v2726_v37 = vpack.c.bf16 %v2703_v51, %v2703_v51 }
0x164d   :  { %8046 = vmatmul.mubr.msk.bf16.vlgmr.msra.gmra.mrb[32].mxu0 %vm83_vm2, %v2726_v37 }
0x164e   :  { %8881 = vmatprep.mubr.msk.bf16.mxu0 %vm9719_vm0, %v9718_v0 }
0x1720   :  { %v2863_v55 = vpop.f32.mrb[32].mxu0 }
0x1721   :  { %v2864_v4 = vadd.f32 %v2863_v55, %v2733_v52  ;;  %v10647_v58 = vpop.f32.mrb[33].mxu0 }
0x1722   :  { %v2867_v48 = vpop.f32.mrb[34].mxu0 }
0x1723   :  { %v10649_v8 = vpack.c.bf16 %v2864_v4, %v2864_v4  ;;  %v2868_v45 = vpop.f32.mrb[35].mxu0 }
0x1725   :  { %2923 = vrot.lane.b32.xlu1 %v10649_v8, %s11981_s26  ;;  %2873 = vrot.lane.b32.xlu0 %v10649_v8, %s11979_s24  ;;  %s12013_s24 = smov 16  }
0x1729   :  { %2921 = vrot.lane.b32.xlu1 %v10649_v8, %s12004_s30  ;;  %2973 = vrot.lane.b32.xlu0 %v10649_v8, %s12005_s15 }
0x172d   :  { %2971 = vrot.lane.b32.xlu1 %v10649_v8, %s12006_s16  ;;  %3023 = vrot.lane.b32.xlu0 %v10649_v8, %s12007_s17 }
0x1731   :  { %3021 = vrot.lane.b32.xlu1 %v10649_v8, %s12008_s23  ;;  %3073 = vrot.lane.b32.xlu0 %v10649_v8, %s11997_s2 }
0x1735   :  { %3123 = vrot.lane.b32.xlu1 %v10649_v8, %s11999_s25  ;;  %3071 = vrot.lane.b32.xlu0 %v10649_v8, %s12009_s28 }
0x1739   :  { %3121 = vrot.lane.b32.xlu1 %v10649_v8, %s12010_s29  ;;  %3173 = vrot.lane.b32.xlu0 %v10649_v8, %s12001_s1 }
0x173d   :  { %3223 = vrot.lane.b32.xlu1 %v10649_v8, %s11998_s19  ;;  %3171 = vrot.lane.b32.xlu0 %v10649_v8, %s12002_s21 }
0x1741   :  { %3221 = vrot.lane.b32.xlu1 %v10649_v8, %s12000_s0 }
0x1797   :  { %v2924_v53 = vpop.permute.xlu1 %2923  ;;  %v2874_v32 = vpop.permute.xlu0 %2873 }
0x1798   :  { %v2879_v10 = vsel %vm417_vm3, %v2874_v32, 0  ;;  %v2929_v15 = vsel %vm417_vm3, %v2924_v53, 0 }
0x1799   :  { %8850 = vmatpush3.bf16.xpose.msra.mxu1 %v2879_v10 }
0x179a   :  { %8855 = vmatprep.subr.bf16.mxu1 %v9718_v0 }
0x179b   :  { %v2922_v6 = vpop.permute.xlu1 %2921  ;;  %v2974_v49 = vpop.permute.xlu0 %2973 }
0x179c   :  { %v2979_v21 = vsel %vm417_vm3, %v2974_v49, 0 }
0x179f   :  { %v2972_v14 = vpop.permute.xlu1 %2971  ;;  %v3024_v7 = vpop.permute.xlu0 %3023 }
0x17a0   :  { %8852 = vmatmul.mubr.msk.bf16.vlgmr.msra.gmra.mrb[88].mxu1 %vm417_vm3, %v10649_v8  ;;  %v3029_v11 = vsel %vm417_vm3, %v3024_v7, 0 }
0x17a1   :  { %8856 = vmatpush3.bf16.xpose.msra.mxu1 %v2929_v15  ;;  %8857 = vmatprep.mubr.msk.bf16.mxu1 %vm9719_vm0, %v9718_v0 }
0x17a2   :  { %8861 = vmatprep.subr.bf16.mxu1 %v9718_v0 }
0x17a3   :  { %v3022_v40 = vpop.permute.xlu1 %3021  ;;  %v3074_v28 = vpop.permute.xlu0 %3073 }
0x17a4   :  { %v3079_v18 = vsel %vm417_vm3, %v3074_v28, 0 }
0x17a7   :  { %v3124_v19 = vpop.permute.xlu1 %3123  ;;  %v3072_v30 = vpop.permute.xlu0 %3071 }
0x17a8   :  { %v3129_v23 = vsel %vm417_vm3, %v3124_v19, 0  ;;  %8858 = vmatmul.mubr.msk.bf16.vlgmr.msra.gmra.mrb[92].mxu1 %vm417_vm3, %v2922_v6 }
0x17a9   :  { %8862 = vmatpush3.bf16.xpose.msra.mxu1 %v2979_v21  ;;  %8880 = vmatpush3.bf16.xpose.msra.mxu0 %v3129_v23 }
0x17aa   :  { %8863 = vmatprep.mubr.msk.bf16.mxu1 %vm9719_vm0, %v9718_v0  ;;  %8867 = vmatprep.subr.bf16.mxu1 %v9718_v0 }
0x17ab   :  { %v3122_v2 = vpop.permute.xlu1 %3121  ;;  %8891 = vmatprep.subr.bf16.mxu0 %v9718_v0  ;;  %v3174_v33 = vpop.permute.xlu0 %3173 }
0x17ac   :  { %v3179_v35 = vsel %vm417_vm3, %v3174_v33, 0 }
0x17af   :  { %v3224_v61 = vpop.permute.xlu1 %3223  ;;  %v3172_v26 = vpop.permute.xlu0 %3171 }
0x17b0   :  { %v3229_v25 = vsel %vm417_vm3, %v3224_v61, 0  ;;  %8864 = vmatmul.mubr.msk.bf16.vlgmr.msra.gmra.mrb[96].mxu1 %vm417_vm3, %v2972_v14  ;;  %8882 = vmatmul.mubr.msk.bf16.vlgmr.msra.gmra.mrb[36].mxu0 %vm417_vm3, %v3122_v2 }
0x17b1   :  { %8868 = vmatpush3.bf16.xpose.msra.mxu1 %v3029_v11  ;;  %8892 = vmatpush3.bf16.xpose.msra.mxu0 %v3229_v25 }
0x17b2   :  { %8869 = vmatprep.mubr.msk.bf16.mxu1 %vm9719_vm0, %v9718_v0  ;;  %8893 = vmatprep.mubr.msk.bf16.mxu0 %vm9719_vm0, %v9718_v0 }
0x17b3   :  { %8873 = vmatprep.subr.bf16.mxu1 %v9718_v0  ;;  %8907 = vmatprep.subr.bf16.mxu0 %v9718_v0  ;;  %v3222_v31 = vpop.permute.xlu1 %3221 }
0x17b8   :  { %8870 = vmatmul.mubr.msk.bf16.vlgmr.msra.gmra.mrb[100].mxu1 %vm417_vm3, %v3022_v40  ;;  %8894 = vmatmul.mubr.msk.bf16.vlgmr.msra.gmra.mrb[40].mxu0 %vm417_vm3, %v3222_v31 }
0x17b9   :  { %8874 = vmatpush3.bf16.xpose.msra.mxu1 %v3079_v18  ;;  %8875 = vmatprep.mubr.msk.bf16.mxu1 %vm9719_vm0, %v9718_v0 }
0x17ba   :  { %8885 = vmatprep.subr.bf16.mxu1 %v9718_v0  ;;  %8915 = vmatprep.mubr.msk.bf16.mxu0 %vm9719_vm0, %v9718_v0 }
0x17c0   :  { %8876 = vmatmul.mubr.msk.bf16.vlgmr.msra.gmra.mrb[104].mxu1 %vm417_vm3, %v3072_v30 }
0x17c1   :  { %8886 = vmatpush3.bf16.xpose.msra.mxu1 %v3179_v35  ;;  %8887 = vmatprep.mubr.msk.bf16.mxu1 %vm9719_vm0, %v9718_v0 }
0x17c8   :  { %8888 = vmatmul.mubr.msk.bf16.vlgmr.msra.gmra.mrb[108].mxu1 %vm417_vm3, %v3172_v26 }
0x1873   :  { %v2915_v54 = vpop.f32.mrb[88].mxu1 }
0x1874   :  { %v8853_v34 = vpop.f32.mrb[89].mxu1  ;;  %v3271_v38 = vsel %vm814_vm4, %v2915_v54, -inf }
0x1875   :  { %3272 = vmax.xlane.f32.xlu0 %v3271_v38  ;;  %v2918_v20 = vpop.f32.mrb[90].mxu1 }
0x1876   :  { %v8854_v41 = vpop.f32.mrb[91].mxu1 }
0x187b   :  { %v2965_v44 = vpop.f32.mrb[92].mxu1 }
0x187c   :  { %v8859_v39 = vpop.f32.mrb[93].mxu1  ;;  %v3274_v47 = vsel %vm814_vm4, %v2965_v44, -inf }
0x187d   :  { %3275 = vmax.xlane.f32.xlu1 %v3274_v47  ;;  %v2968_v22 = vpop.f32.mrb[94].mxu1 }
0x187e   :  { %v8860_v50 = vpop.f32.mrb[95].mxu1 }
0x1883   :  { %v3015_v51 = vpop.f32.mrb[96].mxu1  ;;  %v3165_v37 = vpop.f32.mrb[36].mxu0 }
0x1884   :  { %v8865_v52 = vpop.f32.mrb[97].mxu1  ;;  %v8883_v55 = vpop.f32.mrb[37].mxu0  ;;  %v3277_v4 = vsel %vm814_vm4, %v3015_v51, -inf  ;;  %v3286_v7 = vsel %vm814_vm4, %v3165_v37, -inf }
0x1885   :  { %v3168_v48 = vpop.f32.mrb[38].mxu0  ;;  %3278 = vmax.xlane.f32.xlu0 %v3277_v4  ;;  %v3018_v45 = vpop.f32.mrb[98].mxu1 }
0x1886   :  { %v8866_v53 = vpop.f32.mrb[99].mxu1  ;;  %v8884_v32 = vpop.f32.mrb[39].mxu0 }
0x188b   :  { %v3065_v10 = vpop.f32.mrb[100].mxu1  ;;  %v3265_v6 = vpop.f32.mrb[40].mxu0 }
0x188c   :  { %v8871_v14 = vpop.f32.mrb[101].mxu1  ;;  %v8895_v15 = vpop.f32.mrb[41].mxu0  ;;  %v3280_v40 = vsel %vm814_vm4, %v3065_v10, -inf  ;;  %v3292_v11 = vsel %vm814_vm4, %v3265_v6, -inf }
0x188d   :  { %v3268_v49 = vpop.f32.mrb[42].mxu0  ;;  %3281 = vmax.xlane.f32.xlu0 %v3280_v40  ;;  %v3068_v19 = vpop.f32.mrb[102].mxu1 }
0x188e   :  { %v8872_v21 = vpop.f32.mrb[103].mxu1  ;;  %v8896_v23 = vpop.f32.mrb[43].mxu0 }
0x1891   :  { %3287 = vmax.xlane.f32.xlu0 %v3286_v7 }
0x1893   :  { %v3115_v2 = vpop.f32.mrb[104].mxu1 }
0x1894   :  { %v8877_v61 = vpop.f32.mrb[105].mxu1  ;;  %v3283_v25 = vsel %vm814_vm4, %v3115_v2, -inf }
0x1895   :  { %3293 = vmax.xlane.f32.xlu0 %v3292_v11  ;;  %3284 = vmax.xlane.f32.xlu1 %v3283_v25  ;;  %v3118_v28 = vpop.f32.mrb[106].mxu1 }
0x1896   :  { %v8878_v30 = vpop.f32.mrb[107].mxu1 }
0x189b   :  { %v3215_v31 = vpop.f32.mrb[108].mxu1 }
0x189c   :  { %v8889_v18 = vpop.f32.mrb[109].mxu1  ;;  %v3289_v33 = vsel %vm814_vm4, %v3215_v31, -inf }
0x189d   :  { %3290 = vmax.xlane.f32.xlu1 %v3289_v33  ;;  %v3218_v35 = vpop.f32.mrb[110].mxu1 }
0x189e   :  { %v8890_v26 = vpop.f32.mrb[111].mxu1 }
0x1902   :  { %v3273_v34 = vpop.xlane.xlu0 %3272 }
0x1903   :  { %v3295_v38 = vsub.f32 %v2915_v54, %v3273_v34  ;;  %v2737_v34 = vrot.slane %v10643_v43, %v9939_v62 }
0x1905   :  { %v3303_v20 = vmul.f32 1.442695, %v3295_v38  ;;  %v2866_v38 = vadd.f32 %v10647_v58, %v2737_v34 }
0x1907   :  { %9535 = vpow2.f32 %v3303_v20  ;;  %v2871_v20 = vpack.c.bf16 %v2866_v38, %v2866_v38 }
0x190a   :  { %v3276_v52 = vpop.xlane.xlu1 %3275 }
0x190b   :  { %v3296_v4 = vsub.f32 %v2965_v44, %v3276_v52 }
0x190d   :  { %v3305_v54 = vmul.f32 1.442695, %v3296_v4 }
0x1911   :  { %v10727_v41 = vpop.eup %9535 }
0x1912   :  { %v3279_v39 = vpop.xlane.xlu0 %3278  ;;  %v3319_v47 = vsel %vm814_vm4, %v10727_v41, 0.0 }
0x1913   :  { %v3297_v22 = vsub.f32 %v3015_v51, %v3279_v39  ;;  %3320 = vadd.xlane.f32.xlu1 %v3319_v47 }
0x1915   :  { %v3307_v50 = vmul.f32 1.442695, %v3297_v22 }
0x1917   :  { %9537 = vpow2.f32 %v3307_v50 }
0x191a   :  { %v3282_v55 = vpop.xlane.xlu0 %3281 }
0x191b   :  { %v3298_v19 = vsub.f32 %v3065_v10, %v3282_v55 }
0x191d   :  { %v3309_v44 = vmul.f32 1.442695, %v3298_v19 }
0x191e   :  { %v3288_v48 = vpop.xlane.xlu0 %3287 }
0x191f   :  { %v3300_v45 = vsub.f32 %v3165_v37, %v3288_v48 }
0x1921   :  { %v10731_v53 = vpop.eup %9537  ;;  %v3313_v32 = vmul.f32 1.442695, %v3300_v45 }
0x1922   :  { %v3285_v14 = vpop.xlane.xlu1 %3284  ;;  %v3294_v15 = vpop.xlane.xlu0 %3293  ;;  %v3325_v40 = vsel %vm814_vm4, %v10731_v53, 0.0 }
0x1923   :  { %9539 = vpow2.f32 %v3313_v32  ;;  %v3299_v49 = vsub.f32 %v3115_v2, %v3285_v14  ;;  %v3302_v51 = vsub.f32 %v3265_v6, %v3294_v15  ;;  %3326 = vadd.xlane.f32.xlu1 %v3325_v40 }
0x1924   :  { %9541 = vpow2.f32 %v3305_v54 }
0x1925   :  { %v3311_v21 = vmul.f32 1.442695, %v3299_v49  ;;  %v3317_v23 = vmul.f32 1.442695, %v3302_v51 }
0x1927   :  { %9543 = vpow2.f32 %v3311_v21 }
0x1928   :  { %9545 = vpow2.f32 %v3317_v23 }
0x1929   :  { %9547 = vpow2.f32 %v3309_v44 }
0x192a   :  { %v3291_v37 = vpop.xlane.xlu1 %3290 }
0x192b   :  { %v3301_v7 = vsub.f32 %v3215_v31, %v3291_v37 }
0x192d   :  { %v9540_v61 = vpop.eup %9539  ;;  %v3315_v11 = vmul.f32 1.442695, %v3301_v7 }
0x192e   :  { %v3334_v25 = vsel %vm814_vm4, %v9540_v61, 0.0  ;;  %v9542_v28 = vpop.eup %9541 }
0x192f   :  { %9549 = vpow2.f32 %v3315_v11  ;;  %3335 = vadd.xlane.f32.xlu0 %v3334_v25  ;;  %v3322_v10 = vsel %vm814_vm4, %v9542_v28, 0.0 }
0x1931   :  { %v9544_v2 = vpop.eup %9543 }
0x1932   :  { %v3331_v6 = vsel %vm814_vm4, %v9544_v2, 0.0  ;;  %v9546_v30 = vpop.eup %9545 }
0x1933   :  { %3332 = vadd.xlane.f32.xlu1 %v3331_v6  ;;  %3323 = vadd.xlane.f32.xlu0 %v3322_v10  ;;  %v3340_v18 = vsel %vm814_vm4, %v9546_v30, 0.0  ;;  %v9548_v33 = vpop.eup %9547 }
0x1934   :  { %v3328_v26 = vsel %vm814_vm4, %v9548_v33, 0.0 }
0x1937   :  { %3341 = vadd.xlane.f32.xlu0 %v3340_v18 }
0x1939   :  { %v9550_v31 = vpop.eup %9549 }
0x193a   :  { %v3337_v35 = vsel %vm814_vm4, %v9550_v31, 0.0 }
0x193b   :  { %3338 = vadd.xlane.f32.xlu1 %v3337_v35  ;;  %3329 = vadd.xlane.f32.xlu0 %v3328_v26 }
0x194c   :  { %3364 = vrot.lane.b32.xlu1 %v10649_v8, %s12003_s22 }
0x1951   :  { %3366 = vrot.lane.b32.xlu0 %v2871_v20, %s12003_s22 }
0x19a0   :  { %v3321_v39 = vpop.xlane.xlu1 %3320 }
0x19a1   :  { %9551 = vrcp.f32 %v3321_v39 }
0x19ab   :  { %v9552_v58 = vpop.eup %9551 }
0x19ac   :  { %v3351_v32 = vmul.f32 %v9552_v58, %v10727_v41 }
0x19b0   :  { %v3327_v22 = vpop.xlane.xlu1 %3326 }
0x19bc   :  { %v3336_v47 = vpop.xlane.xlu0 %3335 }
0x19c0   :  { %v3324_v50 = vpop.xlane.xlu0 %3323  ;;  %v3333_v52 = vpop.xlane.xlu1 %3332 }
0x19c1   :  { %9553 = vrcp.f32 %v3324_v50 }
0x19c2   :  { %9555 = vrcp.f32 %v3333_v52 }
0x19c3   :  { %9557 = vrcp.f32 %v3327_v22 }
0x19c4   :  { %v3342_v55 = vpop.xlane.xlu0 %3341  ;;  %9559 = vrcp.f32 %v3336_v47 }
0x19c8   :  { %v3339_v4 = vpop.xlane.xlu1 %3338  ;;  %v3330_v43 = vpop.xlane.xlu0 %3329 }
0x19c9   :  { %9561 = vrcp.f32 %v3330_v43 }
0x19ca   :  { %9563 = vrcp.f32 %v3339_v4 }
0x19cb   :  { %v9554_v48 = vpop.eup %9553  ;;  %9565 = vrcp.f32 %v3342_v55 }
0x19cc   :  { %v3365_v8 = vpop.permute.xlu1 %3364  ;;  %v3367_v45 = vpop.permute.xlu0 %3366  ;;  %v3352_v14 = vmul.f32 %v9554_v48, %v9542_v28 }
0x19cd   :  { %v3368_v54 = vsel %vm912_vm5, %v3365_v8, %v3367_v45  ;;  %v9556_v49 = vpop.eup %9555 }
0x19ce   :  { %v3382_v15 = vsel %vm87_vm1, %v3368_v54, 0  ;;  %9163 = vmatprep.subr.msk.bf16.mxu1 %vm87_vm1, %v3368_v54  ;;  %v3359_v40 = vpack.c.bf16 %v3352_v14, %v3351_v32  ;;  %v9558_v51 = vpop.eup %9557  ;;  %v3355_v23 = vmul.f32 %v9556_v49, %v9544_v2  ;;  %v9288_v2 = vld [vmem:[%s11942_s5 + $0x48] sm:$0xff]  }
0x19cf   :  { %8898 = vmatpush3.bf16.msra.mxu1 %v3382_v15  ;;  %v9560_v19 = vpop.eup %9559  ;;  %v3353_v44 = vmul.f32 %v9558_v51, %v10731_v53  ;;  %v9286_v53 = vld [vmem:[%s11942_s5 + $0x38] sm:$0xff]   ;;  %v3476_v51 = vrot.slane %v10631_v42, %v10099_v5 }
0x19d0   :  { %8899 = vmatprep.mubr.msk.bf16.mxu1 %vm814_vm4, %v3359_v40  ;;  %v3356_v41 = vmul.f32 %v9560_v19, %v9540_v61  ;;  %8908 = vmatpush3.bf16.msra.mxu0 %v9286_v53  ;;  %v9287_v61 = vld [vmem:[%s11942_s5 + $0x40] sm:$0xff]  }
0x19d1   :  { %8909 = vmatprep.subr.bf16.mxu0 %v9718_v0  ;;  %v9295_v53 = vld [vmem:[%s11943_s6 + $0x84] ss:$8 sps:$4 sm:$0xff]  }
0x19d2   :  { %v3361_v25 = vpack.c.bf16 %v3356_v41, %v3355_v23 }
0x19d3   :  { %v9562_v21 = vpop.eup %9561 }
0x19d4   :  { %v3354_v37 = vmul.f32 %v9562_v21, %v9548_v33  ;;  %v9564_v11 = vpop.eup %9563  ;;  %8910 = vmatpush3.bf16.msra.mxu0 %v9287_v61  ;;  %v9293_v61 = vld [vmem:[%s11943_s6 + $0x80] ss:$8 sps:$4 sm:$0xff]  }
0x19d5   :  { %v9566_v28 = vpop.eup %9565  ;;  %v3357_v6 = vmul.f32 %v9564_v11, %v9550_v31  ;;  %8911 = vmatprep.subr.bf16.mxu0 %v9718_v0 }
0x19d6   :  { %v3360_v7 = vpack.c.bf16 %v3354_v37, %v3353_v44  ;;  %v3358_v10 = vmul.f32 %v9566_v28, %v9546_v30  ;;  %v9289_v30 = vld [vmem:[%s11942_s5 + $0x50] ss:$0 sps:$4 sm:$0xff]  }
0x19d7   :  { %v3502_v33 = vsel %vm87_vm1, %v9289_v30, 0  ;;  %v9296_v30 = vld [vmem:[%s11943_s6 + $0x90] ss:$8 sps:$4 sm:$0xff]  }
0x19d8   :  { %8900 = vmatmul.mubr.msk.bf16.vlgmr.msra.gmra.mrb[112].mxu1 %vm814_vm4, %v3360_v7  ;;  %v3362_v18 = vpack.c.bf16 %v3358_v10, %v3357_v6  ;;  %8912 = vmatpush3.bf16.msra.mxu0 %v9288_v2  ;;  %v9298_v2 = vld [vmem:[%s11943_s6 + $0x94] ss:$8 sps:$4 sm:$0xff]  }
0x19d9   :  { %8903 = vmatprep.mubr.msk.bf16.mxu1 %vm814_vm4, %v3361_v25  ;;  %8913 = vmatprep.subr.bf16.mxu0 %v9718_v0 }
0x19dc   :  { %8914 = vmatpush3.bf16.msra.mxu0 %v3502_v33  ;;  %v8077_v33 = vld [vmem:[%s11943_s6 + $0xa0] sm:$0xff] }
0x19dd   :  { %3851 = vmatprep.subr.bf16.mxu0 %v9720_v27 }
0x19e0   :  { %8904 = vmatmul.mubr.msk.bf16.gmra.mrb[116].mxu1 %vm814_vm4, %v3362_v18  ;;  %v9292_v18 = vld [vmem:[%s11943_s6 + $0x74] ss:$8 sps:$4 sm:$0xff]  }
0x19e1   :  { %3666 = vmatprep.mubr.bf16.mxu1 %v9720_v27  ;;  %3634 = vmatprep.subr.bf16.mxu1 %v9292_v18 }
0x1aab   :  { %v8901_v31 = vpop.f32.mrb[112].mxu1 }
0x1aac   :  { %v3418_v35 = vpop.f32.mrb[113].mxu1  ;;  %v3452_v39 = vmul.f32 %v8901_v31, %v10096_v3  ;;  %v8086_v31 = vcombine.high %v8077_v33, %v8077_v33 }
0x1aad   :  { %v8902_v26 = vpop.f32.mrb[114].mxu1  ;;  %v3449_v38 = vmul.f32 %v3418_v35, %v10087_v63  ;;  %v8085_v35 = vcombine.low %v8077_v33, %v8077_v33 }
0x1aae   :  { %v3421_v34 = vpop.f32.mrb[115].mxu1  ;;  %v3454_v22 = vmul.f32 %v8902_v26, %v10103_v9 }
0x1aaf   :  { %v3450_v20 = vmul.f32 %v3421_v34, %v10093_v57  ;;  %v3629_v26 = vsel %vm87_vm1, %v8085_v35, 0  ;;  %v9301_v34 = vld [vmem:[%s11944_s8 + $0xe0] sm:$0xff]  }
0x1ab1   :  { %v3451_v47 = vadd.f32 %v3450_v20, %v3449_v38 }
0x1ab3   :  { %v3453_v50 = vadd.f32 %v3452_v39, %v3451_v47  ;;  %v8905_v52 = vpop.f32.mrb[116].mxu1  ;;  %v3561_v47 = vrot.slane %v10631_v42, %v10084_v56 }
0x1ab4   :  { %v3434_v55 = vpop.f32.mrb[117].mxu1  ;;  %v3460_v54 = vmul.f32 %v8905_v52, %v10121_v24 }
0x1ab5   :  { %v3455_v4 = vadd.f32 %v3454_v22, %v3453_v50  ;;  %v3456_v43 = vmul.f32 %v3434_v55, %v10112_v17  ;;  %v8906_v58 = vpop.f32.mrb[118].mxu1  ;;  %v3566_v50 = vrot.slane %v10631_v42, %v10090_v1 }
0x1ab6   :  { %v3437_v48 = vpop.f32.mrb[119].mxu1  ;;  %v3462_v14 = vmul.f32 %v8906_v58, %v10124_v29  ;;  %v9302_v58 = vld [vmem:[%s11944_s8 + $0xe8] sm:$0xff]  }
0x1ab7   :  { %v3457_v8 = vadd.f32 %v3456_v43, %v3455_v4  ;;  %v3458_v45 = vmul.f32 %v3437_v48, %v10117_v13  ;;  %v9303_v48 = vld [vmem:[%s11944_s8 + $0xf0] sm:$0xff]  }
0x1ab9   :  { %v3459_v32 = vadd.f32 %v3458_v45, %v3457_v8  ;;  %v9304_v8 = vld [vmem:[%s11944_s8 + $0xf8] sm:$0xff]   ;;  %v9305_v45 = vld [vmem:[%s11944_s8 + $0x100] sm:$0xff]  }
0x1abb   :  { %v3461_v15 = vadd.f32 %v3460_v54, %v3459_v32  ;;  %v9306_v54 = vld [vmem:[%s11944_s8 + $0x108] sm:$0xff]   ;;  %v9307_v32 = vld [vmem:[%s11944_s8 + $0x110] sm:$0xff]  }
0x1abd   :  { %v3463_v40 = vadd.f32 %v3462_v14, %v3461_v15  ;;  %v9308_v14 = vld [vmem:[%s11944_s8 + $0x118] sm:$0xff]   ;;  %v9309_v15 = vld [vmem:[%s11944_s8 + $0x120] sm:$0xff]  }
0x1abf   :  { %v3472_v49 = vpack.c.bf16 %v3463_v40, %v3463_v40  ;;  %v9310_v40 = vld [vmem:[%s11944_s8 + $0x128] sm:$0xff]  }
0x1ac1   :  { %8916 = vmatmul.mubr.msk.bf16.vlgmr.msra.gmra.mrb[44].mxu0 %vm83_vm2, %v3472_v49  ;;  %v9311_v49 = vld [vmem:[%s11944_s8 + $0x130] sm:$0xff]  }
0x1ac2   :  { %3852 = vmatpush1.bf16.msra.mxu0 %v9301_v34 }
0x1ac3   :  { %3853 = vmatprep.subr.bf16.mxu0 %v9720_v27 }
0x1ac6   :  { %3854 = vmatpush1.bf16.msra.mxu0 %v9302_v58 }
0x1ac7   :  { %3855 = vmatprep.subr.bf16.mxu0 %v9720_v27 }
0x1aca   :  { %3856 = vmatpush1.bf16.msra.mxu0 %v9303_v48 }
0x1acb   :  { %3857 = vmatprep.subr.bf16.mxu0 %v9720_v27 }
0x1ace   :  { %3858 = vmatpush1.bf16.msra.mxu0 %v9304_v8 }
0x1acf   :  { %3859 = vmatprep.subr.bf16.mxu0 %v9720_v27 }
0x1ad2   :  { %3860 = vmatpush1.bf16.msra.mxu0 %v9305_v45 }
0x1ad3   :  { %3861 = vmatprep.subr.bf16.mxu0 %v9720_v27 }
0x1ad6   :  { %3862 = vmatpush1.bf16.msra.mxu0 %v9306_v54 }
0x1ad7   :  { %3863 = vmatprep.subr.bf16.mxu0 %v9720_v27 }
0x1ada   :  { %3864 = vmatpush1.bf16.msra.mxu0 %v9307_v32 }
0x1adb   :  { %3865 = vmatprep.subr.bf16.mxu0 %v9720_v27 }
0x1ade   :  { %3866 = vmatpush1.bf16.msra.mxu0 %v9308_v14 }
0x1adf   :  { %3867 = vmatprep.subr.bf16.mxu0 %v9720_v27 }
0x1ae2   :  { %3868 = vmatpush1.bf16.msra.mxu0 %v9309_v15 }
0x1ae3   :  { %3869 = vmatprep.subr.bf16.mxu0 %v9720_v27 }
0x1ae6   :  { %3870 = vmatpush1.bf16.msra.mxu0 %v9310_v40 }
0x1ae7   :  { %3871 = vmatprep.subr.bf16.mxu0 %v9720_v27 }
0x1aea   :  { %3872 = vmatpush1.bf16.msra.mxu0 %v9311_v49 }
0x1aeb   :  { %3873 = vmatprep.subr.bf16.mxu0 %v9720_v27 }
0x1b94   :  { %v3538_v19 = vpop.f32.mrb[44].mxu0 }
0x1b95   :  { %v3539_v21 = vadd.f32 %v3538_v19, %v3476_v51  ;;  %v8917_v23 = vpop.f32.mrb[45].mxu0  ;;  %v9312_v51 = vld [vmem:[%s11944_s8 + $0x138] sm:$0xff]   ;;  %v9313_v19 = vld [vmem:[%s11944_s8 + $0x140] sm:$0xff]  }
0x1b96   :  { %v3541_v44 = vpop.f32.mrb[46].mxu0  ;;  %3874 = vmatpush1.bf16.msra.mxu0 %v9312_v51  ;;  %v8078_v23 = vld [vmem:[%s11945_s7 + $0x2] ss:$8 sm:$0x3] }
0x1b97   :  { %v10786_v37 = vadd.f32 %v3539_v21, %v10567_v36  ;;  %v8918_v41 = vpop.f32.mrb[47].mxu0  ;;  %v9290_v36 = vld [vmem:[%s11943_s6 + $0x70] ss:$8 sps:$4 sm:$0xff]   ;;  %3875 = vmatprep.subr.bf16.mxu0 %v9720_v27  ;;  %v9314_v21 = vld [vmem:[%s11944_s8 + $0x148] sm:$0xff]   ;;  %v3583_v44 = vrot.slane %v8078_v23, %v9931_v60 }
0x1b98   :  { %3635 = vmatpush1.bf16.msra.mxu1 %v9290_v36  ;;  %v3587_v41 = vrot.slane %v8078_v23, %v9939_v62 }
0x1b99   :  { %v3545_v7 = vsel %vm83_vm2, %v10786_v37, 0.0  ;;  %3636 = vmatprep.subr.bf16.mxu1 %v9295_v53 }
0x1b9a   :  { %3546 = vadd.xlane.f32.xlu1 %v3545_v7  ;;  %3876 = vmatpush1.bf16.msra.mxu0 %v9313_v19 }
0x1b9b   :  { %3877 = vmatprep.subr.bf16.mxu0 %v9720_v27 }
0x1b9c   :  { %3637 = vmatpush1.bf16.msra.mxu1 %v9293_v61 }
0x1b9d   :  { %3638 = vmatprep.subr.bf16.mxu1 %v9298_v2 }
0x1b9e   :  { %3878 = vmatpush1.bf16.msra.mxu0 %v9314_v21 }
0x1b9f   :  { %8919 = vmatprep.subr.bf16.mxu0 %v9718_v0 }
0x1ba0   :  { %3639 = vmatpush1.bf16.msra.mxu1 %v9296_v30 }
0x1ba1   :  { %8087 = vmatprep.subr.msk.bf16.mxu1 %vm87_vm1, %v8086_v31 }
0x1ba4   :  { %3641 = vmatpush1.bf16.msra.mxu1 %v3629_v26 }
0x1ba5   :  { %4042 = vmatprep.subr.bf16.mxu1 %v9720_v27 }
0x1c27   :  { %v3547_v11 = vpop.xlane.xlu1 %3546 }
0x1c28   :  { %v3548_v25 = vmul.f32 0.017857144, %v3547_v11 }
0x1c2a   :  { %v3549_v28 = vsub.f32 %v10786_v37, %v3548_v25 }
0x1c2c   :  { %v3550_v6 = vmul.f32 %v3549_v28, %v3549_v28 }
0x1c2e   :  { %v3551_v10 = vsel %vm83_vm2, %v3550_v6, 0.0 }
0x1c2f   :  { %3552 = vadd.xlane.f32.xlu0 %v3551_v10 }
0x1cbc   :  { %v3553_v38 = vpop.xlane.xlu0 %3552 }
0x1cbd   :  { %v3554_v20 = vmul.f32 0.017857144, %v3553_v38 }
0x1cbf   :  { %v3555_v39 = vadd.f32 1e-05, %v3554_v20 }
0x1cc1   :  { %9567 = vrsqrt.f32 %v3555_v39 }
0x1ccb   :  { %v9568_v22 = vpop.eup %9567 }
0x1ccc   :  { %v3557_v52 = vmul.f32 %v9568_v22, %v3549_v28 }
0x1cce   :  { %v3562_v55 = vmul.f32 %v3561_v47, %v3557_v52 }
0x1cd0   :  { %v3567_v4 = vadd.f32 %v3566_v50, %v3562_v55 }
0x1cd2   :  { %v3576_v43 = vpack.c.bf16 %v3567_v4, %v3567_v4 }
0x1cd4   :  { %8088 = vmatmul.mubr.msk.bf16.vlgmr.msra.gmra.mrb[120].mxu1 %vm83_vm2, %v3576_v43 }
0x1cd5   :  { %4074 = vmatprep.mubr.bf16.mxu1 %v9720_v27 }
0x1da7   :  { %v3668_v7 = vpop.f32.mrb[120].mxu1 }
0x1da8   :  { %v3669_v11 = vadd.f32 %v3668_v7, %v3583_v44  ;;  %v3670_v25 = vpop.f32.mrb[121].mxu1 }
0x1da9   :  { %v3671_v28 = vadd.f32 %v3670_v25, %v3587_v41  ;;  %v3672_v6 = vpop.f32.mrb[122].mxu1 }
0x1daa   :  { %v3677_v10 = vmul.f32 0.70710677, %v3669_v11  ;;  %v3673_v18 = vpop.f32.mrb[123].mxu1 }
0x1dab   :  { %v3678_v36 = vmul.f32 0.70710677, %v3671_v28 }
0x1dac   :  { %v3683_v53 = vand.u32 2147483647, %v3677_v10  ;;  %vm3679_vm14 = vcmp.ge.f32.partialorder %v3677_v10, 0.0  ;;  %v3763_v10 = vrot.slane %v10631_v42, %v10107_v12  ;;  %v9316_v42 = vld [vmem:[%s11939_s3 + $0x104] sm:$0xff]  }
0x1dad   :  { %v3684_v61 = vand.u32 2147483647, %v3678_v36  ;;  %vm3680_vm15 = vcmp.ge.f32.partialorder %v3678_v36, 0.0  ;;  %v3681_v6 = vsel %vm3679_vm14, 1.0, %v9737_v46 }
0x1dae   :  { %v3685_v2 = vmul.f32 0.3275911, %v3683_v53  ;;  %v3711_v35 = vsub.f32 0.0, %v3683_v53 }
0x1daf   :  { %v3686_v30 = vmul.f32 0.3275911, %v3684_v61  ;;  %v3712_v26 = vsub.f32 0.0, %v3684_v61 }
0x1db0   :  { %v3687_v33 = vadd.f32 1.0, %v3685_v2  ;;  %v3713_v38 = vmul.f32 %v3711_v35, %v3683_v53 }
0x1db1   :  { %v3688_v31 = vadd.f32 1.0, %v3686_v30  ;;  %v3714_v47 = vmul.f32 %v3712_v26, %v3684_v61  ;;  %v3682_v61 = vsel %vm3680_vm15, 1.0, %v9737_v46  ;;  %v3675_v30 = vmul.f32 0.5, %v3669_v11 }
0x1db2   :  { %9569 = vrcp.f32 %v3687_v33  ;;  %v3715_v52 = vmul.f32 1.442695, %v3713_v38 }
0x1db3   :  { %9571 = vrcp.f32 %v3688_v31  ;;  %v3717_v43 = vmul.f32 1.442695, %v3714_v47  ;;  %v3676_v31 = vmul.f32 0.5, %v3671_v28 }
0x1db4   :  { %9573 = vpow2.f32 %v3715_v52  ;;  %v9315_v52 = vld [vmem:[%s11939_s3 + $0xfc] sm:$0xff]  }
0x1db5   :  { %9575 = vpow2.f32 %v3717_v43 }
0x1dbc   :  { %v9570_v34 = vpop.eup %9569 }
0x1dbd   :  { %v9572_v20 = vpop.eup %9571  ;;  %v3693_v39 = vmul.f32 1.0614054, %v9570_v34 }
0x1dbe   :  { %v3694_v22 = vmul.f32 1.0614054, %v9572_v20  ;;  %v9574_v21 = vpop.eup %9573 }
0x1dbf   :  { %v3695_v50 = vadd.f32 -1.4531521, %v3693_v39  ;;  %v9576_v44 = vpop.eup %9575 }
0x1dc0   :  { %v3696_v55 = vadd.f32 -1.4531521, %v3694_v22 }
0x1dc1   :  { %v3697_v4 = vmul.f32 %v9570_v34, %v3695_v50 }
0x1dc2   :  { %v3698_v58 = vmul.f32 %v9572_v20, %v3696_v55  ;;  %v4010_v55 = vsel %vm83_vm2, %v9315_v52, 0 }
0x1dc3   :  { %v3699_v48 = vadd.f32 1.4214138, %v3697_v4  ;;  %4043 = vmatpush1.bf16.xpose.msra.mxu1 %v4010_v55  ;;  %v9317_v4 = vld [vmem:[%s11939_s3 + $0x10c] sm:$0xff]  }
0x1dc4   :  { %v3700_v8 = vadd.f32 1.4214138, %v3698_v58  ;;  %4044 = vmatprep.subr.bf16.mxu1 %v9720_v27  ;;  %v4016_v43 = vsel %vm83_vm2, %v9317_v4, 0  ;;  %v9318_v58 = vld [vmem:[%s11939_s3 + $0x114] sm:$0xff]  }
0x1dc5   :  { %v3701_v45 = vmul.f32 %v9570_v34, %v3699_v48  ;;  %v4019_v48 = vsel %vm83_vm2, %v9318_v58, 0 }
0x1dc6   :  { %v3702_v54 = vmul.f32 %v9572_v20, %v3700_v8  ;;  %v9319_v8 = vld [vmem:[%s11939_s3 + $0x11c] sm:$0xff]  }
0x1dc7   :  { %v3703_v32 = vadd.f32 -0.28449672, %v3701_v45  ;;  %v4022_v45 = vsel %vm83_vm2, %v9319_v8, 0 }
0x1dc8   :  { %v3704_v14 = vadd.f32 -0.28449672, %v3702_v54  ;;  %v9320_v54 = vld [vmem:[%s11939_s3 + $0x124] sm:$0xff]  }
0x1dc9   :  { %v3705_v15 = vmul.f32 %v9570_v34, %v3703_v32  ;;  %v4025_v32 = vsel %vm83_vm2, %v9320_v54, 0 }
0x1dca   :  { %v3706_v40 = vmul.f32 %v9572_v20, %v3704_v14  ;;  %v9321_v14 = vld [vmem:[%s11939_s3 + $0x12c] sm:$0xff]  }
0x1dcb   :  { %v3707_v49 = vadd.f32 0.2548296, %v3705_v15  ;;  %v4028_v15 = vsel %vm83_vm2, %v9321_v14, 0 }
0x1dcc   :  { %v3708_v51 = vadd.f32 0.2548296, %v3706_v40  ;;  %v9322_v40 = vld [vmem:[%s11939_s3 + $0x134] sm:$0xff]  }
0x1dcd   :  { %v3709_v19 = vmul.f32 %v9570_v34, %v3707_v49  ;;  %v4031_v49 = vsel %vm83_vm2, %v9322_v40, 0 }
0x1dce   :  { %v3710_v23 = vmul.f32 %v9572_v20, %v3708_v51 }
0x1dcf   :  { %v3719_v41 = vmul.f32 %v9574_v21, %v3709_v19 }
0x1dd0   :  { %v3720_v7 = vmul.f32 %v9576_v44, %v3710_v23 }
0x1dd1   :  { %v3721_v25 = vsub.f32 1.0, %v3719_v41  ;;  %v9323_v41 = vld [vmem:[%s11939_s3 + $0x13c] sm:$0xff]  }
0x1dd2   :  { %v3722_v18 = vsub.f32 1.0, %v3720_v7  ;;  %v4034_v7 = vsel %vm83_vm2, %v9323_v41, 0 }
0x1dd3   :  { %v3723_v53 = vmul.f32 %v3721_v25, %v3681_v6  ;;  %v9324_v25 = vld [vmem:[%s11939_s3 + $0x144] sm:$0xff]  }
0x1dd4   :  { %v3724_v2 = vmul.f32 %v3722_v18, %v3682_v61  ;;  %v4037_v6 = vsel %vm83_vm2, %v9324_v25, 0  ;;  %v9325_v18 = vld [vmem:[%s11939_s3 + $0x14c] ss:$0 sps:$4 sm:$0xff]  }
0x1dd5   :  { %v3725_v33 = vadd.f32 1.0, %v3723_v53  ;;  %v4040_v53 = vsel %vm83_vm2, %v9325_v18, 0 }
0x1dd6   :  { %v3726_v35 = vadd.f32 1.0, %v3724_v2 }
0x1dd7   :  { %v3727_v26 = vmul.f32 %v3725_v33, %v3675_v30  ;;  %v10955_v33 = vld [vmem:[%s11940_s9 + $0x18] sm:$0x3f] }
0x1dd8   :  { %v3728_v34 = vmul.f32 %v3726_v35, %v3676_v31  ;;  %v3910_v31 = vrot.slane %v10955_v33, %v9931_v60 }
0x1dd9   :  { %v3758_v20 = vpack.c.bf16 %v3727_v26, %v3727_v26 }
0x1dda   :  { %v3759_v38 = vpack.c.bf16 %v3728_v34, %v3728_v34  ;;  %v3915_v34 = vrot.slane %v10955_v33, %v9939_v62 }
0x1ddc   :  { %8131 = vmatprep.mubr.msk.bf16.mxu0 %vm1421_vm11, %v3759_v38 }
0x1ddd   :  { %3884 = vmatmul.mubr.bf16.vlgmr.msra.gmra.mrb[48].mxu0 %v3758_v20 }
0x1dde   :  { %8921 = vmatprep.mubr.msk.bf16.mxu0 %vm9719_vm0, %v9718_v0 }
0x1eb0   :  { %v3885_v36 = vpop.f32.mrb[48].mxu0 }
0x1eb1   :  { %v3886_v39 = vadd.f32 %v3885_v36, %v3763_v10  ;;  %v3887_v47 = vpop.f32.mrb[49].mxu0  ;;  %v10967_v36 = vld [vmem:[%s11941_s4 + $0x3] ss:$8 sm:$0x3] }
0x1eb2   :  { %v3888_v11 = vpop.f32.mrb[50].mxu0 }
0x1eb3   :  { %v10891_v28 = vadd.f32 %v3886_v39, %v10786_v37  ;;  %v3889_v22 = vpop.f32.mrb[51].mxu0  ;;  %v4013_v37 = vsel %vm83_vm2, %v9316_v42, 0  ;;  %v3946_v39 = vrot.slane %v10967_v36, %v9931_v60 }
0x1eb4   :  { %4045 = vmatpush1.bf16.xpose.msra.mxu1 %v4013_v37 }
0x1eb5   :  { %v3894_v50 = vsel %vm83_vm2, %v10891_v28, 0.0  ;;  %4046 = vmatprep.subr.bf16.mxu1 %v9720_v27 }
0x1eb6   :  { %3895 = vadd.xlane.f32.xlu1 %v3894_v50 }
0x1ebc   :  { %4047 = vmatpush1.bf16.xpose.msra.mxu1 %v4016_v43 }
0x1ebd   :  { %4048 = vmatprep.subr.bf16.mxu1 %v9720_v27 }
0x1ec4   :  { %4049 = vmatpush1.bf16.xpose.msra.mxu1 %v4019_v48 }
0x1ec5   :  { %4050 = vmatprep.subr.bf16.mxu1 %v9720_v27 }
0x1ecc   :  { %4051 = vmatpush1.bf16.xpose.msra.mxu1 %v4022_v45 }
0x1ecd   :  { %4052 = vmatprep.subr.bf16.mxu1 %v9720_v27 }
0x1ed4   :  { %4053 = vmatpush1.bf16.xpose.msra.mxu1 %v4025_v32 }
0x1ed5   :  { %4054 = vmatprep.subr.bf16.mxu1 %v9720_v27 }
0x1edc   :  { %4055 = vmatpush1.bf16.xpose.msra.mxu1 %v4028_v15 }
0x1edd   :  { %4056 = vmatprep.subr.bf16.mxu1 %v9720_v27 }
0x1ee4   :  { %4057 = vmatpush1.bf16.xpose.msra.mxu1 %v4031_v49 }
0x1ee5   :  { %4058 = vmatprep.subr.bf16.mxu1 %v9720_v27 }
0x1eec   :  { %4059 = vmatpush1.bf16.xpose.msra.mxu1 %v4034_v7 }
0x1eed   :  { %4060 = vmatprep.subr.bf16.mxu1 %v9720_v27 }
0x1ef4   :  { %4061 = vmatpush1.bf16.xpose.msra.mxu1 %v4037_v6 }
0x1ef5   :  { %4062 = vmatprep.subr.bf16.mxu1 %v9720_v27 }
0x1efc   :  { %4063 = vmatpush1.bf16.xpose.msra.mxu1 %v4040_v53 }
0x1efd   :  { %8949 = vmatprep.subr.bf16.mxu1 %v9718_v0 }
0x1f43   :  { %v3896_v51 = vpop.xlane.xlu1 %3895 }
0x1f44   :  { %v3897_v19 = vmul.f32 0.017857144, %v3896_v51 }
0x1f46   :  { %v3898_v21 = vsub.f32 %v10891_v28, %v3897_v19 }
0x1f48   :  { %v3899_v23 = vmul.f32 %v3898_v21, %v3898_v21 }
0x1f4a   :  { %v3900_v44 = vsel %vm83_vm2, %v3899_v23, 0.0 }
0x1f4b   :  { %3901 = vadd.xlane.f32.xlu0 %v3900_v44 }
0x1fd8   :  { %v3902_v61 = vpop.xlane.xlu0 %3901 }
0x1fd9   :  { %v3903_v2 = vmul.f32 0.017857144, %v3902_v61 }
0x1fdb   :  { %v3904_v30 = vadd.f32 1e-05, %v3903_v2 }
0x1fdd   :  { %9577 = vrsqrt.f32 %v3904_v30 }
0x1fe7   :  { %v9578_v35 = vpop.eup %9577 }
0x1fe8   :  { %v3906_v26 = vmul.f32 %v9578_v35, %v3898_v21 }
0x1fea   :  { %v3911_v38 = vmul.f32 %v3910_v31, %v3906_v26 }
0x1fec   :  { %v3916_v20 = vadd.f32 %v3915_v34, %v3911_v38 }
0x1fee   :  { %v3939_v10 = vpack.c.bf16 %v3916_v20, %v3916_v20 }
0x1ff0   :  { %8166 = vmatmul.mubr.msk.bf16.vlgmr.msra.gmra.mrb[124].mxu1 %vm83_vm2, %v3939_v10 }
0x1ff1   :  { %8951 = vmatprep.mubr.msk.bf16.mxu1 %vm9719_vm0, %v9718_v0 }
0x20c3   :  { %v4076_v47 = vpop.f32.mrb[124].mxu1 }
0x20c4   :  { %v4077_v11 = vadd.f32 %v4076_v47, %v3946_v39  ;;  %v10971_v22 = vpop.f32.mrb[125].mxu1 }
0x20c5   :  { %v4080_v50 = vpop.f32.mrb[126].mxu1 }
0x20c6   :  { %v10973_v52 = vpack.c.bf16 %v4077_v11, %v4077_v11  ;;  %v4081_v55 = vpop.f32.mrb[127].mxu1 }
0x20c8   :  { %4136 = vrot.lane.b32.xlu0 %v10973_v52, %s12011_s12  ;;  %4086 = vrot.lane.b32.xlu1 %v10973_v52, %s12012_s14 }
0x20cc   :  { %4184 = vrot.lane.b32.xlu0 %v10973_v52, %s12006_s16  ;;  %4134 = vrot.lane.b32.xlu1 %v10973_v52, %s12004_s30 }
0x20d0   :  { %4234 = vrot.lane.b32.xlu0 %v10973_v52, %s12008_s23  ;;  %4186 = vrot.lane.b32.xlu1 %v10973_v52, %s12005_s15 }
0x20d4   :  { %4336 = vrot.lane.b32.xlu0 %v10973_v52, %s11999_s25  ;;  %4236 = vrot.lane.b32.xlu1 %v10973_v52, %s12007_s17 }
0x20d8   :  { %4334 = vrot.lane.b32.xlu0 %v10973_v52, %s12010_s29  ;;  %4286 = vrot.lane.b32.xlu1 %v10973_v52, %s11997_s2 }
0x20dc   :  { %4436 = vrot.lane.b32.xlu0 %v10973_v52, %s11998_s19  ;;  %4284 = vrot.lane.b32.xlu1 %v10973_v52, %s12009_s28 }
0x20e0   :  { %4434 = vrot.lane.b32.xlu0 %v10973_v52, %s12000_s0  ;;  %4386 = vrot.lane.b32.xlu1 %v10973_v52, %s12001_s1 }
0x20e4   :  { %4384 = vrot.lane.b32.xlu1 %v10973_v52, %s12002_s21 }
0x213a   :  { %v4137_v42 = vpop.permute.xlu0 %4136  ;;  %v4087_v37 = vpop.permute.xlu1 %4086 }
0x213b   :  { %v4092_v4 = vsel %vm417_vm3, %v4087_v37, 0  ;;  %v4142_v8 = vsel %vm417_vm3, %v4137_v42, 0 }
0x213c   :  { %8920 = vmatpush3.bf16.xpose.msra.mxu0 %v4092_v4 }
0x213d   :  { %8925 = vmatprep.subr.bf16.mxu0 %v9718_v0 }
0x213e   :  { %v4185_v43 = vpop.permute.xlu0 %4184  ;;  %v4135_v58 = vpop.permute.xlu1 %4134 }
0x2142   :  { %v4235_v48 = vpop.permute.xlu0 %4234  ;;  %v4187_v32 = vpop.permute.xlu1 %4186 }
0x2143   :  { %8922 = vmatmul.mubr.msk.bf16.vlgmr.msra.gmra.mrb[52].mxu0 %vm417_vm3, %v10973_v52  ;;  %v4192_v15 = vsel %vm417_vm3, %v4187_v32, 0 }
0x2144   :  { %8926 = vmatpush3.bf16.xpose.msra.mxu0 %v4142_v8  ;;  %8927 = vmatprep.mubr.msk.bf16.mxu0 %vm9719_vm0, %v9718_v0 }
0x2145   :  { %8931 = vmatprep.subr.bf16.mxu0 %v9718_v0 }
0x2146   :  { %v4337_v45 = vpop.permute.xlu0 %4336  ;;  %v4237_v40 = vpop.permute.xlu1 %4236 }
0x2147   :  { %v4342_v54 = vsel %vm417_vm3, %v4337_v45, 0  ;;  %v4242_v19 = vsel %vm417_vm3, %v4237_v40, 0 }
0x2148   :  { %8950 = vmatpush3.bf16.xpose.msra.mxu1 %v4342_v54 }
0x2149   :  { %8961 = vmatprep.subr.bf16.mxu1 %v9718_v0 }
0x214a   :  { %v4335_v14 = vpop.permute.xlu0 %4334  ;;  %v4287_v21 = vpop.permute.xlu1 %4286 }
0x214b   :  { %8928 = vmatmul.mubr.msk.bf16.vlgmr.msra.gmra.mrb[56].mxu0 %vm417_vm3, %v4135_v58  ;;  %v4292_v41 = vsel %vm417_vm3, %v4287_v21, 0 }
0x214c   :  { %8932 = vmatpush3.bf16.xpose.msra.mxu0 %v4192_v15  ;;  %8933 = vmatprep.mubr.msk.bf16.mxu0 %vm9719_vm0, %v9718_v0 }
0x214d   :  { %8937 = vmatprep.subr.bf16.mxu0 %v9718_v0 }
0x214e   :  { %v4437_v49 = vpop.permute.xlu0 %4436  ;;  %v4285_v44 = vpop.permute.xlu1 %4284 }
0x214f   :  { %v4442_v51 = vsel %vm417_vm3, %v4437_v49, 0  ;;  %8952 = vmatmul.mubr.msk.bf16.vlgmr.msra.gmra.mrb[128].mxu1 %vm417_vm3, %v4335_v14 }
0x2150   :  { %8962 = vmatpush3.bf16.xpose.msra.mxu1 %v4442_v51  ;;  %8963 = vmatprep.mubr.msk.bf16.mxu1 %vm9719_vm0, %v9718_v0 }
0x2151   :  { %8977 = vmatprep.subr.bf16.mxu1 %v9718_v0 }
0x2152   :  { %v4435_v23 = vpop.permute.xlu0 %4434  ;;  %v4387_v7 = vpop.permute.xlu1 %4386 }
0x2153   :  { %8934 = vmatmul.mubr.msk.bf16.vlgmr.msra.gmra.mrb[60].mxu0 %vm417_vm3, %v4185_v43  ;;  %v4392_v25 = vsel %vm417_vm3, %v4387_v7, 0 }
0x2154   :  { %8938 = vmatpush3.bf16.xpose.msra.mxu0 %v4242_v19  ;;  %8939 = vmatprep.mubr.msk.bf16.mxu0 %vm9719_vm0, %v9718_v0 }
0x2155   :  { %8943 = vmatprep.subr.bf16.mxu0 %v9718_v0 }
0x2156   :  { %v4385_v6 = vpop.permute.xlu1 %4384 }
0x2157   :  { %8964 = vmatmul.mubr.msk.bf16.vlgmr.msra.gmra.mrb[132].mxu1 %vm417_vm3, %v4435_v23 }
0x2158   :  { %8985 = vmatprep.mubr.msk.bf16.mxu1 %vm9719_vm0, %v9718_v0 }
0x215b   :  { %8940 = vmatmul.mubr.msk.bf16.vlgmr.msra.gmra.mrb[64].mxu0 %vm417_vm3, %v4235_v48 }
0x215c   :  { %8944 = vmatpush3.bf16.xpose.msra.mxu0 %v4292_v41  ;;  %8945 = vmatprep.mubr.msk.bf16.mxu0 %vm9719_vm0, %v9718_v0 }
0x215d   :  { %8955 = vmatprep.subr.bf16.mxu0 %v9718_v0 }
0x2163   :  { %8946 = vmatmul.mubr.msk.bf16.vlgmr.msra.gmra.mrb[68].mxu0 %vm417_vm3, %v4285_v44 }
0x2164   :  { %8956 = vmatpush3.bf16.xpose.msra.mxu0 %v4392_v25  ;;  %8957 = vmatprep.mubr.msk.bf16.mxu0 %vm9719_vm0, %v9718_v0 }
0x216b   :  { %8958 = vmatmul.mubr.msk.bf16.vlgmr.msra.gmra.mrb[72].mxu0 %vm417_vm3, %v4385_v6 }
0x2216   :  { %v4128_v18 = vpop.f32.mrb[52].mxu0 }
0x2217   :  { %v8923_v53 = vpop.f32.mrb[53].mxu0  ;;  %v4484_v61 = vsel %vm814_vm4, %v4128_v18, -inf }
0x2218   :  { %4485 = vmax.xlane.f32.xlu1 %v4484_v61  ;;  %v4131_v2 = vpop.f32.mrb[54].mxu0 }
0x2219   :  { %v8924_v30 = vpop.f32.mrb[55].mxu0 }
0x221e   :  { %v4178_v31 = vpop.f32.mrb[56].mxu0 }
0x221f   :  { %v8929_v35 = vpop.f32.mrb[57].mxu0  ;;  %v4487_v26 = vsel %vm814_vm4, %v4178_v31, -inf }
0x2220   :  { %4488 = vmax.xlane.f32.xlu0 %v4487_v26  ;;  %v4181_v34 = vpop.f32.mrb[58].mxu0 }
0x2221   :  { %v8930_v38 = vpop.f32.mrb[59].mxu0 }
0x2222   :  { %v4378_v20 = vpop.f32.mrb[128].mxu1 }
0x2223   :  { %v8953_v10 = vpop.f32.mrb[129].mxu1  ;;  %v4499_v15 = vsel %vm814_vm4, %v4378_v20, -inf }
0x2224   :  { %v4381_v39 = vpop.f32.mrb[130].mxu1 }
0x2225   :  { %v8954_v47 = vpop.f32.mrb[131].mxu1 }
0x2226   :  { %v4228_v11 = vpop.f32.mrb[60].mxu0 }
0x2227   :  { %v8935_v50 = vpop.f32.mrb[61].mxu0  ;;  %v4490_v55 = vsel %vm814_vm4, %v4228_v11, -inf }
0x2228   :  { %4491 = vmax.xlane.f32.xlu0 %v4490_v55  ;;  %v4231_v42 = vpop.f32.mrb[62].mxu0 }
0x2229   :  { %v8936_v37 = vpop.f32.mrb[63].mxu0 }
0x222a   :  { %v4478_v4 = vpop.f32.mrb[132].mxu1 }
0x222b   :  { %v8965_v43 = vpop.f32.mrb[133].mxu1  ;;  %v4505_v51 = vsel %vm814_vm4, %v4478_v4, -inf }
0x222c   :  { %v4481_v58 = vpop.f32.mrb[134].mxu1 }
0x222d   :  { %v8966_v48 = vpop.f32.mrb[135].mxu1 }
0x222e   :  { %v4278_v8 = vpop.f32.mrb[64].mxu0 }
0x222f   :  { %v8941_v45 = vpop.f32.mrb[65].mxu0  ;;  %v4493_v54 = vsel %vm814_vm4, %v4278_v8, -inf }
0x2230   :  { %4494 = vmax.xlane.f32.xlu1 %v4493_v54  ;;  %v4281_v32 = vpop.f32.mrb[66].mxu0 }
0x2231   :  { %v8942_v14 = vpop.f32.mrb[67].mxu0 }
0x2234   :  { %4500 = vmax.xlane.f32.xlu1 %v4499_v15 }
0x2236   :  { %v4328_v40 = vpop.f32.mrb[68].mxu0 }
0x2237   :  { %v8947_v49 = vpop.f32.mrb[69].mxu0  ;;  %v4496_v19 = vsel %vm814_vm4, %v4328_v40, -inf }
0x2238   :  { %4506 = vmax.xlane.f32.xlu1 %v4505_v51  ;;  %4497 = vmax.xlane.f32.xlu0 %v4496_v19  ;;  %v4331_v21 = vpop.f32.mrb[70].mxu0 }
0x2239   :  { %v8948_v23 = vpop.f32.mrb[71].mxu0 }
0x223e   :  { %v4428_v44 = vpop.f32.mrb[72].mxu0 }
0x223f   :  { %v8959_v41 = vpop.f32.mrb[73].mxu0  ;;  %v4502_v7 = vsel %vm814_vm4, %v4428_v44, -inf }
0x2240   :  { %4503 = vmax.xlane.f32.xlu0 %v4502_v7  ;;  %v4431_v25 = vpop.f32.mrb[74].mxu0 }
0x2241   :  { %v8960_v6 = vpop.f32.mrb[75].mxu0 }
0x22a5   :  { %v4486_v53 = vpop.xlane.xlu1 %4485 }
0x22a6   :  { %v4508_v61 = vsub.f32 %v4128_v18, %v4486_v53  ;;  %v3950_v53 = vrot.slane %v10967_v36, %v9939_v62 }
0x22a8   :  { %v4516_v2 = vmul.f32 1.442695, %v4508_v61  ;;  %v4079_v61 = vadd.f32 %v10971_v22, %v3950_v53 }
0x22aa   :  { %9579 = vpow2.f32 %v4516_v2  ;;  %v4084_v2 = vpack.c.bf16 %v4079_v61, %v4079_v61 }
0x22ad   :  { %v4489_v30 = vpop.xlane.xlu0 %4488 }
0x22ae   :  { %v4509_v47 = vsub.f32 %v4178_v31, %v4489_v30 }
0x22b0   :  { %v4518_v18 = vmul.f32 1.442695, %v4509_v47 }
0x22b4   :  { %v11051_v35 = vpop.eup %9579 }
0x22b5   :  { %v4492_v26 = vpop.xlane.xlu0 %4491  ;;  %v4532_v34 = vsel %vm814_vm4, %v11051_v35, 0.0 }
0x22b6   :  { %v4510_v38 = vsub.f32 %v4228_v11, %v4492_v26  ;;  %4533 = vadd.xlane.f32.xlu0 %v4532_v34 }
0x22b8   :  { %v4520_v10 = vmul.f32 1.442695, %v4510_v38 }
0x22ba   :  { %9581 = vpow2.f32 %v4520_v10 }
0x22bd   :  { %v4495_v39 = vpop.xlane.xlu1 %4494 }
0x22be   :  { %v4511_v11 = vsub.f32 %v4278_v8, %v4495_v39 }
0x22c0   :  { %v4522_v31 = vmul.f32 1.442695, %v4511_v11 }
0x22c1   :  { %v4501_v50 = vpop.xlane.xlu1 %4500 }
0x22c2   :  { %v4513_v55 = vsub.f32 %v4378_v20, %v4501_v50 }
0x22c4   :  { %v11055_v42 = vpop.eup %9581  ;;  %v4526_v37 = vmul.f32 1.442695, %v4513_v55 }
0x22c5   :  { %v4498_v43 = vpop.xlane.xlu0 %4497  ;;  %v4507_v58 = vpop.xlane.xlu1 %4506  ;;  %v4538_v48 = vsel %vm814_vm4, %v11055_v42, 0.0 }
0x22c6   :  { %9583 = vpow2.f32 %v4526_v37  ;;  %v4512_v45 = vsub.f32 %v4328_v40, %v4498_v43  ;;  %v4515_v54 = vsub.f32 %v4478_v4, %v4507_v58  ;;  %4539 = vadd.xlane.f32.xlu0 %v4538_v48 }
0x22c7   :  { %9585 = vpow2.f32 %v4518_v18 }
0x22c8   :  { %v4524_v32 = vmul.f32 1.442695, %v4512_v45  ;;  %v4530_v14 = vmul.f32 1.442695, %v4515_v54 }
0x22ca   :  { %9587 = vpow2.f32 %v4524_v32 }
0x22cb   :  { %9589 = vpow2.f32 %v4530_v14 }
0x22cc   :  { %9591 = vpow2.f32 %v4522_v31 }
0x22cd   :  { %v4504_v20 = vpop.xlane.xlu0 %4503 }
0x22ce   :  { %v4514_v15 = vsub.f32 %v4428_v44, %v4504_v20 }
0x22d0   :  { %v9584_v49 = vpop.eup %9583  ;;  %v4528_v51 = vmul.f32 1.442695, %v4514_v15 }
0x22d1   :  { %v4547_v19 = vsel %vm814_vm4, %v9584_v49, 0.0  ;;  %v9586_v21 = vpop.eup %9585 }
0x22d2   :  { %9593 = vpow2.f32 %v4528_v51  ;;  %4548 = vadd.xlane.f32.xlu1 %v4547_v19  ;;  %v4535_v8 = vsel %vm814_vm4, %v9586_v21, 0.0 }
0x22d4   :  { %v9588_v40 = vpop.eup %9587 }
0x22d5   :  { %v4544_v4 = vsel %vm814_vm4, %v9588_v40, 0.0  ;;  %v9590_v23 = vpop.eup %9589 }
0x22d6   :  { %4545 = vadd.xlane.f32.xlu0 %v4544_v4  ;;  %4536 = vadd.xlane.f32.xlu1 %v4535_v8  ;;  %v4553_v41 = vsel %vm814_vm4, %v9590_v23, 0.0  ;;  %v9592_v7 = vpop.eup %9591 }
0x22d7   :  { %v4541_v6 = vsel %vm814_vm4, %v9592_v7, 0.0 }
0x22da   :  { %4554 = vadd.xlane.f32.xlu1 %v4553_v41 }
0x22dc   :  { %v9594_v44 = vpop.eup %9593 }
0x22dd   :  { %v4550_v25 = vsel %vm814_vm4, %v9594_v44, 0.0 }
0x22de   :  { %4551 = vadd.xlane.f32.xlu0 %v4550_v25  ;;  %4542 = vadd.xlane.f32.xlu1 %v4541_v6 }
0x22ef   :  { %4579 = vrot.lane.b32.xlu1 %v4084_v2, %s12003_s22 }
0x22f4   :  { %4577 = vrot.lane.b32.xlu0 %v10973_v52, %s12003_s22 }
0x2343   :  { %v4534_v30 = vpop.xlane.xlu0 %4533 }
0x2344   :  { %9595 = vrcp.f32 %v4534_v30 }
0x234e   :  { %v9596_v22 = vpop.eup %9595 }
0x234f   :  { %v4564_v37 = vmul.f32 %v9596_v22, %v11051_v35 }
0x2353   :  { %v4540_v34 = vpop.xlane.xlu0 %4539 }
0x235f   :  { %v4549_v26 = vpop.xlane.xlu1 %4548 }
0x2363   :  { %v4537_v38 = vpop.xlane.xlu1 %4536  ;;  %v4546_v10 = vpop.xlane.xlu0 %4545 }
0x2364   :  { %9597 = vrcp.f32 %v4537_v38 }
0x2365   :  { %9599 = vrcp.f32 %v4546_v10 }
0x2366   :  { %9601 = vrcp.f32 %v4540_v34 }
0x2367   :  { %v4555_v39 = vpop.xlane.xlu1 %4554  ;;  %9603 = vrcp.f32 %v4549_v26 }
0x236b   :  { %v4552_v47 = vpop.xlane.xlu0 %4551  ;;  %v4543_v36 = vpop.xlane.xlu1 %4542 }
0x236c   :  { %9605 = vrcp.f32 %v4543_v36 }
0x236d   :  { %9607 = vrcp.f32 %v4552_v47 }
0x236e   :  { %v9598_v50 = vpop.eup %9597  ;;  %9609 = vrcp.f32 %v4555_v39 }
0x236f   :  { %v4578_v55 = vpop.permute.xlu0 %4577  ;;  %v4580_v18 = vpop.permute.xlu1 %4579  ;;  %v4565_v43 = vmul.f32 %v9598_v50, %v9586_v21 }
0x2370   :  { %v4581_v52 = vsel %vm912_vm5, %v4578_v55, %v4580_v18  ;;  %v9600_v45 = vpop.eup %9599 }
0x2371   :  { %v4595_v58 = vsel %vm87_vm1, %v4581_v52, 0  ;;  %9164 = vmatprep.subr.msk.bf16.mxu0 %vm87_vm1, %v4581_v52  ;;  %v4572_v48 = vpack.c.bf16 %v4565_v43, %v4564_v37  ;;  %v9602_v54 = vpop.eup %9601  ;;  %v4568_v14 = vmul.f32 %v9600_v45, %v9588_v40  ;;  %v9328_v40 = vld [vmem:[%s11942_s5 + $0x64] sm:$0xff]  }
0x2372   :  { %8968 = vmatpush3.bf16.msra.mxu0 %v4595_v58  ;;  %v9604_v11 = vpop.eup %9603  ;;  %v4566_v31 = vmul.f32 %v9602_v54, %v11055_v42  ;;  %v9326_v42 = vld [vmem:[%s11942_s5 + $0x54] sm:$0xff]   ;;  %v4689_v54 = vrot.slane %v10955_v33, %v10099_v5 }
0x2373   :  { %8969 = vmatprep.mubr.msk.bf16.mxu0 %vm814_vm4, %v4572_v48  ;;  %v4569_v35 = vmul.f32 %v9604_v11, %v9584_v49  ;;  %8978 = vmatpush3.bf16.msra.mxu1 %v9326_v42  ;;  %v9327_v49 = vld [vmem:[%s11942_s5 + $0x5c] sm:$0xff]  }
0x2374   :  { %8979 = vmatprep.subr.bf16.mxu1 %v9718_v0  ;;  %v9335_v42 = vld [vmem:[%s11943_s6 + $0xbc] ss:$8 sps:$4 sm:$0xff]  }
0x2375   :  { %v4574_v19 = vpack.c.bf16 %v4569_v35, %v4568_v14 }
0x2376   :  { %v9606_v32 = vpop.eup %9605 }
0x2377   :  { %v4567_v20 = vmul.f32 %v9606_v32, %v9592_v7  ;;  %v9608_v51 = vpop.eup %9607  ;;  %8980 = vmatpush3.bf16.msra.mxu1 %v9327_v49  ;;  %v9333_v49 = vld [vmem:[%s11943_s6 + $0xb8] ss:$8 sps:$4 sm:$0xff]  }
0x2378   :  { %v9610_v21 = vpop.eup %9609  ;;  %v4570_v4 = vmul.f32 %v9608_v51, %v9594_v44  ;;  %8981 = vmatprep.subr.bf16.mxu1 %v9718_v0 }
0x2379   :  { %v4573_v15 = vpack.c.bf16 %v4567_v20, %v4566_v31  ;;  %v4571_v8 = vmul.f32 %v9610_v21, %v9590_v23  ;;  %v9329_v23 = vld [vmem:[%s11942_s5 + $0x6c] ss:$0 sps:$4 sm:$0xff]  }
0x237a   :  { %v4715_v7 = vsel %vm87_vm1, %v9329_v23, 0  ;;  %v9336_v23 = vld [vmem:[%s11943_s6 + $0xc8] ss:$8 sps:$4 sm:$0xff]  }
0x237b   :  { %8970 = vmatmul.mubr.msk.bf16.vlgmr.msra.gmra.mrb[76].mxu0 %vm814_vm4, %v4573_v15  ;;  %v4575_v41 = vpack.c.bf16 %v4571_v8, %v4570_v4  ;;  %8982 = vmatpush3.bf16.msra.mxu1 %v9328_v40  ;;  %v9338_v40 = vld [vmem:[%s11943_s6 + $0xcc] ss:$8 sps:$4 sm:$0xff]  }
0x237c   :  { %8973 = vmatprep.mubr.msk.bf16.mxu0 %vm814_vm4, %v4574_v19  ;;  %8983 = vmatprep.subr.bf16.mxu1 %v9718_v0 }
0x237f   :  { %8984 = vmatpush3.bf16.msra.mxu1 %v4715_v7  ;;  %v8197_v7 = vld [vmem:[%s11943_s6 + $0xd8] sm:$0xff] }
0x2380   :  { %5064 = vmatprep.subr.bf16.mxu1 %v9720_v27 }
0x2383   :  { %8974 = vmatmul.mubr.msk.bf16.gmra.mrb[80].mxu0 %vm814_vm4, %v4575_v41  ;;  %v9332_v41 = vld [vmem:[%s11943_s6 + $0xac] ss:$8 sps:$4 sm:$0xff]  }
0x2384   :  { %4879 = vmatprep.mubr.bf16.mxu0 %v9720_v27  ;;  %4847 = vmatprep.subr.bf16.mxu0 %v9332_v41 }
0x244e   :  { %v8971_v44 = vpop.f32.mrb[76].mxu0 }
0x244f   :  { %v4631_v25 = vpop.f32.mrb[77].mxu0  ;;  %v4665_v30 = vmul.f32 %v8971_v44, %v10096_v3  ;;  %v8206_v44 = vcombine.high %v8197_v7, %v8197_v7 }
0x2450   :  { %v8972_v6 = vpop.f32.mrb[78].mxu0  ;;  %v4662_v61 = vmul.f32 %v4631_v25, %v10087_v63  ;;  %v8205_v25 = vcombine.low %v8197_v7, %v8197_v7 }
0x2451   :  { %v4634_v53 = vpop.f32.mrb[79].mxu0  ;;  %v4667_v34 = vmul.f32 %v8972_v6, %v10103_v9 }
0x2452   :  { %v4663_v2 = vmul.f32 %v4634_v53, %v10093_v57  ;;  %v4842_v6 = vsel %vm87_vm1, %v8205_v25, 0  ;;  %v9341_v53 = vld [vmem:[%s11944_s8 + $0x150] sm:$0xff]  }
0x2454   :  { %v4664_v26 = vadd.f32 %v4663_v2, %v4662_v61 }
0x2456   :  { %v4666_v38 = vadd.f32 %v4665_v30, %v4664_v26  ;;  %v8975_v10 = vpop.f32.mrb[80].mxu0  ;;  %v4774_v26 = vrot.slane %v10955_v33, %v10084_v56 }
0x2457   :  { %v4647_v39 = vpop.f32.mrb[81].mxu0  ;;  %v4673_v52 = vmul.f32 %v8975_v10, %v10121_v24 }
0x2458   :  { %v4668_v47 = vadd.f32 %v4667_v34, %v4666_v38  ;;  %v4669_v36 = vmul.f32 %v4647_v39, %v10112_v17  ;;  %v8976_v22 = vpop.f32.mrb[82].mxu0  ;;  %v4779_v38 = vrot.slane %v10955_v33, %v10090_v1 }
0x2459   :  { %v4650_v50 = vpop.f32.mrb[83].mxu0  ;;  %v4675_v43 = vmul.f32 %v8976_v22, %v10124_v29  ;;  %v9342_v22 = vld [vmem:[%s11944_s8 + $0x158] sm:$0xff]  }
0x245a   :  { %v4670_v55 = vadd.f32 %v4669_v36, %v4668_v47  ;;  %v4671_v18 = vmul.f32 %v4650_v50, %v10117_v13  ;;  %v9343_v50 = vld [vmem:[%s11944_s8 + $0x160] sm:$0xff]  }
0x245c   :  { %v4672_v37 = vadd.f32 %v4671_v18, %v4670_v55  ;;  %v9344_v55 = vld [vmem:[%s11944_s8 + $0x168] sm:$0xff]   ;;  %v9345_v18 = vld [vmem:[%s11944_s8 + $0x170] sm:$0xff]  }
0x245e   :  { %v4674_v58 = vadd.f32 %v4673_v52, %v4672_v37  ;;  %v9346_v52 = vld [vmem:[%s11944_s8 + $0x178] sm:$0xff]   ;;  %v9347_v37 = vld [vmem:[%s11944_s8 + $0x180] sm:$0xff]  }
0x2460   :  { %v4676_v48 = vadd.f32 %v4675_v43, %v4674_v58  ;;  %v9348_v43 = vld [vmem:[%s11944_s8 + $0x188] sm:$0xff]   ;;  %v9349_v58 = vld [vmem:[%s11944_s8 + $0x190] sm:$0xff]  }
0x2462   :  { %v4685_v45 = vpack.c.bf16 %v4676_v48, %v4676_v48  ;;  %v9350_v48 = vld [vmem:[%s11944_s8 + $0x198] sm:$0xff]  }
0x2464   :  { %8986 = vmatmul.mubr.msk.bf16.vlgmr.msra.gmra.mrb[136].mxu1 %vm83_vm2, %v4685_v45  ;;  %v9351_v45 = vld [vmem:[%s11944_s8 + $0x1a0] sm:$0xff]  }
0x2465   :  { %5065 = vmatpush1.bf16.msra.mxu1 %v9341_v53 }
0x2466   :  { %5066 = vmatprep.subr.bf16.mxu1 %v9720_v27 }
0x2469   :  { %5067 = vmatpush1.bf16.msra.mxu1 %v9342_v22 }
0x246a   :  { %5068 = vmatprep.subr.bf16.mxu1 %v9720_v27 }
0x246d   :  { %5069 = vmatpush1.bf16.msra.mxu1 %v9343_v50 }
0x246e   :  { %5070 = vmatprep.subr.bf16.mxu1 %v9720_v27 }
0x2471   :  { %5071 = vmatpush1.bf16.msra.mxu1 %v9344_v55 }
0x2472   :  { %5072 = vmatprep.subr.bf16.mxu1 %v9720_v27 }
0x2475   :  { %5073 = vmatpush1.bf16.msra.mxu1 %v9345_v18 }
0x2476   :  { %5074 = vmatprep.subr.bf16.mxu1 %v9720_v27 }
0x2479   :  { %5075 = vmatpush1.bf16.msra.mxu1 %v9346_v52 }
0x247a   :  { %5076 = vmatprep.subr.bf16.mxu1 %v9720_v27 }
0x247d   :  { %5077 = vmatpush1.bf16.msra.mxu1 %v9347_v37 }
0x247e   :  { %5078 = vmatprep.subr.bf16.mxu1 %v9720_v27 }
0x2481   :  { %5079 = vmatpush1.bf16.msra.mxu1 %v9348_v43 }
0x2482   :  { %5080 = vmatprep.subr.bf16.mxu1 %v9720_v27 }
0x2485   :  { %5081 = vmatpush1.bf16.msra.mxu1 %v9349_v58 }
0x2486   :  { %5082 = vmatprep.subr.bf16.mxu1 %v9720_v27 }
0x2489   :  { %5083 = vmatpush1.bf16.msra.mxu1 %v9350_v48 }
0x248a   :  { %5084 = vmatprep.subr.bf16.mxu1 %v9720_v27 }
0x248d   :  { %5085 = vmatpush1.bf16.msra.mxu1 %v9351_v45 }
0x248e   :  { %5086 = vmatprep.subr.bf16.mxu1 %v9720_v27 }
0x2537   :  { %v4751_v11 = vpop.f32.mrb[136].mxu1 }
0x2538   :  { %v4752_v32 = vadd.f32 %v4751_v11, %v4689_v54  ;;  %v8987_v14 = vpop.f32.mrb[137].mxu1  ;;  %v9352_v54 = vld [vmem:[%s11944_s8 + $0x1a8] sm:$0xff]   ;;  %v9353_v11 = vld [vmem:[%s11944_s8 + $0x1b0] sm:$0xff]  }
0x2539   :  { %v4754_v31 = vpop.f32.mrb[138].mxu1  ;;  %5087 = vmatpush1.bf16.msra.mxu1 %v9352_v54  ;;  %v8198_v14 = vld [vmem:[%s11945_s7 + $0x3] ss:$8 sm:$0x3] }
0x253a   :  { %v11110_v20 = vadd.f32 %v4752_v32, %v10891_v28  ;;  %v8988_v35 = vpop.f32.mrb[139].mxu1  ;;  %v9330_v28 = vld [vmem:[%s11943_s6 + $0xa8] ss:$8 sps:$4 sm:$0xff]   ;;  %5088 = vmatprep.subr.bf16.mxu1 %v9720_v27  ;;  %v9354_v32 = vld [vmem:[%s11944_s8 + $0x1b8] sm:$0xff]   ;;  %v4796_v31 = vrot.slane %v8198_v14, %v9931_v60 }
0x253b   :  { %4848 = vmatpush1.bf16.msra.mxu0 %v9330_v28  ;;  %v4800_v35 = vrot.slane %v8198_v14, %v9939_v62 }
0x253c   :  { %v4758_v15 = vsel %vm83_vm2, %v11110_v20, 0.0  ;;  %4849 = vmatprep.subr.bf16.mxu0 %v9335_v42 }
0x253d   :  { %4759 = vadd.xlane.f32.xlu1 %v4758_v15  ;;  %5089 = vmatpush1.bf16.msra.mxu1 %v9353_v11 }
0x253e   :  { %5090 = vmatprep.subr.bf16.mxu1 %v9720_v27 }
0x253f   :  { %4850 = vmatpush1.bf16.msra.mxu0 %v9333_v49 }
0x2540   :  { %4851 = vmatprep.subr.bf16.mxu0 %v9338_v40 }
0x2541   :  { %5091 = vmatpush1.bf16.msra.mxu1 %v9354_v32 }
0x2542   :  { %8989 = vmatprep.subr.bf16.mxu1 %v9718_v0 }
0x2543   :  { %4852 = vmatpush1.bf16.msra.mxu0 %v9336_v23 }
0x2544   :  { %8207 = vmatprep.subr.msk.bf16.mxu0 %vm87_vm1, %v8206_v44 }
0x2547   :  { %4854 = vmatpush1.bf16.msra.mxu0 %v4842_v6 }
0x2548   :  { %5255 = vmatprep.subr.bf16.mxu0 %v9720_v27 }
0x25ca   :  { %v4760_v51 = vpop.xlane.xlu1 %4759 }
0x25cb   :  { %v4761_v19 = vmul.f32 0.017857144, %v4760_v51 }
0x25cd   :  { %v4762_v21 = vsub.f32 %v11110_v20, %v4761_v19 }
0x25cf   :  { %v4763_v4 = vmul.f32 %v4762_v21, %v4762_v21 }
0x25d1   :  { %v4764_v8 = vsel %vm83_vm2, %v4763_v4, 0.0 }
0x25d2   :  { %4765 = vadd.xlane.f32.xlu0 %v4764_v8 }
0x265f   :  { %v4766_v61 = vpop.xlane.xlu0 %4765 }
0x2660   :  { %v4767_v2 = vmul.f32 0.017857144, %v4766_v61 }
0x2662   :  { %v4768_v30 = vadd.f32 1e-05, %v4767_v2 }
0x2664   :  { %9611 = vrsqrt.f32 %v4768_v30 }
0x266e   :  { %v9612_v34 = vpop.eup %9611 }
0x266f   :  { %v4770_v10 = vmul.f32 %v9612_v34, %v4762_v21 }
0x2671   :  { %v4775_v39 = vmul.f32 %v4774_v26, %v4770_v10 }
0x2673   :  { %v4780_v47 = vadd.f32 %v4779_v38, %v4775_v39 }
0x2675   :  { %v4789_v36 = vpack.c.bf16 %v4780_v47, %v4780_v47 }
0x2677   :  { %8208 = vmatmul.mubr.msk.bf16.vlgmr.msra.gmra.mrb[84].mxu0 %vm83_vm2, %v4789_v36 }
0x2678   :  { %5287 = vmatprep.mubr.bf16.mxu0 %v9720_v27 }
0x274a   :  { %v4881_v15 = vpop.f32.mrb[84].mxu0 }
0x274b   :  { %v4882_v51 = vadd.f32 %v4881_v15, %v4796_v31  ;;  %v4883_v19 = vpop.f32.mrb[85].mxu0 }
0x274c   :  { %v4884_v21 = vadd.f32 %v4883_v19, %v4800_v35  ;;  %v4885_v4 = vpop.f32.mrb[86].mxu0 }
0x274d   :  { %v4890_v8 = vmul.f32 0.70710677, %v4882_v51  ;;  %v4886_v41 = vpop.f32.mrb[87].mxu0 }
0x274e   :  { %v4891_v28 = vmul.f32 0.70710677, %v4884_v21 }
0x274f   :  { %v4896_v42 = vand.u32 2147483647, %v4890_v8  ;;  %vm4892_vm6 = vcmp.ge.f32.partialorder %v4890_v8, 0.0  ;;  %v4976_v8 = vrot.slane %v10955_v33, %v10107_v12  ;;  %v9356_v33 = vld [vmem:[%s11939_s3 + $0x158] sm:$0xff]  }
0x2750   :  { %v4897_v49 = vand.u32 2147483647, %v4891_v28  ;;  %vm4893_vm7 = vcmp.ge.f32.partialorder %v4891_v28, 0.0  ;;  %v4894_v4 = vsel %vm4892_vm6, 1.0, %v9737_v46 }
0x2751   :  { %v4898_v40 = vmul.f32 0.3275911, %v4896_v42  ;;  %v4924_v25 = vsub.f32 0.0, %v4896_v42 }
0x2752   :  { %v4899_v23 = vmul.f32 0.3275911, %v4897_v49  ;;  %v4925_v6 = vsub.f32 0.0, %v4897_v49 }
0x2753   :  { %v4900_v7 = vadd.f32 1.0, %v4898_v40  ;;  %v4926_v61 = vmul.f32 %v4924_v25, %v4896_v42 }
0x2754   :  { %v4901_v44 = vadd.f32 1.0, %v4899_v23  ;;  %v4927_v26 = vmul.f32 %v4925_v6, %v4897_v49  ;;  %v4895_v49 = vsel %vm4893_vm7, 1.0, %v9737_v46  ;;  %v4888_v23 = vmul.f32 0.5, %v4882_v51 }
0x2755   :  { %9613 = vrcp.f32 %v4900_v7  ;;  %v4928_v10 = vmul.f32 1.442695, %v4926_v61 }
0x2756   :  { %9615 = vrcp.f32 %v4901_v44  ;;  %v4930_v36 = vmul.f32 1.442695, %v4927_v26  ;;  %v4889_v44 = vmul.f32 0.5, %v4884_v21 }
0x2757   :  { %9617 = vpow2.f32 %v4928_v10  ;;  %v9355_v10 = vld [vmem:[%s11939_s3 + $0x150] sm:$0xff]  }
0x2758   :  { %9619 = vpow2.f32 %v4930_v36 }
0x275f   :  { %v9614_v53 = vpop.eup %9613 }
0x2760   :  { %v9616_v2 = vpop.eup %9615  ;;  %v4906_v30 = vmul.f32 1.0614054, %v9614_v53 }
0x2761   :  { %v4907_v34 = vmul.f32 1.0614054, %v9616_v2  ;;  %v9618_v32 = vpop.eup %9617 }
0x2762   :  { %v4908_v38 = vadd.f32 -1.4531521, %v4906_v30  ;;  %v9620_v31 = vpop.eup %9619 }
0x2763   :  { %v4909_v39 = vadd.f32 -1.4531521, %v4907_v34 }
0x2764   :  { %v4910_v47 = vmul.f32 %v9614_v53, %v4908_v38 }
0x2765   :  { %v4911_v22 = vmul.f32 %v9616_v2, %v4909_v39  ;;  %v5223_v39 = vsel %vm83_vm2, %v9355_v10, 0 }
0x2766   :  { %v4912_v50 = vadd.f32 1.4214138, %v4910_v47  ;;  %5256 = vmatpush1.bf16.xpose.msra.mxu0 %v5223_v39  ;;  %v9357_v47 = vld [vmem:[%s11939_s3 + $0x160] sm:$0xff]  }
0x2767   :  { %v4913_v55 = vadd.f32 1.4214138, %v4911_v22  ;;  %5257 = vmatprep.subr.bf16.mxu0 %v9720_v27  ;;  %v5229_v36 = vsel %vm83_vm2, %v9357_v47, 0  ;;  %v9358_v22 = vld [vmem:[%s11939_s3 + $0x168] sm:$0xff]  }
0x2768   :  { %v4914_v18 = vmul.f32 %v9614_v53, %v4912_v50  ;;  %v5232_v50 = vsel %vm83_vm2, %v9358_v22, 0 }
0x2769   :  { %v4915_v52 = vmul.f32 %v9616_v2, %v4913_v55  ;;  %v9359_v55 = vld [vmem:[%s11939_s3 + $0x170] sm:$0xff]  }
0x276a   :  { %v4916_v37 = vadd.f32 -0.28449672, %v4914_v18  ;;  %v5235_v18 = vsel %vm83_vm2, %v9359_v55, 0 }
0x276b   :  { %v4917_v43 = vadd.f32 -0.28449672, %v4915_v52  ;;  %v9360_v52 = vld [vmem:[%s11939_s3 + $0x178] sm:$0xff]  }
0x276c   :  { %v4918_v58 = vmul.f32 %v9614_v53, %v4916_v37  ;;  %v5238_v37 = vsel %vm83_vm2, %v9360_v52, 0 }
0x276d   :  { %v4919_v48 = vmul.f32 %v9616_v2, %v4917_v43  ;;  %v9361_v43 = vld [vmem:[%s11939_s3 + $0x180] sm:$0xff]  }
0x276e   :  { %v4920_v45 = vadd.f32 0.2548296, %v4918_v58  ;;  %v5241_v58 = vsel %vm83_vm2, %v9361_v43, 0 }
0x276f   :  { %v4921_v54 = vadd.f32 0.2548296, %v4919_v48  ;;  %v9362_v48 = vld [vmem:[%s11939_s3 + $0x188] sm:$0xff]  }
0x2770   :  { %v4922_v11 = vmul.f32 %v9614_v53, %v4920_v45  ;;  %v5244_v45 = vsel %vm83_vm2, %v9362_v48, 0 }
0x2771   :  { %v4923_v14 = vmul.f32 %v9616_v2, %v4921_v54 }
0x2772   :  { %v4932_v35 = vmul.f32 %v9618_v32, %v4922_v11 }
0x2773   :  { %v4933_v15 = vmul.f32 %v9620_v31, %v4923_v14 }
0x2774   :  { %v4934_v19 = vsub.f32 1.0, %v4932_v35  ;;  %v9363_v35 = vld [vmem:[%s11939_s3 + $0x190] sm:$0xff]  }
0x2775   :  { %v4935_v41 = vsub.f32 1.0, %v4933_v15  ;;  %v5247_v15 = vsel %vm83_vm2, %v9363_v35, 0 }
0x2776   :  { %v4936_v42 = vmul.f32 %v4934_v19, %v4894_v4  ;;  %v9364_v19 = vld [vmem:[%s11939_s3 + $0x198] sm:$0xff]  }
0x2777   :  { %v4937_v40 = vmul.f32 %v4935_v41, %v4895_v49  ;;  %v5250_v4 = vsel %vm83_vm2, %v9364_v19, 0  ;;  %v9365_v41 = vld [vmem:[%s11939_s3 + $0x1a0] ss:$0 sps:$4 sm:$0xff]  }
0x2778   :  { %v4938_v7 = vadd.f32 1.0, %v4936_v42  ;;  %v5253_v42 = vsel %vm83_vm2, %v9365_v41, 0 }
0x2779   :  { %v4939_v25 = vadd.f32 1.0, %v4937_v40 }
0x277a   :  { %v4940_v6 = vmul.f32 %v4938_v7, %v4888_v23  ;;  %v11279_v7 = vld [vmem:[%s11940_s9 + $0x20] sm:$0x3f] }
0x277b   :  { %v4941_v53 = vmul.f32 %v4939_v25, %v4889_v44  ;;  %v5123_v44 = vrot.slane %v11279_v7, %v9931_v60 }
0x277c   :  { %v4971_v2 = vpack.c.bf16 %v4940_v6, %v4940_v6 }
0x277d   :  { %v4972_v61 = vpack.c.bf16 %v4941_v53, %v4941_v53  ;;  %v5128_v53 = vrot.slane %v11279_v7, %v9939_v62 }
0x277f   :  { %8251 = vmatprep.mubr.msk.bf16.mxu1 %vm1421_vm11, %v4972_v61 }
0x2780   :  { %5097 = vmatmul.mubr.bf16.vlgmr.msra.gmra.mrb[140].mxu1 %v4971_v2 }
0x2781   :  { %8991 = vmatprep.mubr.msk.bf16.mxu1 %vm9719_vm0, %v9718_v0 }
0x2853   :  { %v5098_v28 = vpop.f32.mrb[140].mxu1 }
0x2854   :  { %v5099_v30 = vadd.f32 %v5098_v28, %v4976_v8  ;;  %v5100_v26 = vpop.f32.mrb[141].mxu1  ;;  %v11291_v28 = vld [vmem:[%s11941_s4 + $0x4] ss:$8 sm:$0x3] }
0x2855   :  { %v5101_v51 = vpop.f32.mrb[142].mxu1 }
0x2856   :  { %v11215_v21 = vadd.f32 %v5099_v30, %v11110_v20  ;;  %v5102_v34 = vpop.f32.mrb[143].mxu1  ;;  %v5226_v20 = vsel %vm83_vm2, %v9356_v33, 0  ;;  %v5159_v30 = vrot.slane %v11291_v28, %v9931_v60 }
0x2857   :  { %5258 = vmatpush1.bf16.xpose.msra.mxu0 %v5226_v20 }
0x2858   :  { %v5107_v38 = vsel %vm83_vm2, %v11215_v21, 0.0  ;;  %5259 = vmatprep.subr.bf16.mxu0 %v9720_v27 }
0x2859   :  { %5108 = vadd.xlane.f32.xlu0 %v5107_v38 }
0x285f   :  { %5260 = vmatpush1.bf16.xpose.msra.mxu0 %v5229_v36 }
0x2860   :  { %5261 = vmatprep.subr.bf16.mxu0 %v9720_v27 }
0x2867   :  { %5262 = vmatpush1.bf16.xpose.msra.mxu0 %v5232_v50 }
0x2868   :  { %5263 = vmatprep.subr.bf16.mxu0 %v9720_v27 }
0x286f   :  { %5264 = vmatpush1.bf16.xpose.msra.mxu0 %v5235_v18 }
0x2870   :  { %5265 = vmatprep.subr.bf16.mxu0 %v9720_v27 }
0x2877   :  { %5266 = vmatpush1.bf16.xpose.msra.mxu0 %v5238_v37 }
0x2878   :  { %5267 = vmatprep.subr.bf16.mxu0 %v9720_v27 }
0x287f   :  { %5268 = vmatpush1.bf16.xpose.msra.mxu0 %v5241_v58 }
0x2880   :  { %5269 = vmatprep.subr.bf16.mxu0 %v9720_v27 }
0x2887   :  { %5270 = vmatpush1.bf16.xpose.msra.mxu0 %v5244_v45 }
0x2888   :  { %5271 = vmatprep.subr.bf16.mxu0 %v9720_v27 }
0x288f   :  { %5272 = vmatpush1.bf16.xpose.msra.mxu0 %v5247_v15 }
0x2890   :  { %5273 = vmatprep.subr.bf16.mxu0 %v9720_v27 }
0x2897   :  { %5274 = vmatpush1.bf16.xpose.msra.mxu0 %v5250_v4 }
0x2898   :  { %5275 = vmatprep.subr.bf16.mxu0 %v9720_v27 }
0x289f   :  { %5276 = vmatpush1.bf16.xpose.msra.mxu0 %v5253_v42 }
0x28a0   :  { %9019 = vmatprep.subr.bf16.mxu0 %v9718_v0 }
0x28e6   :  { %v5109_v54 = vpop.xlane.xlu0 %5108 }
0x28e7   :  { %v5110_v11 = vmul.f32 0.017857144, %v5109_v54 }
0x28e9   :  { %v5111_v32 = vsub.f32 %v11215_v21, %v5110_v11 }
0x28eb   :  { %v5112_v14 = vmul.f32 %v5111_v32, %v5111_v32 }
0x28ed   :  { %v5113_v31 = vsel %vm83_vm2, %v5112_v14, 0.0 }
0x28ee   :  { %5114 = vadd.xlane.f32.xlu1 %v5113_v31 }
0x297b   :  { %v5115_v49 = vpop.xlane.xlu1 %5114 }
0x297c   :  { %v5116_v40 = vmul.f32 0.017857144, %v5115_v49 }
0x297e   :  { %v5117_v23 = vadd.f32 1e-05, %v5116_v40 }
0x2980   :  { %9621 = vrsqrt.f32 %v5117_v23 }
0x298a   :  { %v9622_v25 = vpop.eup %9621 }
0x298b   :  { %v5119_v6 = vmul.f32 %v9622_v25, %v5111_v32 }
0x298d   :  { %v5124_v61 = vmul.f32 %v5123_v44, %v5119_v6 }
0x298f   :  { %v5129_v2 = vadd.f32 %v5128_v53, %v5124_v61 }
0x2991   :  { %v5152_v8 = vpack.c.bf16 %v5129_v2, %v5129_v2 }
0x2993   :  { %8286 = vmatmul.mubr.msk.bf16.vlgmr.msra.gmra.mrb[88].mxu0 %vm83_vm2, %v5152_v8 }
0x2994   :  { %9021 = vmatprep.mubr.msk.bf16.mxu0 %vm9719_vm0, %v9718_v0 }
0x2a66   :  { %v5289_v26 = vpop.f32.mrb[88].mxu0 }
0x2a67   :  { %v5290_v51 = vadd.f32 %v5289_v26, %v5159_v30  ;;  %v11295_v34 = vpop.f32.mrb[89].mxu0 }
0x2a68   :  { %v5293_v38 = vpop.f32.mrb[90].mxu0 }
0x2a69   :  { %v11297_v10 = vpack.c.bf16 %v5290_v51, %v5290_v51  ;;  %v5294_v39 = vpop.f32.mrb[91].mxu0 }
0x2a6b   :  { %5349 = vrot.lane.b32.xlu1 %v11297_v10, %s12011_s12  ;;  %5299 = vrot.lane.b32.xlu0 %v11297_v10, %s12012_s14 }
0x2a6f   :  { %5347 = vrot.lane.b32.xlu1 %v11297_v10, %s12004_s30  ;;  %5399 = vrot.lane.b32.xlu0 %v11297_v10, %s12005_s15 }
0x2a73   :  { %5397 = vrot.lane.b32.xlu1 %v11297_v10, %s12006_s16  ;;  %5449 = vrot.lane.b32.xlu0 %v11297_v10, %s12007_s17 }
0x2a77   :  { %5447 = vrot.lane.b32.xlu1 %v11297_v10, %s12008_s23  ;;  %5499 = vrot.lane.b32.xlu0 %v11297_v10, %s11997_s2 }
0x2a7b   :  { %5549 = vrot.lane.b32.xlu1 %v11297_v10, %s11999_s25  ;;  %5497 = vrot.lane.b32.xlu0 %v11297_v10, %s12009_s28 }
0x2a7f   :  { %5547 = vrot.lane.b32.xlu1 %v11297_v10, %s12010_s29  ;;  %5599 = vrot.lane.b32.xlu0 %v11297_v10, %s12001_s1 }
0x2a83   :  { %5649 = vrot.lane.b32.xlu1 %v11297_v10, %s11998_s19  ;;  %5597 = vrot.lane.b32.xlu0 %v11297_v10, %s12002_s21 }
0x2a87   :  { %5647 = vrot.lane.b32.xlu1 %v11297_v10, %s12000_s0 }
0x2add   :  { %v5350_v33 = vpop.permute.xlu1 %5349  ;;  %v5300_v20 = vpop.permute.xlu0 %5299 }
0x2ade   :  { %v5305_v47 = vsel %vm417_vm3, %v5300_v20, 0  ;;  %v5355_v50 = vsel %vm417_vm3, %v5350_v33, 0 }
0x2adf   :  { %8990 = vmatpush3.bf16.xpose.msra.mxu1 %v5305_v47 }
0x2ae0   :  { %8995 = vmatprep.subr.bf16.mxu1 %v9718_v0 }
0x2ae1   :  { %v5348_v36 = vpop.permute.xlu1 %5347  ;;  %v5400_v18 = vpop.permute.xlu0 %5399 }
0x2ae2   :  { %v5405_v37 = vsel %vm417_vm3, %v5400_v18, 0 }
0x2ae5   :  { %v5398_v22 = vpop.permute.xlu1 %5397  ;;  %v5450_v58 = vpop.permute.xlu0 %5449 }
0x2ae6   :  { %8992 = vmatmul.mubr.msk.bf16.vlgmr.msra.gmra.mrb[144].mxu1 %vm417_vm3, %v11297_v10  ;;  %v5455_v54 = vsel %vm417_vm3, %v5450_v58, 0 }
0x2ae7   :  { %8996 = vmatpush3.bf16.xpose.msra.mxu1 %v5355_v50  ;;  %8997 = vmatprep.mubr.msk.bf16.mxu1 %vm9719_vm0, %v9718_v0 }
0x2ae8   :  { %9001 = vmatprep.subr.bf16.mxu1 %v9718_v0 }
0x2ae9   :  { %v5448_v55 = vpop.permute.xlu1 %5447  ;;  %v5500_v32 = vpop.permute.xlu0 %5499 }
0x2aea   :  { %v5505_v35 = vsel %vm417_vm3, %v5500_v32, 0 }
0x2aed   :  { %v5550_v52 = vpop.permute.xlu1 %5549  ;;  %v5498_v14 = vpop.permute.xlu0 %5497 }
0x2aee   :  { %v5555_v43 = vsel %vm417_vm3, %v5550_v52, 0  ;;  %8998 = vmatmul.mubr.msk.bf16.vlgmr.msra.gmra.mrb[148].mxu1 %vm417_vm3, %v5348_v36 }
0x2aef   :  { %9002 = vmatpush3.bf16.xpose.msra.mxu1 %v5405_v37  ;;  %9020 = vmatpush3.bf16.xpose.msra.mxu0 %v5555_v43 }
0x2af0   :  { %9003 = vmatprep.mubr.msk.bf16.mxu1 %vm9719_vm0, %v9718_v0  ;;  %9007 = vmatprep.subr.bf16.mxu1 %v9718_v0 }
0x2af1   :  { %v5548_v48 = vpop.permute.xlu1 %5547  ;;  %9031 = vmatprep.subr.bf16.mxu0 %v9718_v0  ;;  %v5600_v15 = vpop.permute.xlu0 %5599 }
0x2af2   :  { %v5605_v19 = vsel %vm417_vm3, %v5600_v15, 0 }
0x2af5   :  { %v5650_v45 = vpop.permute.xlu1 %5649  ;;  %v5598_v4 = vpop.permute.xlu0 %5597 }
0x2af6   :  { %v5655_v11 = vsel %vm417_vm3, %v5650_v45, 0  ;;  %9004 = vmatmul.mubr.msk.bf16.vlgmr.msra.gmra.mrb[152].mxu1 %vm417_vm3, %v5398_v22  ;;  %9022 = vmatmul.mubr.msk.bf16.vlgmr.msra.gmra.mrb[92].mxu0 %vm417_vm3, %v5548_v48 }
0x2af7   :  { %9008 = vmatpush3.bf16.xpose.msra.mxu1 %v5455_v54  ;;  %9032 = vmatpush3.bf16.xpose.msra.mxu0 %v5655_v11 }
0x2af8   :  { %9009 = vmatprep.mubr.msk.bf16.mxu1 %vm9719_vm0, %v9718_v0  ;;  %9033 = vmatprep.mubr.msk.bf16.mxu0 %vm9719_vm0, %v9718_v0 }
0x2af9   :  { %9013 = vmatprep.subr.bf16.mxu1 %v9718_v0  ;;  %9047 = vmatprep.subr.bf16.mxu0 %v9718_v0  ;;  %v5648_v31 = vpop.permute.xlu1 %5647 }
0x2afe   :  { %9010 = vmatmul.mubr.msk.bf16.vlgmr.msra.gmra.mrb[156].mxu1 %vm417_vm3, %v5448_v55  ;;  %9034 = vmatmul.mubr.msk.bf16.vlgmr.msra.gmra.mrb[96].mxu0 %vm417_vm3, %v5648_v31 }
0x2aff   :  { %9014 = vmatpush3.bf16.xpose.msra.mxu1 %v5505_v35  ;;  %9015 = vmatprep.mubr.msk.bf16.mxu1 %vm9719_vm0, %v9718_v0 }
0x2b00   :  { %9025 = vmatprep.subr.bf16.mxu1 %v9718_v0  ;;  %9055 = vmatprep.mubr.msk.bf16.mxu0 %vm9719_vm0, %v9718_v0 }
0x2b06   :  { %9016 = vmatmul.mubr.msk.bf16.vlgmr.msra.gmra.mrb[160].mxu1 %vm417_vm3, %v5498_v14 }
0x2b07   :  { %9026 = vmatpush3.bf16.xpose.msra.mxu1 %v5605_v19  ;;  %9027 = vmatprep.mubr.msk.bf16.mxu1 %vm9719_vm0, %v9718_v0 }
0x2b0e   :  { %9028 = vmatmul.mubr.msk.bf16.vlgmr.msra.gmra.mrb[164].mxu1 %vm417_vm3, %v5598_v4 }
0x2bb9   :  { %v5341_v41 = vpop.f32.mrb[144].mxu1 }
0x2bba   :  { %v8993_v42 = vpop.f32.mrb[145].mxu1  ;;  %v5697_v49 = vsel %vm814_vm4, %v5341_v41, -inf }
0x2bbb   :  { %5698 = vmax.xlane.f32.xlu0 %v5697_v49  ;;  %v5344_v40 = vpop.f32.mrb[146].mxu1 }
0x2bbc   :  { %v8994_v23 = vpop.f32.mrb[147].mxu1 }
0x2bc1   :  { %v5391_v44 = vpop.f32.mrb[148].mxu1 }
0x2bc2   :  { %v8999_v25 = vpop.f32.mrb[149].mxu1  ;;  %v5700_v6 = vsel %vm814_vm4, %v5391_v44, -inf }
0x2bc3   :  { %5701 = vmax.xlane.f32.xlu1 %v5700_v6  ;;  %v5394_v53 = vpop.f32.mrb[150].mxu1 }
0x2bc4   :  { %v9000_v61 = vpop.f32.mrb[151].mxu1 }
0x2bc9   :  { %v5441_v2 = vpop.f32.mrb[152].mxu1  ;;  %v5591_v8 = vpop.f32.mrb[92].mxu0 }
0x2bca   :  { %v9005_v30 = vpop.f32.mrb[153].mxu1  ;;  %v9023_v26 = vpop.f32.mrb[93].mxu0  ;;  %v5703_v51 = vsel %vm814_vm4, %v5441_v2, -inf  ;;  %v5712_v58 = vsel %vm814_vm4, %v5591_v8, -inf }
0x2bcb   :  { %v5594_v38 = vpop.f32.mrb[94].mxu0  ;;  %5704 = vmax.xlane.f32.xlu0 %v5703_v51  ;;  %v5444_v39 = vpop.f32.mrb[154].mxu1 }
0x2bcc   :  { %v9006_v33 = vpop.f32.mrb[155].mxu1  ;;  %v9024_v20 = vpop.f32.mrb[95].mxu0 }
0x2bd1   :  { %v5491_v47 = vpop.f32.mrb[156].mxu1  ;;  %v5691_v36 = vpop.f32.mrb[96].mxu0 }
0x2bd2   :  { %v9011_v22 = vpop.f32.mrb[157].mxu1  ;;  %v9035_v50 = vpop.f32.mrb[97].mxu0  ;;  %v5706_v55 = vsel %vm814_vm4, %v5491_v47, -inf  ;;  %v5718_v54 = vsel %vm814_vm4, %v5691_v36, -inf }
0x2bd3   :  { %v5694_v18 = vpop.f32.mrb[98].mxu0  ;;  %5707 = vmax.xlane.f32.xlu0 %v5706_v55  ;;  %v5494_v52 = vpop.f32.mrb[158].mxu1 }
0x2bd4   :  { %v9012_v37 = vpop.f32.mrb[159].mxu1  ;;  %v9036_v43 = vpop.f32.mrb[99].mxu0 }
0x2bd7   :  { %5713 = vmax.xlane.f32.xlu0 %v5712_v58 }
0x2bd9   :  { %v5541_v48 = vpop.f32.mrb[160].mxu1 }
0x2bda   :  { %v9017_v45 = vpop.f32.mrb[161].mxu1  ;;  %v5709_v11 = vsel %vm814_vm4, %v5541_v48, -inf }
0x2bdb   :  { %5719 = vmax.xlane.f32.xlu0 %v5718_v54  ;;  %5710 = vmax.xlane.f32.xlu1 %v5709_v11  ;;  %v5544_v32 = vpop.f32.mrb[162].mxu1 }
0x2bdc   :  { %v9018_v14 = vpop.f32.mrb[163].mxu1 }
0x2be1   :  { %v5641_v31 = vpop.f32.mrb[164].mxu1 }
0x2be2   :  { %v9029_v35 = vpop.f32.mrb[165].mxu1  ;;  %v5715_v15 = vsel %vm814_vm4, %v5641_v31, -inf }
0x2be3   :  { %5716 = vmax.xlane.f32.xlu1 %v5715_v15  ;;  %v5644_v19 = vpop.f32.mrb[166].mxu1 }
0x2be4   :  { %v9030_v4 = vpop.f32.mrb[167].mxu1 }
0x2c48   :  { %v5699_v42 = vpop.xlane.xlu0 %5698 }
0x2c49   :  { %v5721_v49 = vsub.f32 %v5341_v41, %v5699_v42  ;;  %v5163_v42 = vrot.slane %v11291_v28, %v9939_v62 }
0x2c4b   :  { %v5729_v40 = vmul.f32 1.442695, %v5721_v49  ;;  %v5292_v49 = vadd.f32 %v11295_v34, %v5163_v42 }
0x2c4d   :  { %9623 = vpow2.f32 %v5729_v40  ;;  %v5297_v40 = vpack.c.bf16 %v5292_v49, %v5292_v49 }
0x2c50   :  { %v5702_v30 = vpop.xlane.xlu1 %5701 }
0x2c51   :  { %v5722_v51 = vsub.f32 %v5391_v44, %v5702_v30 }
0x2c53   :  { %v5731_v41 = vmul.f32 1.442695, %v5722_v51 }
0x2c57   :  { %v11375_v23 = vpop.eup %9623 }
0x2c58   :  { %v5705_v25 = vpop.xlane.xlu0 %5704  ;;  %v5745_v6 = vsel %vm814_vm4, %v11375_v23, 0.0 }
0x2c59   :  { %v5723_v53 = vsub.f32 %v5441_v2, %v5705_v25  ;;  %5746 = vadd.xlane.f32.xlu1 %v5745_v6 }
0x2c5b   :  { %v5733_v61 = vmul.f32 1.442695, %v5723_v53 }
0x2c5d   :  { %9625 = vpow2.f32 %v5733_v61 }
0x2c60   :  { %v5708_v26 = vpop.xlane.xlu0 %5707 }
0x2c61   :  { %v5724_v52 = vsub.f32 %v5491_v47, %v5708_v26 }
0x2c63   :  { %v5735_v44 = vmul.f32 1.442695, %v5724_v52 }
0x2c64   :  { %v5714_v38 = vpop.xlane.xlu0 %5713 }
0x2c65   :  { %v5726_v39 = vsub.f32 %v5591_v8, %v5714_v38 }
0x2c67   :  { %v11379_v33 = vpop.eup %9625  ;;  %v5739_v20 = vmul.f32 1.442695, %v5726_v39 }
0x2c68   :  { %v5711_v22 = vpop.xlane.xlu1 %5710  ;;  %v5720_v50 = vpop.xlane.xlu0 %5719  ;;  %v5751_v55 = vsel %vm814_vm4, %v11379_v33, 0.0 }
0x2c69   :  { %9627 = vpow2.f32 %v5739_v20  ;;  %v5725_v18 = vsub.f32 %v5541_v48, %v5711_v22  ;;  %v5728_v2 = vsub.f32 %v5691_v36, %v5720_v50  ;;  %5752 = vadd.xlane.f32.xlu1 %v5751_v55 }
0x2c6a   :  { %9629 = vpow2.f32 %v5731_v41 }
0x2c6b   :  { %v5737_v37 = vmul.f32 1.442695, %v5725_v18  ;;  %v5743_v43 = vmul.f32 1.442695, %v5728_v2 }
0x2c6d   :  { %9631 = vpow2.f32 %v5737_v37 }
0x2c6e   :  { %9633 = vpow2.f32 %v5743_v43 }
0x2c6f   :  { %9635 = vpow2.f32 %v5735_v44 }
0x2c70   :  { %v5717_v8 = vpop.xlane.xlu1 %5716 }
0x2c71   :  { %v5727_v58 = vsub.f32 %v5641_v31, %v5717_v8 }
0x2c73   :  { %v9628_v45 = vpop.eup %9627  ;;  %v5741_v54 = vmul.f32 1.442695, %v5727_v58 }
0x2c74   :  { %v5760_v11 = vsel %vm814_vm4, %v9628_v45, 0.0  ;;  %v9630_v32 = vpop.eup %9629 }
0x2c75   :  { %9637 = vpow2.f32 %v5741_v54  ;;  %5761 = vadd.xlane.f32.xlu0 %v5760_v11  ;;  %v5748_v47 = vsel %vm814_vm4, %v9630_v32, 0.0 }
0x2c77   :  { %v9632_v48 = vpop.eup %9631 }
0x2c78   :  { %v5757_v36 = vsel %vm814_vm4, %v9632_v48, 0.0  ;;  %v9634_v14 = vpop.eup %9633 }
0x2c79   :  { %5758 = vadd.xlane.f32.xlu1 %v5757_v36  ;;  %5749 = vadd.xlane.f32.xlu0 %v5748_v47  ;;  %v5766_v35 = vsel %vm814_vm4, %v9634_v14, 0.0  ;;  %v9636_v15 = vpop.eup %9635 }
0x2c7a   :  { %v5754_v4 = vsel %vm814_vm4, %v9636_v15, 0.0 }
0x2c7d   :  { %5767 = vadd.xlane.f32.xlu0 %v5766_v35 }
0x2c7f   :  { %v9638_v31 = vpop.eup %9637 }
0x2c80   :  { %v5763_v19 = vsel %vm814_vm4, %v9638_v31, 0.0 }
0x2c81   :  { %5764 = vadd.xlane.f32.xlu1 %v5763_v19  ;;  %5755 = vadd.xlane.f32.xlu0 %v5754_v4 }
0x2c92   :  { %5790 = vrot.lane.b32.xlu1 %v11297_v10, %s12013_s24 }
0x2c97   :  { %5792 = vrot.lane.b32.xlu0 %v5297_v40, %s12013_s24  ;;  %s12021_s24 = sld [smem:[#allocation7_spill]] }
0x2ce6   :  { %v5747_v25 = vpop.xlane.xlu1 %5746 }
0x2ce7   :  { %9639 = vrcp.f32 %v5747_v25 }
0x2cf1   :  { %v9640_v34 = vpop.eup %9639 }
0x2cf2   :  { %v5777_v20 = vmul.f32 %v9640_v34, %v11375_v23 }
0x2cf6   :  { %v5753_v53 = vpop.xlane.xlu1 %5752 }
0x2d02   :  { %v5762_v6 = vpop.xlane.xlu0 %5761 }
0x2d06   :  { %v5750_v61 = vpop.xlane.xlu0 %5749  ;;  %v5759_v30 = vpop.xlane.xlu1 %5758 }
0x2d07   :  { %9641 = vrcp.f32 %v5750_v61 }
0x2d08   :  { %9643 = vrcp.f32 %v5759_v30 }
0x2d09   :  { %9645 = vrcp.f32 %v5753_v53 }
0x2d0a   :  { %v5768_v26 = vpop.xlane.xlu0 %5767  ;;  %9647 = vrcp.f32 %v5762_v6 }
0x2d0e   :  { %v5765_v51 = vpop.xlane.xlu1 %5764  ;;  %v5756_v28 = vpop.xlane.xlu0 %5755 }
0x2d0f   :  { %9649 = vrcp.f32 %v5756_v28 }
0x2d10   :  { %9651 = vrcp.f32 %v5765_v51 }
0x2d11   :  { %v9642_v38 = vpop.eup %9641  ;;  %9653 = vrcp.f32 %v5768_v26 }
0x2d12   :  { %v5791_v10 = vpop.permute.xlu1 %5790  ;;  %v5793_v39 = vpop.permute.xlu0 %5792  ;;  %v5778_v22 = vmul.f32 %v9642_v38, %v9630_v32 }
0x2d13   :  { %v5794_v41 = vsel %vm912_vm5, %v5791_v10, %v5793_v39  ;;  %v9644_v18 = vpop.eup %9643 }
0x2d14   :  { %v5808_v50 = vsel %vm87_vm1, %v5794_v41, 0  ;;  %9165 = vmatprep.subr.msk.bf16.mxu1 %vm87_vm1, %v5794_v41  ;;  %v5785_v55 = vpack.c.bf16 %v5778_v22, %v5777_v20  ;;  %v9646_v2 = vpop.eup %9645  ;;  %v5781_v43 = vmul.f32 %v9644_v18, %v9632_v48  ;;  %v9368_v48 = vld [vmem:[%s12014_s11 + $0x80] sm:$0xff]  }
0x2d15   :  { %9038 = vmatpush3.bf16.msra.mxu1 %v5808_v50  ;;  %v9648_v52 = vpop.eup %9647  ;;  %v5779_v44 = vmul.f32 %v9646_v2, %v11379_v33  ;;  %v9366_v33 = vld [vmem:[%s12014_s11 + $0x70] sm:$0xff]   ;;  %v5902_v2 = vrot.slane %v11279_v7, %v10099_v5 }
0x2d16   :  { %9039 = vmatprep.mubr.msk.bf16.mxu1 %vm814_vm4, %v5785_v55  ;;  %v5782_v23 = vmul.f32 %v9648_v52, %v9628_v45  ;;  %9048 = vmatpush3.bf16.msra.mxu0 %v9366_v33  ;;  %v9367_v45 = vld [vmem:[%s12014_s11 + $0x78] sm:$0xff]  }
0x2d17   :  { %9049 = vmatprep.subr.bf16.mxu0 %v9718_v0  ;;  %v9375_v33 = vld [vmem:[%s11943_s6 + $0xf4] ss:$8 sps:$4 sm:$0xff]  }
0x2d18   :  { %v5787_v11 = vpack.c.bf16 %v5782_v23, %v5781_v43 }
0x2d19   :  { %v9650_v37 = vpop.eup %9649 }
0x2d1a   :  { %v5780_v8 = vmul.f32 %v9650_v37, %v9636_v15  ;;  %v9652_v54 = vpop.eup %9651  ;;  %9050 = vmatpush3.bf16.msra.mxu0 %v9367_v45  ;;  %v9373_v45 = vld [vmem:[%s11943_s6 + $0xf0] ss:$8 sps:$4 sm:$0xff]  }
0x2d1b   :  { %v9654_v32 = vpop.eup %9653  ;;  %v5783_v36 = vmul.f32 %v9652_v54, %v9638_v31  ;;  %9051 = vmatprep.subr.bf16.mxu0 %v9718_v0 }
0x2d1c   :  { %v5786_v58 = vpack.c.bf16 %v5780_v8, %v5779_v44  ;;  %v5784_v47 = vmul.f32 %v9654_v32, %v9634_v14  ;;  %v9369_v14 = vld [vmem:[%s12014_s11 + $0x88] ss:$0 sps:$4 sm:$0xff]  }
0x2d1d   :  { %v5928_v15 = vsel %vm87_vm1, %v9369_v14, 0  ;;  %v9376_v14 = vld [vmem:[%s11943_s6 + $0x100] ss:$8 sps:$4 sm:$0xff]  }
0x2d1e   :  { %9040 = vmatmul.mubr.msk.bf16.vlgmr.msra.gmra.mrb[168].mxu1 %vm814_vm4, %v5786_v58  ;;  %v5788_v35 = vpack.c.bf16 %v5784_v47, %v5783_v36  ;;  %9052 = vmatpush3.bf16.msra.mxu0 %v9368_v48  ;;  %v9378_v48 = vld [vmem:[%s11943_s6 + $0x104] ss:$8 sps:$4 sm:$0xff]  }
0x2d1f   :  { %9043 = vmatprep.mubr.msk.bf16.mxu1 %vm814_vm4, %v5787_v11  ;;  %9053 = vmatprep.subr.bf16.mxu0 %v9718_v0 }
0x2d22   :  { %9054 = vmatpush3.bf16.msra.mxu0 %v5928_v15  ;;  %v8317_v15 = vld [vmem:[%s11943_s6 + $0x110] sm:$0xff] }
0x2d23   :  { %6277 = vmatprep.subr.bf16.mxu0 %v9720_v27 }
0x2d26   :  { %9044 = vmatmul.mubr.msk.bf16.gmra.mrb[172].mxu1 %vm814_vm4, %v5788_v35  ;;  %v9372_v35 = vld [vmem:[%s11943_s6 + $0xe4] ss:$8 sps:$4 sm:$0xff]  }
0x2d27   :  { %6092 = vmatprep.mubr.bf16.mxu1 %v9720_v27  ;;  %6060 = vmatprep.subr.bf16.mxu1 %v9372_v35 }
0x2df1   :  { %v9041_v31 = vpop.f32.mrb[168].mxu1 }
0x2df2   :  { %v5844_v19 = vpop.f32.mrb[169].mxu1  ;;  %v5878_v25 = vmul.f32 %v9041_v31, %v10096_v3  ;;  %v8326_v31 = vcombine.high %v8317_v15, %v8317_v15 }
0x2df3   :  { %v9042_v4 = vpop.f32.mrb[170].mxu1  ;;  %v5875_v49 = vmul.f32 %v5844_v19, %v10087_v63  ;;  %v8325_v19 = vcombine.low %v8317_v15, %v8317_v15 }
0x2df4   :  { %v5847_v42 = vpop.f32.mrb[171].mxu1  ;;  %v5880_v53 = vmul.f32 %v9042_v4, %v10103_v9 }
0x2df5   :  { %v5876_v40 = vmul.f32 %v5847_v42, %v10093_v57  ;;  %v6055_v4 = vsel %vm87_vm1, %v8325_v19, 0  ;;  %v9381_v42 = vld [vmem:[%s11944_s8 + $0x1c0] sm:$0xff]  }
0x2df7   :  { %v5877_v6 = vadd.f32 %v5876_v40, %v5875_v49 }
0x2df9   :  { %v5879_v61 = vadd.f32 %v5878_v25, %v5877_v6  ;;  %v9045_v30 = vpop.f32.mrb[172].mxu1  ;;  %v5987_v6 = vrot.slane %v11279_v7, %v10084_v56 }
0x2dfa   :  { %v5860_v26 = vpop.f32.mrb[173].mxu1  ;;  %v5886_v41 = vmul.f32 %v9045_v30, %v10121_v24 }
0x2dfb   :  { %v5881_v51 = vadd.f32 %v5880_v53, %v5879_v61  ;;  %v5882_v28 = vmul.f32 %v5860_v26, %v10112_v17  ;;  %v9046_v34 = vpop.f32.mrb[174].mxu1  ;;  %v5992_v61 = vrot.slane %v11279_v7, %v10090_v1 }
0x2dfc   :  { %v5863_v38 = vpop.f32.mrb[175].mxu1  ;;  %v5888_v22 = vmul.f32 %v9046_v34, %v10124_v29  ;;  %v9382_v34 = vld [vmem:[%s11944_s8 + $0x1c8] sm:$0xff]  }
0x2dfd   :  { %v5883_v10 = vadd.f32 %v5882_v28, %v5881_v51  ;;  %v5884_v39 = vmul.f32 %v5863_v38, %v10117_v13  ;;  %v9383_v38 = vld [vmem:[%s11944_s8 + $0x1d0] sm:$0xff]  }
0x2dff   :  { %v5885_v20 = vadd.f32 %v5884_v39, %v5883_v10  ;;  %v9384_v10 = vld [vmem:[%s11944_s8 + $0x1d8] sm:$0xff]   ;;  %v9385_v39 = vld [vmem:[%s11944_s8 + $0x1e0] sm:$0xff]  }
0x2e01   :  { %v5887_v50 = vadd.f32 %v5886_v41, %v5885_v20  ;;  %v9386_v41 = vld [vmem:[%s11944_s8 + $0x1e8] sm:$0xff]   ;;  %v9387_v20 = vld [vmem:[%s11944_s8 + $0x1f0] sm:$0xff]  }
0x2e03   :  { %v5889_v55 = vadd.f32 %v5888_v22, %v5887_v50  ;;  %v9388_v22 = vld [vmem:[%s11944_s8 + $0x1f8] sm:$0xff]   ;;  %v9389_v50 = vld [vmem:[%s11944_s8 + $0x200] sm:$0xff]  }
0x2e05   :  { %v5898_v18 = vpack.c.bf16 %v5889_v55, %v5889_v55  ;;  %v9390_v55 = vld [vmem:[%s11944_s8 + $0x208] sm:$0xff]  }
0x2e07   :  { %9056 = vmatmul.mubr.msk.bf16.vlgmr.msra.gmra.mrb[100].mxu0 %vm83_vm2, %v5898_v18  ;;  %v9391_v18 = vld [vmem:[%s11944_s8 + $0x210] sm:$0xff]  }
0x2e08   :  { %6278 = vmatpush1.bf16.msra.mxu0 %v9381_v42 }
0x2e09   :  { %6279 = vmatprep.subr.bf16.mxu0 %v9720_v27 }
0x2e0c   :  { %6280 = vmatpush1.bf16.msra.mxu0 %v9382_v34 }
0x2e0d   :  { %6281 = vmatprep.subr.bf16.mxu0 %v9720_v27 }
0x2e10   :  { %6282 = vmatpush1.bf16.msra.mxu0 %v9383_v38 }
0x2e11   :  { %6283 = vmatprep.subr.bf16.mxu0 %v9720_v27 }
0x2e14   :  { %6284 = vmatpush1.bf16.msra.mxu0 %v9384_v10 }
0x2e15   :  { %6285 = vmatprep.subr.bf16.mxu0 %v9720_v27 }
0x2e18   :  { %6286 = vmatpush1.bf16.msra.mxu0 %v9385_v39 }
0x2e19   :  { %6287 = vmatprep.subr.bf16.mxu0 %v9720_v27 }
0x2e1c   :  { %6288 = vmatpush1.bf16.msra.mxu0 %v9386_v41 }
0x2e1d   :  { %6289 = vmatprep.subr.bf16.mxu0 %v9720_v27 }
0x2e20   :  { %6290 = vmatpush1.bf16.msra.mxu0 %v9387_v20 }
0x2e21   :  { %6291 = vmatprep.subr.bf16.mxu0 %v9720_v27 }
0x2e24   :  { %6292 = vmatpush1.bf16.msra.mxu0 %v9388_v22 }
0x2e25   :  { %6293 = vmatprep.subr.bf16.mxu0 %v9720_v27 }
0x2e28   :  { %6294 = vmatpush1.bf16.msra.mxu0 %v9389_v50 }
0x2e29   :  { %6295 = vmatprep.subr.bf16.mxu0 %v9720_v27 }
0x2e2c   :  { %6296 = vmatpush1.bf16.msra.mxu0 %v9390_v55 }
0x2e2d   :  { %6297 = vmatprep.subr.bf16.mxu0 %v9720_v27 }
0x2e30   :  { %6298 = vmatpush1.bf16.msra.mxu0 %v9391_v18 }
0x2e31   :  { %6299 = vmatprep.subr.bf16.mxu0 %v9720_v27 }
0x2eda   :  { %v5964_v52 = vpop.f32.mrb[100].mxu0 }
0x2edb   :  { %v5965_v37 = vadd.f32 %v5964_v52, %v5902_v2  ;;  %v9057_v43 = vpop.f32.mrb[101].mxu0  ;;  %v9392_v2 = vld [vmem:[%s11944_s8 + $0x218] sm:$0xff]   ;;  %v9393_v52 = vld [vmem:[%s11944_s8 + $0x220] sm:$0xff]  }
0x2edc   :  { %v5967_v44 = vpop.f32.mrb[102].mxu0  ;;  %6300 = vmatpush1.bf16.msra.mxu0 %v9392_v2  ;;  %v8318_v43 = vld [vmem:[%s11945_s7 + $0x4] ss:$8 sm:$0x3] }
0x2edd   :  { %v11434_v8 = vadd.f32 %v5965_v37, %v11215_v21  ;;  %v9058_v23 = vpop.f32.mrb[103].mxu0  ;;  %v9370_v21 = vld [vmem:[%s11943_s6 + $0xe0] ss:$8 sps:$4 sm:$0xff]   ;;  %6301 = vmatprep.subr.bf16.mxu0 %v9720_v27  ;;  %v6009_v44 = vrot.slane %v8318_v43, %v9931_v60 }
0x2ede   :  { %6061 = vmatpush1.bf16.msra.mxu1 %v9370_v21  ;;  %v9394_v37 = vld [vmem:[%s11944_s8 + $0x228] sm:$0xff]   ;;  %v6013_v23 = vrot.slane %v8318_v43, %v9939_v62 }
0x2edf   :  { %v5971_v58 = vsel %vm83_vm2, %v11434_v8, 0.0  ;;  %6062 = vmatprep.subr.bf16.mxu1 %v9375_v33 }
0x2ee0   :  { %5972 = vadd.xlane.f32.xlu1 %v5971_v58  ;;  %6302 = vmatpush1.bf16.msra.mxu0 %v9393_v52 }
0x2ee1   :  { %6303 = vmatprep.subr.bf16.mxu0 %v9720_v27 }
0x2ee2   :  { %6063 = vmatpush1.bf16.msra.mxu1 %v9373_v45 }
0x2ee3   :  { %6064 = vmatprep.subr.bf16.mxu1 %v9378_v48 }
0x2ee4   :  { %6304 = vmatpush1.bf16.msra.mxu0 %v9394_v37 }
0x2ee5   :  { %9059 = vmatprep.subr.bf16.mxu0 %v9718_v0 }
0x2ee6   :  { %6065 = vmatpush1.bf16.msra.mxu1 %v9376_v14 }
0x2ee7   :  { %8327 = vmatprep.subr.msk.bf16.mxu1 %vm87_vm1, %v8326_v31 }
0x2eea   :  { %6067 = vmatpush1.bf16.msra.mxu1 %v6055_v4 }
0x2eeb   :  { %6468 = vmatprep.subr.bf16.mxu1 %v9720_v27 }
0x2f6d   :  { %v5973_v54 = vpop.xlane.xlu1 %5972 }
0x2f6e   :  { %v5974_v11 = vmul.f32 0.017857144, %v5973_v54 }
0x2f70   :  { %v5975_v32 = vsub.f32 %v11434_v8, %v5974_v11 }
0x2f72   :  { %v5976_v36 = vmul.f32 %v5975_v32, %v5975_v32 }
0x2f74   :  { %v5977_v47 = vsel %vm83_vm2, %v5976_v36, 0.0 }
0x2f75   :  { %5978 = vadd.xlane.f32.xlu0 %v5977_v47 }
0x3002   :  { %v5979_v49 = vpop.xlane.xlu0 %5978 }
0x3003   :  { %v5980_v40 = vmul.f32 0.017857144, %v5979_v49 }
0x3005   :  { %v5981_v25 = vadd.f32 1e-05, %v5980_v40 }
0x3007   :  { %9655 = vrsqrt.f32 %v5981_v25 }
0x3011   :  { %v9656_v53 = vpop.eup %9655 }
0x3012   :  { %v5983_v30 = vmul.f32 %v9656_v53, %v5975_v32 }
0x3014   :  { %v5988_v26 = vmul.f32 %v5987_v6, %v5983_v30 }
0x3016   :  { %v5993_v51 = vadd.f32 %v5992_v61, %v5988_v26 }
0x3018   :  { %v6002_v28 = vpack.c.bf16 %v5993_v51, %v5993_v51 }
0x301a   :  { %8328 = vmatmul.mubr.msk.bf16.vlgmr.msra.gmra.mrb[176].mxu1 %vm83_vm2, %v6002_v28 }
0x301b   :  { %6500 = vmatprep.mubr.bf16.mxu1 %v9720_v27 }
0x30ed   :  { %v6094_v58 = vpop.f32.mrb[176].mxu1 }
0x30ee   :  { %v6095_v54 = vadd.f32 %v6094_v58, %v6009_v44  ;;  %v6096_v11 = vpop.f32.mrb[177].mxu1 }
0x30ef   :  { %v6097_v32 = vadd.f32 %v6096_v11, %v6013_v23  ;;  %v6098_v36 = vpop.f32.mrb[178].mxu1 }
0x30f0   :  { %v6103_v47 = vmul.f32 0.70710677, %v6095_v54  ;;  %v6099_v35 = vpop.f32.mrb[179].mxu1 }
0x30f1   :  { %v6104_v21 = vmul.f32 0.70710677, %v6097_v32 }
0x30f2   :  { %v6109_v33 = vand.u32 2147483647, %v6103_v47  ;;  %vm6105_vm8 = vcmp.ge.f32.partialorder %v6103_v47, 0.0  ;;  %v6189_v47 = vrot.slane %v11279_v7, %v10107_v12  ;;  %v9396_v7 = vld [vmem:[%s11939_s3 + $0x1ac] sm:$0xff]  }
0x30f3   :  { %v6110_v45 = vand.u32 2147483647, %v6104_v21  ;;  %vm6106_vm9 = vcmp.ge.f32.partialorder %v6104_v21, 0.0  ;;  %v6107_v36 = vsel %vm6105_vm8, 1.0, %v9737_v46 }
0x30f4   :  { %v6111_v48 = vmul.f32 0.3275911, %v6109_v33  ;;  %v6137_v19 = vsub.f32 0.0, %v6109_v33 }
0x30f5   :  { %v6112_v14 = vmul.f32 0.3275911, %v6110_v45  ;;  %v6138_v4 = vsub.f32 0.0, %v6110_v45 }
0x30f6   :  { %v6113_v15 = vadd.f32 1.0, %v6111_v48  ;;  %v6139_v49 = vmul.f32 %v6137_v19, %v6109_v33 }
0x30f7   :  { %v6114_v31 = vadd.f32 1.0, %v6112_v14  ;;  %v6140_v6 = vmul.f32 %v6138_v4, %v6110_v45  ;;  %v6108_v45 = vsel %vm6106_vm9, 1.0, %v9737_v46  ;;  %v6101_v14 = vmul.f32 0.5, %v6095_v54 }
0x30f8   :  { %9657 = vrcp.f32 %v6113_v15  ;;  %v6141_v30 = vmul.f32 1.442695, %v6139_v49 }
0x30f9   :  { %9659 = vrcp.f32 %v6114_v31  ;;  %v6143_v28 = vmul.f32 1.442695, %v6140_v6  ;;  %v6102_v31 = vmul.f32 0.5, %v6097_v32 }
0x30fa   :  { %9661 = vpow2.f32 %v6141_v30  ;;  %v9395_v30 = vld [vmem:[%s11939_s3 + $0x1a4] sm:$0xff]  }
0x30fb   :  { %9663 = vpow2.f32 %v6143_v28 }
0x3102   :  { %v9658_v42 = vpop.eup %9657 }
0x3103   :  { %v9660_v40 = vpop.eup %9659  ;;  %v6119_v25 = vmul.f32 1.0614054, %v9658_v42 }
0x3104   :  { %v6120_v53 = vmul.f32 1.0614054, %v9660_v40  ;;  %v9662_v37 = vpop.eup %9661 }
0x3105   :  { %v6121_v61 = vadd.f32 -1.4531521, %v6119_v25  ;;  %v9664_v44 = vpop.eup %9663 }
0x3106   :  { %v6122_v26 = vadd.f32 -1.4531521, %v6120_v53 }
0x3107   :  { %v6123_v51 = vmul.f32 %v9658_v42, %v6121_v61 }
0x3108   :  { %v6124_v34 = vmul.f32 %v9660_v40, %v6122_v26  ;;  %v6436_v26 = vsel %vm83_vm2, %v9395_v30, 0 }
0x3109   :  { %v6125_v38 = vadd.f32 1.4214138, %v6123_v51  ;;  %6469 = vmatpush1.bf16.xpose.msra.mxu1 %v6436_v26  ;;  %v9397_v51 = vld [vmem:[%s11939_s3 + $0x1b4] sm:$0xff]  }
0x310a   :  { %v6126_v10 = vadd.f32 1.4214138, %v6124_v34  ;;  %6470 = vmatprep.subr.bf16.mxu1 %v9720_v27  ;;  %v6442_v28 = vsel %vm83_vm2, %v9397_v51, 0  ;;  %v9398_v34 = vld [vmem:[%s11939_s3 + $0x1bc] sm:$0xff]  }
0x310b   :  { %v6127_v39 = vmul.f32 %v9658_v42, %v6125_v38  ;;  %v6445_v38 = vsel %vm83_vm2, %v9398_v34, 0 }
0x310c   :  { %v6128_v41 = vmul.f32 %v9660_v40, %v6126_v10  ;;  %v9399_v10 = vld [vmem:[%s11939_s3 + $0x1c4] sm:$0xff]  }
0x310d   :  { %v6129_v20 = vadd.f32 -0.28449672, %v6127_v39  ;;  %v6448_v39 = vsel %vm83_vm2, %v9399_v10, 0 }
0x310e   :  { %v6130_v22 = vadd.f32 -0.28449672, %v6128_v41  ;;  %v9400_v41 = vld [vmem:[%s11939_s3 + $0x1cc] sm:$0xff]  }
0x310f   :  { %v6131_v50 = vmul.f32 %v9658_v42, %v6129_v20  ;;  %v6451_v20 = vsel %vm83_vm2, %v9400_v41, 0 }
0x3110   :  { %v6132_v55 = vmul.f32 %v9660_v40, %v6130_v22  ;;  %v9401_v22 = vld [vmem:[%s11939_s3 + $0x1d4] sm:$0xff]  }
0x3111   :  { %v6133_v18 = vadd.f32 0.2548296, %v6131_v50  ;;  %v6454_v50 = vsel %vm83_vm2, %v9401_v22, 0 }
0x3112   :  { %v6134_v2 = vadd.f32 0.2548296, %v6132_v55  ;;  %v9402_v55 = vld [vmem:[%s11939_s3 + $0x1dc] sm:$0xff]  }
0x3113   :  { %v6135_v52 = vmul.f32 %v9658_v42, %v6133_v18  ;;  %v6457_v18 = vsel %vm83_vm2, %v9402_v55, 0 }
0x3114   :  { %v6136_v43 = vmul.f32 %v9660_v40, %v6134_v2 }
0x3115   :  { %v6145_v23 = vmul.f32 %v9662_v37, %v6135_v52 }
0x3116   :  { %v6146_v58 = vmul.f32 %v9664_v44, %v6136_v43 }
0x3117   :  { %v6147_v11 = vsub.f32 1.0, %v6145_v23  ;;  %v9403_v23 = vld [vmem:[%s11939_s3 + $0x1e4] sm:$0xff]  }
0x3118   :  { %v6148_v35 = vsub.f32 1.0, %v6146_v58  ;;  %v6460_v58 = vsel %vm83_vm2, %v9403_v23, 0 }
0x3119   :  { %v6149_v33 = vmul.f32 %v6147_v11, %v6107_v36  ;;  %v9404_v11 = vld [vmem:[%s11939_s3 + $0x1ec] sm:$0xff]  }
0x311a   :  { %v6150_v48 = vmul.f32 %v6148_v35, %v6108_v45  ;;  %v6463_v36 = vsel %vm83_vm2, %v9404_v11, 0  ;;  %v9405_v35 = vld [vmem:[%s11939_s3 + $0x1f4] ss:$0 sps:$4 sm:$0xff]  }
0x311b   :  { %v6151_v15 = vadd.f32 1.0, %v6149_v33  ;;  %v6466_v33 = vsel %vm83_vm2, %v9405_v35, 0 }
0x311c   :  { %v6152_v19 = vadd.f32 1.0, %v6150_v48 }
0x311d   :  { %v6153_v4 = vmul.f32 %v6151_v15, %v6101_v14  ;;  %v11603_v15 = vld [vmem:[%s11940_s9 + $0x28] sm:$0x3f] }
0x311e   :  { %v6154_v42 = vmul.f32 %v6152_v19, %v6102_v31  ;;  %v6336_v31 = vrot.slane %v11603_v15, %v9931_v60 }
0x311f   :  { %v6184_v40 = vpack.c.bf16 %v6153_v4, %v6153_v4 }
0x3120   :  { %v6185_v49 = vpack.c.bf16 %v6154_v42, %v6154_v42  ;;  %v6341_v42 = vrot.slane %v11603_v15, %v9939_v62 }
0x3122   :  { %8371 = vmatprep.mubr.msk.bf16.mxu0 %vm1421_vm11, %v6185_v49 }
0x3123   :  { %6310 = vmatmul.mubr.bf16.vlgmr.msra.gmra.mrb[104].mxu0 %v6184_v40 }
0x3124   :  { %9061 = vmatprep.mubr.msk.bf16.mxu0 %vm9719_vm0, %v9718_v0 }
0x31f6   :  { %v6311_v21 = vpop.f32.mrb[104].mxu0 }
0x31f7   :  { %v6312_v25 = vadd.f32 %v6311_v21, %v6189_v47  ;;  %v6313_v6 = vpop.f32.mrb[105].mxu0  ;;  %v11615_v21 = vld [vmem:[%s11941_s4 + $0x5] ss:$8 sm:$0x3]  ;;  %s12015_s4 = smov 16  }
0x31f8   :  { %v6314_v54 = vpop.f32.mrb[106].mxu0 }
0x31f9   :  { %v11539_v32 = vadd.f32 %v6312_v25, %v11434_v8  ;;  %v6315_v53 = vpop.f32.mrb[107].mxu0  ;;  %v6439_v8 = vsel %vm83_vm2, %v9396_v7, 0  ;;  %v6372_v25 = vrot.slane %v11615_v21, %v9931_v60 }
0x31fa   :  { %6471 = vmatpush1.bf16.xpose.msra.mxu1 %v6439_v8 }
0x31fb   :  { %v6320_v61 = vsel %vm83_vm2, %v11539_v32, 0.0  ;;  %6472 = vmatprep.subr.bf16.mxu1 %v9720_v27 }
0x31fc   :  { %6321 = vadd.xlane.f32.xlu1 %v6320_v61 }
0x3202   :  { %6473 = vmatpush1.bf16.xpose.msra.mxu1 %v6442_v28 }
0x3203   :  { %6474 = vmatprep.subr.bf16.mxu1 %v9720_v27 }
0x320a   :  { %6475 = vmatpush1.bf16.xpose.msra.mxu1 %v6445_v38 }
0x320b   :  { %6476 = vmatprep.subr.bf16.mxu1 %v9720_v27 }
0x3212   :  { %6477 = vmatpush1.bf16.xpose.msra.mxu1 %v6448_v39 }
0x3213   :  { %6478 = vmatprep.subr.bf16.mxu1 %v9720_v27 }
0x321a   :  { %6479 = vmatpush1.bf16.xpose.msra.mxu1 %v6451_v20 }
0x321b   :  { %6480 = vmatprep.subr.bf16.mxu1 %v9720_v27 }
0x3222   :  { %6481 = vmatpush1.bf16.xpose.msra.mxu1 %v6454_v50 }
0x3223   :  { %6482 = vmatprep.subr.bf16.mxu1 %v9720_v27 }
0x322a   :  { %6483 = vmatpush1.bf16.xpose.msra.mxu1 %v6457_v18 }
0x322b   :  { %6484 = vmatprep.subr.bf16.mxu1 %v9720_v27 }
0x3232   :  { %6485 = vmatpush1.bf16.xpose.msra.mxu1 %v6460_v58 }
0x3233   :  { %6486 = vmatprep.subr.bf16.mxu1 %v9720_v27 }
0x323a   :  { %6487 = vmatpush1.bf16.xpose.msra.mxu1 %v6463_v36 }
0x323b   :  { %6488 = vmatprep.subr.bf16.mxu1 %v9720_v27 }
0x3242   :  { %6489 = vmatpush1.bf16.xpose.msra.mxu1 %v6466_v33 }
0x3243   :  { %9089 = vmatprep.subr.bf16.mxu1 %v9718_v0 }
0x3289   :  { %v6322_v2 = vpop.xlane.xlu1 %6321 }
0x328a   :  { %v6323_v52 = vmul.f32 0.017857144, %v6322_v2 }
0x328c   :  { %v6324_v37 = vsub.f32 %v11539_v32, %v6323_v52 }
0x328e   :  { %v6325_v43 = vmul.f32 %v6324_v37, %v6324_v37 }
0x3290   :  { %v6326_v44 = vsel %vm83_vm2, %v6325_v43, 0.0 }
0x3291   :  { %6327 = vadd.xlane.f32.xlu0 %v6326_v44 }
0x331e   :  { %v6328_v45 = vpop.xlane.xlu0 %6327 }
0x331f   :  { %v6329_v48 = vmul.f32 0.017857144, %v6328_v45 }
0x3321   :  { %v6330_v14 = vadd.f32 1e-05, %v6329_v48 }
0x3323   :  { %9665 = vrsqrt.f32 %v6330_v14 }
0x332d   :  { %v9666_v19 = vpop.eup %9665 }
0x332e   :  { %v6332_v4 = vmul.f32 %v9666_v19, %v6324_v37 }
0x3330   :  { %v6337_v49 = vmul.f32 %v6336_v31, %v6332_v4 }
0x3332   :  { %v6342_v40 = vadd.f32 %v6341_v42, %v6337_v49 }
0x3334   :  { %v6365_v47 = vpack.c.bf16 %v6342_v40, %v6342_v40 }
0x3336   :  { %8406 = vmatmul.mubr.msk.bf16.vlgmr.msra.gmra.mrb[180].mxu1 %vm83_vm2, %v6365_v47 }
0x3337   :  { %9091 = vmatprep.mubr.msk.bf16.mxu1 %vm9719_vm0, %v9718_v0 }
0x3409   :  { %v6502_v6 = vpop.f32.mrb[180].mxu1 }
0x340a   :  { %v6503_v54 = vadd.f32 %v6502_v6, %v6372_v25  ;;  %v11619_v53 = vpop.f32.mrb[181].mxu1 }
0x340b   :  { %v6506_v61 = vpop.f32.mrb[182].mxu1 }
0x340c   :  { %v11621_v30 = vpack.c.bf16 %v6503_v54, %v6503_v54  ;;  %v6507_v26 = vpop.f32.mrb[183].mxu1 }
0x340e   :  { %6562 = vrot.lane.b32.xlu0 %v11621_v30, %s12011_s12  ;;  %6512 = vrot.lane.b32.xlu1 %v11621_v30, %s12012_s14 }
0x3412   :  { %6610 = vrot.lane.b32.xlu0 %v11621_v30, %s12006_s16  ;;  %6560 = vrot.lane.b32.xlu1 %v11621_v30, %s12004_s30  ;;  %s12019_s30 = sld [smem:[#allocation5_spill]] }
0x3416   :  { %6660 = vrot.lane.b32.xlu0 %v11621_v30, %s12008_s23  ;;  %6612 = vrot.lane.b32.xlu1 %v11621_v30, %s12005_s15 }
0x341a   :  { %6762 = vrot.lane.b32.xlu0 %v11621_v30, %s11999_s25  ;;  %6662 = vrot.lane.b32.xlu1 %v11621_v30, %s12007_s17 }
0x341e   :  { %6760 = vrot.lane.b32.xlu0 %v11621_v30, %s12010_s29  ;;  %6712 = vrot.lane.b32.xlu1 %v11621_v30, %s11997_s2 }
0x3422   :  { %6862 = vrot.lane.b32.xlu0 %v11621_v30, %s11998_s19  ;;  %6710 = vrot.lane.b32.xlu1 %v11621_v30, %s12009_s28  ;;  %s12016_s19 = sld [smem:[#allocation2_spill]] }
0x3426   :  { %6860 = vrot.lane.b32.xlu0 %v11621_v30, %s12000_s0  ;;  %6812 = vrot.lane.b32.xlu1 %v11621_v30, %s12001_s1  ;;  %s12018_s0 = sld [smem:[#allocation4_spill]] }
0x342a   :  { %6810 = vrot.lane.b32.xlu1 %v11621_v30, %s12002_s21 }
0x3480   :  { %v6563_v7 = vpop.permute.xlu0 %6562  ;;  %v6513_v8 = vpop.permute.xlu1 %6512 }
0x3481   :  { %v6518_v51 = vsel %vm417_vm3, %v6513_v8, 0  ;;  %v6568_v10 = vsel %vm417_vm3, %v6563_v7, 0 }
0x3482   :  { %9060 = vmatpush3.bf16.xpose.msra.mxu0 %v6518_v51 }
0x3483   :  { %9065 = vmatprep.subr.bf16.mxu0 %v9718_v0 }
0x3484   :  { %v6611_v28 = vpop.permute.xlu0 %6610  ;;  %v6561_v34 = vpop.permute.xlu1 %6560 }
0x3488   :  { %v6661_v38 = vpop.permute.xlu0 %6660  ;;  %v6613_v20 = vpop.permute.xlu1 %6612 }
0x3489   :  { %9062 = vmatmul.mubr.msk.bf16.vlgmr.msra.gmra.mrb[108].mxu0 %vm417_vm3, %v11621_v30  ;;  %v6618_v50 = vsel %vm417_vm3, %v6613_v20, 0 }
0x348a   :  { %9066 = vmatpush3.bf16.xpose.msra.mxu0 %v6568_v10  ;;  %9067 = vmatprep.mubr.msk.bf16.mxu0 %vm9719_vm0, %v9718_v0 }
0x348b   :  { %9071 = vmatprep.subr.bf16.mxu0 %v9718_v0 }
0x348c   :  { %v6763_v39 = vpop.permute.xlu0 %6762  ;;  %v6663_v55 = vpop.permute.xlu1 %6662 }
0x348d   :  { %v6768_v41 = vsel %vm417_vm3, %v6763_v39, 0  ;;  %v6668_v52 = vsel %vm417_vm3, %v6663_v55, 0 }
0x348e   :  { %9090 = vmatpush3.bf16.xpose.msra.mxu1 %v6768_v41 }
0x348f   :  { %9101 = vmatprep.subr.bf16.mxu1 %v9718_v0 }
0x3490   :  { %v6761_v22 = vpop.permute.xlu0 %6760  ;;  %v6713_v37 = vpop.permute.xlu1 %6712 }
0x3491   :  { %9068 = vmatmul.mubr.msk.bf16.vlgmr.msra.gmra.mrb[112].mxu0 %vm417_vm3, %v6561_v34  ;;  %v6718_v23 = vsel %vm417_vm3, %v6713_v37, 0 }
0x3492   :  { %9072 = vmatpush3.bf16.xpose.msra.mxu0 %v6618_v50  ;;  %9073 = vmatprep.mubr.msk.bf16.mxu0 %vm9719_vm0, %v9718_v0 }
0x3493   :  { %9077 = vmatprep.subr.bf16.mxu0 %v9718_v0 }
0x3494   :  { %v6863_v18 = vpop.permute.xlu0 %6862  ;;  %v6711_v44 = vpop.permute.xlu1 %6710 }
0x3495   :  { %v6868_v2 = vsel %vm417_vm3, %v6863_v18, 0  ;;  %9092 = vmatmul.mubr.msk.bf16.vlgmr.msra.gmra.mrb[184].mxu1 %vm417_vm3, %v6761_v22 }
0x3496   :  { %9102 = vmatpush3.bf16.xpose.msra.mxu1 %v6868_v2  ;;  %9103 = vmatprep.mubr.msk.bf16.mxu1 %vm9719_vm0, %v9718_v0 }
0x3497   :  { %9117 = vmatprep.subr.bf16.mxu1 %v9718_v0 }
0x3498   :  { %v6861_v43 = vpop.permute.xlu0 %6860  ;;  %v6813_v58 = vpop.permute.xlu1 %6812 }
0x3499   :  { %9074 = vmatmul.mubr.msk.bf16.vlgmr.msra.gmra.mrb[116].mxu0 %vm417_vm3, %v6611_v28  ;;  %v6818_v11 = vsel %vm417_vm3, %v6813_v58, 0 }
0x349a   :  { %9078 = vmatpush3.bf16.xpose.msra.mxu0 %v6668_v52  ;;  %9079 = vmatprep.mubr.msk.bf16.mxu0 %vm9719_vm0, %v9718_v0 }
0x349b   :  { %9083 = vmatprep.subr.bf16.mxu0 %v9718_v0 }
0x349c   :  { %v6811_v36 = vpop.permute.xlu1 %6810 }
0x349d   :  { %9104 = vmatmul.mubr.msk.bf16.vlgmr.msra.gmra.mrb[188].mxu1 %vm417_vm3, %v6861_v43 }
0x349e   :  { %9125 = vmatprep.mubr.msk.bf16.mxu1 %vm9719_vm0, %v9718_v0 }
0x34a1   :  { %9080 = vmatmul.mubr.msk.bf16.vlgmr.msra.gmra.mrb[120].mxu0 %vm417_vm3, %v6661_v38 }
0x34a2   :  { %9084 = vmatpush3.bf16.xpose.msra.mxu0 %v6718_v23  ;;  %9085 = vmatprep.mubr.msk.bf16.mxu0 %vm9719_vm0, %v9718_v0 }
0x34a3   :  { %9095 = vmatprep.subr.bf16.mxu0 %v9718_v0 }
0x34a9   :  { %9086 = vmatmul.mubr.msk.bf16.vlgmr.msra.gmra.mrb[124].mxu0 %vm417_vm3, %v6711_v44 }
0x34aa   :  { %9096 = vmatpush3.bf16.xpose.msra.mxu0 %v6818_v11  ;;  %9097 = vmatprep.mubr.msk.bf16.mxu0 %vm9719_vm0, %v9718_v0 }
0x34b1   :  { %9098 = vmatmul.mubr.msk.bf16.vlgmr.msra.gmra.mrb[128].mxu0 %vm417_vm3, %v6811_v36 }
0x355c   :  { %v6554_v35 = vpop.f32.mrb[108].mxu0 }
0x355d   :  { %v9063_v33 = vpop.f32.mrb[109].mxu0  ;;  %v6910_v45 = vsel %vm814_vm4, %v6554_v35, -inf }
0x355e   :  { %6911 = vmax.xlane.f32.xlu1 %v6910_v45  ;;  %v6557_v48 = vpop.f32.mrb[110].mxu0 }
0x355f   :  { %v9064_v14 = vpop.f32.mrb[111].mxu0 }
0x3564   :  { %v6604_v31 = vpop.f32.mrb[112].mxu0 }
0x3565   :  { %v9069_v19 = vpop.f32.mrb[113].mxu0  ;;  %v6913_v4 = vsel %vm814_vm4, %v6604_v31, -inf }
0x3566   :  { %6914 = vmax.xlane.f32.xlu0 %v6913_v4  ;;  %v6607_v42 = vpop.f32.mrb[114].mxu0 }
0x3567   :  { %v9070_v49 = vpop.f32.mrb[115].mxu0 }
0x3568   :  { %v6804_v40 = vpop.f32.mrb[184].mxu1 }
0x3569   :  { %v9093_v47 = vpop.f32.mrb[185].mxu1  ;;  %v6925_v50 = vsel %vm814_vm4, %v6804_v40, -inf }
0x356a   :  { %v6807_v25 = vpop.f32.mrb[186].mxu1 }
0x356b   :  { %v9094_v6 = vpop.f32.mrb[187].mxu1 }
0x356c   :  { %v6654_v54 = vpop.f32.mrb[116].mxu0 }
0x356d   :  { %v9075_v61 = vpop.f32.mrb[117].mxu0  ;;  %v6916_v26 = vsel %vm814_vm4, %v6654_v54, -inf }
0x356e   :  { %6917 = vmax.xlane.f32.xlu0 %v6916_v26  ;;  %v6657_v7 = vpop.f32.mrb[118].mxu0 }
0x356f   :  { %v9076_v8 = vpop.f32.mrb[119].mxu0 }
0x3570   :  { %v6904_v51 = vpop.f32.mrb[188].mxu1 }
0x3571   :  { %v9105_v28 = vpop.f32.mrb[189].mxu1  ;;  %v6931_v2 = vsel %vm814_vm4, %v6904_v51, -inf }
0x3572   :  { %v6907_v34 = vpop.f32.mrb[190].mxu1 }
0x3573   :  { %v9106_v38 = vpop.f32.mrb[191].mxu1 }
0x3574   :  { %v6704_v10 = vpop.f32.mrb[120].mxu0 }
0x3575   :  { %v9081_v39 = vpop.f32.mrb[121].mxu0  ;;  %v6919_v41 = vsel %vm814_vm4, %v6704_v10, -inf }
0x3576   :  { %6920 = vmax.xlane.f32.xlu1 %v6919_v41  ;;  %v6707_v20 = vpop.f32.mrb[122].mxu0 }
0x3577   :  { %v9082_v22 = vpop.f32.mrb[123].mxu0 }
0x357a   :  { %6926 = vmax.xlane.f32.xlu1 %v6925_v50 }
0x357c   :  { %v6754_v55 = vpop.f32.mrb[124].mxu0 }
0x357d   :  { %v9087_v18 = vpop.f32.mrb[125].mxu0  ;;  %v6922_v52 = vsel %vm814_vm4, %v6754_v55, -inf }
0x357e   :  { %6932 = vmax.xlane.f32.xlu1 %v6931_v2  ;;  %6923 = vmax.xlane.f32.xlu0 %v6922_v52  ;;  %v6757_v37 = vpop.f32.mrb[126].mxu0 }
0x357f   :  { %v9088_v43 = vpop.f32.mrb[127].mxu0 }
0x3584   :  { %v6854_v44 = vpop.f32.mrb[128].mxu0 }
0x3585   :  { %v9099_v23 = vpop.f32.mrb[129].mxu0  ;;  %v6928_v58 = vsel %vm814_vm4, %v6854_v44, -inf }
0x3586   :  { %6929 = vmax.xlane.f32.xlu0 %v6928_v58  ;;  %v6857_v11 = vpop.f32.mrb[130].mxu0 }
0x3587   :  { %v9100_v36 = vpop.f32.mrb[131].mxu0 }
0x35eb   :  { %v6912_v33 = vpop.xlane.xlu1 %6911 }
0x35ec   :  { %v6934_v45 = vsub.f32 %v6554_v35, %v6912_v33  ;;  %v6376_v33 = vrot.slane %v11615_v21, %v9939_v62 }
0x35ee   :  { %v6942_v48 = vmul.f32 1.442695, %v6934_v45  ;;  %v6505_v45 = vadd.f32 %v11619_v53, %v6376_v33 }
0x35f0   :  { %9667 = vpow2.f32 %v6942_v48  ;;  %v6510_v48 = vpack.c.bf16 %v6505_v45, %v6505_v45 }
0x35f3   :  { %v6915_v14 = vpop.xlane.xlu0 %6914 }
0x35f4   :  { %v6935_v6 = vsub.f32 %v6604_v31, %v6915_v14 }
0x35f6   :  { %v6944_v35 = vmul.f32 1.442695, %v6935_v6 }
0x35fa   :  { %v11699_v19 = vpop.eup %9667 }
0x35fb   :  { %v6918_v4 = vpop.xlane.xlu0 %6917  ;;  %v6958_v42 = vsel %vm814_vm4, %v11699_v19, 0.0 }
0x35fc   :  { %v6936_v49 = vsub.f32 %v6654_v54, %v6918_v4  ;;  %6959 = vadd.xlane.f32.xlu0 %v6958_v42 }
0x35fe   :  { %v6946_v47 = vmul.f32 1.442695, %v6936_v49 }
0x3600   :  { %9669 = vpow2.f32 %v6946_v47 }
0x3603   :  { %v6921_v25 = vpop.xlane.xlu1 %6920 }
0x3604   :  { %v6937_v54 = vsub.f32 %v6704_v10, %v6921_v25 }
0x3606   :  { %v6948_v31 = vmul.f32 1.442695, %v6937_v54 }
0x3607   :  { %v6927_v61 = vpop.xlane.xlu1 %6926 }
0x3608   :  { %v6939_v26 = vsub.f32 %v6804_v40, %v6927_v61 }
0x360a   :  { %v11703_v7 = vpop.eup %9669  ;;  %v6952_v8 = vmul.f32 1.442695, %v6939_v26 }
0x360b   :  { %v6924_v28 = vpop.xlane.xlu0 %6923  ;;  %v6933_v34 = vpop.xlane.xlu1 %6932  ;;  %v6964_v38 = vsel %vm814_vm4, %v11703_v7, 0.0 }
0x360c   :  { %9671 = vpow2.f32 %v6952_v8  ;;  %v6938_v39 = vsub.f32 %v6754_v55, %v6924_v28  ;;  %v6941_v41 = vsub.f32 %v6904_v51, %v6933_v34  ;;  %6965 = vadd.xlane.f32.xlu0 %v6964_v38 }
0x360d   :  { %9673 = vpow2.f32 %v6944_v35 }
0x360e   :  { %v6950_v20 = vmul.f32 1.442695, %v6938_v39  ;;  %v6956_v22 = vmul.f32 1.442695, %v6941_v41 }
0x3610   :  { %9675 = vpow2.f32 %v6950_v20 }
0x3611   :  { %9677 = vpow2.f32 %v6956_v22 }
0x3612   :  { %9679 = vpow2.f32 %v6948_v31 }
0x3613   :  { %v6930_v40 = vpop.xlane.xlu0 %6929 }
0x3614   :  { %v6940_v50 = vsub.f32 %v6854_v44, %v6930_v40 }
0x3616   :  { %v9672_v18 = vpop.eup %9671  ;;  %v6954_v2 = vmul.f32 1.442695, %v6940_v50 }
0x3617   :  { %v6973_v52 = vsel %vm814_vm4, %v9672_v18, 0.0  ;;  %v9674_v37 = vpop.eup %9673 }
0x3618   :  { %9681 = vpow2.f32 %v6954_v2  ;;  %6974 = vadd.xlane.f32.xlu1 %v6973_v52  ;;  %v6961_v10 = vsel %vm814_vm4, %v9674_v37, 0.0 }
0x361a   :  { %v9676_v55 = vpop.eup %9675 }
0x361b   :  { %v6970_v51 = vsel %vm814_vm4, %v9676_v55, 0.0  ;;  %v9678_v43 = vpop.eup %9677 }
0x361c   :  { %6971 = vadd.xlane.f32.xlu0 %v6970_v51  ;;  %6962 = vadd.xlane.f32.xlu1 %v6961_v10  ;;  %v6979_v23 = vsel %vm814_vm4, %v9678_v43, 0.0  ;;  %v9680_v58 = vpop.eup %9679 }
0x361d   :  { %v6967_v36 = vsel %vm814_vm4, %v9680_v58, 0.0 }
0x3620   :  { %6980 = vadd.xlane.f32.xlu1 %v6979_v23 }
0x3622   :  { %v9682_v44 = vpop.eup %9681 }
0x3623   :  { %v6976_v11 = vsel %vm814_vm4, %v9682_v44, 0.0 }
0x3624   :  { %6977 = vadd.xlane.f32.xlu0 %v6976_v11  ;;  %6968 = vadd.xlane.f32.xlu1 %v6967_v36 }
0x3635   :  { %7005 = vrot.lane.b32.xlu1 %v6510_v48, %s12015_s4 }
0x363a   :  { %7003 = vrot.lane.b32.xlu0 %v11621_v30, %s12015_s4 }
0x3689   :  { %v6960_v14 = vpop.xlane.xlu0 %6959 }
0x368a   :  { %9683 = vrcp.f32 %v6960_v14 }
0x3694   :  { %v9684_v53 = vpop.eup %9683 }
0x3695   :  { %v6990_v8 = vmul.f32 %v9684_v53, %v11699_v19 }
0x3699   :  { %v6966_v42 = vpop.xlane.xlu0 %6965 }
0x36a5   :  { %v6975_v4 = vpop.xlane.xlu1 %6974 }
0x36a9   :  { %v6963_v49 = vpop.xlane.xlu1 %6962  ;;  %v6972_v47 = vpop.xlane.xlu0 %6971 }
0x36aa   :  { %9685 = vrcp.f32 %v6963_v49 }
0x36ab   :  { %9687 = vrcp.f32 %v6972_v47 }
0x36ac   :  { %9689 = vrcp.f32 %v6966_v42 }
0x36ad   :  { %v6981_v25 = vpop.xlane.xlu1 %6980  ;;  %9691 = vrcp.f32 %v6975_v4 }
0x36b1   :  { %v6978_v6 = vpop.xlane.xlu0 %6977  ;;  %v6969_v21 = vpop.xlane.xlu1 %6968 }
0x36b2   :  { %9693 = vrcp.f32 %v6969_v21 }
0x36b3   :  { %9695 = vrcp.f32 %v6978_v6 }
0x36b4   :  { %v9686_v61 = vpop.eup %9685  ;;  %9697 = vrcp.f32 %v6981_v25 }
0x36b5   :  { %v7004_v26 = vpop.permute.xlu0 %7003  ;;  %v7006_v35 = vpop.permute.xlu1 %7005  ;;  %v6991_v28 = vmul.f32 %v9686_v61, %v9674_v37 }
0x36b6   :  { %v7007_v30 = vsel %vm912_vm5, %v7004_v26, %v7006_v35  ;;  %v9688_v39 = vpop.eup %9687 }
0x36b7   :  { %v7021_v34 = vsel %vm87_vm1, %v7007_v30, 0  ;;  %9166 = vmatprep.subr.msk.bf16.mxu0 %vm87_vm1, %v7007_v30  ;;  %v6998_v38 = vpack.c.bf16 %v6991_v28, %v6990_v8  ;;  %v9690_v41 = vpop.eup %9689  ;;  %v6994_v22 = vmul.f32 %v9688_v39, %v9676_v55  ;;  %v9408_v55 = vld [vmem:[%s12016_s19 + $0x9c] sm:$0xff]  }
0x36b8   :  { %9108 = vmatpush3.bf16.msra.mxu0 %v7021_v34  ;;  %v9692_v54 = vpop.eup %9691  ;;  %v6992_v31 = vmul.f32 %v9690_v41, %v11703_v7  ;;  %v9406_v7 = vld [vmem:[%s12016_s19 + $0x8c] sm:$0xff]  }
0x36b9   :  { %9109 = vmatprep.mubr.msk.bf16.mxu0 %vm814_vm4, %v6998_v38  ;;  %v6995_v19 = vmul.f32 %v9692_v54, %v9672_v18  ;;  %9118 = vmatpush3.bf16.msra.mxu1 %v9406_v7  ;;  %v9407_v18 = vld [vmem:[%s12016_s19 + $0x94] sm:$0xff]  }
0x36ba   :  { %9119 = vmatprep.subr.bf16.mxu1 %v9718_v0  ;;  %v9421_v7 = vld [vmem:[%s11944_s8 + $0x230] sm:$0xff]  }
0x36bb   :  { %v7000_v52 = vpack.c.bf16 %v6995_v19, %v6994_v22  ;;  %v9415_v19 = vld [vmem:[%s11943_s6 + $0x12c] ss:$8 sps:$4 sm:$0xff]  }
0x36bc   :  { %v9694_v20 = vpop.eup %9693 }
0x36bd   :  { %v6993_v40 = vmul.f32 %v9694_v20, %v9680_v58  ;;  %v9696_v2 = vpop.eup %9695  ;;  %9120 = vmatpush3.bf16.msra.mxu1 %v9407_v18 }
0x36be   :  { %v9698_v37 = vpop.eup %9697  ;;  %v6996_v51 = vmul.f32 %v9696_v2, %v9682_v44  ;;  %9121 = vmatprep.subr.bf16.mxu1 %v9718_v0  ;;  %v9418_v2 = vld [vmem:[%s11943_s6 + $0x13c] ss:$8 sps:$4 sm:$0xff]  }
0x36bf   :  { %v6999_v50 = vpack.c.bf16 %v6993_v40, %v6992_v31  ;;  %v6997_v10 = vmul.f32 %v9698_v37, %v9678_v43  ;;  %v9409_v43 = vld [vmem:[%s12016_s19 + $0xa4] ss:$0 sps:$4 sm:$0xff]   ;;  %v8437_v37 = vld [vmem:[%s11943_s6 + $0x148] sm:$0xff] }
0x36c0   :  { %v7141_v58 = vsel %vm87_vm1, %v9409_v43, 0  ;;  %v9412_v40 = vld [vmem:[%s11943_s6 + $0x11c] ss:$8 sps:$4 sm:$0xff]  }
0x36c1   :  { %9110 = vmatmul.mubr.msk.bf16.vlgmr.msra.gmra.mrb[132].mxu0 %vm814_vm4, %v6999_v50  ;;  %v7001_v23 = vpack.c.bf16 %v6997_v10, %v6996_v51  ;;  %9122 = vmatpush3.bf16.msra.mxu1 %v9408_v55  ;;  %v9413_v50 = vld [vmem:[%s11943_s6 + $0x128] ss:$8 sps:$4 sm:$0xff]   ;;  %v8446_v51 = vcombine.high %v8437_v37, %v8437_v37  ;;  %v8445_v10 = vcombine.low %v8437_v37, %v8437_v37 }
0x36c2   :  { %9113 = vmatprep.mubr.msk.bf16.mxu0 %vm814_vm4, %v7000_v52  ;;  %9123 = vmatprep.subr.bf16.mxu1 %v9718_v0  ;;  %v9416_v52 = vld [vmem:[%s11943_s6 + $0x138] ss:$8 sps:$4 sm:$0xff]  }
0x36c3   :  { %7273 = vmatprep.subr.bf16.mxu0 %v9412_v40 }
0x36c5   :  { %9124 = vmatpush3.bf16.msra.mxu1 %v7141_v58  ;;  %v7200_v58 = vrot.slane %v11603_v15, %v10084_v56 }
0x36c6   :  { %7490 = vmatprep.subr.bf16.mxu1 %v9720_v27 }
0x36c9   :  { %9114 = vmatmul.mubr.msk.bf16.gmra.mrb[136].mxu0 %vm814_vm4, %v7001_v23  ;;  %v7268_v23 = vsel %vm87_vm1, %v8445_v10, 0 }
0x36ca   :  { %7305 = vmatprep.mubr.bf16.mxu0 %v9720_v27 }
0x3794   :  { %v9111_v44 = vpop.f32.mrb[132].mxu0 }
0x3795   :  { %v7057_v11 = vpop.f32.mrb[133].mxu0  ;;  %v7091_v14 = vmul.f32 %v9111_v44, %v10096_v3 }
0x3796   :  { %v9112_v36 = vpop.f32.mrb[134].mxu0  ;;  %v7088_v45 = vmul.f32 %v7057_v11, %v10087_v63  ;;  %v7205_v11 = vrot.slane %v11603_v15, %v10090_v1 }
0x3797   :  { %v7060_v33 = vpop.f32.mrb[135].mxu0  ;;  %v7093_v42 = vmul.f32 %v9112_v36, %v10103_v9  ;;  %v7115_v9 = vrot.slane %v11603_v15, %v10099_v5 }
0x3798   :  { %v7089_v48 = vmul.f32 %v7060_v33, %v10093_v57 }
0x379a   :  { %v7090_v4 = vadd.f32 %v7089_v48, %v7088_v45 }
0x379c   :  { %v7092_v49 = vadd.f32 %v7091_v14, %v7090_v4  ;;  %v9115_v47 = vpop.f32.mrb[136].mxu0  ;;  %v9422_v14 = vld [vmem:[%s11944_s8 + $0x238] sm:$0xff]   ;;  %v9423_v4 = vld [vmem:[%s11944_s8 + $0x240] sm:$0xff]  }
0x379d   :  { %v7073_v25 = vpop.f32.mrb[137].mxu0  ;;  %v7099_v63 = vmul.f32 %v9115_v47, %v10121_v24  ;;  %v9426_v47 = vld [vmem:[%s11944_s8 + $0x258] sm:$0xff]  }
0x379e   :  { %v7094_v6 = vadd.f32 %v7093_v42, %v7092_v49  ;;  %v7095_v21 = vmul.f32 %v7073_v25, %v10112_v17  ;;  %v9116_v53 = vpop.f32.mrb[138].mxu0  ;;  %v9424_v42 = vld [vmem:[%s11944_s8 + $0x248] sm:$0xff]   ;;  %v9425_v49 = vld [vmem:[%s11944_s8 + $0x250] sm:$0xff]   ;;  %v9427_v25 = vld [vmem:[%s11944_s8 + $0x260] sm:$0xff]  }
0x379f   :  { %v7076_v61 = vpop.f32.mrb[139].mxu0  ;;  %v7101_v57 = vmul.f32 %v9116_v53, %v10124_v29  ;;  %v9430_v53 = vld [vmem:[%s11944_s8 + $0x278] sm:$0xff]  }
0x37a0   :  { %v7096_v26 = vadd.f32 %v7095_v21, %v7094_v6  ;;  %v7097_v35 = vmul.f32 %v7076_v61, %v10117_v13  ;;  %v9428_v6 = vld [vmem:[%s11944_s8 + $0x268] sm:$0xff]   ;;  %v9429_v21 = vld [vmem:[%s11944_s8 + $0x270] sm:$0xff]   ;;  %v9431_v61 = vld [vmem:[%s11944_s8 + $0x280] sm:$0xff]  }
0x37a2   :  { %v7098_v30 = vadd.f32 %v7097_v35, %v7096_v26  ;;  %v9432_v26 = vld [vmem:[%s11944_s8 + $0x288] sm:$0xff]   ;;  %v9433_v35 = vld [vmem:[%s11944_s8 + $0x290] sm:$0xff]  }
0x37a4   :  { %v7100_v3 = vadd.f32 %v7099_v63, %v7098_v30  ;;  %v9434_v63 = vld [vmem:[%s11944_s8 + $0x298] sm:$0xff]   ;;  %v9435_v30 = vld [vmem:[%s12017_s18] sm:$0xff]  }
0x37a6   :  { %v7102_v8 = vadd.f32 %v7101_v57, %v7100_v3  ;;  %v9436_v57 = vld [vmem:[%s12017_s18 + $0x8] sm:$0xff]  }
0x37a8   :  { %v7111_v28 = vpack.c.bf16 %v7102_v8, %v7102_v8 }
0x37aa   :  { %9126 = vmatmul.mubr.msk.bf16.vlgmr.msra.gmra.mrb[192].mxu1 %vm83_vm2, %v7111_v28 }
0x37ab   :  { %7491 = vmatpush1.bf16.msra.mxu1 %v9421_v7 }
0x37ac   :  { %7492 = vmatprep.subr.bf16.mxu1 %v9720_v27 }
0x37af   :  { %7493 = vmatpush1.bf16.msra.mxu1 %v9422_v14 }
0x37b0   :  { %7494 = vmatprep.subr.bf16.mxu1 %v9720_v27 }
0x37b3   :  { %7495 = vmatpush1.bf16.msra.mxu1 %v9423_v4 }
0x37b4   :  { %7496 = vmatprep.subr.bf16.mxu1 %v9720_v27 }
0x37b7   :  { %7497 = vmatpush1.bf16.msra.mxu1 %v9424_v42 }
0x37b8   :  { %7498 = vmatprep.subr.bf16.mxu1 %v9720_v27 }
0x37bb   :  { %7499 = vmatpush1.bf16.msra.mxu1 %v9425_v49 }
0x37bc   :  { %7500 = vmatprep.subr.bf16.mxu1 %v9720_v27 }
0x37bf   :  { %7501 = vmatpush1.bf16.msra.mxu1 %v9426_v47 }
0x37c0   :  { %7502 = vmatprep.subr.bf16.mxu1 %v9720_v27 }
0x37c3   :  { %7503 = vmatpush1.bf16.msra.mxu1 %v9427_v25 }
0x37c4   :  { %7504 = vmatprep.subr.bf16.mxu1 %v9720_v27 }
0x37c7   :  { %7505 = vmatpush1.bf16.msra.mxu1 %v9428_v6 }
0x37c8   :  { %7506 = vmatprep.subr.bf16.mxu1 %v9720_v27 }
0x37cb   :  { %7507 = vmatpush1.bf16.msra.mxu1 %v9429_v21 }
0x37cc   :  { %7508 = vmatprep.subr.bf16.mxu1 %v9720_v27 }
0x37cf   :  { %7509 = vmatpush1.bf16.msra.mxu1 %v9430_v53 }
0x37d0   :  { %7510 = vmatprep.subr.bf16.mxu1 %v9720_v27 }
0x37d3   :  { %7511 = vmatpush1.bf16.msra.mxu1 %v9431_v61 }
0x37d4   :  { %7512 = vmatprep.subr.bf16.mxu1 %v9720_v27 }
0x37d7   :  { %7513 = vmatpush1.bf16.msra.mxu1 %v9432_v26 }
0x37d8   :  { %7514 = vmatprep.subr.bf16.mxu1 %v9720_v27 }
0x37db   :  { %7515 = vmatpush1.bf16.msra.mxu1 %v9433_v35 }
0x37dc   :  { %7516 = vmatprep.subr.bf16.mxu1 %v9720_v27  ;;  %v8438_v27 = vld [vmem:[%s11945_s7 + $0x5] ss:$8 sm:$0x3] }
0x37dd   :  { %v7222_v3 = vrot.slane %v8438_v27, %v9931_v60  ;;  %v7226_v8 = vrot.slane %v8438_v27, %v9939_v62 }
0x37df   :  { %7517 = vmatpush1.bf16.msra.mxu1 %v9434_v63 }
0x387d   :  { %v7177_v34 = vpop.f32.mrb[192].mxu1 }
0x387e   :  { %v7178_v17 = vadd.f32 %v7177_v34, %v7115_v9  ;;  %v9127_v38 = vpop.f32.mrb[193].mxu1 }
0x387f   :  { %v7180_v39 = vpop.f32.mrb[194].mxu1 }
0x3880   :  { %v11758_v41 = vadd.f32 %v7178_v17, %v11539_v32  ;;  %v9128_v13 = vpop.f32.mrb[195].mxu1  ;;  %v9410_v32 = vld [vmem:[%s11943_s6 + $0x118] ss:$8 sps:$4 sm:$0xff]  }
0x3881   :  { %7274 = vmatpush1.bf16.msra.mxu0 %v9410_v32 }
0x3882   :  { %v7184_v24 = vsel %vm83_vm2, %v11758_v41, 0.0  ;;  %7275 = vmatprep.subr.bf16.mxu0 %v9415_v19 }
0x3883   :  { %7185 = vadd.xlane.f32.xlu1 %v7184_v24 }
0x3885   :  { %7276 = vmatpush1.bf16.msra.mxu0 %v9413_v50 }
0x3886   :  { %7277 = vmatprep.subr.bf16.mxu0 %v9418_v2 }
0x3889   :  { %7278 = vmatpush1.bf16.msra.mxu0 %v9416_v52 }
0x388a   :  { %8447 = vmatprep.subr.msk.bf16.mxu0 %vm87_vm1, %v8446_v51 }
0x388d   :  { %7280 = vmatpush1.bf16.msra.mxu0 %v7268_v23 }
0x388e   :  { %9129 = vmatprep.subr.bf16.mxu0 %v9718_v0 }
0x3910   :  { %v7186_v29 = vpop.xlane.xlu1 %7185 }
0x3911   :  { %v7187_v54 = vmul.f32 0.017857144, %v7186_v29 }
0x3913   :  { %v7188_v20 = vsub.f32 %v11758_v41, %v7187_v54 }
0x3915   :  { %v7189_v22 = vmul.f32 %v7188_v20, %v7188_v20 }
0x3917   :  { %v7190_v31 = vsel %vm83_vm2, %v7189_v22, 0.0 }
0x3918   :  { %7191 = vadd.xlane.f32.xlu0 %v7190_v31 }
0x39a5   :  { %v7192_v18 = vpop.xlane.xlu0 %7191 }
0x39a6   :  { %v7193_v55 = vmul.f32 0.017857144, %v7192_v18 }
0x39a8   :  { %v7194_v43 = vadd.f32 1e-05, %v7193_v55 }
0x39aa   :  { %9699 = vrsqrt.f32 %v7194_v43 }
0x39b4   :  { %v9700_v44 = vpop.eup %9699 }
0x39b5   :  { %v7196_v36 = vmul.f32 %v9700_v44, %v7188_v20 }
0x39b7   :  { %v7201_v33 = vmul.f32 %v7200_v58, %v7196_v36 }
0x39b9   :  { %v7206_v45 = vadd.f32 %v7205_v11, %v7201_v33 }
0x39bb   :  { %v7215_v48 = vpack.c.bf16 %v7206_v45, %v7206_v45 }
0x39bd   :  { %8448 = vmatmul.mubr.msk.bf16.vlgmr.msra.gmra.mrb[140].mxu0 %vm83_vm2, %v7215_v48 }
0x39be   :  { %9137 = vmatprep.mubr.msk.bf16.mxu0 %vm9719_vm0, %v9718_v0  ;;  %9130 = vmatpush3.bf16.msra.mxu0 %v9435_v30 }
0x39bf   :  { %9131 = vmatprep.subr.bf16.mxu0 %v9718_v0 }
0x39c2   :  { %9132 = vmatpush3.bf16.msra.mxu0 %v9436_v57 }
0x39c3   :  { %9133 = vmatprep.subr.bf16.mxu0 %v9718_v0 }
0x3a90   :  { %v7307_v28 = vpop.f32.mrb[140].mxu0 }
0x3a91   :  { %v7308_v9 = vadd.f32 %v7307_v28, %v7222_v3  ;;  %v7309_v34 = vpop.f32.mrb[141].mxu0 }
0x3a92   :  { %v7310_v17 = vadd.f32 %v7309_v34, %v7226_v8  ;;  %v7311_v38 = vpop.f32.mrb[142].mxu0 }
0x3a93   :  { %v7316_v39 = vmul.f32 0.70710677, %v7308_v9  ;;  %v7312_v13 = vpop.f32.mrb[143].mxu0  ;;  %v7314_v3 = vmul.f32 0.5, %v7308_v9 }
0x3a94   :  { %v7317_v24 = vmul.f32 0.70710677, %v7310_v17  ;;  %v7315_v28 = vmul.f32 0.5, %v7310_v17  ;;  %v7402_v17 = vrot.slane %v11603_v15, %v10107_v12 }
0x3a95   :  { %v7322_v29 = vand.u32 2147483647, %v7316_v39  ;;  %vm7318_vm3 = vcmp.ge.f32.partialorder %v7316_v39, 0.0  ;;  %v9437_v39 = vld [vmem:[%s12017_s18 + $0x10] sm:$0xff]  }
0x3a96   :  { %v7323_v54 = vand.u32 2147483647, %v7317_v24  ;;  %vm7319_vm4 = vcmp.ge.f32.partialorder %v7317_v24, 0.0  ;;  %v7320_v35 = vsel %vm7318_vm3, 1.0, %v9737_v46  ;;  %9134 = vmatpush3.bf16.msra.mxu0 %v9437_v39 }
0x3a97   :  { %v7324_v20 = vmul.f32 0.3275911, %v7322_v29  ;;  %v7350_v32 = vsub.f32 0.0, %v7322_v29  ;;  %v7321_v57 = vsel %vm7319_vm4, 1.0, %v9737_v46  ;;  %9135 = vmatprep.subr.bf16.mxu0 %v9718_v0  ;;  %v9438_v46 = vld [vmem:[%s12017_s18 + $0x18] ss:$0 sps:$4 sm:$0xff]  }
0x3a98   :  { %v7325_v22 = vmul.f32 0.3275911, %v7323_v54  ;;  %v7351_v19 = vsub.f32 0.0, %v7323_v54  ;;  %v7569_v9 = vsel %vm87_vm1, %v9438_v46, 0 }
0x3a99   :  { %v7326_v31 = vadd.f32 1.0, %v7324_v20  ;;  %v7352_v2 = vmul.f32 %v7350_v32, %v7322_v29 }
0x3a9a   :  { %v7327_v40 = vadd.f32 1.0, %v7325_v22  ;;  %v7353_v51 = vmul.f32 %v7351_v19, %v7323_v54  ;;  %9136 = vmatpush3.bf16.msra.mxu0 %v7569_v9 }
0x3a9b   :  { %9701 = vrcp.f32 %v7326_v31  ;;  %v7354_v7 = vmul.f32 1.442695, %v7352_v2  ;;  %9141 = vmatprep.subr.bf16.mxu0 %v9718_v0 }
0x3a9c   :  { %9703 = vrcp.f32 %v7327_v40  ;;  %v7356_v43 = vmul.f32 1.442695, %v7353_v51 }
0x3a9d   :  { %9705 = vpow2.f32 %v7354_v7 }
0x3a9e   :  { %9707 = vpow2.f32 %v7356_v43 }
0x3aa5   :  { %v9702_v50 = vpop.eup %9701 }
0x3aa6   :  { %v9704_v52 = vpop.eup %9703  ;;  %v7332_v37 = vmul.f32 1.0614054, %v9702_v50 }
0x3aa7   :  { %v7333_v10 = vmul.f32 1.0614054, %v9704_v52  ;;  %v9706_v25 = vpop.eup %9705 }
0x3aa8   :  { %v7334_v23 = vadd.f32 -1.4531521, %v7332_v37  ;;  %v9708_v21 = vpop.eup %9707 }
0x3aa9   :  { %v7335_v18 = vadd.f32 -1.4531521, %v7333_v10 }
0x3aaa   :  { %v7336_v55 = vmul.f32 %v9702_v50, %v7334_v23 }
0x3aab   :  { %v7337_v58 = vmul.f32 %v9704_v52, %v7335_v18 }
0x3aac   :  { %v7338_v44 = vadd.f32 1.4214138, %v7336_v55 }
0x3aad   :  { %v7339_v11 = vadd.f32 1.4214138, %v7337_v58  ;;  %v9439_v58 = vld [vmem:[%s12019_s30] sm:$0xff]  }
0x3aae   :  { %v7340_v36 = vmul.f32 %v9702_v50, %v7338_v44  ;;  %v9441_v44 = vld [vmem:[%s12019_s30 + $0x10] sm:$0xff]  }
0x3aaf   :  { %v7341_v33 = vmul.f32 %v9704_v52, %v7339_v11  ;;  %v9442_v11 = vld [vmem:[%s12019_s30 + $0x18] ss:$0 sps:$4 sm:$0xff]  }
0x3ab0   :  { %v7342_v45 = vadd.f32 -0.28449672, %v7340_v36  ;;  %v7672_v36 = vsel %vm87_vm1, %v9442_v11, 0  ;;  %vm7714_vm1 = vcmask 228352  }
0x3ab1   :  { %v7343_v48 = vadd.f32 -0.28449672, %v7341_v33 }
0x3ab2   :  { %v7344_v14 = vmul.f32 %v9702_v50, %v7342_v45 }
0x3ab3   :  { %v7345_v4 = vmul.f32 %v9704_v52, %v7343_v48 }
0x3ab4   :  { %v7346_v42 = vadd.f32 0.2548296, %v7344_v14 }
0x3ab5   :  { %v7347_v49 = vadd.f32 0.2548296, %v7345_v4 }
0x3ab6   :  { %v7348_v47 = vmul.f32 %v9702_v50, %v7346_v42  ;;  %v11884_v50 = vld [vmem:[%s12018_s0] sm:$0x7f] }
0x3ab7   :  { %v7349_v6 = vmul.f32 %v9704_v52, %v7347_v49  ;;  %v7543_v15 = vrot.slane %v11884_v50, %v9931_v60  ;;  %v9440_v60 = vld [vmem:[%s12019_s30 + $0x8] sm:$0xff]   ;;  %v7627_v14 = vrot.slane %v11884_v50, %v9939_v62  ;;  %v7632_v49 = vrot.slane %v11884_v50, %v10084_v56 }
0x3ab8   :  { %v7358_v53 = vmul.f32 %v9706_v25, %v7348_v47  ;;  %v7737_v9 = vrot.slane %v11884_v50, %v10107_v12 }
0x3ab9   :  { %v7359_v61 = vmul.f32 %v9708_v21, %v7349_v6 }
0x3aba   :  { %v7360_v26 = vsub.f32 1.0, %v7358_v53  ;;  %v7646_v53 = vrot.slane %v11884_v50, %v10090_v1  ;;  %v9443_v1 = vld [vmem:[%s12020_s27] sm:$0xff]  }
0x3abb   :  { %v7361_v63 = vsub.f32 1.0, %v7359_v61 }
0x3abc   :  { %v7362_v30 = vmul.f32 %v7360_v26, %v7320_v35 }
0x3abd   :  { %v7363_v27 = vmul.f32 %v7361_v63, %v7321_v57 }
0x3abe   :  { %v7364_v8 = vadd.f32 1.0, %v7362_v30 }
0x3abf   :  { %v7365_v34 = vadd.f32 1.0, %v7363_v27 }
0x3ac0   :  { %v7366_v38 = vmul.f32 %v7364_v8, %v7314_v3 }
0x3ac1   :  { %v7367_v13 = vmul.f32 %v7365_v34, %v7315_v28  ;;  %v9444_v28 = vld [vmem:[%s12020_s27 + $0x8] sm:$0x3f]  }
0x3ac2   :  { %v7397_v54 = vpack.c.bf16 %v7366_v38, %v7366_v38 }
0x3ac3   :  { %v7398_v29 = vpack.c.bf16 %v7367_v13, %v7367_v13 }
0x3ac5   :  { %8491 = vmatprep.mubr.msk.bf16.mxu1 %vm1421_vm11, %v7398_v29 }
0x3ac6   :  { %7523 = vmatmul.mubr.bf16.vlgmr.msra.gmra.mrb[196].mxu1 %v7397_v54  ;;  %v7732_v54 = vrot.slane %v11884_v50, %v10099_v5 }
0x3b99   :  { %v7524_v24 = vpop.f32.mrb[196].mxu1 }
0x3b9a   :  { %v7525_v20 = vadd.f32 %v7524_v24, %v7402_v17  ;;  %v7526_v22 = vpop.f32.mrb[197].mxu1 }
0x3b9b   :  { %v7527_v31 = vpop.f32.mrb[198].mxu1 }
0x3b9c   :  { %v7530_v40 = vadd.f32 %v7525_v20, %v11758_v41  ;;  %v7528_v32 = vpop.f32.mrb[199].mxu1 }
0x3b9e   :  { %v7539_v19 = vpack.c.bf16 %v7530_v40, %v7530_v40 }
0x3ba0   :  { %9138 = vmatmul.mubr.msk.bf16.vlgmr.msra.gmra.mrb[144].mxu0 %vm83_vm2, %v7539_v19 }
0x3ba1   :  { %9149 = vmatprep.mubr.msk.bf16.mxu0 %vm9719_vm0, %v9718_v0  ;;  %9142 = vmatpush3.bf16.msra.mxu0 %v9439_v58 }
0x3ba2   :  { %9143 = vmatprep.subr.bf16.mxu0 %v9718_v0 }
0x3ba5   :  { %9144 = vmatpush3.bf16.msra.mxu0 %v9440_v60 }
0x3ba6   :  { %9145 = vmatprep.subr.bf16.mxu0 %v9718_v0 }
0x3ba9   :  { %9146 = vmatpush3.bf16.msra.mxu0 %v9441_v44 }
0x3baa   :  { %9147 = vmatprep.subr.bf16.mxu0 %v9718_v0 }
0x3bad   :  { %9148 = vmatpush3.bf16.msra.mxu0 %v7672_v36 }
0x3bae   :  { %9153 = vmatprep.subr.bf16.mxu0 %v9718_v0 }
0x3c73   :  { %v7605_v2 = vpop.f32.mrb[144].mxu0 }
0x3c74   :  { %v7606_v52 = vadd.f32 %v7605_v2, %v7543_v15  ;;  %v9139_v37 = vpop.f32.mrb[145].mxu0 }
0x3c75   :  { %v7608_v51 = vpop.f32.mrb[146].mxu0 }
0x3c76   :  { %v9140_v41 = vpop.f32.mrb[147].mxu0  ;;  %v7611_v10 = vsel %vm83_vm2, %v7606_v52, 0.0 }
0x3c77   :  { %7612 = vadd.xlane.f32.xlu0 %v7611_v10 }
0x3d04   :  { %v7613_v23 = vpop.xlane.xlu0 %7612 }
0x3d05   :  { %v7614_v7 = vmul.f32 0.017857144, %v7613_v23 }
0x3d07   :  { %v7615_v18 = vsub.f32 %v7606_v52, %v7614_v7 }
0x3d09   :  { %v7616_v55 = vmul.f32 %v7615_v18, %v7615_v18 }
0x3d0b   :  { %v7617_v43 = vsel %vm83_vm2, %v7616_v55, 0.0 }
0x3d0c   :  { %7618 = vadd.xlane.f32.xlu1 %v7617_v43 }
0x3d99   :  { %v7619_v33 = vpop.xlane.xlu1 %7618 }
0x3d9a   :  { %v7620_v45 = vmul.f32 0.017857144, %v7619_v33 }
0x3d9c   :  { %v7621_v48 = vadd.f32 1e-05, %v7620_v45 }
0x3d9e   :  { %9709 = vrsqrt.f32 %v7621_v48 }
0x3da8   :  { %v9710_v4 = vpop.eup %9709 }
0x3da9   :  { %v7623_v42 = vmul.f32 %v9710_v4, %v7615_v18 }
0x3dab   :  { %v7628_v47 = vmul.f32 %v7627_v14, %v7623_v42 }
0x3dad   :  { %v7633_v25 = vadd.f32 %v7632_v49, %v7628_v47 }
0x3daf   :  { %v7634_v6 = vmax.f32 %v7633_v25, 0.0 }
0x3db1   :  { %v7642_v21 = vpack.c.bf16 %v7634_v6, %v7634_v6 }
0x3db3   :  { %9150 = vmatmul.mubr.msk.bf16.vlgmr.msra.gmra.mrb[148].mxu0 %vm83_vm2, %v7642_v21  ;;  %vm7813_vm2 = vcmask 7168  }
0x3db4   :  { %9157 = vmatprep.mubr.msk.bf16.mxu0 %vm9719_vm0, %v9718_v0  ;;  %9154 = vmatpush3.bf16.msra.mxu0 %v9443_v1  ;;  %vm7763_vm0 = vcmask 1045504  }
0x3db5   :  { %9155 = vmatprep.subr.bf16.mxu0 %v9718_v0  ;;  %v7765_v34 = vsel %vm7763_vm0, %v9444_v28, 0  ;;  %v7748_v0 = vrot.slane %v11884_v50, %v1031_v16 }
0x3db8   :  { %9156 = vmatpush3.bf16.msra.mxu0 %v7765_v34 }
0x3e86   :  { %v7708_v61 = vpop.f32.mrb[148].mxu0 }
0x3e87   :  { %v7709_v62 = vadd.f32 %v7708_v61, %v7646_v53  ;;  %v9151_v26 = vpop.f32.mrb[149].mxu0 }
0x3e88   :  { %v7711_v35 = vpop.f32.mrb[150].mxu0 }
0x3e89   :  { %v9152_v63 = vpop.f32.mrb[151].mxu0  ;;  %v7715_v56 = vsel %vm7714_vm1, %v7709_v62, 0.0 }
0x3e8a   :  { %7716 = vadd.xlane.f32.xlu0 %v7715_v56 }
0x3f17   :  { %v7717_v30 = vpop.xlane.xlu0 %7716 }
0x3f18   :  { %v7719_v57 = vmul.f32 0.035714287, %v7717_v30 }
0x3f1a   :  { %v7720_v27 = vsub.f32 %v7709_v62, %v7719_v57 }
0x3f1c   :  { %v7721_v3 = vmul.f32 %v7720_v27, %v7720_v27 }
0x3f1e   :  { %v7722_v8 = vsel %vm7714_vm1, %v7721_v3, 0.0 }
0x3f1f   :  { %7723 = vadd.xlane.f32.xlu1 %v7722_v8 }
0x3fac   :  { %v7724_v38 = vpop.xlane.xlu1 %7723 }
0x3fad   :  { %v7725_v13 = vmul.f32 0.035714287, %v7724_v38 }
0x3faf   :  { %v7726_v29 = vadd.f32 1e-05, %v7725_v13 }
0x3fb1   :  { %9711 = vrsqrt.f32 %v7726_v29 }
0x3fbb   :  { %v9712_v39 = vpop.eup %9711 }
0x3fbc   :  { %v7728_v46 = vmul.f32 %v9712_v39, %v7720_v27 }
0x3fbe   :  { %v7733_v17 = vmul.f32 %v7732_v54, %v7728_v46 }
0x3fc0   :  { %v7738_v24 = vadd.f32 %v7737_v9, %v7733_v17 }
0x3fc2   :  { %v7739_v20 = vmax.f32 %v7738_v24, 0.0 }
0x3fc4   :  { %v7744_v22 = vpack.c.bf16 %v7739_v20, %v7739_v20 }
0x3fc6   :  { %9158 = vmatmul.mubr.msk.bf16.vlgmr.msra.gmra.mrb[152].mxu0 %vm7714_vm1, %v7744_v22 }
0x4099   :  { %v7801_v31 = vpop.f32.mrb[152].mxu0 }
0x409a   :  { %v7802_v40 = vadd.f32 %v7801_v31, %v7748_v0  ;;  %v9159_v32 = vpop.f32.mrb[153].mxu0 }
0x409b   :  { %v7804_v19 = vpop.f32.mrb[154].mxu0 }
0x409c   :  { %v8505_v5 = vmul.f32 -1.442695, %v7802_v40  ;;  %v9160_v15 = vpop.f32.mrb[155].mxu0 }
0x409e   :  { %9713 = vpow2.f32 %v8505_v5 }
0x40a8   :  { %v9714_v2 = vpop.eup %9713 }
0x40a9   :  { %v7810_v52 = vadd.f32 1.0, %v9714_v2 }
0x40ab   :  { %9715 = vrcp.f32 %v7810_v52 }
0x40b5   :  { %v9716_v12 = vpop.eup %9715 }
0x40b6   :  { %7814 = vst.msk [vmem:[%s12021_s24] sm:$0xff] %vm7813_vm2, %v9716_v12 }

</bundles_post_ra>
